<compile_context>
chip_gen: v6e
topology: v6e:2x2x1
jax: 0.10.0
libtpu: 0.0.40
codegen_flags: <defaults>
</compile_context>

<pallas_src>
import functools

import jax
import jax.numpy as jnp
from jax.experimental import pallas as pl
from jax.experimental.pallas import tpu as pltpu


# ---------------------------------------------------------------------------
# Plain-JAX layout glue (no data blow-up: pad + space-to-depth is a same-size
# relayout of the activation, unlike a materialized im2col which is 4-16x).
# ---------------------------------------------------------------------------
def _pad_s2d_flatten(x):
    """(B,H,W,C) NHWC -> zero-pad 1 -> 2x2 space-to-depth -> flatten spatial.

    Returns (B, Hs*Ws, 4*C) with
      out[b, i*Ws + j, (p*2+q)*C + c] = x_pad[b, 2*i + p, 2*j + q, c],
    where Hs = H//2 + 1, Ws = W//2 + 1.
    """
    B, H, W, C = x.shape
    assert H % 2 == 0 and W % 2 == 0, "spatial dims must be even"
    xp = jnp.pad(x, ((0, 0), (1, 1), (1, 1), (0, 0)))
    Hs, Ws = (H + 2) // 2, (W + 2) // 2
    xs = xp.reshape(B, Hs, 2, Ws, 2, C).transpose(0, 1, 3, 2, 4, 5)
    return xs.reshape(B, Hs * Ws, 4 * C), Hs, Ws


def _make_tap_weights(w_hwio):
    """(4,4,Cin,Cout) HWIO conv weights -> (4, 4*Cin, Cout) tap matrices.

    Tap t = a*2 + b (a,b in {0,1}) is ordered (p, q, c) along its rows so it
    contracts against the space-to-depth channel group of s2d[i+a, j+b].
    """
    kh, kw, ci, co = w_hwio.shape
    assert kh == 4 and kw == 4
    w = w_hwio.reshape(2, 2, 2, 2, ci, co)        # (a, p, b, q, ci, co)
    w = jnp.transpose(w, (0, 2, 1, 3, 4, 5))      # (a, b, p, q, ci, co)
    return w.reshape(4, 4 * ci, co)


# ---------------------------------------------------------------------------
# Fused down-conv kernel: 4x4 conv stride 2 pad 1 (+ bias | InstanceNorm)
# (+ LeakyReLU), one batch element per grid step, 4 tap-dots accumulated in f32.
# ---------------------------------------------------------------------------
def _down_conv_kernel(x_ref, w_ref, b_ref, m_ref, o_ref, *,
                      ws, use_in, use_lrelu, inv_count,
                      eps=1e-5, slope=0.2):
    # x_ref: (1, Hs*Ws, 4*Cin) bf16   flattened space-to-depth activation
    # w_ref: (4, 4*Cin, Cout)  bf16   per-tap weight matrices
    # b_ref: (1, Cout)         f32    bias (unused when use_in: IN cancels it)
    # m_ref: (Pf, 1)           f32    1.0 valid rows, 0.0 junk column
    # o_ref: (1, Pf, Cout)            Pf = Ho*Ws - 1 flat rows (incl. junk)
    pf = o_ref.shape[1]
    co = o_ref.shape[2]

    acc = jnp.zeros((pf, co), jnp.float32)
    for t, (a, b) in enumerate(((0, 0), (0, 1), (1, 0), (1, 1))):
        xt = x_ref[0, pl.ds(a * ws + b, pf), :]            # (Pf, 4*Cin) bf16
        acc = acc + jnp.dot(xt, w_ref[t],
                            preferred_element_type=jnp.float32)

    if use_in:
        # InstanceNorm2d(affine=False): per-channel stats over the Ho*Wo valid
        # positions, computed in one pass; junk rows masked out; bias skipped
        # (a per-channel bias is exactly cancelled by IN).
        m = m_ref[...]                                     # (Pf, 1)
        ym = acc * m
        mean = jnp.sum(ym, axis=0, keepdims=True) * inv_count
        ex2 = jnp.sum(ym * acc, axis=0, keepdims=True) * inv_count
        var = jnp.maximum(ex2 - mean * mean, 0.0)
        y = (acc - mean) * jax.lax.rsqrt(var + eps)
    else:
        y = acc + b_ref[...]

    if use_lrelu:
        y = jnp.where(y > 0, y, slope * y)                 # LeakyReLU(0.2)

    o_ref[0] = y.astype(o_ref.dtype)


def conv_down_block(x, w_hwio, bias, *, use_in, use_lrelu,
                    out_dtype=jnp.bfloat16):
    """4x4 conv, stride 2, pad 1 (+InstanceNorm)(+LeakyReLU) on NHWC input."""
    B, H, W, C = x.shape
    Co = w_hwio.shape[-1]
    Ho, Wo = H // 2, W // 2
    x_flat, Hs, Ws = _pad_s2d_flatten(x)
    K4 = 4 * C
    Pf = Ho * Ws - 1            # flat rows covering every valid output position

    x_flat = x_flat.astype(jnp.bfloat16)
    w_taps = _make_tap_weights(w_hwio).astype(jnp.bfloat16)
    b_row = bias.reshape(1, Co).astype(jnp.float32)
    r = jnp.arange(Pf)
    mask = ((r % Ws) < Wo).astype(jnp.float32).reshape(Pf, 1)

    kernel = functools.partial(
        _down_conv_kernel, ws=Ws, use_in=use_in, use_lrelu=use_lrelu,
        inv_count=1.0 / float(Ho * Wo))

    cost = pl.CostEstimate(
        flops=int(2 * B * 4 * Pf * K4 * Co),
        transcendentals=int(B * Co) if use_in else 0,
        bytes_accessed=int(x_flat.size * 2 + w_taps.size * 2 + b_row.size * 4 +
                           mask.size * 4 + B * Pf * Co * 2),
    )

    out = pl.pallas_call(
        kernel,
        out_shape=jax.ShapeDtypeStruct((B, Pf, Co), out_dtype),
        grid_spec=pltpu.PrefetchScalarGridSpec(
            num_scalar_prefetch=0,
            grid=(B,),
            in_specs=[
                pl.BlockSpec((1, Hs * Ws, K4), lambda bi: (bi, 0, 0)),
                pl.BlockSpec((4, K4, Co), lambda bi: (0, 0, 0)),
                pl.BlockSpec((1, Co), lambda bi: (0, 0)),
                pl.BlockSpec((Pf, 1), lambda bi: (0, 0)),
            ],
            out_specs=pl.BlockSpec((1, Pf, Co), lambda bi: (bi, 0, 0)),
        ),
        compiler_params=pltpu.CompilerParams(
            dimension_semantics=("parallel",),
            vmem_limit_bytes=32 * 1024 * 1024),
        cost_estimate=cost,
    )(x_flat, w_taps, b_row, mask)

    # Drop the junk column and restore NHWC: (B, Pf, Co) -> (B, Ho, Wo, Co).
    y = jnp.pad(out, ((0, 0), (0, 1), (0, 0))).reshape(B, Ho, Ws, Co)
    return y[:, :, :Wo, :]


# ---------------------------------------------------------------------------
# Final layer: 4x4 conv (stride 1, pad 1, Cout=1) + global avg-pool, fused and
# rewritten mean-first (avg over positions commutes with the conv tap sum).
# ---------------------------------------------------------------------------
def _final_conv_pool_kernel(x_ref, w_ref, b_ref, o_ref, *, ho, wo, inv_p):
    # x_ref: (1, Hp, Wp, C) bf16 padded activation; w_ref: (16, C) f32;
    # b_ref: (1, 1) f32; o_ref: (1, 1, 1) f32.
    c = w_ref.shape[1]
    acc = jnp.zeros((1, c), jnp.float32)
    for kh in range(4):
        for kw in range(4):
            win = x_ref[0, pl.ds(kh, ho), pl.ds(kw, wo), :].astype(jnp.float32)
            tap = jnp.sum(jnp.sum(win, axis=0), axis=0, keepdims=True)  # (1, C)
            acc = acc + tap * w_ref[pl.ds(kh * 4 + kw, 1), :]
    val = jnp.sum(acc, axis=1, keepdims=True) * inv_p + b_ref[...]
    o_ref[0] = val.astype(o_ref.dtype)


def final_conv_avgpool(x, w_hwio, bias):
    B, H, W, C = x.shape
    Ho, Wo = H - 1, W - 1                       # (H+2) - 4 + 1
    assert Ho >= 1 and Wo >= 1, "input too small for the final 4x4 conv"
    Hp, Wp = H + 2, W + 2
    xp = jnp.pad(x, ((0, 0), (1, 1), (1, 1), (0, 0))).astype(jnp.bfloat16)
    w_flat = w_hwio.reshape(16, C).astype(jnp.float32)   # rows ordered kh*4+kw
    b11 = bias.reshape(1, 1).astype(jnp.float32)

    kernel = functools.partial(_final_conv_pool_kernel,
                               ho=Ho, wo=Wo, inv_p=1.0 / float(Ho * Wo))

    out = pl.pallas_call(
        kernel,
        out_shape=jax.ShapeDtypeStruct((B, 1, 1), jnp.float32),
        grid_spec=pltpu.PrefetchScalarGridSpec(
            num_scalar_prefetch=0,
            grid=(B,),
            in_specs=[
                pl.BlockSpec((1, Hp, Wp, C), lambda bi: (bi, 0, 0, 0)),
                pl.BlockSpec((16, C), lambda bi: (0, 0)),
                pl.BlockSpec((1, 1), lambda bi: (0, 0)),
            ],
            out_specs=pl.BlockSpec((1, 1, 1), lambda bi: (bi, 0, 0)),
        ),
        compiler_params=pltpu.CompilerParams(
            dimension_semantics=("parallel",),
            vmem_limit_bytes=32 * 1024 * 1024),
    )(xp, w_flat, b11)

    return out.reshape(B, 1)


# ---------------------------------------------------------------------------
# Deterministic synthetic parameters (HWIO conv weights, matching nn.Conv2d
# shapes transposed to (kH, kW, Cin, Cout)).
# ---------------------------------------------------------------------------
def init_params(key, input_nc):
    specs = [(input_nc, 64), (64, 128), (128, 256), (256, 512), (512, 1)]
    params = []
    for i, (ic, oc) in enumerate(specs):
        kw_, kb_ = jax.random.split(jax.random.fold_in(key, i))
        fan_in = ic * 16
        w = jax.random.normal(kw_, (4, 4, ic, oc), jnp.float32) / jnp.sqrt(fan_in)
        b = jax.random.normal(kb_, (oc,), jnp.float32) * 0.01
        params.append((w, b))
    return params


# ---------------------------------------------------------------------------
# Full Discriminator forward: NCHW in, (B, 1) out.
# ---------------------------------------------------------------------------
def discriminator_forward(x_nchw, params):
    x = jnp.transpose(x_nchw, (0, 2, 3, 1)).astype(jnp.float32)   # NCHW -> NHWC
    (w1, b1), (w2, b2), (w3, b3), (w4, b4), (w5, b5) = params

    x = conv_down_block(x, w1, b1, use_in=False, use_lrelu=True)   # C   -> 64
    x = conv_down_block(x, w2, b2, use_in=True,  use_lrelu=True)   # 64  -> 128
    x = conv_down_block(x, w3, b3, use_in=True,  use_lrelu=True)   # 128 -> 256
    x = conv_down_block(x, w4, b4, use_in=True,  use_lrelu=True)   # 256 -> 512
    return final_conv_avgpool(x, w5, b5)                           # 512 -> 1


if __name__ == "__main__":
    key = jax.random.PRNGKey(0)
    kx, kp = jax.random.split(key)

    # Smallest spatial size that survives 4 stride-2 convs + the final 4x4 conv.
    B, C_in, H, W = 2, 3, 32, 32
    x = jax.random.normal(kx, (B, C_in, H, W), jnp.float32)
    params = init_params(kp, C_in)

    fwd = jax.jit(discriminator_forward)
    out = jax.block_until_ready(fwd(x, params))

    assert out.shape == (B, 1), out.shape
    assert bool(jnp.all(jnp.isfinite(out)))
    print("KERNEL_OK")
</pallas_src>

<mosaic_0001>
module attributes {stable_mosaic.version = 11 : i64} {
  func.func @_down_conv_kernel(%arg0: i32, %arg1: memref<1x289x12xbf16, #tpu.memory_space<vmem>>, %arg2: memref<4x12x64xbf16, #tpu.memory_space<vmem>>, %arg3: memref<1x64xf32, #tpu.memory_space<vmem>>, %arg4: memref<271x1xf32, #tpu.memory_space<vmem>>, %arg5: memref<1x271x64xbf16, #tpu.memory_space<vmem>>) attributes {dimension_semantics = [#tpu.dimension_semantics<parallel>], iteration_bounds = array<i64: 2>, scalar_prefetch = 0 : i64, scratch_operands = 0 : i64, tpu.core_type = #tpu.core_type<tc>, window_params = [{transform_indices = @transform_0, window_bounds = array<i64: 1, 289, 12>}, {pipeline_mode = #tpu.pipeline_mode<synchronous>, transform_indices = @transform_1, window_bounds = array<i64: 4, 12, 64>}, {pipeline_mode = #tpu.pipeline_mode<synchronous>, transform_indices = @transform_2, window_bounds = array<i64: 1, 64>}, {pipeline_mode = #tpu.pipeline_mode<synchronous>, transform_indices = @transform_3, window_bounds = array<i64: 271, 1>}, {transform_indices = @transform_4, window_bounds = array<i64: 1, 271, 64>}]} {
    %cst = arith.constant 0.000000e+00 : f32
    %0 = vector.broadcast %cst : f32 to vector<271x64xf32>
    %c0 = arith.constant 0 : index
    %c0_0 = arith.constant 0 : index
    %c0_1 = arith.constant 0 : index
    %1 = vector.load %arg1[%c0, %c0_0, %c0_1] : memref<1x289x12xbf16, #tpu.memory_space<vmem>>, vector<1x271x12xbf16>
    %2 = vector.shape_cast %1 : vector<1x271x12xbf16> to vector<271x12xbf16>
    %c0_2 = arith.constant 0 : index
    %c0_3 = arith.constant 0 : index
    %c0_4 = arith.constant 0 : index
    %3 = vector.load %arg2[%c0_2, %c0_3, %c0_4] : memref<4x12x64xbf16, #tpu.memory_space<vmem>>, vector<1x12x64xbf16>
    %4 = vector.shape_cast %3 : vector<1x12x64xbf16> to vector<12x64xbf16>
    %cst_5 = arith.constant dense<0.000000e+00> : vector<271x64xf32>
    %5 = tpu.matmul %2, %4, %cst_5 {dimension_numbers = #tpu.dot_dimension_numbers<[1], [0], [0], [1], [0, 0, 1, 1], [], []>} : vector<271x12xbf16>, vector<12x64xbf16>, vector<271x64xf32> -> vector<271x64xf32>
    %6 = arith.addf %0, %5 : vector<271x64xf32>
    %c0_6 = arith.constant 0 : index
    %c1 = arith.constant 1 : index
    %c0_7 = arith.constant 0 : index
    %7 = vector.load %arg1[%c0_6, %c1, %c0_7] : memref<1x289x12xbf16, #tpu.memory_space<vmem>>, vector<1x271x12xbf16>
    %8 = vector.shape_cast %7 : vector<1x271x12xbf16> to vector<271x12xbf16>
    %c1_8 = arith.constant 1 : index
    %c0_9 = arith.constant 0 : index
    %c0_10 = arith.constant 0 : index
    %9 = vector.load %arg2[%c1_8, %c0_9, %c0_10] : memref<4x12x64xbf16, #tpu.memory_space<vmem>>, vector<1x12x64xbf16>
    %10 = vector.shape_cast %9 : vector<1x12x64xbf16> to vector<12x64xbf16>
    %cst_11 = arith.constant dense<0.000000e+00> : vector<271x64xf32>
    %11 = tpu.matmul %8, %10, %cst_11 {dimension_numbers = #tpu.dot_dimension_numbers<[1], [0], [0], [1], [0, 0, 1, 1], [], []>} : vector<271x12xbf16>, vector<12x64xbf16>, vector<271x64xf32> -> vector<271x64xf32>
    %12 = arith.addf %6, %11 : vector<271x64xf32>
    %c0_12 = arith.constant 0 : index
    %c17 = arith.constant 17 : index
    %c0_13 = arith.constant 0 : index
    %13 = vector.load %arg1[%c0_12, %c17, %c0_13] : memref<1x289x12xbf16, #tpu.memory_space<vmem>>, vector<1x271x12xbf16>
    %14 = vector.shape_cast %13 : vector<1x271x12xbf16> to vector<271x12xbf16>
    %c2 = arith.constant 2 : index
    %c0_14 = arith.constant 0 : index
    %c0_15 = arith.constant 0 : index
    %15 = vector.load %arg2[%c2, %c0_14, %c0_15] : memref<4x12x64xbf16, #tpu.memory_space<vmem>>, vector<1x12x64xbf16>
    %16 = vector.shape_cast %15 : vector<1x12x64xbf16> to vector<12x64xbf16>
    %cst_16 = arith.constant dense<0.000000e+00> : vector<271x64xf32>
    %17 = tpu.matmul %14, %16, %cst_16 {dimension_numbers = #tpu.dot_dimension_numbers<[1], [0], [0], [1], [0, 0, 1, 1], [], []>} : vector<271x12xbf16>, vector<12x64xbf16>, vector<271x64xf32> -> vector<271x64xf32>
    %18 = arith.addf %12, %17 : vector<271x64xf32>
    %c0_17 = arith.constant 0 : index
    %c18 = arith.constant 18 : index
    %c0_18 = arith.constant 0 : index
    %19 = vector.load %arg1[%c0_17, %c18, %c0_18] : memref<1x289x12xbf16, #tpu.memory_space<vmem>>, vector<1x271x12xbf16>
    %20 = vector.shape_cast %19 : vector<1x271x12xbf16> to vector<271x12xbf16>
    %c3 = arith.constant 3 : index
    %c0_19 = arith.constant 0 : index
    %c0_20 = arith.constant 0 : index
    %21 = vector.load %arg2[%c3, %c0_19, %c0_20] : memref<4x12x64xbf16, #tpu.memory_space<vmem>>, vector<1x12x64xbf16>
    %22 = vector.shape_cast %21 : vector<1x12x64xbf16> to vector<12x64xbf16>
    %cst_21 = arith.constant dense<0.000000e+00> : vector<271x64xf32>
    %23 = tpu.matmul %20, %22, %cst_21 {dimension_numbers = #tpu.dot_dimension_numbers<[1], [0], [0], [1], [0, 0, 1, 1], [], []>} : vector<271x12xbf16>, vector<12x64xbf16>, vector<271x64xf32> -> vector<271x64xf32>
    %24 = arith.addf %18, %23 : vector<271x64xf32>
    %c0_22 = arith.constant 0 : index
    %c0_23 = arith.constant 0 : index
    %25 = vector.load %arg3[%c0_22, %c0_23] : memref<1x64xf32, #tpu.memory_space<vmem>>, vector<1x64xf32>
    %26 = vector.broadcast %25 : vector<1x64xf32> to vector<271x64xf32>
    %27 = arith.addf %24, %26 : vector<271x64xf32>
    %cst_24 = arith.constant 0.000000e+00 : f32
    %28 = vector.broadcast %cst_24 : f32 to vector<271x64xf32>
    %29 = arith.cmpf ogt, %27, %28 : vector<271x64xf32>
    %cst_25 = arith.constant 2.000000e-01 : f32
    %30 = vector.broadcast %cst_25 : f32 to vector<271x64xf32>
    %31 = arith.mulf %30, %27 : vector<271x64xf32>
    %32 = arith.select %29, %27, %31 : vector<271x64xi1>, vector<271x64xf32>
    %33 = arith.truncf %32 : vector<271x64xf32> to vector<271x64xbf16>
    %c0_26 = arith.constant 0 : index
    %c0_27 = arith.constant 0 : index
    %c0_28 = arith.constant 0 : index
    %34 = vector.load %arg5[%c0_26, %c0_27, %c0_28] : memref<1x271x64xbf16, #tpu.memory_space<vmem>>, vector<1x271x64xbf16>
    %35 = vector.shape_cast %34 : vector<1x271x64xbf16> to vector<271x64xbf16>
    %36 = vector.shape_cast %33 : vector<271x64xbf16> to vector<1x271x64xbf16>
    tpu.vector_store %arg5[%c0_26, %c0_27, %c0_28], %36 {strides = array<i32>} : memref<1x271x64xbf16, #tpu.memory_space<vmem>>, vector<1x271x64xbf16>,
    return
  }
  func.func @transform_0(%arg0: i32) -> (i32, i32, i32) {
    %c0_i32 = arith.constant 0 : i32
    %c0_i32_0 = arith.constant 0 : i32
    %c0_i32_1 = arith.constant 0 : i32
    return %arg0, %c0_i32, %c0_i32_0 : i32, i32, i32
  }
  func.func @transform_1(%arg0: i32) -> (i32, i32, i32) {
    %c0_i32 = arith.constant 0 : i32
    %c0_i32_0 = arith.constant 0 : i32
    %c0_i32_1 = arith.constant 0 : i32
    %c0_i32_2 = arith.constant 0 : i32
    return %c0_i32, %c0_i32_0, %c0_i32_1 : i32, i32, i32
  }
  func.func @transform_2(%arg0: i32) -> (i32, i32) {
    %c0_i32 = arith.constant 0 : i32
    %c0_i32_0 = arith.constant 0 : i32
    %c0_i32_1 = arith.constant 0 : i32
    return %c0_i32, %c0_i32_0 : i32, i32
  }
  func.func @transform_3(%arg0: i32) -> (i32, i32) {
    %c0_i32 = arith.constant 0 : i32
    %c0_i32_0 = arith.constant 0 : i32
    %c0_i32_1 = arith.constant 0 : i32
    return %c0_i32, %c0_i32_0 : i32, i32
  }
  func.func @transform_4(%arg0: i32) -> (i32, i32, i32) {
    %c0_i32 = arith.constant 0 : i32
    %c0_i32_0 = arith.constant 0 : i32
    %c0_i32_1 = arith.constant 0 : i32
    return %arg0, %c0_i32, %c0_i32_0 : i32, i32, i32
  }
}

module attributes {stable_mosaic.version = 11 : i64} {
  func.func @_down_conv_kernel(%arg0: i32, %arg1: memref<1x81x256xbf16, #tpu.memory_space<vmem>>, %arg2: memref<4x256x128xbf16, #tpu.memory_space<vmem>>, %arg3: memref<1x128xf32, #tpu.memory_space<vmem>>, %arg4: memref<71x1xf32, #tpu.memory_space<vmem>>, %arg5: memref<1x71x128xbf16, #tpu.memory_space<vmem>>) attributes {dimension_semantics = [#tpu.dimension_semantics<parallel>], iteration_bounds = array<i64: 2>, scalar_prefetch = 0 : i64, scratch_operands = 0 : i64, tpu.core_type = #tpu.core_type<tc>, window_params = [{transform_indices = @transform_0, window_bounds = array<i64: 1, 81, 256>}, {pipeline_mode = #tpu.pipeline_mode<synchronous>, transform_indices = @transform_1, window_bounds = array<i64: 4, 256, 128>}, {pipeline_mode = #tpu.pipeline_mode<synchronous>, transform_indices = @transform_2, window_bounds = array<i64: 1, 128>}, {pipeline_mode = #tpu.pipeline_mode<synchronous>, transform_indices = @transform_3, window_bounds = array<i64: 71, 1>}, {transform_indices = @transform_4, window_bounds = array<i64: 1, 71, 128>}]} {
    %cst = arith.constant 0.000000e+00 : f32
    %0 = vector.broadcast %cst : f32 to vector<71x128xf32>
    %c0 = arith.constant 0 : index
    %c0_0 = arith.constant 0 : index
    %c0_1 = arith.constant 0 : index
    %1 = vector.load %arg1[%c0, %c0_0, %c0_1] : memref<1x81x256xbf16, #tpu.memory_space<vmem>>, vector<1x71x256xbf16>
    %2 = vector.shape_cast %1 : vector<1x71x256xbf16> to vector<71x256xbf16>
    %c0_2 = arith.constant 0 : index
    %c0_3 = arith.constant 0 : index
    %c0_4 = arith.constant 0 : index
    %3 = vector.load %arg2[%c0_2, %c0_3, %c0_4] : memref<4x256x128xbf16, #tpu.memory_space<vmem>>, vector<1x256x128xbf16>
    %4 = vector.shape_cast %3 : vector<1x256x128xbf16> to vector<256x128xbf16>
    %cst_5 = arith.constant dense<0.000000e+00> : vector<71x128xf32>
    %5 = tpu.matmul %2, %4, %cst_5 {dimension_numbers = #tpu.dot_dimension_numbers<[1], [0], [0], [1], [0, 0, 1, 1], [], []>} : vector<71x256xbf16>, vector<256x128xbf16>, vector<71x128xf32> -> vector<71x128xf32>
    %6 = arith.addf %0, %5 : vector<71x128xf32>
    %c0_6 = arith.constant 0 : index
    %c1 = arith.constant 1 : index
    %c0_7 = arith.constant 0 : index
    %7 = vector.load %arg1[%c0_6, %c1, %c0_7] : memref<1x81x256xbf16, #tpu.memory_space<vmem>>, vector<1x71x256xbf16>
    %8 = vector.shape_cast %7 : vector<1x71x256xbf16> to vector<71x256xbf16>
    %c1_8 = arith.constant 1 : index
    %c0_9 = arith.constant 0 : index
    %c0_10 = arith.constant 0 : index
    %9 = vector.load %arg2[%c1_8, %c0_9, %c0_10] : memref<4x256x128xbf16, #tpu.memory_space<vmem>>, vector<1x256x128xbf16>
    %10 = vector.shape_cast %9 : vector<1x256x128xbf16> to vector<256x128xbf16>
    %cst_11 = arith.constant dense<0.000000e+00> : vector<71x128xf32>
    %11 = tpu.matmul %8, %10, %cst_11 {dimension_numbers = #tpu.dot_dimension_numbers<[1], [0], [0], [1], [0, 0, 1, 1], [], []>} : vector<71x256xbf16>, vector<256x128xbf16>, vector<71x128xf32> -> vector<71x128xf32>
    %12 = arith.addf %6, %11 : vector<71x128xf32>
    %c0_12 = arith.constant 0 : index
    %c9 = arith.constant 9 : index
    %c0_13 = arith.constant 0 : index
    %13 = vector.load %arg1[%c0_12, %c9, %c0_13] : memref<1x81x256xbf16, #tpu.memory_space<vmem>>, vector<1x71x256xbf16>
    %14 = vector.shape_cast %13 : vector<1x71x256xbf16> to vector<71x256xbf16>
    %c2 = arith.constant 2 : index
    %c0_14 = arith.constant 0 : index
    %c0_15 = arith.constant 0 : index
    %15 = vector.load %arg2[%c2, %c0_14, %c0_15] : memref<4x256x128xbf16, #tpu.memory_space<vmem>>, vector<1x256x128xbf16>
    %16 = vector.shape_cast %15 : vector<1x256x128xbf16> to vector<256x128xbf16>
    %cst_16 = arith.constant dense<0.000000e+00> : vector<71x128xf32>
    %17 = tpu.matmul %14, %16, %cst_16 {dimension_numbers = #tpu.dot_dimension_numbers<[1], [0], [0], [1], [0, 0, 1, 1], [], []>} : vector<71x256xbf16>, vector<256x128xbf16>, vector<71x128xf32> -> vector<71x128xf32>
    %18 = arith.addf %12, %17 : vector<71x128xf32>
    %c0_17 = arith.constant 0 : index
    %c10 = arith.constant 10 : index
    %c0_18 = arith.constant 0 : index
    %19 = vector.load %arg1[%c0_17, %c10, %c0_18] : memref<1x81x256xbf16, #tpu.memory_space<vmem>>, vector<1x71x256xbf16>
    %20 = vector.shape_cast %19 : vector<1x71x256xbf16> to vector<71x256xbf16>
    %c3 = arith.constant 3 : index
    %c0_19 = arith.constant 0 : index
    %c0_20 = arith.constant 0 : index
    %21 = vector.load %arg2[%c3, %c0_19, %c0_20] : memref<4x256x128xbf16, #tpu.memory_space<vmem>>, vector<1x256x128xbf16>
    %22 = vector.shape_cast %21 : vector<1x256x128xbf16> to vector<256x128xbf16>
    %cst_21 = arith.constant dense<0.000000e+00> : vector<71x128xf32>
    %23 = tpu.matmul %20, %22, %cst_21 {dimension_numbers = #tpu.dot_dimension_numbers<[1], [0], [0], [1], [0, 0, 1, 1], [], []>} : vector<71x256xbf16>, vector<256x128xbf16>, vector<71x128xf32> -> vector<71x128xf32>
    %24 = arith.addf %18, %23 : vector<71x128xf32>
    %c0_22 = arith.constant 0 : index
    %c0_23 = arith.constant 0 : index
    %25 = vector.load %arg4[%c0_22, %c0_23] : memref<71x1xf32, #tpu.memory_space<vmem>>, vector<71x1xf32>
    %26 = vector.broadcast %25 : vector<71x1xf32> to vector<71x128xf32>
    %27 = arith.mulf %24, %26 : vector<71x128xf32>
    %cst_24 = arith.constant dense<0.000000e+00> : vector<128xf32>
    %28 = vector.multi_reduction <add>, %27, %cst_24 [0] : vector<71x128xf32> to vector<128xf32>
    %29 = vector.shape_cast %28 : vector<128xf32> to vector<1x128xf32>
    %cst_25 = arith.constant 1.562500e-02 : f32
    %30 = vector.broadcast %cst_25 : f32 to vector<1x128xf32>
    %31 = arith.mulf %29, %30 : vector<1x128xf32>
    %32 = arith.mulf %27, %24 : vector<71x128xf32>
    %cst_26 = arith.constant dense<0.000000e+00> : vector<128xf32>
    %33 = vector.multi_reduction <add>, %32, %cst_26 [0] : vector<71x128xf32> to vector<128xf32>
    %34 = vector.shape_cast %33 : vector<128xf32> to vector<1x128xf32>
    %cst_27 = arith.constant 1.562500e-02 : f32
    %35 = vector.broadcast %cst_27 : f32 to vector<1x128xf32>
    %36 = arith.mulf %34, %35 : vector<1x128xf32>
    %37 = arith.mulf %31, %31 : vector<1x128xf32>
    %38 = arith.subf %36, %37 : vector<1x128xf32>
    %cst_28 = arith.constant 0.000000e+00 : f32
    %39 = vector.broadcast %cst_28 : f32 to vector<1x128xf32>
    %40 = arith.maximumf %38, %39 : vector<1x128xf32>
    %41 = vector.broadcast %31 : vector<1x128xf32> to vector<71x128xf32>
    %42 = arith.subf %24, %41 : vector<71x128xf32>
    %cst_29 = arith.constant 9.99999974E-6 : f32
    %43 = vector.broadcast %cst_29 : f32 to vector<1x128xf32>
    %44 = arith.addf %40, %43 : vector<1x128xf32>
    %45 = math.rsqrt %44 : vector<1x128xf32>
    %46 = vector.broadcast %45 : vector<1x128xf32> to vector<71x128xf32>
    %47 = arith.mulf %42, %46 : vector<71x128xf32>
    %cst_30 = arith.constant 0.000000e+00 : f32
    %48 = vector.broadcast %cst_30 : f32 to vector<71x128xf32>
    %49 = arith.cmpf ogt, %47, %48 : vector<71x128xf32>
    %cst_31 = arith.constant 2.000000e-01 : f32
    %50 = vector.broadcast %cst_31 : f32 to vector<71x128xf32>
    %51 = arith.mulf %50, %47 : vector<71x128xf32>
    %52 = arith.select %49, %47, %51 : vector<71x128xi1>, vector<71x128xf32>
    %53 = arith.truncf %52 : vector<71x128xf32> to vector<71x128xbf16>
    %c0_32 = arith.constant 0 : index
    %c0_33 = arith.constant 0 : index
    %c0_34 = arith.constant 0 : index
    %54 = vector.load %arg5[%c0_32, %c0_33, %c0_34] : memref<1x71x128xbf16, #tpu.memory_space<vmem>>, vector<1x71x128xbf16>
    %55 = vector.shape_cast %54 : vector<1x71x128xbf16> to vector<71x128xbf16>
    %56 = vector.shape_cast %53 : vector<71x128xbf16> to vector<1x71x128xbf16>
    tpu.vector_store %arg5[%c0_32, %c0_33, %c0_34], %56 {strides = array<i32>} : memref<1x71x128xbf16, #tpu.memory_space<vmem>>, vector<1x71x128xbf16>,
    return
  }
  func.func @transform_0(%arg0: i32) -> (i32, i32, i32) {
    %c0_i32 = arith.constant 0 : i32
    %c0_i32_0 = arith.constant 0 : i32
    %c0_i32_1 = arith.constant 0 : i32
    return %arg0, %c0_i32, %c0_i32_0 : i32, i32, i32
  }
  func.func @transform_1(%arg0: i32) -> (i32, i32, i32) {
    %c0_i32 = arith.constant 0 : i32
    %c0_i32_0 = arith.constant 0 : i32
    %c0_i32_1 = arith.constant 0 : i32
    %c0_i32_2 = arith.constant 0 : i32
    return %c0_i32, %c0_i32_0, %c0_i32_1 : i32, i32, i32
  }
  func.func @transform_2(%arg0: i32) -> (i32, i32) {
    %c0_i32 = arith.constant 0 : i32
    %c0_i32_0 = arith.constant 0 : i32
    %c0_i32_1 = arith.constant 0 : i32
    return %c0_i32, %c0_i32_0 : i32, i32
  }
  func.func @transform_3(%arg0: i32) -> (i32, i32) {
    %c0_i32 = arith.constant 0 : i32
    %c0_i32_0 = arith.constant 0 : i32
    %c0_i32_1 = arith.constant 0 : i32
    return %c0_i32, %c0_i32_0 : i32, i32
  }
  func.func @transform_4(%arg0: i32) -> (i32, i32, i32) {
    %c0_i32 = arith.constant 0 : i32
    %c0_i32_0 = arith.constant 0 : i32
    %c0_i32_1 = arith.constant 0 : i32
    return %arg0, %c0_i32, %c0_i32_0 : i32, i32, i32
  }
}

module attributes {stable_mosaic.version = 11 : i64} {
  func.func @_down_conv_kernel(%arg0: i32, %arg1: memref<1x25x512xbf16, #tpu.memory_space<vmem>>, %arg2: memref<4x512x256xbf16, #tpu.memory_space<vmem>>, %arg3: memref<1x256xf32, #tpu.memory_space<vmem>>, %arg4: memref<19x1xf32, #tpu.memory_space<vmem>>, %arg5: memref<1x19x256xbf16, #tpu.memory_space<vmem>>) attributes {dimension_semantics = [#tpu.dimension_semantics<parallel>], iteration_bounds = array<i64: 2>, scalar_prefetch = 0 : i64, scratch_operands = 0 : i64, tpu.core_type = #tpu.core_type<tc>, window_params = [{transform_indices = @transform_0, window_bounds = array<i64: 1, 25, 512>}, {pipeline_mode = #tpu.pipeline_mode<synchronous>, transform_indices = @transform_1, window_bounds = array<i64: 4, 512, 256>}, {pipeline_mode = #tpu.pipeline_mode<synchronous>, transform_indices = @transform_2, window_bounds = array<i64: 1, 256>}, {pipeline_mode = #tpu.pipeline_mode<synchronous>, transform_indices = @transform_3, window_bounds = array<i64: 19, 1>}, {transform_indices = @transform_4, window_bounds = array<i64: 1, 19, 256>}]} {
    %cst = arith.constant 0.000000e+00 : f32
    %0 = vector.broadcast %cst : f32 to vector<19x256xf32>
    %c0 = arith.constant 0 : index
    %c0_0 = arith.constant 0 : index
    %c0_1 = arith.constant 0 : index
    %1 = vector.load %arg1[%c0, %c0_0, %c0_1] : memref<1x25x512xbf16, #tpu.memory_space<vmem>>, vector<1x19x512xbf16>
    %2 = vector.shape_cast %1 : vector<1x19x512xbf16> to vector<19x512xbf16>
    %c0_2 = arith.constant 0 : index
    %c0_3 = arith.constant 0 : index
    %c0_4 = arith.constant 0 : index
    %3 = vector.load %arg2[%c0_2, %c0_3, %c0_4] : memref<4x512x256xbf16, #tpu.memory_space<vmem>>, vector<1x512x256xbf16>
    %4 = vector.shape_cast %3 : vector<1x512x256xbf16> to vector<512x256xbf16>
    %cst_5 = arith.constant dense<0.000000e+00> : vector<19x256xf32>
    %5 = tpu.matmul %2, %4, %cst_5 {dimension_numbers = #tpu.dot_dimension_numbers<[1], [0], [0], [1], [0, 0, 1, 1], [], []>} : vector<19x512xbf16>, vector<512x256xbf16>, vector<19x256xf32> -> vector<19x256xf32>
    %6 = arith.addf %0, %5 : vector<19x256xf32>
    %c0_6 = arith.constant 0 : index
    %c1 = arith.constant 1 : index
    %c0_7 = arith.constant 0 : index
    %7 = vector.load %arg1[%c0_6, %c1, %c0_7] : memref<1x25x512xbf16, #tpu.memory_space<vmem>>, vector<1x19x512xbf16>
    %8 = vector.shape_cast %7 : vector<1x19x512xbf16> to vector<19x512xbf16>
    %c1_8 = arith.constant 1 : index
    %c0_9 = arith.constant 0 : index
    %c0_10 = arith.constant 0 : index
    %9 = vector.load %arg2[%c1_8, %c0_9, %c0_10] : memref<4x512x256xbf16, #tpu.memory_space<vmem>>, vector<1x512x256xbf16>
    %10 = vector.shape_cast %9 : vector<1x512x256xbf16> to vector<512x256xbf16>
    %cst_11 = arith.constant dense<0.000000e+00> : vector<19x256xf32>
    %11 = tpu.matmul %8, %10, %cst_11 {dimension_numbers = #tpu.dot_dimension_numbers<[1], [0], [0], [1], [0, 0, 1, 1], [], []>} : vector<19x512xbf16>, vector<512x256xbf16>, vector<19x256xf32> -> vector<19x256xf32>
    %12 = arith.addf %6, %11 : vector<19x256xf32>
    %c0_12 = arith.constant 0 : index
    %c5 = arith.constant 5 : index
    %c0_13 = arith.constant 0 : index
    %13 = vector.load %arg1[%c0_12, %c5, %c0_13] : memref<1x25x512xbf16, #tpu.memory_space<vmem>>, vector<1x19x512xbf16>
    %14 = vector.shape_cast %13 : vector<1x19x512xbf16> to vector<19x512xbf16>
    %c2 = arith.constant 2 : index
    %c0_14 = arith.constant 0 : index
    %c0_15 = arith.constant 0 : index
    %15 = vector.load %arg2[%c2, %c0_14, %c0_15] : memref<4x512x256xbf16, #tpu.memory_space<vmem>>, vector<1x512x256xbf16>
    %16 = vector.shape_cast %15 : vector<1x512x256xbf16> to vector<512x256xbf16>
    %cst_16 = arith.constant dense<0.000000e+00> : vector<19x256xf32>
    %17 = tpu.matmul %14, %16, %cst_16 {dimension_numbers = #tpu.dot_dimension_numbers<[1], [0], [0], [1], [0, 0, 1, 1], [], []>} : vector<19x512xbf16>, vector<512x256xbf16>, vector<19x256xf32> -> vector<19x256xf32>
    %18 = arith.addf %12, %17 : vector<19x256xf32>
    %c0_17 = arith.constant 0 : index
    %c6 = arith.constant 6 : index
    %c0_18 = arith.constant 0 : index
    %19 = vector.load %arg1[%c0_17, %c6, %c0_18] : memref<1x25x512xbf16, #tpu.memory_space<vmem>>, vector<1x19x512xbf16>
    %20 = vector.shape_cast %19 : vector<1x19x512xbf16> to vector<19x512xbf16>
    %c3 = arith.constant 3 : index
    %c0_19 = arith.constant 0 : index
    %c0_20 = arith.constant 0 : index
    %21 = vector.load %arg2[%c3, %c0_19, %c0_20] : memref<4x512x256xbf16, #tpu.memory_space<vmem>>, vector<1x512x256xbf16>
    %22 = vector.shape_cast %21 : vector<1x512x256xbf16> to vector<512x256xbf16>
    %cst_21 = arith.constant dense<0.000000e+00> : vector<19x256xf32>
    %23 = tpu.matmul %20, %22, %cst_21 {dimension_numbers = #tpu.dot_dimension_numbers<[1], [0], [0], [1], [0, 0, 1, 1], [], []>} : vector<19x512xbf16>, vector<512x256xbf16>, vector<19x256xf32> -> vector<19x256xf32>
    %24 = arith.addf %18, %23 : vector<19x256xf32>
    %c0_22 = arith.constant 0 : index
    %c0_23 = arith.constant 0 : index
    %25 = vector.load %arg4[%c0_22, %c0_23] : memref<19x1xf32, #tpu.memory_space<vmem>>, vector<19x1xf32>
    %26 = vector.broadcast %25 : vector<19x1xf32> to vector<19x256xf32>
    %27 = arith.mulf %24, %26 : vector<19x256xf32>
    %cst_24 = arith.constant dense<0.000000e+00> : vector<256xf32>
    %28 = vector.multi_reduction <add>, %27, %cst_24 [0] : vector<19x256xf32> to vector<256xf32>
    %29 = vector.shape_cast %28 : vector<256xf32> to vector<1x256xf32>
    %cst_25 = arith.constant 6.250000e-02 : f32
    %30 = vector.broadcast %cst_25 : f32 to vector<1x256xf32>
    %31 = arith.mulf %29, %30 : vector<1x256xf32>
    %32 = arith.mulf %27, %24 : vector<19x256xf32>
    %cst_26 = arith.constant dense<0.000000e+00> : vector<256xf32>
    %33 = vector.multi_reduction <add>, %32, %cst_26 [0] : vector<19x256xf32> to vector<256xf32>
    %34 = vector.shape_cast %33 : vector<256xf32> to vector<1x256xf32>
    %cst_27 = arith.constant 6.250000e-02 : f32
    %35 = vector.broadcast %cst_27 : f32 to vector<1x256xf32>
    %36 = arith.mulf %34, %35 : vector<1x256xf32>
    %37 = arith.mulf %31, %31 : vector<1x256xf32>
    %38 = arith.subf %36, %37 : vector<1x256xf32>
    %cst_28 = arith.constant 0.000000e+00 : f32
    %39 = vector.broadcast %cst_28 : f32 to vector<1x256xf32>
    %40 = arith.maximumf %38, %39 : vector<1x256xf32>
    %41 = vector.broadcast %31 : vector<1x256xf32> to vector<19x256xf32>
    %42 = arith.subf %24, %41 : vector<19x256xf32>
    %cst_29 = arith.constant 9.99999974E-6 : f32
    %43 = vector.broadcast %cst_29 : f32 to vector<1x256xf32>
    %44 = arith.addf %40, %43 : vector<1x256xf32>
    %45 = math.rsqrt %44 : vector<1x256xf32>
    %46 = vector.broadcast %45 : vector<1x256xf32> to vector<19x256xf32>
    %47 = arith.mulf %42, %46 : vector<19x256xf32>
    %cst_30 = arith.constant 0.000000e+00 : f32
    %48 = vector.broadcast %cst_30 : f32 to vector<19x256xf32>
    %49 = arith.cmpf ogt, %47, %48 : vector<19x256xf32>
    %cst_31 = arith.constant 2.000000e-01 : f32
    %50 = vector.broadcast %cst_31 : f32 to vector<19x256xf32>
    %51 = arith.mulf %50, %47 : vector<19x256xf32>
    %52 = arith.select %49, %47, %51 : vector<19x256xi1>, vector<19x256xf32>
    %53 = arith.truncf %52 : vector<19x256xf32> to vector<19x256xbf16>
    %c0_32 = arith.constant 0 : index
    %c0_33 = arith.constant 0 : index
    %c0_34 = arith.constant 0 : index
    %54 = vector.load %arg5[%c0_32, %c0_33, %c0_34] : memref<1x19x256xbf16, #tpu.memory_space<vmem>>, vector<1x19x256xbf16>
    %55 = vector.shape_cast %54 : vector<1x19x256xbf16> to vector<19x256xbf16>
    %56 = vector.shape_cast %53 : vector<19x256xbf16> to vector<1x19x256xbf16>
    tpu.vector_store %arg5[%c0_32, %c0_33, %c0_34], %56 {strides = array<i32>} : memref<1x19x256xbf16, #tpu.memory_space<vmem>>, vector<1x19x256xbf16>,
    return
  }
  func.func @transform_0(%arg0: i32) -> (i32, i32, i32) {
    %c0_i32 = arith.constant 0 : i32
    %c0_i32_0 = arith.constant 0 : i32
    %c0_i32_1 = arith.constant 0 : i32
    return %arg0, %c0_i32, %c0_i32_0 : i32, i32, i32
  }
  func.func @transform_1(%arg0: i32) -> (i32, i32, i32) {
    %c0_i32 = arith.constant 0 : i32
    %c0_i32_0 = arith.constant 0 : i32
    %c0_i32_1 = arith.constant 0 : i32
    %c0_i32_2 = arith.constant 0 : i32
    return %c0_i32, %c0_i32_0, %c0_i32_1 : i32, i32, i32
  }
  func.func @transform_2(%arg0: i32) -> (i32, i32) {
    %c0_i32 = arith.constant 0 : i32
    %c0_i32_0 = arith.constant 0 : i32
    %c0_i32_1 = arith.constant 0 : i32
    return %c0_i32, %c0_i32_0 : i32, i32
  }
  func.func @transform_3(%arg0: i32) -> (i32, i32) {
    %c0_i32 = arith.constant 0 : i32
    %c0_i32_0 = arith.constant 0 : i32
    %c0_i32_1 = arith.constant 0 : i32
    return %c0_i32, %c0_i32_0 : i32, i32
  }
  func.func @transform_4(%arg0: i32) -> (i32, i32, i32) {
    %c0_i32 = arith.constant 0 : i32
    %c0_i32_0 = arith.constant 0 : i32
    %c0_i32_1 = arith.constant 0 : i32
    return %arg0, %c0_i32, %c0_i32_0 : i32, i32, i32
  }
}

module attributes {stable_mosaic.version = 11 : i64} {
  func.func @_down_conv_kernel(%arg0: i32, %arg1: memref<1x9x1024xbf16, #tpu.memory_space<vmem>>, %arg2: memref<4x1024x512xbf16, #tpu.memory_space<vmem>>, %arg3: memref<1x512xf32, #tpu.memory_space<vmem>>, %arg4: memref<5x1xf32, #tpu.memory_space<vmem>>, %arg5: memref<1x5x512xbf16, #tpu.memory_space<vmem>>) attributes {dimension_semantics = [#tpu.dimension_semantics<parallel>], iteration_bounds = array<i64: 2>, scalar_prefetch = 0 : i64, scratch_operands = 0 : i64, tpu.core_type = #tpu.core_type<tc>, window_params = [{transform_indices = @transform_0, window_bounds = array<i64: 1, 9, 1024>}, {pipeline_mode = #tpu.pipeline_mode<synchronous>, transform_indices = @transform_1, window_bounds = array<i64: 4, 1024, 512>}, {pipeline_mode = #tpu.pipeline_mode<synchronous>, transform_indices = @transform_2, window_bounds = array<i64: 1, 512>}, {pipeline_mode = #tpu.pipeline_mode<synchronous>, transform_indices = @transform_3, window_bounds = array<i64: 5, 1>}, {transform_indices = @transform_4, window_bounds = array<i64: 1, 5, 512>}]} {
    %cst = arith.constant 0.000000e+00 : f32
    %0 = vector.broadcast %cst : f32 to vector<5x512xf32>
    %c0 = arith.constant 0 : index
    %c0_0 = arith.constant 0 : index
    %c0_1 = arith.constant 0 : index
    %1 = vector.load %arg1[%c0, %c0_0, %c0_1] : memref<1x9x1024xbf16, #tpu.memory_space<vmem>>, vector<1x5x1024xbf16>
    %2 = vector.shape_cast %1 : vector<1x5x1024xbf16> to vector<5x1024xbf16>
    %c0_2 = arith.constant 0 : index
    %c0_3 = arith.constant 0 : index
    %c0_4 = arith.constant 0 : index
    %3 = vector.load %arg2[%c0_2, %c0_3, %c0_4] : memref<4x1024x512xbf16, #tpu.memory_space<vmem>>, vector<1x1024x512xbf16>
    %4 = vector.shape_cast %3 : vector<1x1024x512xbf16> to vector<1024x512xbf16>
    %cst_5 = arith.constant dense<0.000000e+00> : vector<5x512xf32>
    %5 = tpu.matmul %2, %4, %cst_5 {dimension_numbers = #tpu.dot_dimension_numbers<[1], [0], [0], [1], [0, 0, 1, 1], [], []>} : vector<5x1024xbf16>, vector<1024x512xbf16>, vector<5x512xf32> -> vector<5x512xf32>
    %6 = arith.addf %0, %5 : vector<5x512xf32>
    %c0_6 = arith.constant 0 : index
    %c1 = arith.constant 1 : index
    %c0_7 = arith.constant 0 : index
    %7 = vector.load %arg1[%c0_6, %c1, %c0_7] : memref<1x9x1024xbf16, #tpu.memory_space<vmem>>, vector<1x5x1024xbf16>
    %8 = vector.shape_cast %7 : vector<1x5x1024xbf16> to vector<5x1024xbf16>
    %c1_8 = arith.constant 1 : index
    %c0_9 = arith.constant 0 : index
    %c0_10 = arith.constant 0 : index
    %9 = vector.load %arg2[%c1_8, %c0_9, %c0_10] : memref<4x1024x512xbf16, #tpu.memory_space<vmem>>, vector<1x1024x512xbf16>
    %10 = vector.shape_cast %9 : vector<1x1024x512xbf16> to vector<1024x512xbf16>
    %cst_11 = arith.constant dense<0.000000e+00> : vector<5x512xf32>
    %11 = tpu.matmul %8, %10, %cst_11 {dimension_numbers = #tpu.dot_dimension_numbers<[1], [0], [0], [1], [0, 0, 1, 1], [], []>} : vector<5x1024xbf16>, vector<1024x512xbf16>, vector<5x512xf32> -> vector<5x512xf32>
    %12 = arith.addf %6, %11 : vector<5x512xf32>
    %c0_12 = arith.constant 0 : index
    %c3 = arith.constant 3 : index
    %c0_13 = arith.constant 0 : index
    %13 = vector.load %arg1[%c0_12, %c3, %c0_13] : memref<1x9x1024xbf16, #tpu.memory_space<vmem>>, vector<1x5x1024xbf16>
    %14 = vector.shape_cast %13 : vector<1x5x1024xbf16> to vector<5x1024xbf16>
    %c2 = arith.constant 2 : index
    %c0_14 = arith.constant 0 : index
    %c0_15 = arith.constant 0 : index
    %15 = vector.load %arg2[%c2, %c0_14, %c0_15] : memref<4x1024x512xbf16, #tpu.memory_space<vmem>>, vector<1x1024x512xbf16>
    %16 = vector.shape_cast %15 : vector<1x1024x512xbf16> to vector<1024x512xbf16>
    %cst_16 = arith.constant dense<0.000000e+00> : vector<5x512xf32>
    %17 = tpu.matmul %14, %16, %cst_16 {dimension_numbers = #tpu.dot_dimension_numbers<[1], [0], [0], [1], [0, 0, 1, 1], [], []>} : vector<5x1024xbf16>, vector<1024x512xbf16>, vector<5x512xf32> -> vector<5x512xf32>
    %18 = arith.addf %12, %17 : vector<5x512xf32>
    %c0_17 = arith.constant 0 : index
    %c4 = arith.constant 4 : index
    %c0_18 = arith.constant 0 : index
    %19 = vector.load %arg1[%c0_17, %c4, %c0_18] : memref<1x9x1024xbf16, #tpu.memory_space<vmem>>, vector<1x5x1024xbf16>
    %20 = vector.shape_cast %19 : vector<1x5x1024xbf16> to vector<5x1024xbf16>
    %c3_19 = arith.constant 3 : index
    %c0_20 = arith.constant 0 : index
    %c0_21 = arith.constant 0 : index
    %21 = vector.load %arg2[%c3_19, %c0_20, %c0_21] : memref<4x1024x512xbf16, #tpu.memory_space<vmem>>, vector<1x1024x512xbf16>
    %22 = vector.shape_cast %21 : vector<1x1024x512xbf16> to vector<1024x512xbf16>
    %cst_22 = arith.constant dense<0.000000e+00> : vector<5x512xf32>
    %23 = tpu.matmul %20, %22, %cst_22 {dimension_numbers = #tpu.dot_dimension_numbers<[1], [0], [0], [1], [0, 0, 1, 1], [], []>} : vector<5x1024xbf16>, vector<1024x512xbf16>, vector<5x512xf32> -> vector<5x512xf32>
    %24 = arith.addf %18, %23 : vector<5x512xf32>
    %c0_23 = arith.constant 0 : index
    %c0_24 = arith.constant 0 : index
    %25 = vector.load %arg4[%c0_23, %c0_24] : memref<5x1xf32, #tpu.memory_space<vmem>>, vector<5x1xf32>
    %26 = vector.broadcast %25 : vector<5x1xf32> to vector<5x512xf32>
    %27 = arith.mulf %24, %26 : vector<5x512xf32>
    %cst_25 = arith.constant dense<0.000000e+00> : vector<512xf32>
    %28 = vector.multi_reduction <add>, %27, %cst_25 [0] : vector<5x512xf32> to vector<512xf32>
    %29 = vector.shape_cast %28 : vector<512xf32> to vector<1x512xf32>
    %cst_26 = arith.constant 2.500000e-01 : f32
    %30 = vector.broadcast %cst_26 : f32 to vector<1x512xf32>
    %31 = arith.mulf %29, %30 : vector<1x512xf32>
    %32 = arith.mulf %27, %24 : vector<5x512xf32>
    %cst_27 = arith.constant dense<0.000000e+00> : vector<512xf32>
    %33 = vector.multi_reduction <add>, %32, %cst_27 [0] : vector<5x512xf32> to vector<512xf32>
    %34 = vector.shape_cast %33 : vector<512xf32> to vector<1x512xf32>
    %cst_28 = arith.constant 2.500000e-01 : f32
    %35 = vector.broadcast %cst_28 : f32 to vector<1x512xf32>
    %36 = arith.mulf %34, %35 : vector<1x512xf32>
    %37 = arith.mulf %31, %31 : vector<1x512xf32>
    %38 = arith.subf %36, %37 : vector<1x512xf32>
    %cst_29 = arith.constant 0.000000e+00 : f32
    %39 = vector.broadcast %cst_29 : f32 to vector<1x512xf32>
    %40 = arith.maximumf %38, %39 : vector<1x512xf32>
    %41 = vector.broadcast %31 : vector<1x512xf32> to vector<5x512xf32>
    %42 = arith.subf %24, %41 : vector<5x512xf32>
    %cst_30 = arith.constant 9.99999974E-6 : f32
    %43 = vector.broadcast %cst_30 : f32 to vector<1x512xf32>
    %44 = arith.addf %40, %43 : vector<1x512xf32>
    %45 = math.rsqrt %44 : vector<1x512xf32>
    %46 = vector.broadcast %45 : vector<1x512xf32> to vector<5x512xf32>
    %47 = arith.mulf %42, %46 : vector<5x512xf32>
    %cst_31 = arith.constant 0.000000e+00 : f32
    %48 = vector.broadcast %cst_31 : f32 to vector<5x512xf32>
    %49 = arith.cmpf ogt, %47, %48 : vector<5x512xf32>
    %cst_32 = arith.constant 2.000000e-01 : f32
    %50 = vector.broadcast %cst_32 : f32 to vector<5x512xf32>
    %51 = arith.mulf %50, %47 : vector<5x512xf32>
    %52 = arith.select %49, %47, %51 : vector<5x512xi1>, vector<5x512xf32>
    %53 = arith.truncf %52 : vector<5x512xf32> to vector<5x512xbf16>
    %c0_33 = arith.constant 0 : index
    %c0_34 = arith.constant 0 : index
    %c0_35 = arith.constant 0 : index
    %54 = vector.load %arg5[%c0_33, %c0_34, %c0_35] : memref<1x5x512xbf16, #tpu.memory_space<vmem>>, vector<1x5x512xbf16>
    %55 = vector.shape_cast %54 : vector<1x5x512xbf16> to vector<5x512xbf16>
    %56 = vector.shape_cast %53 : vector<5x512xbf16> to vector<1x5x512xbf16>
    tpu.vector_store %arg5[%c0_33, %c0_34, %c0_35], %56 {strides = array<i32>} : memref<1x5x512xbf16, #tpu.memory_space<vmem>>, vector<1x5x512xbf16>,
    return
  }
  func.func @transform_0(%arg0: i32) -> (i32, i32, i32) {
    %c0_i32 = arith.constant 0 : i32
    %c0_i32_0 = arith.constant 0 : i32
    %c0_i32_1 = arith.constant 0 : i32
    return %arg0, %c0_i32, %c0_i32_0 : i32, i32, i32
  }
  func.func @transform_1(%arg0: i32) -> (i32, i32, i32) {
    %c0_i32 = arith.constant 0 : i32
    %c0_i32_0 = arith.constant 0 : i32
    %c0_i32_1 = arith.constant 0 : i32
    %c0_i32_2 = arith.constant 0 : i32
    return %c0_i32, %c0_i32_0, %c0_i32_1 : i32, i32, i32
  }
  func.func @transform_2(%arg0: i32) -> (i32, i32) {
    %c0_i32 = arith.constant 0 : i32
    %c0_i32_0 = arith.constant 0 : i32
    %c0_i32_1 = arith.constant 0 : i32
    return %c0_i32, %c0_i32_0 : i32, i32
  }
  func.func @transform_3(%arg0: i32) -> (i32, i32) {
    %c0_i32 = arith.constant 0 : i32
    %c0_i32_0 = arith.constant 0 : i32
    %c0_i32_1 = arith.constant 0 : i32
    return %c0_i32, %c0_i32_0 : i32, i32
  }
  func.func @transform_4(%arg0: i32) -> (i32, i32, i32) {
    %c0_i32 = arith.constant 0 : i32
    %c0_i32_0 = arith.constant 0 : i32
    %c0_i32_1 = arith.constant 0 : i32
    return %arg0, %c0_i32, %c0_i32_0 : i32, i32, i32
  }
}

module attributes {stable_mosaic.version = 11 : i64} {
  func.func @_final_conv_pool_kernel(%arg0: i32, %arg1: memref<1x4x4x512xbf16, #tpu.memory_space<vmem>>, %arg2: memref<16x512xf32, #tpu.memory_space<vmem>>, %arg3: memref<1x1xf32, #tpu.memory_space<vmem>>, %arg4: memref<1x1x1xf32, #tpu.memory_space<vmem>>) attributes {dimension_semantics = [#tpu.dimension_semantics<parallel>], iteration_bounds = array<i64: 2>, scalar_prefetch = 0 : i64, scratch_operands = 0 : i64, tpu.core_type = #tpu.core_type<tc>, window_params = [{transform_indices = @transform_0, window_bounds = array<i64: 1, 4, 4, 512>}, {pipeline_mode = #tpu.pipeline_mode<synchronous>, transform_indices = @transform_1, window_bounds = array<i64: 16, 512>}, {pipeline_mode = #tpu.pipeline_mode<synchronous>, transform_indices = @transform_2, window_bounds = array<i64: 1, 1>}, {transform_indices = @transform_3, window_bounds = array<i64: 1, 1, 1>}]} {
    %cst = arith.constant 0.000000e+00 : f32
    %0 = vector.broadcast %cst : f32 to vector<1x512xf32>
    %c0 = arith.constant 0 : index
    %c0_0 = arith.constant 0 : index
    %c0_1 = arith.constant 0 : index
    %c0_2 = arith.constant 0 : index
    %1 = vector.load %arg1[%c0, %c0_0, %c0_1, %c0_2] : memref<1x4x4x512xbf16, #tpu.memory_space<vmem>>, vector<1x1x1x512xbf16>
    %2 = vector.shape_cast %1 : vector<1x1x1x512xbf16> to vector<1x1x512xbf16>
    %3 = arith.extf %2 : vector<1x1x512xbf16> to vector<1x1x512xf32>
    %cst_3 = arith.constant dense<0.000000e+00> : vector<1x512xf32>
    %4 = vector.multi_reduction <add>, %3, %cst_3 [0] : vector<1x1x512xf32> to vector<1x512xf32>
    %cst_4 = arith.constant dense<0.000000e+00> : vector<512xf32>
    %5 = vector.multi_reduction <add>, %4, %cst_4 [0] : vector<1x512xf32> to vector<512xf32>
    %6 = vector.shape_cast %5 : vector<512xf32> to vector<1x512xf32>
    %c0_5 = arith.constant 0 : index
    %c0_6 = arith.constant 0 : index
    %7 = vector.load %arg2[%c0_5, %c0_6] : memref<16x512xf32, #tpu.memory_space<vmem>>, vector<1x512xf32>
    %8 = arith.mulf %6, %7 : vector<1x512xf32>
    %9 = arith.addf %0, %8 : vector<1x512xf32>
    %c0_7 = arith.constant 0 : index
    %c0_8 = arith.constant 0 : index
    %c1 = arith.constant 1 : index
    %c0_9 = arith.constant 0 : index
    %10 = vector.load %arg1[%c0_7, %c0_8, %c1, %c0_9] : memref<1x4x4x512xbf16, #tpu.memory_space<vmem>>, vector<1x1x1x512xbf16>
    %11 = vector.shape_cast %10 : vector<1x1x1x512xbf16> to vector<1x1x512xbf16>
    %12 = arith.extf %11 : vector<1x1x512xbf16> to vector<1x1x512xf32>
    %cst_10 = arith.constant dense<0.000000e+00> : vector<1x512xf32>
    %13 = vector.multi_reduction <add>, %12, %cst_10 [0] : vector<1x1x512xf32> to vector<1x512xf32>
    %cst_11 = arith.constant dense<0.000000e+00> : vector<512xf32>
    %14 = vector.multi_reduction <add>, %13, %cst_11 [0] : vector<1x512xf32> to vector<512xf32>
    %15 = vector.shape_cast %14 : vector<512xf32> to vector<1x512xf32>
    %c1_12 = arith.constant 1 : index
    %c0_13 = arith.constant 0 : index
    %16 = vector.load %arg2[%c1_12, %c0_13] : memref<16x512xf32, #tpu.memory_space<vmem>>, vector<1x512xf32>
    %17 = arith.mulf %15, %16 : vector<1x512xf32>
    %18 = arith.addf %9, %17 : vector<1x512xf32>
    %c0_14 = arith.constant 0 : index
    %c0_15 = arith.constant 0 : index
    %c2 = arith.constant 2 : index
    %c0_16 = arith.constant 0 : index
    %19 = vector.load %arg1[%c0_14, %c0_15, %c2, %c0_16] : memref<1x4x4x512xbf16, #tpu.memory_space<vmem>>, vector<1x1x1x512xbf16>
    %20 = vector.shape_cast %19 : vector<1x1x1x512xbf16> to vector<1x1x512xbf16>
    %21 = arith.extf %20 : vector<1x1x512xbf16> to vector<1x1x512xf32>
    %cst_17 = arith.constant dense<0.000000e+00> : vector<1x512xf32>
    %22 = vector.multi_reduction <add>, %21, %cst_17 [0] : vector<1x1x512xf32> to vector<1x512xf32>
    %cst_18 = arith.constant dense<0.000000e+00> : vector<512xf32>
    %23 = vector.multi_reduction <add>, %22, %cst_18 [0] : vector<1x512xf32> to vector<512xf32>
    %24 = vector.shape_cast %23 : vector<512xf32> to vector<1x512xf32>
    %c2_19 = arith.constant 2 : index
    %c0_20 = arith.constant 0 : index
    %25 = vector.load %arg2[%c2_19, %c0_20] : memref<16x512xf32, #tpu.memory_space<vmem>>, vector<1x512xf32>
    %26 = arith.mulf %24, %25 : vector<1x512xf32>
    %27 = arith.addf %18, %26 : vector<1x512xf32>
    %c0_21 = arith.constant 0 : index
    %c0_22 = arith.constant 0 : index
    %c3 = arith.constant 3 : index
    %c0_23 = arith.constant 0 : index
    %28 = vector.load %arg1[%c0_21, %c0_22, %c3, %c0_23] : memref<1x4x4x512xbf16, #tpu.memory_space<vmem>>, vector<1x1x1x512xbf16>
    %29 = vector.shape_cast %28 : vector<1x1x1x512xbf16> to vector<1x1x512xbf16>
    %30 = arith.extf %29 : vector<1x1x512xbf16> to vector<1x1x512xf32>
    %cst_24 = arith.constant dense<0.000000e+00> : vector<1x512xf32>
    %31 = vector.multi_reduction <add>, %30, %cst_24 [0] : vector<1x1x512xf32> to vector<1x512xf32>
    %cst_25 = arith.constant dense<0.000000e+00> : vector<512xf32>
    %32 = vector.multi_reduction <add>, %31, %cst_25 [0] : vector<1x512xf32> to vector<512xf32>
    %33 = vector.shape_cast %32 : vector<512xf32> to vector<1x512xf32>
    %c3_26 = arith.constant 3 : index
    %c0_27 = arith.constant 0 : index
    %34 = vector.load %arg2[%c3_26, %c0_27] : memref<16x512xf32, #tpu.memory_space<vmem>>, vector<1x512xf32>
    %35 = arith.mulf %33, %34 : vector<1x512xf32>
    %36 = arith.addf %27, %35 : vector<1x512xf32>
    %c0_28 = arith.constant 0 : index
    %c1_29 = arith.constant 1 : index
    %c0_30 = arith.constant 0 : index
    %c0_31 = arith.constant 0 : index
    %37 = vector.load %arg1[%c0_28, %c1_29, %c0_30, %c0_31] : memref<1x4x4x512xbf16, #tpu.memory_space<vmem>>, vector<1x1x1x512xbf16>
    %38 = vector.shape_cast %37 : vector<1x1x1x512xbf16> to vector<1x1x512xbf16>
    %39 = arith.extf %38 : vector<1x1x512xbf16> to vector<1x1x512xf32>
    %cst_32 = arith.constant dense<0.000000e+00> : vector<1x512xf32>
    %40 = vector.multi_reduction <add>, %39, %cst_32 [0] : vector<1x1x512xf32> to vector<1x512xf32>
    %cst_33 = arith.constant dense<0.000000e+00> : vector<512xf32>
    %41 = vector.multi_reduction <add>, %40, %cst_33 [0] : vector<1x512xf32> to vector<512xf32>
    %42 = vector.shape_cast %41 : vector<512xf32> to vector<1x512xf32>
    %c4 = arith.constant 4 : index
    %c0_34 = arith.constant 0 : index
    %43 = vector.load %arg2[%c4, %c0_34] : memref<16x512xf32, #tpu.memory_space<vmem>>, vector<1x512xf32>
    %44 = arith.mulf %42, %43 : vector<1x512xf32>
    %45 = arith.addf %36, %44 : vector<1x512xf32>
    %c0_35 = arith.constant 0 : index
    %c1_36 = arith.constant 1 : index
    %c1_37 = arith.constant 1 : index
    %c0_38 = arith.constant 0 : index
    %46 = vector.load %arg1[%c0_35, %c1_36, %c1_37, %c0_38] : memref<1x4x4x512xbf16, #tpu.memory_space<vmem>>, vector<1x1x1x512xbf16>
    %47 = vector.shape_cast %46 : vector<1x1x1x512xbf16> to vector<1x1x512xbf16>
    %48 = arith.extf %47 : vector<1x1x512xbf16> to vector<1x1x512xf32>
    %cst_39 = arith.constant dense<0.000000e+00> : vector<1x512xf32>
    %49 = vector.multi_reduction <add>, %48, %cst_39 [0] : vector<1x1x512xf32> to vector<1x512xf32>
    %cst_40 = arith.constant dense<0.000000e+00> : vector<512xf32>
    %50 = vector.multi_reduction <add>, %49, %cst_40 [0] : vector<1x512xf32> to vector<512xf32>
    %51 = vector.shape_cast %50 : vector<512xf32> to vector<1x512xf32>
    %c5 = arith.constant 5 : index
    %c0_41 = arith.constant 0 : index
    %52 = vector.load %arg2[%c5, %c0_41] : memref<16x512xf32, #tpu.memory_space<vmem>>, vector<1x512xf32>
    %53 = arith.mulf %51, %52 : vector<1x512xf32>
    %54 = arith.addf %45, %53 : vector<1x512xf32>
    %c0_42 = arith.constant 0 : index
    %c1_43 = arith.constant 1 : index
    %c2_44 = arith.constant 2 : index
    %c0_45 = arith.constant 0 : index
    %55 = vector.load %arg1[%c0_42, %c1_43, %c2_44, %c0_45] : memref<1x4x4x512xbf16, #tpu.memory_space<vmem>>, vector<1x1x1x512xbf16>
    %56 = vector.shape_cast %55 : vector<1x1x1x512xbf16> to vector<1x1x512xbf16>
    %57 = arith.extf %56 : vector<1x1x512xbf16> to vector<1x1x512xf32>
    %cst_46 = arith.constant dense<0.000000e+00> : vector<1x512xf32>
    %58 = vector.multi_reduction <add>, %57, %cst_46 [0] : vector<1x1x512xf32> to vector<1x512xf32>
    %cst_47 = arith.constant dense<0.000000e+00> : vector<512xf32>
    %59 = vector.multi_reduction <add>, %58, %cst_47 [0] : vector<1x512xf32> to vector<512xf32>
    %60 = vector.shape_cast %59 : vector<512xf32> to vector<1x512xf32>
    %c6 = arith.constant 6 : index
    %c0_48 = arith.constant 0 : index
    %61 = vector.load %arg2[%c6, %c0_48] : memref<16x512xf32, #tpu.memory_space<vmem>>, vector<1x512xf32>
    %62 = arith.mulf %60, %61 : vector<1x512xf32>
    %63 = arith.addf %54, %62 : vector<1x512xf32>
    %c0_49 = arith.constant 0 : index
    %c1_50 = arith.constant 1 : index
    %c3_51 = arith.constant 3 : index
    %c0_52 = arith.constant 0 : index
    %64 = vector.load %arg1[%c0_49, %c1_50, %c3_51, %c0_52] : memref<1x4x4x512xbf16, #tpu.memory_space<vmem>>, vector<1x1x1x512xbf16>
    %65 = vector.shape_cast %64 : vector<1x1x1x512xbf16> to vector<1x1x512xbf16>
    %66 = arith.extf %65 : vector<1x1x512xbf16> to vector<1x1x512xf32>
    %cst_53 = arith.constant dense<0.000000e+00> : vector<1x512xf32>
    %67 = vector.multi_reduction <add>, %66, %cst_53 [0] : vector<1x1x512xf32> to vector<1x512xf32>
    %cst_54 = arith.constant dense<0.000000e+00> : vector<512xf32>
    %68 = vector.multi_reduction <add>, %67, %cst_54 [0] : vector<1x512xf32> to vector<512xf32>
    %69 = vector.shape_cast %68 : vector<512xf32> to vector<1x512xf32>
    %c7 = arith.constant 7 : index
    %c0_55 = arith.constant 0 : index
    %70 = vector.load %arg2[%c7, %c0_55] : memref<16x512xf32, #tpu.memory_space<vmem>>, vector<1x512xf32>
    %71 = arith.mulf %69, %70 : vector<1x512xf32>
    %72 = arith.addf %63, %71 : vector<1x512xf32>
    %c0_56 = arith.constant 0 : index
    %c2_57 = arith.constant 2 : index
    %c0_58 = arith.constant 0 : index
    %c0_59 = arith.constant 0 : index
    %73 = vector.load %arg1[%c0_56, %c2_57, %c0_58, %c0_59] : memref<1x4x4x512xbf16, #tpu.memory_space<vmem>>, vector<1x1x1x512xbf16>
    %74 = vector.shape_cast %73 : vector<1x1x1x512xbf16> to vector<1x1x512xbf16>
    %75 = arith.extf %74 : vector<1x1x512xbf16> to vector<1x1x512xf32>
    %cst_60 = arith.constant dense<0.000000e+00> : vector<1x512xf32>
    %76 = vector.multi_reduction <add>, %75, %cst_60 [0] : vector<1x1x512xf32> to vector<1x512xf32>
    %cst_61 = arith.constant dense<0.000000e+00> : vector<512xf32>
    %77 = vector.multi_reduction <add>, %76, %cst_61 [0] : vector<1x512xf32> to vector<512xf32>
    %78 = vector.shape_cast %77 : vector<512xf32> to vector<1x512xf32>
    %c8 = arith.constant 8 : index
    %c0_62 = arith.constant 0 : index
    %79 = vector.load %arg2[%c8, %c0_62] : memref<16x512xf32, #tpu.memory_space<vmem>>, vector<1x512xf32>
    %80 = arith.mulf %78, %79 : vector<1x512xf32>
    %81 = arith.addf %72, %80 : vector<1x512xf32>
    %c0_63 = arith.constant 0 : index
    %c2_64 = arith.constant 2 : index
    %c1_65 = arith.constant 1 : index
    %c0_66 = arith.constant 0 : index
    %82 = vector.load %arg1[%c0_63, %c2_64, %c1_65, %c0_66] : memref<1x4x4x512xbf16, #tpu.memory_space<vmem>>, vector<1x1x1x512xbf16>
    %83 = vector.shape_cast %82 : vector<1x1x1x512xbf16> to vector<1x1x512xbf16>
    %84 = arith.extf %83 : vector<1x1x512xbf16> to vector<1x1x512xf32>
    %cst_67 = arith.constant dense<0.000000e+00> : vector<1x512xf32>
    %85 = vector.multi_reduction <add>, %84, %cst_67 [0] : vector<1x1x512xf32> to vector<1x512xf32>
    %cst_68 = arith.constant dense<0.000000e+00> : vector<512xf32>
    %86 = vector.multi_reduction <add>, %85, %cst_68 [0] : vector<1x512xf32> to vector<512xf32>
    %87 = vector.shape_cast %86 : vector<512xf32> to vector<1x512xf32>
    %c9 = arith.constant 9 : index
    %c0_69 = arith.constant 0 : index
    %88 = vector.load %arg2[%c9, %c0_69] : memref<16x512xf32, #tpu.memory_space<vmem>>, vector<1x512xf32>
    %89 = arith.mulf %87, %88 : vector<1x512xf32>
    %90 = arith.addf %81, %89 : vector<1x512xf32>
    %c0_70 = arith.constant 0 : index
    %c2_71 = arith.constant 2 : index
    %c2_72 = arith.constant 2 : index
    %c0_73 = arith.constant 0 : index
    %91 = vector.load %arg1[%c0_70, %c2_71, %c2_72, %c0_73] : memref<1x4x4x512xbf16, #tpu.memory_space<vmem>>, vector<1x1x1x512xbf16>
    %92 = vector.shape_cast %91 : vector<1x1x1x512xbf16> to vector<1x1x512xbf16>
    %93 = arith.extf %92 : vector<1x1x512xbf16> to vector<1x1x512xf32>
    %cst_74 = arith.constant dense<0.000000e+00> : vector<1x512xf32>
    %94 = vector.multi_reduction <add>, %93, %cst_74 [0] : vector<1x1x512xf32> to vector<1x512xf32>
    %cst_75 = arith.constant dense<0.000000e+00> : vector<512xf32>
    %95 = vector.multi_reduction <add>, %94, %cst_75 [0] : vector<1x512xf32> to vector<512xf32>
    %96 = vector.shape_cast %95 : vector<512xf32> to vector<1x512xf32>
    %c10 = arith.constant 10 : index
    %c0_76 = arith.constant 0 : index
    %97 = vector.load %arg2[%c10, %c0_76] : memref<16x512xf32, #tpu.memory_space<vmem>>, vector<1x512xf32>
    %98 = arith.mulf %96, %97 : vector<1x512xf32>
    %99 = arith.addf %90, %98 : vector<1x512xf32>
    %c0_77 = arith.constant 0 : index
    %c2_78 = arith.constant 2 : index
    %c3_79 = arith.constant 3 : index
    %c0_80 = arith.constant 0 : index
    %100 = vector.load %arg1[%c0_77, %c2_78, %c3_79, %c0_80] : memref<1x4x4x512xbf16, #tpu.memory_space<vmem>>, vector<1x1x1x512xbf16>
    %101 = vector.shape_cast %100 : vector<1x1x1x512xbf16> to vector<1x1x512xbf16>
    %102 = arith.extf %101 : vector<1x1x512xbf16> to vector<1x1x512xf32>
    %cst_81 = arith.constant dense<0.000000e+00> : vector<1x512xf32>
    %103 = vector.multi_reduction <add>, %102, %cst_81 [0] : vector<1x1x512xf32> to vector<1x512xf32>
    %cst_82 = arith.constant dense<0.000000e+00> : vector<512xf32>
    %104 = vector.multi_reduction <add>, %103, %cst_82 [0] : vector<1x512xf32> to vector<512xf32>
    %105 = vector.shape_cast %104 : vector<512xf32> to vector<1x512xf32>
    %c11 = arith.constant 11 : index
    %c0_83 = arith.constant 0 : index
    %106 = vector.load %arg2[%c11, %c0_83] : memref<16x512xf32, #tpu.memory_space<vmem>>, vector<1x512xf32>
    %107 = arith.mulf %105, %106 : vector<1x512xf32>
    %108 = arith.addf %99, %107 : vector<1x512xf32>
    %c0_84 = arith.constant 0 : index
    %c3_85 = arith.constant 3 : index
    %c0_86 = arith.constant 0 : index
    %c0_87 = arith.constant 0 : index
    %109 = vector.load %arg1[%c0_84, %c3_85, %c0_86, %c0_87] : memref<1x4x4x512xbf16, #tpu.memory_space<vmem>>, vector<1x1x1x512xbf16>
    %110 = vector.shape_cast %109 : vector<1x1x1x512xbf16> to vector<1x1x512xbf16>
    %111 = arith.extf %110 : vector<1x1x512xbf16> to vector<1x1x512xf32>
    %cst_88 = arith.constant dense<0.000000e+00> : vector<1x512xf32>
    %112 = vector.multi_reduction <add>, %111, %cst_88 [0] : vector<1x1x512xf32> to vector<1x512xf32>
    %cst_89 = arith.constant dense<0.000000e+00> : vector<512xf32>
    %113 = vector.multi_reduction <add>, %112, %cst_89 [0] : vector<1x512xf32> to vector<512xf32>
    %114 = vector.shape_cast %113 : vector<512xf32> to vector<1x512xf32>
    %c12 = arith.constant 12 : index
    %c0_90 = arith.constant 0 : index
    %115 = vector.load %arg2[%c12, %c0_90] : memref<16x512xf32, #tpu.memory_space<vmem>>, vector<1x512xf32>
    %116 = arith.mulf %114, %115 : vector<1x512xf32>
    %117 = arith.addf %108, %116 : vector<1x512xf32>
    %c0_91 = arith.constant 0 : index
    %c3_92 = arith.constant 3 : index
    %c1_93 = arith.constant 1 : index
    %c0_94 = arith.constant 0 : index
    %118 = vector.load %arg1[%c0_91, %c3_92, %c1_93, %c0_94] : memref<1x4x4x512xbf16, #tpu.memory_space<vmem>>, vector<1x1x1x512xbf16>
    %119 = vector.shape_cast %118 : vector<1x1x1x512xbf16> to vector<1x1x512xbf16>
    %120 = arith.extf %119 : vector<1x1x512xbf16> to vector<1x1x512xf32>
    %cst_95 = arith.constant dense<0.000000e+00> : vector<1x512xf32>
    %121 = vector.multi_reduction <add>, %120, %cst_95 [0] : vector<1x1x512xf32> to vector<1x512xf32>
    %cst_96 = arith.constant dense<0.000000e+00> : vector<512xf32>
    %122 = vector.multi_reduction <add>, %121, %cst_96 [0] : vector<1x512xf32> to vector<512xf32>
    %123 = vector.shape_cast %122 : vector<512xf32> to vector<1x512xf32>
    %c13 = arith.constant 13 : index
    %c0_97 = arith.constant 0 : index
    %124 = vector.load %arg2[%c13, %c0_97] : memref<16x512xf32, #tpu.memory_space<vmem>>, vector<1x512xf32>
    %125 = arith.mulf %123, %124 : vector<1x512xf32>
    %126 = arith.addf %117, %125 : vector<1x512xf32>
    %c0_98 = arith.constant 0 : index
    %c3_99 = arith.constant 3 : index
    %c2_100 = arith.constant 2 : index
    %c0_101 = arith.constant 0 : index
    %127 = vector.load %arg1[%c0_98, %c3_99, %c2_100, %c0_101] : memref<1x4x4x512xbf16, #tpu.memory_space<vmem>>, vector<1x1x1x512xbf16>
    %128 = vector.shape_cast %127 : vector<1x1x1x512xbf16> to vector<1x1x512xbf16>
    %129 = arith.extf %128 : vector<1x1x512xbf16> to vector<1x1x512xf32>
    %cst_102 = arith.constant dense<0.000000e+00> : vector<1x512xf32>
    %130 = vector.multi_reduction <add>, %129, %cst_102 [0] : vector<1x1x512xf32> to vector<1x512xf32>
    %cst_103 = arith.constant dense<0.000000e+00> : vector<512xf32>
    %131 = vector.multi_reduction <add>, %130, %cst_103 [0] : vector<1x512xf32> to vector<512xf32>
    %132 = vector.shape_cast %131 : vector<512xf32> to vector<1x512xf32>
    %c14 = arith.constant 14 : index
    %c0_104 = arith.constant 0 : index
    %133 = vector.load %arg2[%c14, %c0_104] : memref<16x512xf32, #tpu.memory_space<vmem>>, vector<1x512xf32>
    %134 = arith.mulf %132, %133 : vector<1x512xf32>
    %135 = arith.addf %126, %134 : vector<1x512xf32>
    %c0_105 = arith.constant 0 : index
    %c3_106 = arith.constant 3 : index
    %c3_107 = arith.constant 3 : index
    %c0_108 = arith.constant 0 : index
    %136 = vector.load %arg1[%c0_105, %c3_106, %c3_107, %c0_108] : memref<1x4x4x512xbf16, #tpu.memory_space<vmem>>, vector<1x1x1x512xbf16>
    %137 = vector.shape_cast %136 : vector<1x1x1x512xbf16> to vector<1x1x512xbf16>
    %138 = arith.extf %137 : vector<1x1x512xbf16> to vector<1x1x512xf32>
    %cst_109 = arith.constant dense<0.000000e+00> : vector<1x512xf32>
    %139 = vector.multi_reduction <add>, %138, %cst_109 [0] : vector<1x1x512xf32> to vector<1x512xf32>
    %cst_110 = arith.constant dense<0.000000e+00> : vector<512xf32>
    %140 = vector.multi_reduction <add>, %139, %cst_110 [0] : vector<1x512xf32> to vector<512xf32>
    %141 = vector.shape_cast %140 : vector<512xf32> to vector<1x512xf32>
    %c15 = arith.constant 15 : index
    %c0_111 = arith.constant 0 : index
    %142 = vector.load %arg2[%c15, %c0_111] : memref<16x512xf32, #tpu.memory_space<vmem>>, vector<1x512xf32>
    %143 = arith.mulf %141, %142 : vector<1x512xf32>
    %144 = arith.addf %135, %143 : vector<1x512xf32>
    %cst_112 = arith.constant dense<0.000000e+00> : vector<1xf32>
    %145 = vector.multi_reduction <add>, %144, %cst_112 [1] : vector<1x512xf32> to vector<1xf32>
    %146 = vector.shape_cast %145 : vector<1xf32> to vector<1x1xf32>
    %cst_113 = arith.constant 1.000000e+00 : f32
    %147 = vector.broadcast %cst_113 : f32 to vector<1x1xf32>
    %148 = arith.mulf %146, %147 : vector<1x1xf32>
    %c0_114 = arith.constant 0 : index
    %c0_115 = arith.constant 0 : index
    %149 = vector.load %arg3[%c0_114, %c0_115] : memref<1x1xf32, #tpu.memory_space<vmem>>, vector<1x1xf32>
    %150 = arith.addf %148, %149 : vector<1x1xf32>
    %c0_116 = arith.constant 0 : index
    %c0_117 = arith.constant 0 : index
    %c0_118 = arith.constant 0 : index
    %151 = vector.load %arg4[%c0_116, %c0_117, %c0_118] : memref<1x1x1xf32, #tpu.memory_space<vmem>>, vector<1x1x1xf32>
    %152 = vector.shape_cast %151 : vector<1x1x1xf32> to vector<1x1xf32>
    %153 = vector.shape_cast %150 : vector<1x1xf32> to vector<1x1x1xf32>
    tpu.vector_store %arg4[%c0_116, %c0_117, %c0_118], %153 {strides = array<i32>} : memref<1x1x1xf32, #tpu.memory_space<vmem>>, vector<1x1x1xf32>,
    return
  }
  func.func @transform_0(%arg0: i32) -> (i32, i32, i32, i32) {
    %c0_i32 = arith.constant 0 : i32
    %c0_i32_0 = arith.constant 0 : i32
    %c0_i32_1 = arith.constant 0 : i32
    %c0_i32_2 = arith.constant 0 : i32
    return %arg0, %c0_i32, %c0_i32_0, %c0_i32_1 : i32, i32, i32, i32
  }
  func.func @transform_1(%arg0: i32) -> (i32, i32) {
    %c0_i32 = arith.constant 0 : i32
    %c0_i32_0 = arith.constant 0 : i32
    %c0_i32_1 = arith.constant 0 : i32
    return %c0_i32, %c0_i32_0 : i32, i32
  }
  func.func @transform_2(%arg0: i32) -> (i32, i32) {
    %c0_i32 = arith.constant 0 : i32
    %c0_i32_0 = arith.constant 0 : i32
    %c0_i32_1 = arith.constant 0 : i32
    return %c0_i32, %c0_i32_0 : i32, i32
  }
  func.func @transform_3(%arg0: i32) -> (i32, i32, i32) {
    %c0_i32 = arith.constant 0 : i32
    %c0_i32_0 = arith.constant 0 : i32
    %c0_i32_1 = arith.constant 0 : i32
    return %arg0, %c0_i32, %c0_i32_0 : i32, i32, i32
  }
}

</mosaic_0001>

<bundles_post_ra>
// kernel: discriminator_forward.5
= control target key start
LH: loop header
LB: loop body
LE: loop exit
PB: predicated region body
PF: predicated region fallthrough
CT: control target
= control target key end

     0   :  { %s2880_s15 = smov 0   ;;  %s3440_s0 = inlined_call_operand.vmem [shape: bf16[2,289,12], index: 0, kind: input, shape index: {}]   ;;  %s3441_s1 = inlined_call_operand.vmem [shape: bf16[4,12,64], index: 1, kind: input, shape index: {}]   ;;  %s3442_s2 = inlined_call_operand.vmem [shape: f32[1,64], index: 2, kind: input, shape index: {}]   ;;  %s3443_s3 = inlined_call_operand.vmem [shape: f32[271,1], index: 3, kind: input, shape index: {}]   ;;  %s3444_s4 = inlined_call_operand.vmem [shape: bf16[2,271,64], index: 4, kind: output, shape index: {}]  }
   0x1 LB: > { %s2217_s16 = sadd.s32 4294967295, %s2851_s15   ;;  %p2221_p0 = scmp.ge.s32.totalorder %s2851_s15, 1  ;;  %s2851_s15 = sphi %s2880_s15, %s14_s15  }
   0x2   : > { %p162_p1 = scmp.lt.s32.totalorder %s2851_s15, 3 }
   0x4   : > { %p163_p2 = pnand %p2221_p0, %p162_p1 }
   0x5   : > { %p188_p3 = scmp.lt.s32.totalorder (!%p163_p2), %s2217_s16, 1 }
   0x6   : > { %166 = sbr.rel (%p163_p2) target bundleno = 497 (0x1f1), region = 36 }
   0xb   : > { %vm516_vm0 = vcmask 1045504   ;;  %v2853_v0 = vmov 0.0   ;;  %v2789_v1 = vld [vmem:[%s3441_s1] sm:$0x3f]   ;;  %vm2854_vm1 = vmmov 0   ;;  %s3446_s16 = smov (!%p188_p3, %s2217_s16), 1 }
   0xc   : > { %2567 = vmatprep.subr.bf16.mxu1 %v2853_v0  ;;  %2497 = vmatprep.subr.bf16.mxu0 %v2853_v0  ;;  %v2790_v2 = vld [vmem:[%s3441_s1 + $0x8] sm:$0x3f]   ;;  %v729_v3 = vsel %vm516_vm0, %v2789_v1, 0  ;;  %s2777_s20 = smul.u32 148, %s3446_s16  ;;  %v2794_v5 = vld [vmem:[%s3441_s1 + $0x18] sm:$0x3f]  }
   0xd   : > { %2569 = vmatprep.mubr.msk.bf16.mxu1 %vm2854_vm1, %v2853_v0  ;;  %2499 = vmatprep.mubr.msk.bf16.mxu0 %vm2854_vm1, %v2853_v0  ;;  %v518_v4 = vsel %vm516_vm0, %v2790_v2, 0  ;;  %vm464_vm2 = vcmask 97280   ;;  %v1638_v7 = vsel %vm516_vm0, %v2794_v5, 0  ;;  %v2793_v12 = vld [vmem:[%s3441_s1 + $0x10] sm:$0x3f]   ;;  %vm1545_vm4 = vcmask 1046528  }
   0xe   : > { %2568 = vmatpush3.bf16.msra.mxu1 %v729_v3  ;;  %2498 = vmatpush3.bf16.msra.mxu0 %v518_v4  ;;  %s2913_s25 = scalar_lea.vmem %s3440_s0, %s2777_s20  ;;  %vm323_vm3 = vsmask.f32 7424  ;;  %v1214_v19 = vsel %vm516_vm0, %v2793_v12, 0  ;;  %s2778_s30 = smul.u32 136, %s3446_s16  ;;  %vm2122_vm6 = vcmask 519168  }
   0xf   : > { %2707 = vmatprep.subr.bf16.mxu1 %v2853_v0  ;;  %2637 = vmatprep.subr.bf16.mxu0 %v2853_v0  ;;  %v2791_v6 = vld [vmem:[%s2913_s25] sm:$0xff]   ;;  %v2792_v8 = vld [vmem:[%s2913_s25 + $0x8] sm:$0xff]   ;;  %v2795_v13 = vld [vmem:[%s2913_s25 + $0x10] sm:$0xff]  }
  0x10   : > { %v325_v9 = vshrl.u32 %v2791_v6, 16  ;;  %v327_v10 = vshll.u32 %v2791_v6, 16  ;;  %v332_v11 = vshll.u32 %v2792_v8, 16  ;;  %v336_v17 = vshrl.u32 %v2792_v8, 16  ;;  %v2796_v23 = vld [vmem:[%s2913_s25 + $0x18] sm:$0xff]   ;;  %v2797_v29 = vld [vmem:[%s2913_s25 + $0x20] sm:$0xff]   ;;  %s3301_s7 = scalar_lea.vmem %s3444_s4, %s2778_s30 }
  0x11   : > { %2570 = vmatmul.mubr.msk.bf16.vlgmr.msra.gmra.mxu1 %vm464_vm2, %v2791_v6  ;;  %v340_v18 = vshll.u32 %v2795_v13, 16  ;;  %v344_v25 = vshrl.u32 %v2795_v13, 16  ;;  %v348_v26 = vshll.u32 %v2796_v23, 16  ;;  %v352_v31 = vshrl.u32 %v2796_v23, 16  ;;  %v2798_v35 = vld [vmem:[%s2913_s25 + $0x28] sm:$0xff]   ;;  %v2799_v41 = vld [vmem:[%s2913_s25 + $0x30] sm:$0xff]  }
  0x12   : > { %2708 = vmatpush3.bf16.msra.mxu1 %v1638_v7  ;;  %2573 = vmatprep.mubr.msk.bf16.mxu1 %vm2854_vm1, %v2853_v0  ;;  %v329_v14 = vrot.slane %v327_v10, 1  ;;  %v334_v15 = vrot.slane %v332_v11, 1  ;;  %v356_v32 = vshll.u32 %v2797_v29, 16  ;;  %v360_v37 = vshrl.u32 %v2797_v29, 16  ;;  %v2800_v47 = vld [vmem:[%s2913_s25 + $0x38] sm:$0xff]   ;;  %v2801_v53 = vld [vmem:[%s2913_s25 + $0x40] sm:$0xff]  }
  0x13   : > { %v342_v22 = vrot.slane %v340_v18, 1  ;;  %v350_v28 = vrot.slane %v348_v26, 1  ;;  %v364_v38 = vshll.u32 %v2798_v35, 16  ;;  %v368_v43 = vshrl.u32 %v2798_v35, 16  ;;  %v2802_v59 = vld [vmem:[%s2913_s25 + $0x48] sm:$0xff]   ;;  %v2803_v2 = vld [vmem:[%s2913_s25 + $0x50] sm:$0xff]  }
  0x14   : > { %v330_v16 = vor.u32 %v329_v14, %v325_v9  ;;  %v338_v21 = vor.u32 %v336_v17, %v334_v15  ;;  %v358_v34 = vrot.slane %v356_v32, 1  ;;  %v372_v44 = vshll.u32 %v2799_v41, 16  ;;  %v2805_v14 = vld [vmem:[%s2913_s25 + $0x60] sm:$0xff]   ;;  %v2807_v26 = vld [vmem:[%s2913_s25 + $0x70] sm:$0xff]   ;;  %v2808_v32 = vld [vmem:[%s2913_s25 + $0x78] sm:$0xff]  }
  0x15   : > { %v346_v27 = vor.u32 %v344_v25, %v342_v22  ;;  %v354_v33 = vor.u32 %v352_v31, %v350_v28  ;;  %v366_v40 = vrot.slane %v364_v38, 1  ;;  %v376_v49 = vshrl.u32 %v2799_v41, 16  ;;  %v2809_v38 = vld [vmem:[%s2913_s25 + $0x80] sm:$0xff]  }
  0x16   : > { %v335_v20 = vsel %vm323_vm3, %v330_v16, %v334_v15  ;;  %v343_v24 = vsel %vm323_vm3, %v338_v21, %v342_v22  ;;  %v362_v39 = vor.u32 %v360_v37, %v358_v34  ;;  %v374_v46 = vrot.slane %v372_v44, 1 }
  0x17   : > { %2500 = vmatmul.mubr.msk.bf16.vlgmr.msra.gmra.mxu0 %vm464_vm2, %v335_v20  ;;  %v351_v30 = vsel %vm323_vm3, %v346_v27, %v350_v28  ;;  %v359_v36 = vsel %vm323_vm3, %v354_v33, %v358_v34  ;;  %v370_v45 = vor.u32 %v368_v43, %v366_v40  ;;  %v380_v50 = vshll.u32 %v2800_v47, 16  ;;  %v2806_v20 = vld [vmem:[%s2913_s25 + $0x68] sm:$0xff]  }
  0x18   : > { %2638 = vmatpush3.bf16.msra.mxu0 %v1214_v19  ;;  %2503 = vmatprep.mubr.msk.bf16.mxu0 %vm2854_vm1, %v2853_v0  ;;  %v367_v42 = vsel %vm323_vm3, %v362_v39, %v366_v40  ;;  %v378_v51 = vor.u32 %v376_v49, %v374_v46  ;;  %v384_v55 = vshrl.u32 %v2800_v47, 16  ;;  %v388_v56 = vshll.u32 %v2801_v53, 16  ;;  %v2813_v49 = vld [vmem:[%s2913_s25 + $0x10] sm:$0xff]  }
  0x19   : > { %2574 = vmatmul.mubr.msk.bf16.gmra.mxu1 %vm464_vm2, %v2792_v8  ;;  %v375_v48 = vsel %vm323_vm3, %v370_v45, %v374_v46  ;;  %v382_v52 = vrot.slane %v380_v50, 1  ;;  %v392_v61 = vshrl.u32 %v2801_v53, 16  ;;  %v396_v62 = vshll.u32 %v2802_v59, 16  ;;  %v2804_v8 = vld [vmem:[%s2913_s25 + $0x58] sm:$0xff]   ;;  %v2812_v45 = vld [vmem:[%s2913_s25 + $0x8] sm:$0xff]  }
  0x1a   : > { %2577 = vmatprep.mubr.msk.bf16.mxu1 %vm2854_vm1, %v2853_v0  ;;  %v390_v58 = vrot.slane %v388_v56, 1  ;;  %v400_v4 = vshrl.u32 %v2802_v59, 16  ;;  %v404_v5 = vshll.u32 %v2803_v2, 16  ;;  %v408_v10 = vshrl.u32 %v2803_v2, 16  ;;  %v2810_v46 = vld [vmem:[%s2913_s25 + $0x8] sm:$0xfe]  }
  0x1b   : > { %v383_v54 = vsel %vm323_vm3, %v378_v51, %v382_v52  ;;  %v386_v57 = vor.u32 %v384_v55, %v382_v52  ;;  %v398_v1 = vrot.slane %v396_v62, 1  ;;  %v412_v11 = vshll.u32 %v2804_v8, 16 }
  0x1c   : > { %v394_v63 = vor.u32 %v392_v61, %v390_v58  ;;  %v406_v7 = vrot.slane %v404_v5, 1  ;;  %v416_v16 = vshrl.u32 %v2804_v8, 16  ;;  %v420_v17 = vshll.u32 %v2805_v14, 16  ;;  %v2815_v61 = vld [vmem:[%s2913_s25 + $0x18] sm:$0xff]  }
  0x1d   : > { %v391_v60 = vsel %vm323_vm3, %v386_v57, %v390_v58  ;;  %v402_v6 = vor.u32 %v400_v4, %v398_v1  ;;  %v424_v22 = vshrl.u32 %v2805_v14, 16  ;;  %v432_v28 = vshrl.u32 %v2806_v20, 16  ;;  %v2814_v58 = vld [vmem:[%s2913_s25 + $0x18] sm:$0xff]   ;;  %v2816_v4 = vld [vmem:[%s2913_s25 + $0x20] sm:$0xff]  }
  0x1e   : > { %v399_v3 = vsel %vm323_vm3, %v394_v63, %v398_v1  ;;  %v410_v12 = vor.u32 %v408_v10, %v406_v7  ;;  %v422_v19 = vrot.slane %v420_v17, 1  ;;  %v440_v34 = vshrl.u32 %v2807_v26, 16 }
  0x1f   : > { %2504 = vmatmul.mubr.msk.bf16.gmra.mxu0 %vm464_vm2, %v343_v24  ;;  %v407_v9 = vsel %vm323_vm3, %v402_v6, %v406_v7  ;;  %v448_v40 = vshrl.u32 %v2808_v32, 16  ;;  %v1025_v50 = vshll.u32 %v2812_v45, 16  ;;  %v1546_v51 = vrot.slane %v2810_v46, 1  ;;  %v2817_v7 = vld [vmem:[%s2913_s25 + $0x20] sm:$0xff]  }
  0x20   : > { %2507 = vmatprep.mubr.msk.bf16.mxu0 %vm2854_vm1, %v2853_v0  ;;  %v426_v24 = vor.u32 %v424_v22, %v422_v19  ;;  %v1030_v56 = vshll.u32 %v2813_v49, 16  ;;  %v1549_v62 = vrot.slane %v2814_v58, 1  ;;  %v1034_v1 = vshrl.u32 %v2813_v49, 16  ;;  %v2820_v22 = vld [vmem:[%s2913_s25 + $0x30] sm:$0xff]   ;;  %v2826_v49 = vld [vmem:[%s2913_s25 + $0x48] sm:$0xff]  }
  0x21   : > { %2578 = vmatmul.mubr.msk.bf16.gmra.mxu1 %vm464_vm2, %v2795_v13  ;;  %v414_v13 = vrot.slane %v412_v11, 1  ;;  %v1027_v55 = vrot.slane %v1025_v50, 1  ;;  %v1042_v10 = vshrl.u32 %v2815_v61, 16  ;;  %v1046_v11 = vshll.u32 %v2817_v7, 16  ;;  %v2828_v58 = vld [vmem:[%s2913_s25 + $0x50] sm:$0xff]  }
  0x22   : > { %2581 = vmatprep.mubr.msk.bf16.mxu1 %vm2854_vm1, %v2853_v0 }
  0x23   : > { %v415_v15 = vsel %vm323_vm3, %v410_v12, %v414_v13  ;;  %v418_v18 = vor.u32 %v416_v16, %v414_v13  ;;  %v2818_v13 = vld [vmem:[%s2913_s25 + $0x28] sm:$0xff]  }
  0x24   : > { %v2819_v16 = vld [vmem:[%s2913_s25 + $0x28] sm:$0xff]   ;;  %v1553_v17 = vrot.slane %v2818_v13, 1 }
  0x25   : > { %v423_v21 = vsel %vm323_vm3, %v418_v18, %v422_v19  ;;  %v1050_v19 = vshrl.u32 %v2817_v7, 16  ;;  %v2830_v7 = vld [vmem:[%s2913_s25 + $0x58] sm:$0xff]  }
  0x27   : > { %2508 = vmatmul.mubr.msk.bf16.gmra.mxu0 %vm464_vm2, %v351_v30 }
  0x28   : > { %2511 = vmatprep.mubr.msk.bf16.mxu0 %vm2854_vm1, %v2853_v0 }
  0x29   : > { %2582 = vmatmul.mubr.msk.bf16.gmra.mxu1 %vm464_vm2, %v2796_v23  ;;  %v428_v23 = vshll.u32 %v2806_v20, 16 }
  0x2a   : > { %2585 = vmatprep.mubr.msk.bf16.mxu1 %vm2854_vm1, %v2853_v0 }
  0x2b   : > { %v430_v25 = vrot.slane %v428_v23, 1 }
  0x2d   : > { %v431_v27 = vsel %vm323_vm3, %v426_v24, %v430_v25  ;;  %v434_v30 = vor.u32 %v432_v28, %v430_v25  ;;  %v2821_v25 = vld [vmem:[%s2913_s25 + $0x30] sm:$0xff]   ;;  %v1058_v28 = vshrl.u32 %v2819_v16, 16 }
  0x2f   : > { %2512 = vmatmul.mubr.msk.bf16.gmra.mxu0 %vm464_vm2, %v359_v36 }
  0x30   : > { %2515 = vmatprep.mubr.msk.bf16.mxu0 %vm2854_vm1, %v2853_v0 }
  0x31   : > { %2586 = vmatmul.mubr.msk.bf16.gmra.mxu1 %vm464_vm2, %v2797_v29  ;;  %v436_v29 = vshll.u32 %v2807_v26, 16 }
  0x32   : > { %2589 = vmatprep.mubr.msk.bf16.mxu1 %vm2854_vm1, %v2853_v0 }
  0x33   : > { %v438_v31 = vrot.slane %v436_v29, 1  ;;  %v1062_v29 = vshll.u32 %v2821_v25, 16 }
  0x35   : > { %v439_v33 = vsel %vm323_vm3, %v434_v30, %v438_v31  ;;  %v442_v36 = vor.u32 %v440_v34, %v438_v31  ;;  %v2822_v31 = vld [vmem:[%s2913_s25 + $0x38] sm:$0xff]  }
  0x36   : > { %v2823_v34 = vld [vmem:[%s2913_s25 + $0x38] sm:$0xff]  }
  0x37   : > { %2516 = vmatmul.mubr.msk.bf16.gmra.mxu0 %vm464_vm2, %v367_v42  ;;  %v1074_v46 = vshrl.u32 %v2823_v34, 16 }
  0x38   : > { %2519 = vmatprep.mubr.msk.bf16.mxu0 %vm2854_vm1, %v2853_v0 }
  0x39   : > { %2590 = vmatmul.mubr.msk.bf16.gmra.mxu1 %vm464_vm2, %v2798_v35  ;;  %v444_v35 = vshll.u32 %v2808_v32, 16 }
  0x3a   : > { %2593 = vmatprep.mubr.msk.bf16.mxu1 %vm2854_vm1, %v2853_v0 }
  0x3b   : > { %v446_v37 = vrot.slane %v444_v35, 1  ;;  %v1557_v35 = vrot.slane %v2822_v31, 1 }
  0x3d   : > { %v447_v39 = vsel %vm323_vm3, %v442_v36, %v446_v37  ;;  %v450_v42 = vor.u32 %v448_v40, %v446_v37  ;;  %v1066_v37 = vshrl.u32 %v2821_v25, 16  ;;  %v2824_v40 = vld [vmem:[%s2913_s25 + $0x40] sm:$0xff]  }
  0x3f   : > { %2520 = vmatmul.mubr.msk.bf16.gmra.mxu0 %vm464_vm2, %v375_v48  ;;  %v456_v48 = vshrl.u32 %v2809_v38, 16 }
  0x40   : > { %2523 = vmatprep.mubr.msk.bf16.mxu0 %vm2854_vm1, %v2853_v0 }
  0x41   : > { %2594 = vmatmul.mubr.msk.bf16.gmra.mxu1 %vm464_vm2, %v2799_v41  ;;  %v452_v41 = vshll.u32 %v2809_v38, 16 }
  0x42   : > { %2597 = vmatprep.mubr.msk.bf16.mxu1 %vm2854_vm1, %v2853_v0 }
  0x43   : > { %v454_v43 = vrot.slane %v452_v41, 1 }
  0x45   : > { %v455_v44 = vsel %vm323_vm3, %v450_v42, %v454_v43 }
  0x47   : > { %2524 = vmatmul.mubr.msk.bf16.gmra.mxu0 %vm464_vm2, %v383_v54  ;;  %v1023_v54 = vshrl.u32 %v2812_v45, 16 }
  0x48   : > { %2527 = vmatprep.mubr.msk.bf16.mxu0 %vm2854_vm1, %v2853_v0 }
  0x49   : > { %2598 = vmatmul.mubr.msk.bf16.gmra.mxu1 %vm464_vm2, %v2800_v47  ;;  %v2811_v47 = vld [vmem:[%s2913_s25 + $0x10] sm:$0xff]  }
  0x4a   : > { %2601 = vmatprep.mubr.msk.bf16.mxu1 %vm2854_vm1, %v2853_v0  ;;  %v1547_v52 = vrot.slane %v2811_v47, 1 }
  0x4c   : > { %v1548_v57 = vsel %vm1545_vm4, %v1546_v51, %v1547_v52 }
  0x4f   : > { %2528 = vmatmul.mubr.msk.bf16.gmra.mxu0 %vm464_vm2, %v391_v60  ;;  %v1032_v60 = vrot.slane %v1030_v56, 1 }
  0x50   : > { %2531 = vmatprep.mubr.msk.bf16.mxu0 %vm2854_vm1, %v2853_v0 }
  0x51   : > { %2602 = vmatmul.mubr.msk.bf16.gmra.mxu1 %vm464_vm2, %v2801_v53  ;;  %v458_v53 = vor.u32 %v456_v48, %v454_v43  ;;  %v1036_v5 = vor.u32 %v1034_v1, %v1032_v60  ;;  %v2825_v43 = vld [vmem:[%s2913_s25 + $0x40] sm:$0xff]  }
  0x52   : > { %2605 = vmatprep.mubr.msk.bf16.mxu1 %vm2854_vm1, %v2853_v0  ;;  %v1078_v47 = vshll.u32 %v2825_v43, 16 }
  0x54   : > { %v1080_v51 = vrot.slane %v1078_v47, 1 }
  0x57   : > { %2532 = vmatmul.mubr.msk.bf16.gmra.mxu0 %vm464_vm2, %v399_v3  ;;  %v1550_v3 = vsel %vm1545_vm4, %v1547_v52, %v1549_v62  ;;  %v2827_v52 = vld [vmem:[%s2913_s25 + $0x48] sm:$0xff]  }
  0x58   : > { %2535 = vmatprep.mubr.msk.bf16.mxu0 %vm2854_vm1, %v2853_v0  ;;  %v1086_v56 = vshll.u32 %v2827_v52, 16 }
  0x59   : > { %2606 = vmatmul.mubr.msk.bf16.gmra.mxu1 %vm464_vm2, %v2802_v59  ;;  %v1028_v59 = vor.u32 %v1027_v55, %v1023_v54  ;;  %v1082_v55 = vshrl.u32 %v2825_v43, 16 }
  0x5a   : > { %2609 = vmatprep.mubr.msk.bf16.mxu1 %vm2854_vm1, %v2853_v0 }
  0x5b   : > { %v1033_v63 = vsel %vm323_vm3, %v1028_v59, %v1032_v60  ;;  %v1084_v60 = vor.u32 %v1082_v55, %v1080_v51 }
  0x5f   : > { %2536 = vmatmul.mubr.msk.bf16.gmra.mxu0 %vm464_vm2, %v407_v9 }
  0x60   : > { %2539 = vmatprep.mubr.msk.bf16.mxu0 %vm2854_vm1, %v2853_v0 }
  0x61   : > { %2610 = vmatmul.mubr.msk.bf16.gmra.mxu1 %vm464_vm2, %v2803_v2  ;;  %v1038_v2 = vshll.u32 %v2815_v61, 16  ;;  %v1088_v61 = vrot.slane %v1086_v56, 1 }
  0x62   : > { %2613 = vmatprep.mubr.msk.bf16.mxu1 %vm2854_vm1, %v2853_v0 }
  0x63   : > { %v1040_v6 = vrot.slane %v1038_v2, 1 }
  0x65   : > { %v1041_v9 = vsel %vm323_vm3, %v1036_v5, %v1040_v6 }
  0x67   : > { %2540 = vmatmul.mubr.msk.bf16.gmra.mxu0 %vm464_vm2, %v415_v15  ;;  %v1048_v15 = vrot.slane %v1046_v11, 1 }
  0x68   : > { %2543 = vmatprep.mubr.msk.bf16.mxu0 %vm2854_vm1, %v2853_v0 }
  0x69   : > { %2614 = vmatmul.mubr.msk.bf16.gmra.mxu1 %vm464_vm2, %v2804_v8  ;;  %v1551_v8 = vrot.slane %v2816_v4, 1  ;;  %v1052_v23 = vor.u32 %v1050_v19, %v1048_v15  ;;  %v1090_v4 = vshrl.u32 %v2827_v52, 16  ;;  %v2835_v52 = vld [vmem:[%s2913_s25 + $0x68] sm:$0xff]  }
  0x6a   : > { %2617 = vmatprep.mubr.msk.bf16.mxu1 %vm2854_vm1, %v2853_v0 }
  0x6b   : > { %v1552_v12 = vsel %vm1545_vm4, %v1549_v62, %v1551_v8  ;;  %v2829_v62 = vld [vmem:[%s2913_s25 + $0x50] sm:$0xff]  }
  0x6c   : > { %v1094_v5 = vshll.u32 %v2829_v62, 16 }
  0x6e   : > { %v1096_v13 = vrot.slane %v1094_v5, 1 }
  0x6f   : > { %2544 = vmatmul.mubr.msk.bf16.gmra.mxu0 %vm464_vm2, %v423_v21  ;;  %v1554_v21 = vsel %vm1545_vm4, %v1551_v8, %v1553_v17 }
  0x70   : > { %2547 = vmatprep.mubr.msk.bf16.mxu0 %vm2854_vm1, %v2853_v0 }
  0x71   : > { %2618 = vmatmul.mubr.msk.bf16.gmra.mxu1 %vm464_vm2, %v2805_v14  ;;  %v1044_v14 = vor.u32 %v1042_v10, %v1040_v6 }
  0x72   : > { %2621 = vmatprep.mubr.msk.bf16.mxu1 %vm2854_vm1, %v2853_v0 }
  0x73   : > { %v1049_v18 = vsel %vm323_vm3, %v1044_v14, %v1048_v15  ;;  %v2831_v14 = vld [vmem:[%s2913_s25 + $0x58] sm:$0xff]  }
  0x77   : > { %2548 = vmatmul.mubr.msk.bf16.gmra.mxu0 %vm464_vm2, %v431_v27 }
  0x78   : > { %2551 = vmatprep.mubr.msk.bf16.mxu0 %vm2854_vm1, %v2853_v0 }
  0x79   : > { %2622 = vmatmul.mubr.msk.bf16.gmra.mxu1 %vm464_vm2, %v2806_v20  ;;  %v1054_v20 = vshll.u32 %v2819_v16, 16  ;;  %v1565_v16 = vrot.slane %v2830_v7, 1 }
  0x7a   : > { %2625 = vmatprep.mubr.msk.bf16.mxu1 %vm2854_vm1, %v2853_v0 }
  0x7b   : > { %v1056_v24 = vrot.slane %v1054_v20, 1 }
  0x7d   : > { %v1057_v27 = vsel %vm323_vm3, %v1052_v23, %v1056_v24  ;;  %v1102_v23 = vshll.u32 %v2831_v14, 16 }
  0x7f   : > { %2552 = vmatmul.mubr.msk.bf16.gmra.mxu0 %vm464_vm2, %v439_v33  ;;  %v1064_v33 = vrot.slane %v1062_v29, 1 }
  0x80   : > { %2555 = vmatprep.mubr.msk.bf16.mxu0 %vm2854_vm1, %v2853_v0 }
  0x81   : > { %2626 = vmatmul.mubr.msk.bf16.gmra.mxu1 %vm464_vm2, %v2807_v26  ;;  %v1555_v26 = vrot.slane %v2820_v22, 1  ;;  %v1068_v41 = vor.u32 %v1066_v37, %v1064_v33  ;;  %v1098_v22 = vshrl.u32 %v2829_v62, 16 }
  0x82   : > { %2629 = vmatprep.mubr.msk.bf16.mxu1 %vm2854_vm1, %v2853_v0 }
  0x83   : > { %v1556_v30 = vsel %vm1545_vm4, %v1553_v17, %v1555_v26  ;;  %v1100_v31 = vor.u32 %v1098_v22, %v1096_v13  ;;  %v2838_v22 = vld [vmem:[%s2913_s25 + $0x78] sm:$0xff]  }
  0x87   : > { %2556 = vmatmul.mubr.msk.bf16.gmra.mxu0 %vm464_vm2, %v447_v39  ;;  %v1558_v39 = vsel %vm1545_vm4, %v1555_v26, %v1557_v35  ;;  %v2832_v26 = vld [vmem:[%s2913_s25 + $0x60] sm:$0xff]  }
  0x88   : > { %2559 = vmatprep.mubr.msk.bf16.mxu0 %vm2854_vm1, %v2853_v0 }
  0x89   : > { %2630 = vmatmul.mubr.msk.bf16.gmra.mxu1 %vm464_vm2, %v2808_v32  ;;  %v1060_v32 = vor.u32 %v1058_v28, %v1056_v24 }
  0x8a   : > { %2633 = vmatprep.mubr.msk.bf16.mxu1 %vm2854_vm1, %v2853_v0 }
  0x8b   : > { %v1065_v36 = vsel %vm323_vm3, %v1060_v32, %v1064_v33  ;;  %v1104_v32 = vrot.slane %v1102_v23, 1  ;;  %v2833_v33 = vld [vmem:[%s2913_s25 + $0x60] sm:$0xff]  }
  0x8f   : > { %2560 = vmatmul.mubr.msk.bf16.gmra.mxu0 %vm464_vm2, %v455_v44  ;;  %v1559_v44 = vrot.slane %v2824_v40, 1  ;;  %v1105_v40 = vsel %vm323_vm3, %v1100_v31, %v1104_v32 }
  0x90   : > { %2563 = vmatprep.mubr.msk.bf16.mxu0 %vm2854_vm1, %v2853_v0 }
  0x91   : > { %2634 = vmatmul.mubr.msk.bf16.gmra.mxu1 %vm464_vm2, %v2809_v38  ;;  %v1070_v38 = vshll.u32 %v2823_v34, 16  ;;  %v1560_v48 = vsel %vm1545_vm4, %v1557_v35, %v1559_v44  ;;  %v1567_v35 = vrot.slane %v2832_v26, 1 }
  0x92   : > { %2709 = vmatprep.mubr.msk.bf16.mxu1 %vm2854_vm1, %v2853_v0 }
  0x93   : > { %v1072_v42 = vrot.slane %v1070_v38, 1 }
  0x95   : > { %v1073_v45 = vsel %vm323_vm3, %v1068_v41, %v1072_v42  ;;  %v1076_v50 = vor.u32 %v1074_v46, %v1072_v42  ;;  %v1106_v41 = vshrl.u32 %v2831_v14, 16  ;;  %v1110_v42 = vshll.u32 %v2833_v33, 16 }
  0x97   : > { %2564 = vmatmul.mubr.msk.bf16.gmra.mxu0 %vm464_vm2, %v458_v53  ;;  %v1561_v53 = vrot.slane %v2826_v49, 1  ;;  %v1081_v54 = vsel %vm323_vm3, %v1076_v50, %v1080_v51  ;;  %v1108_v50 = vor.u32 %v1106_v41, %v1104_v32  ;;  %v1112_v51 = vrot.slane %v1110_v42, 1 }
  0x98   : > { %2639 = vmatprep.mubr.msk.bf16.mxu0 %vm2854_vm1, %v2853_v0  ;;  %v1573_v32 = vrot.slane %v2838_v22, 1 }
  0x99   : > { %2710 = vmatmul.mubr.msk.bf16.vlgmr.msra.gmra.mxu1 %vm464_vm2, %v1548_v57  ;;  %v1562_v57 = vsel %vm1545_vm4, %v1559_v44, %v1561_v53  ;;  %v1568_v44 = vsel %vm1545_vm4, %v1565_v16, %v1567_v35 }
  0x9a   : > { %2713 = vmatprep.mubr.msk.bf16.mxu1 %vm2854_vm1, %v2853_v0 }
  0x9f   : > { %2640 = vmatmul.mubr.msk.bf16.vlgmr.msra.gmra.mxu0 %vm464_vm2, %v1033_v63  ;;  %v1563_v63 = vrot.slane %v2828_v58, 1 }
  0xa0   : > { %2643 = vmatprep.mubr.msk.bf16.mxu0 %vm2854_vm1, %v2853_v0 }
  0xa1   : > { %2714 = vmatmul.mubr.msk.bf16.gmra.mxu1 %vm464_vm2, %v1550_v3  ;;  %v1089_v3 = vsel %vm323_vm3, %v1084_v60, %v1088_v61  ;;  %v1564_v6 = vsel %vm1545_vm4, %v1561_v53, %v1563_v63  ;;  %v1566_v25 = vsel %vm1545_vm4, %v1563_v63, %v1565_v16  ;;  %v1114_v60 = vshrl.u32 %v2833_v33, 16 }
  0xa2   : > { %2717 = vmatprep.mubr.msk.bf16.mxu1 %vm2854_vm1, %v2853_v0 }
  0xa3   : > { %v1116_v5 = vor.u32 %v1114_v60, %v1112_v51 }
  0xa7   : > { %2644 = vmatmul.mubr.msk.bf16.gmra.mxu0 %vm464_vm2, %v1041_v9 }
  0xa8   : > { %2647 = vmatprep.mubr.msk.bf16.mxu0 %vm2854_vm1, %v2853_v0 }
  0xa9   : > { %2718 = vmatmul.mubr.msk.bf16.gmra.mxu1 %vm464_vm2, %v1552_v12  ;;  %v1092_v12 = vor.u32 %v1090_v4, %v1088_v61  ;;  %v1118_v61 = vshll.u32 %v2835_v52, 16 }
  0xaa   : > { %2721 = vmatprep.mubr.msk.bf16.mxu1 %vm2854_vm1, %v2853_v0 }
  0xab   : > { %v1120_v7 = vrot.slane %v1118_v61, 1 }
  0xad   : > { %v1121_v16 = vsel %vm323_vm3, %v1116_v5, %v1120_v7 }
  0xaf   : > { %2648 = vmatmul.mubr.msk.bf16.gmra.mxu0 %vm464_vm2, %v1049_v18 }
  0xb0   : > { %2651 = vmatprep.mubr.msk.bf16.mxu0 %vm2854_vm1, %v2853_v0 }
  0xb1   : > { %2722 = vmatmul.mubr.msk.bf16.gmra.mxu1 %vm464_vm2, %v1554_v21  ;;  %v1097_v21 = vsel %vm323_vm3, %v1092_v12, %v1096_v13 }
  0xb2   : > { %2725 = vmatprep.mubr.msk.bf16.mxu1 %vm2854_vm1, %v2853_v0 }
  0xb7   : > { %2652 = vmatmul.mubr.msk.bf16.gmra.mxu0 %vm464_vm2, %v1057_v27 }
  0xb8   : > { %2655 = vmatprep.mubr.msk.bf16.mxu0 %vm2854_vm1, %v2853_v0 }
  0xb9   : > { %2726 = vmatmul.mubr.msk.bf16.gmra.mxu1 %vm464_vm2, %v1556_v30 }
  0xba   : > { %2729 = vmatprep.mubr.msk.bf16.mxu1 %vm2854_vm1, %v2853_v0 }
  0xbf   : > { %2656 = vmatmul.mubr.msk.bf16.gmra.mxu0 %vm464_vm2, %v1065_v36 }
  0xc0   : > { %2659 = vmatprep.mubr.msk.bf16.mxu0 %vm2854_vm1, %v2853_v0 }
  0xc1   : > { %2730 = vmatmul.mubr.msk.bf16.gmra.mxu1 %vm464_vm2, %v1558_v39 }
  0xc2   : > { %2733 = vmatprep.mubr.msk.bf16.mxu1 %vm2854_vm1, %v2853_v0 }
  0xc7   : > { %2660 = vmatmul.mubr.msk.bf16.gmra.mxu0 %vm464_vm2, %v1073_v45  ;;  %v2834_v45 = vld [vmem:[%s2913_s25 + $0x68] sm:$0xff]  }
  0xc8   : > { %2663 = vmatprep.mubr.msk.bf16.mxu0 %vm2854_vm1, %v2853_v0 }
  0xc9   : > { %2734 = vmatmul.mubr.msk.bf16.gmra.mxu1 %vm464_vm2, %v1560_v48 }
  0xca   : > { %2737 = vmatprep.mubr.msk.bf16.mxu1 %vm2854_vm1, %v2853_v0 }
  0xcf   : > { %2664 = vmatmul.mubr.msk.bf16.gmra.mxu0 %vm464_vm2, %v1081_v54  ;;  %v1569_v54 = vrot.slane %v2834_v45, 1 }
  0xd0   : > { %2667 = vmatprep.mubr.msk.bf16.mxu0 %vm2854_vm1, %v2853_v0 }
  0xd1   : > { %v765_v59 = vpop.f32.mrf.mxu1  ;;  %2738 = vmatmul.mubr.msk.bf16.gmra.mxu1 %vm464_vm2, %v1562_v57  ;;  %v1570_v63 = vsel %vm1545_vm4, %v1567_v35, %v1569_v54 }
  0xd2   : > { %2741 = vmatprep.mubr.msk.bf16.mxu1 %vm2854_vm1, %v2853_v0 }
  0xd3   : > { %v2571_v1 = vpop.f32.mrf.mxu1 }
  0xd4   : > { %v2836_v1 = vld [vmem:[%s2913_s25 + $0x70] sm:$0xff]  }
  0xd5   : > { %v768_v2 = vpop.f32.mrf.mxu1 }
  0xd7   : > { %v2572_v8 = vpop.f32.mrf.mxu1  ;;  %v554_v9 = vpop.f32.mrf.mxu0  ;;  %2668 = vmatmul.mubr.msk.bf16.gmra.mxu0 %vm464_vm2, %v1089_v3 }
  0xd8   : > { %v3139_v10 = vadd.f32 %v765_v59, %v554_v9  ;;  %2671 = vmatprep.mubr.msk.bf16.mxu0 %vm2854_vm1, %v2853_v0  ;;  %v1113_v59 = vsel %vm323_vm3, %v1108_v50, %v1112_v51  ;;  %v2837_v8 = vld [vmem:[%s2913_s25 + $0x70] sm:$0xff]   ;;  %v2841_v51 = vld [vmem:[%s2913_s25 + $0x80] sm:$0xff]  }
  0xd9   : > { %v773_v11 = vpop.f32.mrf.mxu1  ;;  %2742 = vmatmul.mubr.msk.bf16.gmra.mxu1 %vm464_vm2, %v1564_v6  ;;  %v2501_v15 = vpop.f32.mrf.mxu0  ;;  %v1142_v61 = vshll.u32 %v2841_v51, 16 }
  0xda   : > { %2745 = vmatprep.mubr.msk.bf16.mxu1 %vm2854_vm1, %v2853_v0 }
  0xdb   : > { %v2575_v17 = vpop.f32.mrf.mxu1  ;;  %v557_v18 = vpop.f32.mrf.mxu0 }
  0xdc   : > { %v3147_v19 = vadd.f32 %v768_v2, %v557_v18  ;;  %v1122_v17 = vshrl.u32 %v2835_v52, 16  ;;  %v1126_v18 = vshll.u32 %v2837_v8, 16 }
  0xdd   : > { %v776_v20 = vpop.f32.mrf.mxu1  ;;  %v2502_v24 = vpop.f32.mrf.mxu0 }
  0xdf   : > { %v2576_v27 = vpop.f32.mrf.mxu1  ;;  %v562_v28 = vpop.f32.mrf.mxu0  ;;  %2672 = vmatmul.mubr.msk.bf16.gmra.mxu0 %vm464_vm2, %v1097_v21 }
  0xe0   : > { %v3153_v29 = vadd.f32 %v773_v11, %v562_v28  ;;  %2675 = vmatprep.mubr.msk.bf16.mxu0 %vm2854_vm1, %v2853_v0  ;;  %v1571_v11 = vrot.slane %v2836_v1, 1  ;;  %v1124_v27 = vor.u32 %v1122_v17, %v1120_v7  ;;  %v1128_v28 = vrot.slane %v1126_v18, 1  ;;  %v2842_v1 = vld [vmem:[%s2913_s25 + $0x88] sm:$0xff]  }
  0xe1   : > { %v781_v30 = vpop.f32.mrf.mxu1  ;;  %2746 = vmatmul.mubr.msk.bf16.gmra.mxu1 %vm464_vm2, %v1566_v25  ;;  %v2505_v34 = vpop.f32.mrf.mxu0 }
  0xe2   : > { %2749 = vmatprep.mubr.msk.bf16.mxu1 %vm2854_vm1, %v2853_v0  ;;  %v1572_v21 = vsel %vm1545_vm4, %v1569_v54, %v1571_v11  ;;  %v1574_v42 = vsel %vm1545_vm4, %v1571_v11, %v1573_v32 }
  0xe3   : > { %v2579_v36 = vpop.f32.mrf.mxu1  ;;  %v565_v37 = vpop.f32.mrf.mxu0 }
  0xe4   : > { %v3161_v38 = vadd.f32 %v776_v20, %v565_v37  ;;  %v1129_v37 = vsel %vm323_vm3, %v1124_v27, %v1128_v28 }
  0xe5   : > { %v784_v39 = vpop.f32.mrf.mxu1  ;;  %v2506_v43 = vpop.f32.mrf.mxu0 }
  0xe6   : > { %v2840_v43 = vld [vmem:[%s2913_s25 + $0x80] sm:$0xff]  }
  0xe7   : > { %v2580_v46 = vpop.f32.mrf.mxu1  ;;  %v570_v47 = vpop.f32.mrf.mxu0  ;;  %2676 = vmatmul.mubr.msk.bf16.gmra.mxu0 %vm464_vm2, %v1105_v40 }
  0xe8   : > { %v3167_v48 = vadd.f32 %v781_v30, %v570_v47  ;;  %2679 = vmatprep.mubr.msk.bf16.mxu0 %vm2854_vm1, %v2853_v0  ;;  %v2839_v30 = vld [vmem:[%s2913_s25 + $0x78] sm:$0xff]  }
  0xe9   : > { %v789_v49 = vpop.f32.mrf.mxu1  ;;  %2750 = vmatmul.mubr.msk.bf16.gmra.mxu1 %vm464_vm2, %v1568_v44  ;;  %v2509_v53 = vpop.f32.mrf.mxu0  ;;  %v1134_v40 = vshll.u32 %v2839_v30, 16  ;;  %v1138_v60 = vshrl.u32 %v2839_v30, 16 }
  0xea   : > { %2753 = vmatprep.mubr.msk.bf16.mxu1 %vm2854_vm1, %v2853_v0  ;;  %v1575_v53 = vrot.slane %v2840_v43, 1 }
  0xeb   : > { %v2583_v55 = vpop.f32.mrf.mxu1  ;;  %v573_v56 = vpop.f32.mrf.mxu0  ;;  %v1136_v50 = vrot.slane %v1134_v40, 1 }
  0xec   : > { %v3175_v57 = vadd.f32 %v784_v39, %v573_v56  ;;  %v1130_v39 = vshrl.u32 %v2837_v8, 16  ;;  %v1144_v8 = vrot.slane %v1142_v61, 1 }
  0xed   : > { %v792_v58 = vpop.f32.mrf.mxu1  ;;  %v2510_v62 = vpop.f32.mrf.mxu0  ;;  %v1140_v7 = vor.u32 %v1138_v60, %v1136_v50 }
  0xef   : > { %v2584_v2 = vpop.f32.mrf.mxu1  ;;  %v578_v3 = vpop.f32.mrf.mxu0  ;;  %2680 = vmatmul.mubr.msk.bf16.gmra.mxu0 %vm464_vm2, %v1113_v59  ;;  %v1145_v18 = vsel %vm323_vm3, %v1140_v7, %v1144_v8 }
  0xf0   : > { %v3181_v4 = vadd.f32 %v789_v49, %v578_v3  ;;  %2683 = vmatprep.mubr.msk.bf16.mxu0 %vm2854_vm1, %v2853_v0  ;;  %v1132_v49 = vor.u32 %v1130_v39, %v1128_v28 }
  0xf1   : > { %v797_v6 = vpop.f32.mrf.mxu1  ;;  %2754 = vmatmul.mubr.msk.bf16.gmra.mxu1 %vm464_vm2, %v1570_v63  ;;  %v2513_v9 = vpop.f32.mrf.mxu0  ;;  %v1576_v63 = vsel %vm1545_vm4, %v1573_v32, %v1575_v53 }
  0xf2   : > { %2757 = vmatprep.mubr.msk.bf16.mxu1 %vm2854_vm1, %v2853_v0  ;;  %v1137_v59 = vsel %vm323_vm3, %v1132_v49, %v1136_v50  ;;  %v2843_v9 = vld [vmem:[%s2913_s25 + $0x88] sm:$0xff]  }
  0xf3   : > { %v2587_v12 = vpop.f32.mrf.mxu1  ;;  %v581_v13 = vpop.f32.mrf.mxu0 }
  0xf4   : > { %v3189_v14 = vadd.f32 %v792_v58, %v581_v13  ;;  %v1577_v12 = vrot.slane %v2842_v1, 1 }
  0xf5   : > { %v800_v15 = vpop.f32.mrf.mxu1  ;;  %v2514_v20 = vpop.f32.mrf.mxu0 }
  0xf6   : > { %v1146_v20 = vshrl.u32 %v2841_v51, 16 }
  0xf7   : > { %v2588_v23 = vpop.f32.mrf.mxu1  ;;  %v586_v24 = vpop.f32.mrf.mxu0  ;;  %2684 = vmatmul.mubr.msk.bf16.gmra.mxu0 %vm464_vm2, %v1121_v16 }
  0xf8   : > { %v3195_v25 = vadd.f32 %v797_v6, %v586_v24  ;;  %2687 = vmatprep.mubr.msk.bf16.mxu0 %vm2854_vm1, %v2853_v0  ;;  %v1578_v23 = vsel %vm1545_vm4, %v1575_v53, %v1577_v12  ;;  %v2844_v24 = vld [vmem:[%s2913_s25 + $0x90] ss:$0 sps:$4 sm:$0x11]  }
  0xf9   : > { %v805_v26 = vpop.f32.mrf.mxu1  ;;  %2758 = vmatmul.mubr.msk.bf16.gmra.mxu1 %vm464_vm2, %v1572_v21  ;;  %v2517_v31 = vpop.f32.mrf.mxu0  ;;  %v1150_v21 = vshll.u32 %v2843_v9, 16 }
  0xfa   : > { %2761 = vmatprep.mubr.msk.bf16.mxu1 %vm2854_vm1, %v2853_v0  ;;  %v1148_v31 = vor.u32 %v1146_v20, %v1144_v8 }
  0xfb   : > { %v2591_v33 = vpop.f32.mrf.mxu1  ;;  %v589_v34 = vpop.f32.mrf.mxu0  ;;  %v1152_v32 = vrot.slane %v1150_v21, 1 }
  0xfc   : > { %v3203_v35 = vadd.f32 %v800_v15, %v589_v34  ;;  %v1579_v34 = vrot.slane %v2844_v24, 1 }
  0xfd   : > { %v808_v36 = vpop.f32.mrf.mxu1  ;;  %v2518_v41 = vpop.f32.mrf.mxu0 }
  0xfe   : > { %v1153_v41 = vsel %vm323_vm3, %v1148_v31, %v1152_v32  ;;  %v1580_v43 = vsel %vm1545_vm4, %v1577_v12, %v1579_v34 }
  0xff   : > { %v2592_v44 = vpop.f32.mrf.mxu1  ;;  %v594_v45 = vpop.f32.mrf.mxu0  ;;  %2688 = vmatmul.mubr.msk.bf16.gmra.mxu0 %vm464_vm2, %v1129_v37 }
 0x100   : > { %v3209_v46 = vadd.f32 %v805_v26, %v594_v45  ;;  %2691 = vmatprep.mubr.msk.bf16.mxu0 %vm2854_vm1, %v2853_v0 }
 0x101   : > { %v813_v47 = vpop.f32.mrf.mxu1  ;;  %2762 = vmatmul.mubr.msk.bf16.gmra.mxu1 %vm464_vm2, %v1574_v42  ;;  %v2521_v52 = vpop.f32.mrf.mxu0 }
 0x102   : > { %2765 = vmatprep.mubr.msk.bf16.mxu1 %vm2854_vm1, %v2853_v0 }
 0x103   : > { %v2595_v54 = vpop.f32.mrf.mxu1  ;;  %v597_v55 = vpop.f32.mrf.mxu0 }
 0x104   : > { %v3217_v56 = vadd.f32 %v808_v36, %v597_v55 }
 0x105   : > { %v816_v58 = vpop.f32.mrf.mxu1  ;;  %v2522_v62 = vpop.f32.mrf.mxu0 }
 0x107   : > { %v2596_v2 = vpop.f32.mrf.mxu1  ;;  %v602_v3 = vpop.f32.mrf.mxu0  ;;  %2692 = vmatmul.mubr.msk.bf16.gmra.mxu0 %vm464_vm2, %v1137_v59 }
 0x108   : > { %v3223_v5 = vadd.f32 %v813_v47, %v602_v3  ;;  %2695 = vmatprep.mubr.msk.bf16.mxu0 %vm2854_vm1, %v2853_v0  ;;  %v1154_v47 = vshrl.u32 %v2843_v9, 16 }
 0x109   : > { %v821_v6 = vpop.f32.mrf.mxu1  ;;  %2766 = vmatmul.mubr.msk.bf16.gmra.mxu1 %vm464_vm2, %v1576_v63  ;;  %v2525_v11 = vpop.f32.mrf.mxu0 }
 0x10a   : > { %2769 = vmatprep.mubr.msk.bf16.mxu1 %vm2854_vm1, %v2853_v0  ;;  %v1156_v54 = vor.u32 %v1154_v47, %v1152_v32 }
 0x10b   : > { %v2599_v13 = vpop.f32.mrf.mxu1  ;;  %v605_v15 = vpop.f32.mrf.mxu0 }
 0x10c   : > { %v3231_v16 = vadd.f32 %v816_v58, %v605_v15 }
 0x10d   : > { %v824_v17 = vpop.f32.mrf.mxu1  ;;  %v2526_v22 = vpop.f32.mrf.mxu0 }
 0x10f   : > { %v2600_v26 = vpop.f32.mrf.mxu1  ;;  %v610_v27 = vpop.f32.mrf.mxu0  ;;  %2696 = vmatmul.mubr.msk.bf16.gmra.mxu0 %vm464_vm2, %v1145_v18 }
 0x110   : > { %v3237_v28 = vadd.f32 %v821_v6, %v610_v27  ;;  %2699 = vmatprep.mubr.msk.bf16.mxu0 %vm2854_vm1, %v2853_v0 }
 0x111   : > { %v829_v30 = vpop.f32.mrf.mxu1  ;;  %2770 = vmatmul.mubr.msk.bf16.gmra.mxu1 %vm464_vm2, %v1578_v23  ;;  %v2529_v33 = vpop.f32.mrf.mxu0 }
 0x112   : > { %2773 = vmatprep.mubr.msk.bf16.mxu1 %vm2854_vm1, %v2853_v0 }
 0x113   : > { %v2603_v36 = vpop.f32.mrf.mxu1  ;;  %v613_v37 = vpop.f32.mrf.mxu0 }
 0x114   : > { %v3244_v39 = vadd.f32 %v824_v17, %v613_v37 }
 0x115   : > { %v832_v40 = vpop.f32.mrf.mxu1  ;;  %v2530_v42 = vpop.f32.mrf.mxu0 }
 0x117   : > { %v2604_v44 = vpop.f32.mrf.mxu1  ;;  %v618_v45 = vpop.f32.mrf.mxu0  ;;  %2700 = vmatmul.mubr.msk.bf16.gmra.mxu0 %vm464_vm2, %v1153_v41 }
 0x118   : > { %v3249_v49 = vadd.f32 %v829_v30, %v618_v45  ;;  %2703 = vmatprep.mubr.msk.bf16.mxu0 %vm2854_vm1, %v2853_v0 }
 0x119   : > { %v837_v50 = vpop.f32.mrf.mxu1  ;;  %2774 = vmatmul.mubr.msk.bf16.gmra.mxu1 %vm464_vm2, %v1580_v43  ;;  %v2533_v51 = vpop.f32.mrf.mxu0 }
 0x11b   : > { %v2607_v52 = vpop.f32.mrf.mxu1  ;;  %v621_v53 = vpop.f32.mrf.mxu0 }
 0x11c   : > { %v3254_v55 = vadd.f32 %v832_v40, %v621_v53 }
 0x11d   : > { %v840_v58 = vpop.f32.mrf.mxu1  ;;  %v2534_v59 = vpop.f32.mrf.mxu0 }
 0x11f   : > { %v2608_v60 = vpop.f32.mrf.mxu1  ;;  %v626_v61 = vpop.f32.mrf.mxu0  ;;  %2704 = vmatmul.mubr.msk.bf16.gmra.mxu0 %vm464_vm2, %v1156_v54 }
 0x120   : > { %v3257_v62 = vadd.f32 %v837_v50, %v626_v61 }
 0x121   : > { %v845_v63 = vpop.f32.mrf.mxu1  ;;  %v2537_v1 = vpop.f32.mrf.mxu0 }
 0x123   : > { %v2611_v2 = vpop.f32.mrf.mxu1  ;;  %v629_v3 = vpop.f32.mrf.mxu0 }
 0x124   : > { %v3259_v6 = vadd.f32 %v840_v58, %v629_v3 }
 0x125   : > { %v848_v0 = vpop.f32.mrf.mxu1  ;;  %v2538_v7 = vpop.f32.mrf.mxu0 }
 0x127   : > { %v2612_v8 = vpop.f32.mrf.mxu1  ;;  %v634_v9 = vpop.f32.mrf.mxu0 }
 0x128   : > { %v3261_v11 = vadd.f32 %v845_v63, %v634_v9 }
 0x129   : > { %v853_v12 = vpop.f32.mrf.mxu1  ;;  %v2541_v13 = vpop.f32.mrf.mxu0 }
 0x12b   : > { %v2615_v15 = vpop.f32.mrf.mxu1  ;;  %v637_v17 = vpop.f32.mrf.mxu0 }
 0x12c   : > { %v3263_v18 = vadd.f32 %v848_v0, %v637_v17 }
 0x12d   : > { %v856_v20 = vpop.f32.mrf.mxu1  ;;  %v2542_v21 = vpop.f32.mrf.mxu0 }
 0x12f   : > { %v2616_v22 = vpop.f32.mrf.mxu1  ;;  %v642_v23 = vpop.f32.mrf.mxu0 }
 0x130   : > { %v3265_v24 = vadd.f32 %v853_v12, %v642_v23 }
 0x131   : > { %v861_v26 = vpop.f32.mrf.mxu1  ;;  %v2545_v27 = vpop.f32.mrf.mxu0 }
 0x133   : > { %v2619_v30 = vpop.f32.mrf.mxu1  ;;  %v645_v31 = vpop.f32.mrf.mxu0 }
 0x134   : > { %v3267_v32 = vadd.f32 %v856_v20, %v645_v31 }
 0x135   : > { %v864_v33 = vpop.f32.mrf.mxu1  ;;  %v2546_v34 = vpop.f32.mrf.mxu0 }
 0x137   : > { %v2620_v36 = vpop.f32.mrf.mxu1  ;;  %v650_v37 = vpop.f32.mrf.mxu0 }
 0x138   : > { %v3269_v40 = vadd.f32 %v861_v26, %v650_v37 }
 0x139   : > { %v869_v41 = vpop.f32.mrf.mxu1  ;;  %v2549_v42 = vpop.f32.mrf.mxu0 }
 0x13b   : > { %v2623_v43 = vpop.f32.mrf.mxu1  ;;  %v653_v44 = vpop.f32.mrf.mxu0 }
 0x13c   : > { %v3271_v45 = vadd.f32 %v864_v33, %v653_v44 }
 0x13d   : > { %v872_v47 = vpop.f32.mrf.mxu1  ;;  %v2550_v50 = vpop.f32.mrf.mxu0 }
 0x13f   : > { %v2624_v51 = vpop.f32.mrf.mxu1  ;;  %v658_v52 = vpop.f32.mrf.mxu0 }
 0x140   : > { %v3273_v53 = vadd.f32 %v869_v41, %v658_v52 }
 0x141   : > { %v877_v54 = vpop.f32.mrf.mxu1  ;;  %v2553_v58 = vpop.f32.mrf.mxu0 }
 0x143   : > { %v2627_v59 = vpop.f32.mrf.mxu1  ;;  %v661_v60 = vpop.f32.mrf.mxu0 }
 0x144   : > { %v3275_v61 = vadd.f32 %v872_v47, %v661_v60 }
 0x145   : > { %v880_v63 = vpop.f32.mrf.mxu1  ;;  %v2554_v1 = vpop.f32.mrf.mxu0 }
 0x147   : > { %v2628_v2 = vpop.f32.mrf.mxu1  ;;  %v666_v3 = vpop.f32.mrf.mxu0 }
 0x148   : > { %v3277_v0 = vadd.f32 %v877_v54, %v666_v3 }
 0x149   : > { %v885_v7 = vpop.f32.mrf.mxu1  ;;  %v2557_v8 = vpop.f32.mrf.mxu0 }
 0x14b   : > { %v2631_v9 = vpop.f32.mrf.mxu1  ;;  %v669_v12 = vpop.f32.mrf.mxu0 }
 0x14c   : > { %v3279_v13 = vadd.f32 %v880_v63, %v669_v12  ;;  %v3293_v63 = vld [vmem:[%s3442_s2] ss:$0 sm:$0xff] }
 0x14d   : > { %v888_v15 = vpop.f32.mrf.mxu1  ;;  %v2558_v17 = vpop.f32.mrf.mxu0 }
 0x14f   : > { %v2632_v20 = vpop.f32.mrf.mxu1  ;;  %v674_v21 = vpop.f32.mrf.mxu0 }
 0x150   : > { %v3281_v22 = vadd.f32 %v885_v7, %v674_v21 }
 0x151   : > { %v893_v23 = vpop.f32.mrf.mxu1  ;;  %v2561_v26 = vpop.f32.mrf.mxu0 }
 0x153   : > { %v2635_v27 = vpop.f32.mrf.mxu1  ;;  %v677_v30 = vpop.f32.mrf.mxu0 }
 0x154   : > { %v3283_v31 = vadd.f32 %v888_v15, %v677_v30 }
 0x155   : > { %v896_v33 = vpop.f32.mrf.mxu1  ;;  %v2562_v34 = vpop.f32.mrf.mxu0 }
 0x157   : > { %v2636_v36 = vpop.f32.mrf.mxu1  ;;  %v682_v37 = vpop.f32.mrf.mxu0 }
 0x158   : > { %v3285_v41 = vadd.f32 %v893_v23, %v682_v37 }
 0x159   : > { %v1674_v42 = vpop.f32.mrf.mxu1  ;;  %v2565_v43 = vpop.f32.mrf.mxu0 }
 0x15b   : > { %v2711_v44 = vpop.f32.mrf.mxu1  ;;  %v685_v47 = vpop.f32.mrf.mxu0 }
 0x15c   : > { %v3287_v50 = vadd.f32 %v896_v33, %v685_v47 }
 0x15d   : > { %v1677_v51 = vpop.f32.mrf.mxu1  ;;  %v2566_v52 = vpop.f32.mrf.mxu0 }
 0x15f   : > { %v2712_v54 = vpop.f32.mrf.mxu1  ;;  %v1250_v58 = vpop.f32.mrf.mxu0 }
 0x160   : > { %v1385_v59 = vadd.f32 %v1250_v58, %v3139_v10 }
 0x161   : > { %v1682_v60 = vpop.f32.mrf.mxu1  ;;  %v2641_v1 = vpop.f32.mrf.mxu0 }
 0x162   : > { %v1809_v2 = vadd.f32 %v1674_v42, %v1385_v59 }
 0x163   : > { %v2715_v3 = vpop.f32.mrf.mxu1  ;;  %v1253_v7 = vpop.f32.mrf.mxu0 }
 0x164   : > { %v1850_v8 = vadd.f32 %v3293_v63, %v1809_v2  ;;  %v1386_v9 = vadd.f32 %v1253_v7, %v3147_v19 }
 0x165   : > { %v1685_v12 = vpop.f32.mrf.mxu1  ;;  %v2642_v15 = vpop.f32.mrf.mxu0 }
 0x166   : > { %vm1884_vm5 = vcmp.gt.f32.partialorder %v1850_v8, 0.0  ;;  %v1918_v17 = vmul.f32 0.2, %v1850_v8  ;;  %v1810_v10 = vadd.f32 %v1677_v51, %v1386_v9 }
 0x167   : > { %v2716_v20 = vpop.f32.mrf.mxu1  ;;  %v1258_v21 = vpop.f32.mrf.mxu0 }
 0x168   : > { %v1952_v23 = vsel %vm1884_vm5, %v1850_v8, %v1918_v17  ;;  %v1851_v26 = vadd.f32 %v3293_v63, %v1810_v10  ;;  %v1387_v27 = vadd.f32 %v1258_v21, %v3153_v29 }
 0x169   : > { %v1690_v19 = vpop.f32.mrf.mxu1  ;;  %v2391_v30 = vpack.c.bf16 %v1952_v23, %v1952_v23  ;;  %v2645_v33 = vpop.f32.mrf.mxu0 }
 0x16a   : > { %vm1885_vm7 = vcmp.gt.f32.partialorder %v1851_v26, 0.0  ;;  %v1919_v34 = vmul.f32 0.2, %v1851_v26  ;;  %v1811_v36 = vadd.f32 %v1682_v60, %v1387_v27 }
 0x16b   : > { %v2719_v37 = vpop.f32.mrf.mxu1  ;;  %2123 = vst.msk [vmem:[%s3301_s7] sm:$0xf] %vm2122_vm6, %v2391_v30  ;;  %v1261_v42 = vpop.f32.mrf.mxu0 }
 0x16c   : > { %v1953_v43 = vsel %vm1885_vm7, %v1851_v26, %v1919_v34  ;;  %v1852_v44 = vadd.f32 %v3293_v63, %v1811_v36  ;;  %v1388_v47 = vadd.f32 %v1261_v42, %v3161_v38 }
 0x16d   : > { %v1693_v51 = vpop.f32.mrf.mxu1  ;;  %v2392_v52 = vpack.c.bf16 %v1953_v43, %v1953_v43  ;;  %v2646_v54 = vpop.f32.mrf.mxu0 }
 0x16e   : > { %vm1886_vm8 = vcmp.gt.f32.partialorder %v1852_v44, 0.0  ;;  %v1920_v29 = vmul.f32 0.2, %v1852_v44  ;;  %v1812_v58 = vadd.f32 %v1685_v12, %v1388_v47 }
 0x16f   : > { %v2720_v59 = vpop.f32.mrf.mxu1  ;;  %2124 = vst.msk [vmem:[%s3301_s7 + $0x4] sm:$0xf] %vm2122_vm6, %v2392_v52  ;;  %v1266_v60 = vpop.f32.mrf.mxu0 }
 0x170   : > { %v1954_v1 = vsel %vm1886_vm8, %v1852_v44, %v1920_v29  ;;  %v1853_v2 = vadd.f32 %v3293_v63, %v1812_v58  ;;  %v1389_v3 = vadd.f32 %v1266_v60, %v3167_v48 }
 0x171   : > { %v1698_v7 = vpop.f32.mrf.mxu1  ;;  %v2393_v8 = vpack.c.bf16 %v1954_v1, %v1954_v1  ;;  %v2649_v9 = vpop.f32.mrf.mxu0 }
 0x172   : > { %vm1887_vm9 = vcmp.gt.f32.partialorder %v1853_v2, 0.0  ;;  %v1921_v38 = vmul.f32 0.2, %v1853_v2  ;;  %v1813_v15 = vadd.f32 %v1690_v19, %v1389_v3 }
 0x173   : > { %v2723_v17 = vpop.f32.mrf.mxu1  ;;  %2125 = vst.msk [vmem:[%s3301_s7 + $0x8] sm:$0xf] %vm2122_vm6, %v2393_v8  ;;  %v1269_v12 = vpop.f32.mrf.mxu0 }
 0x174   : > { %v1955_v10 = vsel %vm1887_vm9, %v1853_v2, %v1921_v38  ;;  %v1854_v20 = vadd.f32 %v3293_v63, %v1813_v15  ;;  %v1390_v21 = vadd.f32 %v1269_v12, %v3175_v57 }
 0x175   : > { %v1701_v23 = vpop.f32.mrf.mxu1  ;;  %v2394_v26 = vpack.c.bf16 %v1955_v10, %v1955_v10  ;;  %v2650_v27 = vpop.f32.mrf.mxu0 }
 0x176   : > { %vm1888_vm10 = vcmp.gt.f32.partialorder %v1854_v20, 0.0  ;;  %v1922_v48 = vmul.f32 0.2, %v1854_v20  ;;  %v1814_v30 = vadd.f32 %v1693_v51, %v1390_v21 }
 0x177   : > { %v2724_v33 = vpop.f32.mrf.mxu1  ;;  %2126 = vst.msk [vmem:[%s3301_s7 + $0xc] sm:$0xf] %vm2122_vm6, %v2394_v26  ;;  %v1274_v19 = vpop.f32.mrf.mxu0 }
 0x178   : > { %v1956_v34 = vsel %vm1888_vm10, %v1854_v20, %v1922_v48  ;;  %v1855_v36 = vadd.f32 %v3293_v63, %v1814_v30  ;;  %v1391_v37 = vadd.f32 %v1274_v19, %v3181_v4 }
 0x179   : > { %v1706_v42 = vpop.f32.mrf.mxu1  ;;  %v2395_v43 = vpack.c.bf16 %v1956_v34, %v1956_v34  ;;  %v2653_v44 = vpop.f32.mrf.mxu0 }
 0x17a   : > { %vm1889_vm11 = vcmp.gt.f32.partialorder %v1855_v36, 0.0  ;;  %v1923_v57 = vmul.f32 0.2, %v1855_v36  ;;  %v1815_v47 = vadd.f32 %v1698_v7, %v1391_v37 }
 0x17b   : > { %v2727_v52 = vpop.f32.mrf.mxu1  ;;  %2127 = vst.msk [vmem:[%s3301_s7 + $0x10] sm:$0xf] %vm2122_vm6, %v2395_v43  ;;  %v1277_v51 = vpop.f32.mrf.mxu0 }
 0x17c   : > { %v1957_v54 = vsel %vm1889_vm11, %v1855_v36, %v1923_v57  ;;  %v1856_v29 = vadd.f32 %v3293_v63, %v1815_v47  ;;  %v1392_v58 = vadd.f32 %v1277_v51, %v3189_v14 }
 0x17d   : > { %v1709_v59 = vpop.f32.mrf.mxu1  ;;  %v2396_v60 = vpack.c.bf16 %v1957_v54, %v1957_v54  ;;  %v2654_v1 = vpop.f32.mrf.mxu0 }
 0x17e   : > { %vm1890_vm12 = vcmp.gt.f32.partialorder %v1856_v29, 0.0  ;;  %v1924_v4 = vmul.f32 0.2, %v1856_v29  ;;  %v1816_v2 = vadd.f32 %v1701_v23, %v1392_v58 }
 0x17f   : > { %v2728_v3 = vpop.f32.mrf.mxu1  ;;  %2128 = vst.msk [vmem:[%s3301_s7 + $0x14] sm:$0xf] %vm2122_vm6, %v2396_v60  ;;  %v1282_v7 = vpop.f32.mrf.mxu0 }
 0x180   : > { %v1958_v8 = vsel %vm1890_vm12, %v1856_v29, %v1924_v4  ;;  %v1857_v9 = vadd.f32 %v3293_v63, %v1816_v2  ;;  %v1393_v38 = vadd.f32 %v1282_v7, %v3195_v25 }
 0x181   : > { %v1714_v15 = vpop.f32.mrf.mxu1  ;;  %v2397_v17 = vpack.c.bf16 %v1958_v8, %v1958_v8  ;;  %v2657_v12 = vpop.f32.mrf.mxu0 }
 0x182   : > { %vm1891_vm13 = vcmp.gt.f32.partialorder %v1857_v9, 0.0  ;;  %v1925_v14 = vmul.f32 0.2, %v1857_v9  ;;  %v1817_v10 = vadd.f32 %v1706_v42, %v1393_v38 }
 0x183   : > { %v2731_v20 = vpop.f32.mrf.mxu1  ;;  %2129 = vst.msk [vmem:[%s3301_s7 + $0x18] sm:$0xf] %vm2122_vm6, %v2397_v17  ;;  %v1285_v21 = vpop.f32.mrf.mxu0 }
 0x184   : > { %v1959_v23 = vsel %vm1891_vm13, %v1857_v9, %v1925_v14  ;;  %v1858_v26 = vadd.f32 %v3293_v63, %v1817_v10  ;;  %v1394_v27 = vadd.f32 %v1285_v21, %v3203_v35 }
 0x185   : > { %v1717_v48 = vpop.f32.mrf.mxu1  ;;  %v2398_v30 = vpack.c.bf16 %v1959_v23, %v1959_v23  ;;  %v2658_v33 = vpop.f32.mrf.mxu0 }
 0x186   : > { %vm1892_vm14 = vcmp.gt.f32.partialorder %v1858_v26, 0.0  ;;  %v1926_v25 = vmul.f32 0.2, %v1858_v26  ;;  %v1818_v19 = vadd.f32 %v1709_v59, %v1394_v27 }
 0x187   : > { %v2732_v34 = vpop.f32.mrf.mxu1  ;;  %2130 = vst.msk [vmem:[%s3301_s7 + $0x1c] sm:$0xf] %vm2122_vm6, %v2398_v30  ;;  %v1290_v36 = vpop.f32.mrf.mxu0 }
 0x188   : > { %v1960_v37 = vsel %vm1892_vm14, %v1858_v26, %v1926_v25  ;;  %v1859_v42 = vadd.f32 %v3293_v63, %v1818_v19  ;;  %v1395_v43 = vadd.f32 %v1290_v36, %v3209_v46 }
 0x189   : > { %v1722_v44 = vpop.f32.mrf.mxu1  ;;  %v2399_v57 = vpack.c.bf16 %v1960_v37, %v1960_v37  ;;  %v2661_v47 = vpop.f32.mrf.mxu0 }
 0x18a   : > { %vm1893_vm15 = vcmp.gt.f32.partialorder %v1859_v42, 0.0  ;;  %v1927_v35 = vmul.f32 0.2, %v1859_v42  ;;  %v1819_v52 = vadd.f32 %v1714_v15, %v1395_v43 }
 0x18b   : > { %v2735_v51 = vpop.f32.mrf.mxu1  ;;  %2131 = vst.msk [vmem:[%s3301_s7 + $0x20] sm:$0xf] %vm2122_vm6, %v2399_v57  ;;  %v1293_v54 = vpop.f32.mrf.mxu0 }
 0x18c   : > { %v1961_v29 = vsel %vm1893_vm15, %v1859_v42, %v1927_v35  ;;  %v1860_v58 = vadd.f32 %v3293_v63, %v1819_v52  ;;  %v1396_v59 = vadd.f32 %v1293_v54, %v3217_v56 }
 0x18d   : > { %v1725_v60 = vpop.f32.mrf.mxu1  ;;  %v2400_v1 = vpack.c.bf16 %v1961_v29, %v1961_v29  ;;  %v2662_v4 = vpop.f32.mrf.mxu0 }
 0x18e   : > { %vm1894_vm0 = vcmp.gt.f32.partialorder %v1860_v58, 0.0  ;;  %v1928_v46 = vmul.f32 0.2, %v1860_v58  ;;  %v1820_v2 = vadd.f32 %v1717_v48, %v1396_v59 }
 0x18f   : > { %v2736_v3 = vpop.f32.mrf.mxu1  ;;  %2132 = vst.msk [vmem:[%s3301_s7 + $0x24] sm:$0xf] %vm2122_vm6, %v2400_v1  ;;  %v1298_v7 = vpop.f32.mrf.mxu0 }
 0x190   : > { %v1962_v8 = vsel %vm1894_vm0, %v1860_v58, %v1928_v46  ;;  %v1861_v9 = vadd.f32 %v3293_v63, %v1820_v2  ;;  %v1397_v38 = vadd.f32 %v1298_v7, %v3223_v5 }
 0x191   : > { %v1730_v15 = vpop.f32.mrf.mxu1  ;;  %v2401_v17 = vpack.c.bf16 %v1962_v8, %v1962_v8  ;;  %v2665_v12 = vpop.f32.mrf.mxu0 }
 0x192   : > { %vm1895_vm1 = vcmp.gt.f32.partialorder %v1861_v9, 0.0  ;;  %v1929_v56 = vmul.f32 0.2, %v1861_v9  ;;  %v1821_v14 = vadd.f32 %v1722_v44, %v1397_v38 }
 0x193   : > { %v2739_v10 = vpop.f32.mrf.mxu1  ;;  %2133 = vst.msk [vmem:[%s3301_s7 + $0x28] sm:$0xf] %vm2122_vm6, %v2401_v17  ;;  %v1301_v20 = vpop.f32.mrf.mxu0 }
 0x194   : > { %v1963_v21 = vsel %vm1895_vm1, %v1861_v9, %v1929_v56  ;;  %v1862_v23 = vadd.f32 %v3293_v63, %v1821_v14  ;;  %v1398_v26 = vadd.f32 %v1301_v20, %v3231_v16 }
 0x195   : > { %v1733_v27 = vpop.f32.mrf.mxu1  ;;  %v2402_v48 = vpack.c.bf16 %v1963_v21, %v1963_v21  ;;  %v2666_v30 = vpop.f32.mrf.mxu0 }
 0x196   : > { %vm1896_vm2 = vcmp.gt.f32.partialorder %v1862_v23, 0.0  ;;  %v1930_v5 = vmul.f32 0.2, %v1862_v23  ;;  %v1822_v33 = vadd.f32 %v1725_v60, %v1398_v26 }
 0x197   : > { %v2740_v25 = vpop.f32.mrf.mxu1  ;;  %2134 = vst.msk [vmem:[%s3301_s7 + $0x2c] sm:$0xf] %vm2122_vm6, %v2402_v48  ;;  %v1306_v19 = vpop.f32.mrf.mxu0 }
 0x198   : > { %v1964_v34 = vsel %vm1896_vm2, %v1862_v23, %v1930_v5  ;;  %v1863_v36 = vadd.f32 %v3293_v63, %v1822_v33  ;;  %v1399_v37 = vadd.f32 %v1306_v19, %v3237_v28 }
 0x199   : > { %v1738_v42 = vpop.f32.mrf.mxu1  ;;  %v2403_v43 = vpack.c.bf16 %v1964_v34, %v1964_v34  ;;  %v2669_v44 = vpop.f32.mrf.mxu0 }
 0x19a   : > { %vm1897_vm3 = vcmp.gt.f32.partialorder %v1863_v36, 0.0  ;;  %v1931_v16 = vmul.f32 0.2, %v1863_v36  ;;  %v1823_v57 = vadd.f32 %v1730_v15, %v1399_v37 }
 0x19b   : > { %v2743_v47 = vpop.f32.mrf.mxu1  ;;  %2135 = vst.msk [vmem:[%s3301_s7 + $0x30] sm:$0xf] %vm2122_vm6, %v2403_v43  ;;  %v1309_v35 = vpop.f32.mrf.mxu0 }
 0x19c   : > { %v1965_v52 = vsel %vm1897_vm3, %v1863_v36, %v1931_v16  ;;  %v1864_v51 = vadd.f32 %v3293_v63, %v1823_v57  ;;  %v1400_v54 = vadd.f32 %v1309_v35, %v3244_v39 }
 0x19d   : > { %v1741_v29 = vpop.f32.mrf.mxu1  ;;  %v2404_v58 = vpack.c.bf16 %v1965_v52, %v1965_v52  ;;  %v2670_v59 = vpop.f32.mrf.mxu0 }
 0x19e   : > { %vm1898_vm4 = vcmp.gt.f32.partialorder %v1864_v51, 0.0  ;;  %v1932_v28 = vmul.f32 0.2, %v1864_v51  ;;  %v1824_v60 = vadd.f32 %v1733_v27, %v1400_v54 }
 0x19f   : > { %v2744_v1 = vpop.f32.mrf.mxu1  ;;  %2136 = vst.msk [vmem:[%s3301_s7 + $0x34] sm:$0xf] %vm2122_vm6, %v2404_v58  ;;  %v1314_v4 = vpop.f32.mrf.mxu0 }
 0x1a0   : > { %v1966_v46 = vsel %vm1898_vm4, %v1864_v51, %v1932_v28  ;;  %v1865_v2 = vadd.f32 %v3293_v63, %v1824_v60  ;;  %v1401_v3 = vadd.f32 %v1314_v4, %v3249_v49 }
 0x1a1   : > { %v1746_v7 = vpop.f32.mrf.mxu1  ;;  %v2405_v8 = vpack.c.bf16 %v1966_v46, %v1966_v46  ;;  %v2673_v9 = vpop.f32.mrf.mxu0 }
 0x1a2   : > { %vm1899_vm5 = vcmp.gt.f32.partialorder %v1865_v2, 0.0  ;;  %v1933_v39 = vmul.f32 0.2, %v1865_v2  ;;  %v1825_v38 = vadd.f32 %v1738_v42, %v1401_v3 }
 0x1a3   : > { %v2747_v15 = vpop.f32.mrf.mxu1  ;;  %2137 = vst.msk [vmem:[%s3301_s7 + $0x38] sm:$0xf] %vm2122_vm6, %v2405_v8  ;;  %v1317_v17 = vpop.f32.mrf.mxu0 }
 0x1a4   : > { %v1967_v12 = vsel %vm1899_vm5, %v1865_v2, %v1933_v39  ;;  %v1866_v56 = vadd.f32 %v3293_v63, %v1825_v38  ;;  %v1402_v14 = vadd.f32 %v1317_v17, %v3254_v55 }
 0x1a5   : > { %v1749_v10 = vpop.f32.mrf.mxu1  ;;  %v2406_v20 = vpack.c.bf16 %v1967_v12, %v1967_v12  ;;  %v2674_v21 = vpop.f32.mrf.mxu0 }
 0x1a6   : > { %vm1900_vm7 = vcmp.gt.f32.partialorder %v1866_v56, 0.0  ;;  %v1934_v49 = vmul.f32 0.2, %v1866_v56  ;;  %v1826_v23 = vadd.f32 %v1741_v29, %v1402_v14 }
 0x1a7   : > { %v2748_v26 = vpop.f32.mrf.mxu1  ;;  %2138 = vst.msk [vmem:[%s3301_s7 + $0x3c] sm:$0xf] %vm2122_vm6, %v2406_v20  ;;  %v1322_v27 = vpop.f32.mrf.mxu0 }
 0x1a8   : > { %v1968_v48 = vsel %vm1900_vm7, %v1866_v56, %v1934_v49  ;;  %v1867_v30 = vadd.f32 %v3293_v63, %v1826_v23  ;;  %v1403_v5 = vadd.f32 %v1322_v27, %v3257_v62 }
 0x1a9   : > { %v1754_v33 = vpop.f32.mrf.mxu1  ;;  %v2407_v25 = vpack.c.bf16 %v1968_v48, %v1968_v48  ;;  %v2677_v19 = vpop.f32.mrf.mxu0 }
 0x1aa   : > { %vm1901_vm8 = vcmp.gt.f32.partialorder %v1867_v30, 0.0  ;;  %v1935_v55 = vmul.f32 0.2, %v1867_v30  ;;  %v1827_v34 = vadd.f32 %v1746_v7, %v1403_v5 }
 0x1ab   : > { %v2751_v36 = vpop.f32.mrf.mxu1  ;;  %2139 = vst.msk [vmem:[%s3301_s7 + $0x40] sm:$0xf] %vm2122_vm6, %v2407_v25  ;;  %v1325_v37 = vpop.f32.mrf.mxu0 }
 0x1ac   : > { %v1969_v42 = vsel %vm1901_vm8, %v1867_v30, %v1935_v55  ;;  %v1868_v43 = vadd.f32 %v3293_v63, %v1827_v34  ;;  %v1404_v44 = vadd.f32 %v1325_v37, %v3259_v6 }
 0x1ad   : > { %v1757_v16 = vpop.f32.mrf.mxu1  ;;  %v2408_v57 = vpack.c.bf16 %v1969_v42, %v1969_v42  ;;  %v2678_v47 = vpop.f32.mrf.mxu0 }
 0x1ae   : > { %vm1902_vm9 = vcmp.gt.f32.partialorder %v1868_v43, 0.0  ;;  %v1936_v62 = vmul.f32 0.2, %v1868_v43  ;;  %v1828_v35 = vadd.f32 %v1749_v10, %v1404_v44 }
 0x1af   : > { %v2752_v52 = vpop.f32.mrf.mxu1  ;;  %2140 = vst.msk [vmem:[%s3301_s7 + $0x44] sm:$0xf] %vm2122_vm6, %v2408_v57  ;;  %v1330_v51 = vpop.f32.mrf.mxu0 }
 0x1b0   : > { %v1970_v54 = vsel %vm1902_vm9, %v1868_v43, %v1936_v62  ;;  %v1869_v29 = vadd.f32 %v3293_v63, %v1828_v35  ;;  %v1405_v58 = vadd.f32 %v1330_v51, %v3261_v11  ;;  %vm2157_vm9 = vsmask.f32 3328 }
 0x1b1   : > { %v1762_v59 = vpop.f32.mrf.mxu1  ;;  %v2409_v28 = vpack.c.bf16 %v1970_v54, %v1970_v54  ;;  %v2681_v60 = vpop.f32.mrf.mxu0 }
 0x1b2   : > { %vm1903_vm10 = vcmp.gt.f32.partialorder %v1869_v29, 0.0  ;;  %v1937_v6 = vmul.f32 0.2, %v1869_v29  ;;  %v1829_v1 = vadd.f32 %v1754_v33, %v1405_v58 }
 0x1b3   : > { %v2755_v4 = vpop.f32.mrf.mxu1  ;;  %2141 = vst.msk [vmem:[%s3301_s7 + $0x48] sm:$0xf] %vm2122_vm6, %v2409_v28  ;;  %v1333_v46 = vpop.f32.mrf.mxu0 }
 0x1b4   : > { %v1971_v2 = vsel %vm1903_vm10, %v1869_v29, %v1937_v6  ;;  %v1870_v3 = vadd.f32 %v3293_v63, %v1829_v1  ;;  %v1406_v7 = vadd.f32 %v1333_v46, %v3263_v18 }
 0x1b5   : > { %v1765_v8 = vpop.f32.mrf.mxu1  ;;  %v2410_v9 = vpack.c.bf16 %v1971_v2, %v1971_v2  ;;  %v2682_v39 = vpop.f32.mrf.mxu0 }
 0x1b6   : > { %vm1904_vm11 = vcmp.gt.f32.partialorder %v1870_v3, 0.0  ;;  %v1938_v11 = vmul.f32 0.2, %v1870_v3  ;;  %v1830_v38 = vadd.f32 %v1757_v16, %v1406_v7 }
 0x1b7   : > { %v2756_v15 = vpop.f32.mrf.mxu1  ;;  %2142 = vst.msk [vmem:[%s3301_s7 + $0x4c] sm:$0xf] %vm2122_vm6, %v2410_v9  ;;  %v1338_v17 = vpop.f32.mrf.mxu0 }
 0x1b8   : > { %v1972_v12 = vsel %vm1904_vm11, %v1870_v3, %v1938_v11  ;;  %v1871_v56 = vadd.f32 %v3293_v63, %v1830_v38  ;;  %v1407_v14 = vadd.f32 %v1338_v17, %v3265_v24  ;;  %vm2158_vm11 = vmand %vm2122_vm6, %vm2157_vm9 }
 0x1b9   : > { %v1770_v10 = vpop.f32.mrf.mxu1  ;;  %v2411_v20 = vpack.c.bf16 %v1972_v12, %v1972_v12  ;;  %v2685_v21 = vpop.f32.mrf.mxu0 }
 0x1ba   : > { %vm1905_vm12 = vcmp.gt.f32.partialorder %v1871_v56, 0.0  ;;  %v1939_v18 = vmul.f32 0.2, %v1871_v56  ;;  %v1831_v49 = vadd.f32 %v1762_v59, %v1407_v14 }
 0x1bb   : > { %v2759_v23 = vpop.f32.mrf.mxu1  ;;  %2143 = vst.msk [vmem:[%s3301_s7 + $0x50] sm:$0xf] %vm2122_vm6, %v2411_v20  ;;  %v1341_v26 = vpop.f32.mrf.mxu0 }
 0x1bc   : > { %v1973_v27 = vsel %vm1905_vm12, %v1871_v56, %v1939_v18  ;;  %v1872_v48 = vadd.f32 %v3293_v63, %v1831_v49  ;;  %v1408_v30 = vadd.f32 %v1341_v26, %v3267_v32 }
 0x1bd   : > { %v1773_v5 = vpop.f32.mrf.mxu1  ;;  %v2412_v33 = vpack.c.bf16 %v1973_v27, %v1973_v27  ;;  %v2686_v25 = vpop.f32.mrf.mxu0 }
 0x1be   : > { %vm1906_vm13 = vcmp.gt.f32.partialorder %v1872_v48, 0.0  ;;  %v1940_v24 = vmul.f32 0.2, %v1872_v48  ;;  %v1832_v19 = vadd.f32 %v1765_v8, %v1408_v30 }
 0x1bf   : > { %v2760_v55 = vpop.f32.mrf.mxu1  ;;  %2144 = vst.msk [vmem:[%s3301_s7 + $0x54] sm:$0xf] %vm2122_vm6, %v2412_v33  ;;  %v1346_v34 = vpop.f32.mrf.mxu0 }
 0x1c0   : > { %v1974_v36 = vsel %vm1906_vm13, %v1872_v48, %v1940_v24  ;;  %v1873_v37 = vadd.f32 %v3293_v63, %v1832_v19  ;;  %v1409_v42 = vadd.f32 %v1346_v34, %v3269_v40 }
 0x1c1   : > { %v1778_v43 = vpop.f32.mrf.mxu1  ;;  %v2413_v44 = vpack.c.bf16 %v1974_v36, %v1974_v36  ;;  %v2689_v16 = vpop.f32.mrf.mxu0 }
 0x1c2   : > { %vm1907_vm14 = vcmp.gt.f32.partialorder %v1873_v37, 0.0  ;;  %v1941_v32 = vmul.f32 0.2, %v1873_v37  ;;  %v1833_v57 = vadd.f32 %v1770_v10, %v1409_v42 }
 0x1c3   : > { %v2763_v47 = vpop.f32.mrf.mxu1  ;;  %2145 = vst.msk [vmem:[%s3301_s7 + $0x58] sm:$0xf] %vm2122_vm6, %v2413_v44  ;;  %v1349_v62 = vpop.f32.mrf.mxu0 }
 0x1c4   : > { %v1975_v35 = vsel %vm1907_vm14, %v1873_v37, %v1941_v32  ;;  %v1874_v52 = vadd.f32 %v3293_v63, %v1833_v57  ;;  %v1410_v51 = vadd.f32 %v1349_v62, %v3271_v45 }
 0x1c5   : > { %v1781_v54 = vpop.f32.mrf.mxu1  ;;  %v2414_v29 = vpack.c.bf16 %v1975_v35, %v1975_v35  ;;  %v2690_v58 = vpop.f32.mrf.mxu0 }
 0x1c6   : > { %vm1908_vm15 = vcmp.gt.f32.partialorder %v1874_v52, 0.0  ;;  %v1942_v40 = vmul.f32 0.2, %v1874_v52  ;;  %v1834_v59 = vadd.f32 %v1773_v5, %v1410_v51 }
 0x1c7   : > { %v2764_v28 = vpop.f32.mrf.mxu1  ;;  %2146 = vst.msk [vmem:[%s3301_s7 + $0x5c] sm:$0xf] %vm2122_vm6, %v2414_v29  ;;  %v1354_v60 = vpop.f32.mrf.mxu0 }
 0x1c8   : > { %v1976_v6 = vsel %vm1908_vm15, %v1874_v52, %v1942_v40  ;;  %v1875_v1 = vadd.f32 %v3293_v63, %v1834_v59  ;;  %v1411_v4 = vadd.f32 %v1354_v60, %v3273_v53 }
 0x1c9   : > { %v1786_v46 = vpop.f32.mrf.mxu1  ;;  %v2415_v2 = vpack.c.bf16 %v1976_v6, %v1976_v6  ;;  %v2693_v3 = vpop.f32.mrf.mxu0 }
 0x1ca   : > { %vm1909_vm0 = vcmp.gt.f32.partialorder %v1875_v1, 0.0  ;;  %v1943_v45 = vmul.f32 0.2, %v1875_v1  ;;  %v1835_v7 = vadd.f32 %v1778_v43, %v1411_v4 }
 0x1cb   : > { %v2767_v8 = vpop.f32.mrf.mxu1  ;;  %2147 = vst.msk [vmem:[%s3301_s7 + $0x60] sm:$0xf] %vm2122_vm6, %v2415_v2  ;;  %v1357_v9 = vpop.f32.mrf.mxu0 }
 0x1cc   : > { %v1977_v39 = vsel %vm1909_vm0, %v1875_v1, %v1943_v45  ;;  %v1876_v11 = vadd.f32 %v3293_v63, %v1835_v7  ;;  %v1412_v38 = vadd.f32 %v1357_v9, %v3275_v61 }
 0x1cd   : > { %v1789_v15 = vpop.f32.mrf.mxu1  ;;  %v2416_v17 = vpack.c.bf16 %v1977_v39, %v1977_v39  ;;  %v2694_v12 = vpop.f32.mrf.mxu0 }
 0x1ce   : > { %vm1910_vm1 = vcmp.gt.f32.partialorder %v1876_v11, 0.0  ;;  %v1944_v53 = vmul.f32 0.2, %v1876_v11  ;;  %v1836_v56 = vadd.f32 %v1781_v54, %v1412_v38 }
 0x1cf   : > { %v2768_v14 = vpop.f32.mrf.mxu1  ;;  %2148 = vst.msk [vmem:[%s3301_s7 + $0x64] sm:$0xf] %vm2122_vm6, %v2416_v17  ;;  %v1362_v10 = vpop.f32.mrf.mxu0 }
 0x1d0   : > { %v1978_v20 = vsel %vm1910_vm1, %v1876_v11, %v1944_v53  ;;  %v1877_v21 = vadd.f32 %v3293_v63, %v1836_v56  ;;  %v1413_v18 = vadd.f32 %v1362_v10, %v3277_v0 }
 0x1d1   : > { %v1794_v49 = vpop.f32.mrf.mxu1  ;;  %v2417_v23 = vpack.c.bf16 %v1978_v20, %v1978_v20  ;;  %v2697_v26 = vpop.f32.mrf.mxu0 }
 0x1d2   : > { %vm1911_vm2 = vcmp.gt.f32.partialorder %v1877_v21, 0.0  ;;  %v1945_v61 = vmul.f32 0.2, %v1877_v21  ;;  %v1837_v27 = vadd.f32 %v1786_v46, %v1413_v18 }
 0x1d3   : > { %v2771_v48 = vpop.f32.mrf.mxu1  ;;  %2149 = vst.msk [vmem:[%s3301_s7 + $0x68] sm:$0xf] %vm2122_vm6, %v2417_v23  ;;  %v1365_v30 = vpop.f32.mrf.mxu0 }
 0x1d4   : > { %v1979_v5 = vsel %vm1911_vm2, %v1877_v21, %v1945_v61  ;;  %v1878_v33 = vadd.f32 %v3293_v63, %v1837_v27  ;;  %v1414_v25 = vadd.f32 %v1365_v30, %v3279_v13 }
 0x1d5   : > { %v1797_v24 = vpop.f32.mrf.mxu1  ;;  %v2418_v19 = vpack.c.bf16 %v1979_v5, %v1979_v5  ;;  %v2698_v55 = vpop.f32.mrf.mxu0 }
 0x1d6   : > { %vm1912_vm3 = vcmp.gt.f32.partialorder %v1878_v33, 0.0  ;;  %v1946_v0 = vmul.f32 0.2, %v1878_v33  ;;  %v1838_v34 = vadd.f32 %v1789_v15, %v1414_v25 }
 0x1d7   : > { %v2772_v36 = vpop.f32.mrf.mxu1  ;;  %2150 = vst.msk [vmem:[%s3301_s7 + $0x6c] sm:$0xf] %vm2122_vm6, %v2418_v19  ;;  %v1370_v37 = vpop.f32.mrf.mxu0 }
 0x1d8   : > { %v1980_v42 = vsel %vm1912_vm3, %v1878_v33, %v1946_v0  ;;  %v1879_v43 = vadd.f32 %v3293_v63, %v1838_v34  ;;  %v1415_v44 = vadd.f32 %v1370_v37, %v3281_v22 }
 0x1d9   : > { %v1802_v16 = vpop.f32.mrf.mxu1  ;;  %v2419_v32 = vpack.c.bf16 %v1980_v42, %v1980_v42  ;;  %v2701_v57 = vpop.f32.mrf.mxu0 }
 0x1da   : > { %vm1913_vm4 = vcmp.gt.f32.partialorder %v1879_v43, 0.0  ;;  %v1947_v13 = vmul.f32 0.2, %v1879_v43  ;;  %v1839_v47 = vadd.f32 %v1794_v49, %v1415_v44 }
 0x1db   : > { %v2775_v62 = vpop.f32.mrf.mxu1  ;;  %2151 = vst.msk [vmem:[%s3301_s7 + $0x70] sm:$0xf] %vm2122_vm6, %v2419_v32  ;;  %v1373_v35 = vpop.f32.mrf.mxu0 }
 0x1dc   : > { %v1981_v52 = vsel %vm1913_vm4, %v1879_v43, %v1947_v13  ;;  %v1880_v51 = vadd.f32 %v3293_v63, %v1839_v47  ;;  %v1416_v54 = vadd.f32 %v1373_v35, %v3283_v31 }
 0x1dd   : > { %v1805_v29 = vpop.f32.mrf.mxu1  ;;  %v2420_v58 = vpack.c.bf16 %v1981_v52, %v1981_v52  ;;  %v2702_v22 = vpop.f32.mrf.mxu0 }
 0x1de   : > { %vm1914_vm5 = vcmp.gt.f32.partialorder %v1880_v51, 0.0  ;;  %v1948_v40 = vmul.f32 0.2, %v1880_v51  ;;  %v1840_v59 = vadd.f32 %v1797_v24, %v1416_v54 }
 0x1df   : > { %v2776_v28 = vpop.f32.mrf.mxu1  ;;  %2152 = vst.msk [vmem:[%s3301_s7 + $0x74] sm:$0xf] %vm2122_vm6, %v2420_v58  ;;  %v1378_v60 = vpop.f32.mrf.mxu0 }
 0x1e0   : > { %v1982_v6 = vsel %vm1914_vm5, %v1880_v51, %v1948_v40  ;;  %v1881_v1 = vadd.f32 %v3293_v63, %v1840_v59  ;;  %v1417_v4 = vadd.f32 %v1378_v60, %v3285_v41 }
 0x1e1   : > { %v2421_v46 = vpack.c.bf16 %v1982_v6, %v1982_v6  ;;  %v2705_v2 = vpop.f32.mrf.mxu0 }
 0x1e2   : > { %vm1915_vm7 = vcmp.gt.f32.partialorder %v1881_v1, 0.0  ;;  %v1949_v31 = vmul.f32 0.2, %v1881_v1  ;;  %v1841_v3 = vadd.f32 %v1802_v16, %v1417_v4 }
 0x1e3   : > { %2153 = vst.msk [vmem:[%s3301_s7 + $0x78] sm:$0xf] %vm2122_vm6, %v2421_v46  ;;  %v1381_v45 = vpop.f32.mrf.mxu0 }
 0x1e4   : > { %v1983_v7 = vsel %vm1915_vm7, %v1881_v1, %v1949_v31  ;;  %v1882_v8 = vadd.f32 %v3293_v63, %v1841_v3  ;;  %v1418_v9 = vadd.f32 %v1381_v45, %v3287_v50  ;;  %v2159_v50 = vld [vmem:[%s3301_s7 + $0x84] sm:$0xf] }
 0x1e5   : > { %v2422_v39 = vpack.c.bf16 %v1983_v7, %v1983_v7  ;;  %v2706_v11 = vpop.f32.mrf.mxu0 }
 0x1e6   : > { %vm1916_vm8 = vcmp.gt.f32.partialorder %v1882_v8, 0.0  ;;  %v1950_v41 = vmul.f32 0.2, %v1882_v8  ;;  %v1842_v38 = vadd.f32 %v1805_v29, %v1418_v9 }
 0x1e7   : > { %2154 = vst.msk [vmem:[%s3301_s7 + $0x7c] sm:$0xf] %vm2122_vm6, %v2422_v39 }
 0x1e8   : > { %v1984_v15 = vsel %vm1916_vm8, %v1882_v8, %v1950_v41  ;;  %v1883_v17 = vadd.f32 %v3293_v63, %v1842_v38 }
 0x1e9   : > { %v2423_v12 = vpack.c.bf16 %v1984_v15, %v1984_v15 }
 0x1ea   : > { %vm1917_vm10 = vcmp.gt.f32.partialorder %v1883_v17, 0.0  ;;  %v1951_v53 = vmul.f32 0.2, %v1883_v17 }
 0x1eb   : > { %2155 = vst.msk [vmem:[%s3301_s7 + $0x80] sm:$0xf] %vm2122_vm6, %v2423_v12 }
 0x1ec   : > { %v1985_v56 = vsel %vm1917_vm10, %v1883_v17, %v1951_v53 }
 0x1ed   : > { %v2424_v14 = vpack.c.bf16 %v1985_v56, %v1985_v56 }
 0x1ef   : > { %v2160_v10 = vsel %vm2158_vm11, %v2424_v14, %v2159_v50 }
 0x1f0   : > { %2161 = vst [vmem:[%s3301_s7 + $0x84] sm:$0xf] %v2160_v10 }
 0x1f1 PF: > { %s14_s15 = sadd.s32 1, %s2851_s15  }
 0x1f2   : > { %p11_p4 = scmp.ge.s32.totalorder %s14_s15, 4  }
 0x1f4   :  { %13 = sbr.rel (!%p11_p4) target bundleno = 1 (0x1), region = 69 }

// kernel: discriminator_forward.6
= control target key start
LH: loop header
LB: loop body
LE: loop exit
PB: predicated region body
PF: predicated region fallthrough
CT: control target
= control target key end

     0   :  { %s2200_s15 = smov 0   ;;  %s2689_s0 = inlined_call_operand.vmem [shape: bf16[2,81,256], index: 0, kind: input, shape index: {}]   ;;  %s2690_s1 = inlined_call_operand.vmem [shape: bf16[4,256,128], index: 1, kind: input, shape index: {}]   ;;  %s2691_s2 = inlined_call_operand.vmem [shape: f32[1,128], index: 2, kind: input, shape index: {}]   ;;  %s2692_s3 = inlined_call_operand.vmem [shape: f32[71,1], index: 3, kind: input, shape index: {}]   ;;  %s2693_s4 = inlined_call_operand.vmem [shape: bf16[2,71,128], index: 4, kind: output, shape index: {}]  }
   0x1 LB: > { %s1639_s16 = sadd.s32 4294967295, %s2172_s15   ;;  %p1643_p0 = scmp.ge.s32.totalorder %s2172_s15, 1  ;;  %s2172_s15 = sphi %s2200_s15, %s14_s15  }
   0x2   : > { %p162_p1 = scmp.lt.s32.totalorder %s2172_s15, 3 }
   0x4   : > { %p163_p2 = pnand %p1643_p0, %p162_p1 }
   0x5   : > { %p188_p3 = scmp.lt.s32.totalorder (!%p163_p2), %s1639_s16, 1 }
   0x6   : > { %166 = sbr.rel (%p163_p2) target bundleno = 373 (0x175), region = 36 }
   0xb   : > { %v2076_v0 = vld [vmem:[%s2690_s1 + $0xf8] sm:$0xff]   ;;  %v2080_v4 = vld [vmem:[%s2690_s1 + $0xf0] sm:$0xff]   ;;  %v2174_v5 = vmov 0   ;;  %v2084_v9 = vld [vmem:[%s2690_s1 + $0xe8] sm:$0xff]   ;;  %s2695_s16 = smov (!%p188_p3, %s1639_s16), 1  ;;  %vm1172_vm1 = vcmask 1046528  }
   0xc   : > { %v2077_v1 = vld [vmem:[%s2690_s1 + $0x78] sm:$0xff]   ;;  %1879 = vmatprep.subr.bf16.mxu0 %v2076_v0  ;;  %2074 = vset.pattern.permute.xlu0 %v2174_v5  ;;  %v2081_v6 = vld [vmem:[%s2690_s1 + $0x70] sm:$0xff]   ;;  %v2085_v10 = vld [vmem:[%s2690_s1 + $0x68] sm:$0xff]   ;;  %s2063_s18 = smul.u32 88, %s2695_s16  ;;  %vm310_vm0 = vsmask.f32 7424 }
   0xd   : > { %v2078_v2 = vld [vmem:[%s2690_s1 + $0xb8] sm:$0xff]   ;;  %1925 = vmatprep.subr.bf16.mxu1 %v2077_v1  ;;  %2075 = vset.pattern.permute.xlu1 %v2174_v5  ;;  %v2082_v7 = vld [vmem:[%s2690_s1 + $0xb0] sm:$0xff]   ;;  %v2086_v11 = vld [vmem:[%s2690_s1 + $0xa8] sm:$0xff]   ;;  %vm1578_vm2 = vcmask 1043456   ;;  %vm1579_vm3 = vsmask.f32 3328 }
   0xe   : > { %v2079_v3 = vld [vmem:[%s2690_s1 + $0x38] sm:$0xff]   ;;  %1880 = vmatpush3.bf16.msra.mxu0 %v2078_v2  ;;  %v2083_v8 = vld [vmem:[%s2690_s1 + $0x30] sm:$0xff]   ;;  %v2087_v12 = vld [vmem:[%s2690_s1 + $0x28] sm:$0xff]   ;;  %s2308_s29 = scalar_lea.vmem %s2689_s0, %s2063_s18 }
   0xf   : > { %1926 = vmatpush3.bf16.msra.mxu1 %v2079_v3  ;;  %1881 = vmatprep.subr.bf16.mxu0 %v2080_v4  ;;  %v2088_v13 = vld [vmem:[%s2690_s1 + $0xe0] sm:$0xff]   ;;  %v2092_v17 = vld [vmem:[%s2690_s1 + $0xd8] sm:$0xff]   ;;  %v2096_v21 = vld [vmem:[%s2690_s1 + $0xd0] sm:$0xff]  }
  0x10   : > { %1927 = vmatprep.subr.bf16.mxu1 %v2081_v6  ;;  %v2089_v14 = vld [vmem:[%s2690_s1 + $0x60] sm:$0xff]   ;;  %v2093_v18 = vld [vmem:[%s2690_s1 + $0x58] sm:$0xff]   ;;  %v2097_v22 = vld [vmem:[%s2690_s1 + $0x50] sm:$0xff]  }
  0x11   : > { %v2090_v15 = vld [vmem:[%s2690_s1 + $0xa0] sm:$0xff]   ;;  %v2094_v19 = vld [vmem:[%s2690_s1 + $0x98] sm:$0xff]   ;;  %v2098_v23 = vld [vmem:[%s2690_s1 + $0x90] sm:$0xff]  }
  0x12   : > { %1882 = vmatpush3.bf16.msra.mxu0 %v2082_v7  ;;  %v2091_v16 = vld [vmem:[%s2690_s1 + $0x20] sm:$0xff]   ;;  %v2095_v20 = vld [vmem:[%s2690_s1 + $0x18] sm:$0xff]   ;;  %v2099_v24 = vld [vmem:[%s2690_s1 + $0x10] sm:$0xff]  }
  0x13   : > { %1928 = vmatpush3.bf16.msra.mxu1 %v2083_v8  ;;  %1883 = vmatprep.subr.bf16.mxu0 %v2084_v9  ;;  %v2100_v25 = vld [vmem:[%s2690_s1 + $0xc8] sm:$0xff]   ;;  %v2104_v29 = vld [vmem:[%s2690_s1 + $0xc0] sm:$0xff]   ;;  %v2321_v35 = vld [vmem:[%s2308_s29 + $0x10] sm:$0xff] }
  0x14   : > { %1929 = vmatprep.subr.bf16.mxu1 %v2085_v10  ;;  %v2101_v26 = vld [vmem:[%s2690_s1 + $0x48] sm:$0xff]   ;;  %v2105_v30 = vld [vmem:[%s2690_s1 + $0x40] sm:$0xff]   ;;  %v2324_v36 = vld [vmem:[%s2308_s29 + $0x18] sm:$0xff] }
  0x15   : > { %v2102_v27 = vld [vmem:[%s2690_s1 + $0x88] sm:$0xff]   ;;  %v2106_v31 = vld [vmem:[%s2690_s1 + $0x80] sm:$0xff]   ;;  %v1681_v39 = vcombine.high %v2321_v35, %v2324_v36  ;;  %v1680_v40 = vcombine.low %v2321_v35, %v2324_v36  ;;  %v2112_v41 = vld [vmem:[%s2690_s1 + $0x178] sm:$0xff]  }
  0x16   : > { %1884 = vmatpush3.bf16.msra.mxu0 %v2086_v11  ;;  %v2103_v28 = vld [vmem:[%s2690_s1 + $0x8] sm:$0xff]   ;;  %v2107_v32 = vld [vmem:[%s2690_s1] sm:$0xff]   ;;  %v2114_v46 = vld [vmem:[%s2690_s1 + $0x1f8] sm:$0xff]  }
  0x17   : > { %1930 = vmatpush3.bf16.msra.mxu1 %v2087_v12  ;;  %1885 = vmatprep.subr.bf16.mxu0 %v2088_v13  ;;  %v199_v33 = vld [vmem:[%s2308_s29] sm:$0xff]  ;;  %v2318_v34 = vld [vmem:[%s2308_s29 + $0x8] sm:$0xff]  ;;  %v331_v47 = vshll.u32 %v1681_v39, 16  ;;  %v319_v48 = vshll.u32 %v1680_v40, 16  ;;  %v2113_v53 = vld [vmem:[%s2690_s1 + $0x138] sm:$0xff]   ;;  %v343_v60 = vshrl.u32 %v1681_v39, 16 }
  0x18   : > { %1931 = vmatprep.subr.bf16.mxu1 %v2089_v14  ;;  %v1679_v37 = vcombine.high %v199_v33, %v2318_v34  ;;  %v1678_v38 = vcombine.low %v199_v33, %v2318_v34  ;;  %v2115_v54 = vld [vmem:[%s2690_s1 + $0x1b8] sm:$0xff]   ;;  %v2116_v57 = vld [vmem:[%s2690_s1 + $0x170] sm:$0xff]   ;;  %v2348_v58 = vld [vmem:[%s2308_s29 + $0x20] sm:$0xff]  ;;  %v335_v61 = vshrl.u32 %v1680_v40, 16 }
  0x19   : > { %v333_v51 = vrot.slane %v331_v47, 1  ;;  %v321_v52 = vrot.slane %v319_v48, 1  ;;  %v2351_v59 = vld [vmem:[%s2308_s29 + $0x28] sm:$0xff]  ;;  %v2119_v1 = vld [vmem:[%s2690_s1 + $0x1f0] sm:$0xff]   ;;  %v2132_v33 = vld [vmem:[%s2690_s1 + $0x158] sm:$0xff]  }
  0x1a   : > { %1886 = vmatpush3.bf16.msra.mxu0 %v2090_v15  ;;  %v324_v42 = vshrl.u32 %v1679_v37, 16  ;;  %v326_v43 = vshll.u32 %v1679_v37, 16  ;;  %705 = vmatprep.mubr.bf16.mxu1 %v1679_v37  ;;  %v312_v44 = vshrl.u32 %v1678_v38, 16  ;;  %v314_v45 = vshll.u32 %v1678_v38, 16  ;;  %v2117_v3 = vld [vmem:[%s2690_s1 + $0x130] sm:$0xff]   ;;  %v2122_v9 = vld [vmem:[%s2690_s1 + $0x168] sm:$0xff]   ;;  %vm1580_vm13 = vmand %vm1578_vm2, %vm1579_vm3 }
  0x1b   : > { %1932 = vmatpush3.bf16.msra.mxu1 %v2091_v16  ;;  %1887 = vmatprep.subr.bf16.mxu0 %v2092_v17  ;;  %v1683_v0 = vcombine.high %v2348_v58, %v2351_v59  ;;  %v1682_v2 = vcombine.low %v2348_v58, %v2351_v59  ;;  %v2121_v4 = vld [vmem:[%s2690_s1 + $0x1b0] sm:$0xff]   ;;  %v345_v5 = vor.u32 %v343_v60, %v333_v51  ;;  %v2124_v12 = vld [vmem:[%s2690_s1 + $0x1e8] sm:$0xff]   ;;  %v2382_v17 = vld [vmem:[%s2308_s29 + $0x38] sm:$0xff] }
  0x1c   : > { %1933 = vmatprep.subr.bf16.mxu1 %v2093_v18  ;;  %v328_v49 = vrot.slane %v326_v43, 1  ;;  %v316_v50 = vrot.slane %v314_v45, 1  ;;  %v337_v8 = vor.u32 %v335_v61, %v321_v52  ;;  %v2125_v15 = vld [vmem:[%s2690_s1 + $0x1a8] sm:$0xff]   ;;  %v2379_v16 = vld [vmem:[%s2308_s29 + $0x30] sm:$0xff]  ;;  %v2136_v45 = vld [vmem:[%s2690_s1 + $0x198] sm:$0xff]  }
  0x1d   : > { %v347_v6 = vshll.u32 %v1683_v0, 16  ;;  %v339_v7 = vshll.u32 %v1682_v2, 16  ;;  %v359_v13 = vshrl.u32 %v1683_v0, 16  ;;  %v2138_v48 = vld [vmem:[%s2690_s1 + $0x150] sm:$0xff]  }
  0x1e   : > { %1888 = vmatpush3.bf16.msra.mxu0 %v2094_v19  ;;  %v329_v55 = vor.u32 %v328_v49, %v324_v42  ;;  %v317_v56 = vor.u32 %v316_v50, %v312_v44  ;;  %v2123_v19 = vld [vmem:[%s2690_s1 + $0x128] sm:$0xff]   ;;  %v2419_v42 = vld [vmem:[%s2308_s29 + $0x40] sm:$0xff]  ;;  %v2436_v49 = vcombine.high %v2324_v36, %v2348_v58  ;;  %v2139_v60 = vld [vmem:[%s2690_s1 + $0x110] sm:$0xff]  }
  0x1f   : > { %1934 = vmatpush3.bf16.msra.mxu1 %v2095_v20  ;;  %1889 = vmatprep.subr.bf16.mxu0 %v2096_v21  ;;  %v349_v10 = vrot.slane %v347_v6, 1  ;;  %v341_v11 = vrot.slane %v339_v7, 1  ;;  %v1685_v20 = vcombine.high %v2379_v16, %v2382_v17  ;;  %v1684_v21 = vcombine.low %v2379_v16, %v2382_v17  ;;  %v2141_v61 = vld [vmem:[%s2690_s1 + $0x190] sm:$0xff]   ;;  %v2145_v6 = vld [vmem:[%s2690_s1 + $0x188] sm:$0xff]  }
  0x20   : > { %1935 = vmatprep.subr.bf16.mxu1 %v2097_v22  ;;  %v334_v62 = vsel %vm310_vm0, %v329_v55, %v333_v51  ;;  %v322_v63 = vsel %vm310_vm0, %v317_v56, %v321_v52  ;;  %v351_v22 = vshrl.u32 %v1682_v2, 16  ;;  %v1687_v44 = vcombine.high %v2419_v42, %v2419_v42 }
  0x21   : > { %527 = vmatprep.mubr.bf16.mxu0 %v334_v62  ;;  %v350_v14 = vsel %vm310_vm0, %v345_v5, %v349_v10  ;;  %v342_v18 = vsel %vm310_vm0, %v337_v8, %v341_v11  ;;  %v367_v47 = vshrl.u32 %v1684_v21, 16  ;;  %v2142_v62 = vld [vmem:[%s2690_s1 + $0x148] sm:$0xff]   ;;  %v1752_v7 = vcombine.low %v2318_v34, %v2321_v35 }
  0x22   : > { %1890 = vmatpush3.bf16.msra.mxu0 %v2098_v23  ;;  %v2127_v23 = vld [vmem:[%s2690_s1 + $0x160] sm:$0xff]   ;;  %v379_v51 = vshll.u32 %v1687_v44, 16 }
  0x23   : > { %1936 = vmatpush3.bf16.msra.mxu1 %v2099_v24  ;;  %1891 = vmatprep.subr.bf16.mxu0 %v2100_v25  ;;  %v361_v24 = vor.u32 %v359_v13, %v349_v10  ;;  %v363_v25 = vshll.u32 %v1685_v20, 16 }
  0x24   : > { %1937 = vmatprep.subr.bf16.mxu1 %v2101_v26  ;;  %v355_v26 = vshll.u32 %v1684_v21, 16  ;;  %v381_v55 = vrot.slane %v379_v51, 1  ;;  %v1759_v51 = vcombine.high %v2382_v17, %v2419_v42 }
  0x26   : > { %1892 = vmatpush3.bf16.msra.mxu0 %v2102_v27  ;;  %v2129_v27 = vld [vmem:[%s2690_s1 + $0x120] sm:$0xff]  }
  0x27   : > { %1938 = vmatpush3.bf16.msra.mxu1 %v2103_v28  ;;  %1893 = vmatprep.subr.bf16.mxu0 %v2104_v29  ;;  %v2130_v28 = vld [vmem:[%s2690_s1 + $0x1e0] sm:$0xff]   ;;  %v365_v29 = vrot.slane %v363_v25, 1  ;;  %v1380_v25 = vld [vmem:[%s2692_s3 + $0x10] sm:$0xff] }
  0x28   : > { %1939 = vmatprep.subr.bf16.mxu1 %v2105_v30  ;;  %v353_v30 = vor.u32 %v351_v22, %v341_v11  ;;  %v2147_v11 = vld [vmem:[%s2690_s1 + $0x100] sm:$0xff]   ;;  %1399 = vperm.xlu1 %2075, %v1380_v25  }
  0x29   : > { %v366_v37 = vsel %vm310_vm0, %v361_v24, %v365_v29  ;;  %v1177_v24 = vrot.slane %v2436_v49, 1 }
  0x2a   : > { %1894 = vmatpush3.bf16.msra.mxu0 %v2106_v31  ;;  %v357_v31 = vrot.slane %v355_v26, 1 }
  0x2b   : > { %1940 = vmatpush3.bf16.msra.mxu1 %v2107_v32  ;;  %1971 = vmatprep.subr.bf16.mxu0 %v2112_v41  ;;  %v2131_v32 = vld [vmem:[%s2690_s1 + $0x1a0] sm:$0xff]   ;;  %v2134_v41 = vld [vmem:[%s2690_s1 + $0x1d8] sm:$0xff]  }
  0x2c   : > { %2017 = vmatprep.subr.bf16.mxu1 %v2114_v46  ;;  %v358_v43 = vsel %vm310_vm0, %v353_v30, %v357_v31  ;;  %v2429_v46 = vcombine.low %v2419_v42, %v2419_v42  ;;  %v369_v56 = vor.u32 %v367_v47, %v357_v31  ;;  %v825_v30 = vshrl.u32 %v1752_v7, 16 }
  0x2d   : > { %528 = vmatmul.mubr.bf16.vlgmr.msra.gmra.mxu0 %v322_v63  ;;  %v386_v63 = vshrl.u32 %v1687_v44, 16  ;;  %v1756_v47 = vcombine.low %v2351_v59, %v2379_v16 }
  0x2e   : > { %706 = vmatmul.mubr.bf16.vlgmr.msra.gmra.mxu1 %v1678_v38  ;;  %1972 = vmatpush3.bf16.msra.mxu0 %v2113_v53  ;;  %v2133_v38 = vld [vmem:[%s2690_s1 + $0x118] sm:$0xff]   ;;  %v371_v52 = vshll.u32 %v2429_v46, 16  ;;  %v2140_v53 = vld [vmem:[%s2690_s1 + $0x1d0] sm:$0xff]   ;;  %v383_v13 = vshrl.u32 %v2429_v46, 16 }
  0x2f   : > { %713 = vmatprep.mubr.bf16.mxu1 %v1681_v39  ;;  %2018 = vmatpush3.bf16.msra.mxu1 %v2115_v54  ;;  %v375_v39 = vshrl.u32 %v1685_v20, 16  ;;  %v388_v5 = vor.u32 %v386_v63, %v381_v55 }
  0x30   : > { %2019 = vmatprep.subr.bf16.mxu1 %v2119_v1  ;;  %1973 = vmatprep.subr.bf16.mxu0 %v2116_v57  ;;  %v373_v57 = vrot.slane %v371_v52, 1  ;;  %v2143_v1 = vld [vmem:[%s2690_s1 + $0x108] sm:$0xff]   ;;  %v1179_v52 = vrot.slane %v1756_v47, 1 }
  0x31   : > { %535 = vmatprep.mubr.bf16.mxu0 %v350_v14  ;;  %v377_v50 = vor.u32 %v375_v39, %v365_v29  ;;  %v2149_v14 = vld [vmem:[%s2690_s1 + $0x180] sm:$0xff]   ;;  %v1379_v29 = vld [vmem:[%s2692_s3 + $0x8] sm:$0xff]  ;;  %v856_v39 = vshrl.u32 %v2436_v49, 16 }
  0x32   : > { %1974 = vmatpush3.bf16.msra.mxu0 %v2117_v3  ;;  %v844_v3 = vshll.u32 %v2436_v49, 16  ;;  %v385_v26 = vor.u32 %v383_v13, %v373_v57  ;;  %v864_v13 = vshrl.u32 %v1756_v47, 16 }
  0x33   : > { %2020 = vmatpush3.bf16.msra.mxu1 %v2121_v4  ;;  %1975 = vmatprep.subr.bf16.mxu0 %v2122_v9  ;;  %v374_v4 = vsel %vm310_vm0, %v369_v56, %v373_v57  ;;  %v2146_v9 = vld [vmem:[%s2690_s1 + $0x140] sm:$0xff]   ;;  %v1098_v56 = vld [vmem:[%s2308_s29 + $0x50] sm:$0x11]  ;;  %v1385_v57 = vld [vmem:[%s2692_s3 + $0x38] sm:$0xff] }
  0x34   : > { %2021 = vmatprep.subr.bf16.mxu1 %v2124_v12  ;;  %v846_v12 = vrot.slane %v844_v3, 1  ;;  %v1386_v3 = vld [vmem:[%s2692_s3 + $0x40] sm:$0x7f] }
  0x35   : > { %536 = vmatmul.mubr.bf16.gmra.mxu0 %v342_v18  ;;  %v1089_v18 = vld [vmem:[%s2308_s29 + $0x8] sm:$0xee] }
  0x36   : > { %714 = vmatmul.mubr.bf16.gmra.mxu1 %v1680_v40  ;;  %1976 = vmatpush3.bf16.msra.mxu0 %v2123_v19  ;;  %v2413_v40 = vcombine.high %v2318_v34, %v2321_v35  ;;  %v2148_v34 = vld [vmem:[%s2690_s1 + $0x1c0] sm:$0xff]   ;;  %v827_v19 = vshll.u32 %v1752_v7, 16  ;;  %v1810_v22 = vcombine.low %v1089_v18, %v2321_v35  ;;  %v858_v49 = vor.u32 %v856_v39, %v846_v12 }
  0x37   : > { %721 = vmatprep.mubr.bf16.mxu1 %v1683_v0  ;;  %2022 = vmatpush3.bf16.msra.mxu1 %v2125_v15  ;;  %v382_v0 = vsel %vm310_vm0, %v377_v50, %v381_v55  ;;  %v2482_v15 = vcombine.low %v2324_v36, %v2348_v58  ;;  %v1378_v36 = vld [vmem:[%s2692_s3] sm:$0xff]  ;;  %v852_v55 = vshll.u32 %v1756_v47, 16 }
  0x38   : > { %1977 = vmatprep.subr.bf16.mxu0 %v2127_v23  ;;  %2023 = vmatprep.subr.bf16.mxu1 %v2130_v28  ;;  %v839_v54 = vshll.u32 %v2413_v40, 16  ;;  %v837_v8 = vshrl.u32 %v2413_v40, 16  ;;  %v1811_v23 = vcombine.high %v1089_v18, %v2321_v35  ;;  %v829_v31 = vrot.slane %v827_v19, 1 }
  0x39   : > { %543 = vmatprep.mubr.bf16.mxu0 %v366_v37  ;;  %v1174_v58 = vrot.slane %v2482_v15, 1  ;;  %1389 = vperm.xlu0 %2074, %v1378_v36  }
  0x3a   : > { %1978 = vmatpush3.bf16.msra.mxu0 %v2129_v27  ;;  %v841_v10 = vrot.slane %v839_v54, 1  ;;  %v1173_v27 = vrot.slane %v1810_v22, 1  ;;  %v1176_v28 = vrot.slane %v1811_v23, 1  ;;  %v1384_v54 = vld [vmem:[%s2692_s3 + $0x30] sm:$0xff] }
  0x3b   : > { %2024 = vmatpush3.bf16.msra.mxu1 %v2131_v32  ;;  %1979 = vmatprep.subr.bf16.mxu0 %v2132_v33  ;;  %v832_v32 = vshll.u32 %v2482_v15, 16  ;;  %v1381_v33 = vld [vmem:[%s2692_s3 + $0x18] sm:$0xff]  ;;  %v1180_v63 = vsel %vm1172_vm1, %v1174_v58, %v1179_v52 }
  0x3c   : > { %2025 = vmatprep.subr.bf16.mxu1 %v2134_v41  ;;  %v1175_v41 = vsel %vm1172_vm1, %v1173_v27, %v1174_v58  ;;  %1404 = vperm.xlu1 %2075, %v1381_v33  }
  0x3d   : > { %544 = vmatmul.mubr.bf16.gmra.mxu0 %v358_v43  ;;  %1394 = vperm.xlu0 %2074, %v1379_v29  }
  0x3e   : > { %722 = vmatmul.mubr.bf16.gmra.mxu1 %v1682_v2  ;;  %1980 = vmatpush3.bf16.msra.mxu0 %v2133_v38  ;;  %v2144_v2 = vld [vmem:[%s2690_s1 + $0x1c8] sm:$0xff]   ;;  %v1178_v38 = vsel %vm1172_vm1, %v1176_v28, %v1177_v24 }
  0x3f   : > { %729 = vmatprep.mubr.bf16.mxu1 %v1685_v20  ;;  %2026 = vmatpush3.bf16.msra.mxu1 %v2136_v45  ;;  %v2487_v20 = vcombine.high %v2351_v59, %v2379_v16  ;;  %v830_v45 = vor.u32 %v829_v31, %v825_v30  ;;  %v848_v16 = vshrl.u32 %v2482_v15, 16  ;;  %v888_v15 = vshrl.u32 %v1759_v51, 16 }
  0x40   : > { %1981 = vmatprep.subr.bf16.mxu0 %v2138_v48  ;;  %2027 = vmatprep.subr.bf16.mxu1 %v2140_v53  ;;  %v1383_v48 = vld [vmem:[%s2692_s3 + $0x28] sm:$0xff]  ;;  %v1185_v53 = vrot.slane %v1759_v51, 1 }
  0x41   : > { %551 = vmatprep.mubr.bf16.mxu0 %v382_v0  ;;  %v1181_v35 = vrot.slane %v2487_v20, 1  ;;  %v860_v40 = vshll.u32 %v2487_v20, 16  ;;  %1414 = vperm.xlu1 %2075, %v1383_v48   ;;  %v753_v0 = vld [vmem:[%s2308_s29 + $0x48] sm:$0xff]  ;;  %s2064_s29 = smul.u32 36, %s2695_s16 }
  0x42   : > { %1982 = vmatpush3.bf16.msra.mxu0 %v2139_v60  ;;  %v1760_v22 = vcombine.low %v753_v0, %v753_v0 }
  0x43   : > { %2028 = vmatpush3.bf16.msra.mxu1 %v2141_v61  ;;  %1983 = vmatprep.subr.bf16.mxu0 %v2142_v62  ;;  %v1182_v43 = vsel %vm1172_vm1, %v1177_v24, %v1181_v35  ;;  %v862_v50 = vrot.slane %v860_v40, 1  ;;  %v872_v61 = vshrl.u32 %v2487_v20, 16  ;;  %v876_v62 = vshll.u32 %v1759_v51, 16  ;;  %s197_s21 = scalar_lea.vmem %s2693_s4, %s2064_s29 }
  0x44   : > { %2029 = vmatprep.subr.bf16.mxu1 %v2144_v2  ;;  %v1819_v2 = vcombine.high %v753_v0, %v1098_v56  ;;  %v1818_v20 = vcombine.low %v753_v0, %v1098_v56  ;;  %v896_v33 = vshrl.u32 %v1760_v22, 16 }
  0x45   : > { %552 = vmatmul.mubr.bf16.gmra.mxu0 %v374_v4  ;;  %v863_v60 = vsel %vm310_vm0, %v858_v49, %v862_v50  ;;  %1424 = vperm.xlu1 %2075, %v1385_v57   ;;  %v874_v7 = vor.u32 %v872_v61, %v862_v50 }
  0x46   : > { %730 = vmatmul.mubr.bf16.gmra.mxu1 %v1684_v21  ;;  %559 = vmatprep.mubr.bf16.mxu0 %v388_v5  ;;  %v842_v21 = vor.u32 %v841_v10, %v837_v8  ;;  %v854_v5 = vrot.slane %v852_v55, 1  ;;  %v878_v8 = vrot.slane %v876_v62, 1  ;;  %v1187_v36 = vrot.slane %v1818_v20, 1 }
  0x47   : > { %737 = vmatprep.mubr.bf16.mxu1 %v1687_v44  ;;  %2030 = vmatpush3.bf16.msra.mxu1 %v2145_v6  ;;  %v1382_v44 = vld [vmem:[%s2692_s3 + $0x20] sm:$0xff]  ;;  %v1758_v6 = vcombine.low %v2382_v17, %v2419_v42 }
  0x48   : > { %1984 = vmatpush3.bf16.msra.mxu0 %v2143_v1  ;;  %2031 = vmatprep.subr.bf16.mxu1 %v2148_v34  ;;  %v847_v37 = vsel %vm310_vm0, %v842_v21, %v846_v12  ;;  %v1186_v1 = vsel %vm1172_vm1, %v1181_v35, %v1185_v53  ;;  %v866_v42 = vor.u32 %v864_v13, %v854_v5 }
  0x49   : > { %1985 = vmatprep.subr.bf16.mxu0 %v2146_v9  ;;  %1409 = vperm.xlu0 %2074, %v1382_v44   ;;  %v1761_v9 = vcombine.high %v753_v0, %v753_v0  ;;  %v1183_v10 = vrot.slane %v1758_v6, 1  ;;  %v868_v34 = vshll.u32 %v1758_v6, 16  ;;  %v890_v23 = vor.u32 %v888_v15, %v878_v8 }
  0x4a   : > { %v880_v25 = vshrl.u32 %v1758_v6, 16 }
  0x4b   : > { %2032 = vmatpush3.bf16.msra.mxu1 %v2149_v14  ;;  %v879_v14 = vsel %vm310_vm0, %v874_v7, %v878_v8  ;;  %v892_v18 = vshll.u32 %v1761_v9, 16  ;;  %v1184_v19 = vsel %vm1172_vm1, %v1179_v52, %v1183_v10  ;;  %v870_v21 = vrot.slane %v868_v34, 1 }
  0x4c   : > { %1986 = vmatpush3.bf16.msra.mxu0 %v2147_v11  ;;  %v1189_v11 = vrot.slane %v1819_v2, 1  ;;  %v1188_v28 = vsel %vm1172_vm1, %v1183_v10, %v1187_v36  ;;  %v899_v30 = vshrl.u32 %v1761_v9, 16 }
  0x4d   : > { %560 = vmatmul.mubr.bf16.gmra.mxu0 %v385_v26  ;;  %1419 = vperm.xlu0 %2074, %v1384_v54   ;;  %v894_v24 = vrot.slane %v892_v18, 1  ;;  %v871_v58 = vsel %vm310_vm0, %v866_v42, %v870_v21  ;;  %v884_v26 = vshll.u32 %v1760_v22, 16  ;;  %v882_v35 = vor.u32 %v880_v25, %v870_v21 }
  0x4e   : > { %738 = vmatmul.mubr.bf16.gmra.mxu1 %v2429_v46  ;;  %1040 = vmatprep.mubr.bf16.mxu0 %v847_v37  ;;  %v834_v46 = vrot.slane %v832_v32, 1  ;;  %v1190_v17 = vsel %vm1172_vm1, %v1185_v53, %v1189_v11 }
  0x4f   : > { %1329 = vmatprep.mubr.bf16.mxu1 %v1178_v38  ;;  %v895_v27 = vsel %vm310_vm0, %v890_v23, %v894_v24  ;;  %v886_v29 = vrot.slane %v884_v26, 1  ;;  %v901_v32 = vor.u32 %v899_v30, %v894_v24 }
  0x50   : > { %v835_v59 = vsel %vm310_vm0, %v830_v45, %v834_v46  ;;  %v850_v4 = vor.u32 %v848_v16, %v834_v46 }
  0x51   : > { %1429 = vperm.xlu0 %2074, %v1386_v3   ;;  %v887_v31 = vsel %vm310_vm0, %v882_v35, %v886_v29  ;;  %v898_v37 = vor.u32 %v896_v33, %v886_v29 }
  0x52   : > { %v855_v12 = vsel %vm310_vm0, %v850_v4, %v854_v5 }
  0x55   : > { %1041 = vmatmul.mubr.bf16.vlgmr.msra.gmra.mxu0 %v835_v59 }
  0x56   : > { %1330 = vmatmul.mubr.bf16.vlgmr.msra.gmra.mxu1 %v1175_v41  ;;  %1048 = vmatprep.mubr.bf16.mxu0 %v863_v60 }
  0x57   : > { %1337 = vmatprep.mubr.bf16.mxu1 %v1182_v43 }
  0x5d   : > { %1049 = vmatmul.mubr.bf16.gmra.mxu0 %v855_v12 }
  0x5e   : > { %1338 = vmatmul.mubr.bf16.gmra.mxu1 %v1180_v63  ;;  %1056 = vmatprep.mubr.bf16.mxu0 %v879_v14 }
  0x5f   : > { %1345 = vmatprep.mubr.bf16.mxu1 %v1186_v1 }
  0x65   : > { %1057 = vmatmul.mubr.bf16.gmra.mxu0 %v871_v58 }
  0x66   : > { %1346 = vmatmul.mubr.bf16.gmra.mxu1 %v1184_v19  ;;  %1064 = vmatprep.mubr.bf16.mxu0 %v895_v27 }
  0x67   : > { %1353 = vmatprep.mubr.bf16.mxu1 %v1190_v17 }
  0x6d   : > { %1065 = vmatmul.mubr.bf16.gmra.mxu0 %v887_v31 }
  0x6e   : > { %1354 = vmatmul.mubr.bf16.gmra.mxu1 %v1188_v28  ;;  %1072 = vmatprep.mubr.bf16.mxu0 %v901_v32 }
  0x6f   : > { %1361 = vmatprep.mubr.bf16.mxu1 %v1189_v11 }
  0x75   : > { %1073 = vmatmul.mubr.bf16.gmra.mxu0 %v898_v37 }
  0x76   : > { %1362 = vmatmul.mubr.bf16.gmra.mxu1 %v1187_v36 }
  0xb4   : > { %v1390_v25 = vpop.permute.xlu0 %1389 }
  0xed   : > { %v1895_v44 = vpop.f32.mrf.mxu0 }
  0xee   : > { %v1941_v38 = vpop.f32.mrf.mxu1 }
  0xef   : > { %v1896_v46 = vpop.f32.mrf.mxu0 }
  0xf0   : > { %v1942_v39 = vpop.f32.mrf.mxu1  ;;  %v1897_v20 = vadd.f32 %v1896_v46, %v1895_v44  ;;  %v1395_v46 = vpop.permute.xlu0 %1394 }
  0xf1   : > { %v1943_v40 = vadd.f32 %v1942_v39, %v1941_v38  ;;  %v1898_v48 = vpop.f32.mrf.mxu0 }
  0xf2   : > { %v1944_v41 = vpop.f32.mrf.mxu1 }
  0xf3   : > { %v1899_v50 = vpop.f32.mrf.mxu0  ;;  %v708_v23 = vadd.f32 %v1943_v40, %v1897_v20 }
  0xf4   : > { %v1945_v43 = vpop.f32.mrf.mxu1  ;;  %v1900_v24 = vadd.f32 %v1899_v50, %v1898_v48 }
  0xf5   : > { %v1901_v52 = vpop.f32.mrf.mxu0  ;;  %v1946_v36 = vadd.f32 %v1945_v43, %v1944_v41 }
  0xf6   : > { %v2551_v45 = vpop.f32.mrf.mxu1 }
  0xf7   : > { %v1902_v54 = vpop.f32.mrf.mxu0  ;;  %v711_v31 = vadd.f32 %v1946_v36, %v1900_v24 }
  0xf8   : > { %v2553_v47 = vpop.f32.mrf.mxu1  ;;  %v1903_v50 = vadd.f32 %v1902_v54, %v1901_v52 }
  0xf9   : > { %v1904_v16 = vpop.f32.mrf.mxu0 }
  0xfa   : > { %v2555_v49 = vpop.f32.mrf.mxu1 }
  0xfb   : > { %v1905_v56 = vpop.f32.mrf.mxu0 }
  0xfc   : > { %v2557_v51 = vpop.f32.mrf.mxu1 }
  0xfd   : > { %v2567_v60 = vpop.f32.mrf.mxu0 }
  0xfe   : > { %v2559_v53 = vpop.f32.mrf.mxu1 }
  0xff   : > { %v2571_v62 = vpop.f32.mrf.mxu0 }
 0x100   : > { %v2561_v59 = vpop.f32.mrf.mxu1 }
 0x101   : > { %v2575_v0 = vpop.f32.mrf.mxu0 }
 0x102   : > { %v2563_v55 = vpop.f32.mrf.mxu1 }
 0x103   : > { %v2579_v2 = vpop.f32.mrf.mxu0 }
 0x104   : > { %v2565_v57 = vpop.f32.mrf.mxu1 }
 0x105   : > { %v2583_v4 = vpop.f32.mrf.mxu0 }
 0x106   : > { %v2569_v61 = vpop.f32.mrf.mxu1 }
 0x107   : > { %v2585_v5 = vpop.f32.mrf.mxu0 }
 0x108   : > { %v2573_v63 = vpop.f32.mrf.mxu1 }
 0x109   : > { %v2589_v7 = vpop.f32.mrf.mxu0 }
 0x10a   : > { %v2577_v1 = vpop.f32.mrf.mxu1 }
 0x10b   : > { %v2593_v9 = vpop.f32.mrf.mxu0 }
 0x10c   : > { %v2581_v3 = vpop.f32.mrf.mxu1 }
 0x10d   : > { %v2595_v11 = vpop.f32.mrf.mxu0 }
 0x10e   : > { %v2587_v6 = vpop.f32.mrf.mxu1 }
 0x10f   : > { %v2597_v13 = vpop.f32.mrf.mxu0 }
 0x110   : > { %v2591_v8 = vpop.f32.mrf.mxu1 }
 0x111   : > { %v1922_v14 = vpop.f32.mrf.mxu0 }
 0x112   : > { %v1968_v10 = vpop.f32.mrf.mxu1 }
 0x113   : > { %v1923_v18 = vpop.f32.mrf.mxu0  ;;  %v1949_v10 = vadd.f32 %v2553_v47, %v2551_v45  ;;  %v1909_v45 = vadd.f32 %v2571_v62, %v2567_v60  ;;  %v1955_v47 = vadd.f32 %v2561_v59, %v2559_v53 }
 0x114   : > { %v1969_v12 = vpop.f32.mrf.mxu1  ;;  %v1952_v18 = vadd.f32 %v2557_v51, %v2555_v49  ;;  %v1400_v51 = vpop.permute.xlu1 %1399 }
 0x115   : > { %v1987_v17 = vpop.f32.mrf.mxu0  ;;  %v716_v54 = vadd.f32 %v1949_v10, %v1903_v50  ;;  %v724_v62 = vadd.f32 %v1955_v47, %v1909_v45  ;;  %v1921_v45 = vadd.f32 %v2597_v13, %v2595_v11 }
 0x116   : > { %v2033_v34 = vpop.f32.mrf.mxu1 }
 0x117   : > { %v1988_v21 = vpop.f32.mrf.mxu0 }
 0x118   : > { %v2034_v15 = vpop.f32.mrf.mxu1  ;;  %v1989_v58 = vadd.f32 %v1988_v21, %v1987_v17 }
 0x119   : > { %v1990_v26 = vpop.f32.mrf.mxu0  ;;  %v2035_v35 = vadd.f32 %v2034_v15, %v2033_v34  ;;  %v1906_v15 = vadd.f32 %v1905_v56, %v1904_v16 }
 0x11a   : > { %v2036_v19 = vpop.f32.mrf.mxu1  ;;  %v1080_v28 = vadd.f32 %v1989_v58, %v708_v23 }
 0x11b   : > { %v1991_v29 = vpop.f32.mrf.mxu0  ;;  %v719_v24 = vadd.f32 %v1952_v18, %v1906_v15 }
 0x11c   : > { %v2037_v42 = vpop.f32.mrf.mxu1  ;;  %v2599_v32 = vadd.f32 %v2035_v35, %v1080_v28  ;;  %v1992_v33 = vadd.f32 %v1991_v29, %v1990_v26  ;;  %v1912_v26 = vadd.f32 %v2579_v2, %v2575_v0  ;;  %v1958_v28 = vadd.f32 %v2565_v57, %v2563_v55  ;;  %v1405_v55 = vpop.permute.xlu1 %1404 }
 0x11d   : > { %v1993_v37 = vpop.f32.mrf.mxu0  ;;  %v2038_v44 = vadd.f32 %v2037_v42, %v2036_v19  ;;  %v1961_v0 = vadd.f32 %v2573_v63, %v2569_v61  ;;  %v1964_v61 = vadd.f32 %v2581_v3, %v2577_v1  ;;  %v1410_v63 = vpop.permute.xlu0 %1409 }
 0x11e   : > { %v2039_v22 = vpop.f32.mrf.mxu1  ;;  %v1081_v39 = vadd.f32 %v1992_v33, %v711_v31  ;;  %v1432_v43 = vmul.f32 %v1390_v25, %v2599_v32 }
 0x11f   : > { %v1994_v40 = vpop.f32.mrf.mxu0 }
 0x120   : > { %v2040_v27 = vpop.f32.mrf.mxu1  ;;  %v2601_v41 = vadd.f32 %v2038_v44, %v1081_v39  ;;  %v1995_v19 = vadd.f32 %v1994_v40, %v1993_v37  ;;  %v1458_v42 = vmul.f32 %v1432_v43, %v2599_v32  ;;  %v1915_v40 = vadd.f32 %v2585_v5, %v2583_v4 }
 0x121   : > { %v1996_v12 = vpop.f32.mrf.mxu0  ;;  %v2041_v35 = vadd.f32 %v2040_v27, %v2039_v22  ;;  %v1918_v4 = vadd.f32 %v2593_v9, %v2589_v7 }
 0x122   : > { %v2042_v30 = vpop.f32.mrf.mxu1  ;;  %v1433_v14 = vmul.f32 %v1395_v46, %v2601_v41  ;;  %v1082_v36 = vadd.f32 %v1995_v19, %v716_v54  ;;  %v727_v46 = vadd.f32 %v1958_v28, %v1912_v26  ;;  %v732_v15 = vadd.f32 %v1961_v0, %v1915_v40 }
 0x123   : > { %v1997_v20 = vpop.f32.mrf.mxu0  ;;  %v735_v3 = vadd.f32 %v1964_v61, %v1918_v4 }
 0x124   : > { %v2043_v38 = vpop.f32.mrf.mxu1  ;;  %v2610_v21 = vadd.f32 %v1433_v14, %v1432_v43  ;;  %v1459_v52 = vmul.f32 %v1433_v14, %v2601_v41  ;;  %v1998_v16 = vadd.f32 %v1997_v20, %v1996_v12  ;;  %v2623_v31 = vadd.f32 %v2041_v35, %v1082_v36  ;;  %v1415_v20 = vpop.permute.xlu1 %1414 }
 0x125   : > { %v1999_v56 = vpop.f32.mrf.mxu0  ;;  %v2044_v33 = vadd.f32 %v2043_v38, %v2042_v30 }
 0x126   : > { %v2045_v48 = vpop.f32.mrf.mxu1  ;;  %v2617_v49 = vadd.f32 %v1459_v52, %v1458_v42  ;;  %v1083_v53 = vadd.f32 %v1998_v16, %v719_v24  ;;  %v1434_v30 = vmul.f32 %v1400_v51, %v2623_v31  ;;  %v1967_v52 = vadd.f32 %v2591_v8, %v2587_v6  ;;  %v1420_v24 = vpop.permute.xlu0 %1419 }
 0x127   : > { %v2000_v58 = vpop.f32.mrf.mxu0 }
 0x128   : > { %v2046_v34 = vpop.f32.mrf.mxu1  ;;  %v2001_v60 = vadd.f32 %v2000_v58, %v1999_v56  ;;  %v2629_v2 = vadd.f32 %v2044_v33, %v1083_v53  ;;  %v1460_v54 = vmul.f32 %v1434_v30, %v2623_v31  ;;  %v1442_v56 = vadd.f32 %v2610_v21, %v1434_v30 }
 0x129   : > { %v2002_v59 = vpop.f32.mrf.mxu0  ;;  %v2047_v22 = vadd.f32 %v2046_v34, %v2045_v48 }
 0x12a   : > { %v2048_v17 = vpop.f32.mrf.mxu1  ;;  %v1084_v37 = vadd.f32 %v2001_v60, %v724_v62  ;;  %v1435_v48 = vmul.f32 %v1405_v55, %v2629_v2  ;;  %v740_v60 = vadd.f32 %v1967_v52, %v1921_v45 }
 0x12b   : > { %v2003_v39 = vpop.f32.mrf.mxu0 }
 0x12c   : > { %v2049_v23 = vpop.f32.mrf.mxu1  ;;  %v2004_v57 = vadd.f32 %v2003_v39, %v2002_v59  ;;  %v2632_v38 = vadd.f32 %v2047_v22, %v1084_v37  ;;  %v1443_v26 = vadd.f32 %v1442_v56, %v1435_v48  ;;  %v1430_v22 = vpop.permute.xlu0 %1429 }
 0x12d   : > { %v2005_v27 = vpop.f32.mrf.mxu0  ;;  %v2050_v10 = vadd.f32 %v2049_v23, %v2048_v17  ;;  %v1461_v23 = vmul.f32 %v1435_v48, %v2629_v2 }
 0x12e   : > { %v2051_v25 = vpop.f32.mrf.mxu1  ;;  %v1085_v50 = vadd.f32 %v2004_v57, %v727_v46  ;;  %v1436_v7 = vmul.f32 %v1410_v63, %v2632_v38 }
 0x12f   : > { %v2006_v12 = vpop.f32.mrf.mxu0 }
 0x130   : > { %v2052_v29 = vpop.f32.mrf.mxu1  ;;  %v2007_v5 = vadd.f32 %v2006_v12, %v2005_v27  ;;  %v2639_v34 = vadd.f32 %v2050_v10, %v1085_v50  ;;  %v1462_v28 = vmul.f32 %v1436_v7, %v2632_v38  ;;  %v1444_v53 = vadd.f32 %v1443_v26, %v1436_v7 }
 0x131   : > { %v2008_v18 = vpop.f32.mrf.mxu0  ;;  %v2053_v17 = vadd.f32 %v2052_v29, %v2051_v25  ;;  %v1468_v25 = vadd.f32 %v2617_v49, %v1460_v54  ;;  %v1425_v29 = vpop.permute.xlu1 %1424 }
 0x132   : > { %v2054_v44 = vpop.f32.mrf.mxu1  ;;  %v1086_v42 = vadd.f32 %v2007_v5, %v732_v15  ;;  %v1437_v51 = vmul.f32 %v1415_v20, %v2639_v34 }
 0x133   : > { %v2009_v9 = vpop.f32.mrf.mxu0  ;;  %v1469_v35 = vadd.f32 %v1468_v25, %v1461_v23 }
 0x134   : > { %v2055_v43 = vpop.f32.mrf.mxu1  ;;  %v2647_v47 = vadd.f32 %v2053_v17, %v1086_v42  ;;  %v2010_v16 = vadd.f32 %v2009_v9, %v2008_v18  ;;  %v1463_v59 = vmul.f32 %v1437_v51, %v2639_v34 }
 0x135   : > { %v2011_v6 = vpop.f32.mrf.mxu0  ;;  %v2056_v58 = vadd.f32 %v2055_v43, %v2054_v44  ;;  %v1445_v44 = vadd.f32 %v1444_v53, %v1437_v51  ;;  %v1470_v46 = vadd.f32 %v1469_v35, %v1462_v28 }
 0x136   : > { %v2057_v14 = vpop.f32.mrf.mxu1  ;;  %v1087_v36 = vadd.f32 %v2010_v16, %v735_v3  ;;  %v1438_v11 = vmul.f32 %v1420_v24, %v2647_v47 }
 0x137   : > { %v2012_v13 = vpop.f32.mrf.mxu0  ;;  %v1471_v57 = vadd.f32 %v1470_v46, %v1463_v59 }
 0x138   : > { %v2058_v19 = vpop.f32.mrf.mxu1  ;;  %v2655_v62 = vadd.f32 %v2056_v58, %v1087_v36  ;;  %v2013_v21 = vadd.f32 %v2012_v13, %v2011_v6  ;;  %v1464_v40 = vmul.f32 %v1438_v11, %v2647_v47  ;;  %v1446_v27 = vadd.f32 %v1445_v44, %v1438_v11 }
 0x139   : > { %v2014_v33 = vpop.f32.mrf.mxu0  ;;  %v2059_v49 = vadd.f32 %v2058_v19, %v2057_v14 }
 0x13a   : > { %v2060_v1 = vpop.f32.mrf.mxu1  ;;  %v1439_v37 = vmul.f32 %v1425_v29, %v2655_v62  ;;  %v1088_v39 = vadd.f32 %v2013_v21, %v740_v60  ;;  %v1472_v30 = vadd.f32 %v1471_v57, %v1464_v40 }
 0x13b   : > { %v2015_v0 = vpop.f32.mrf.mxu0 }
 0x13c   : > { %v2061_v8 = vpop.f32.mrf.mxu1  ;;  %v1377_v55 = vadd.f32 %v2059_v49, %v1088_v39  ;;  %v1465_v43 = vmul.f32 %v1439_v37, %v2655_v62  ;;  %v1447_v10 = vadd.f32 %v1446_v27, %v1439_v37 }
 0x13e   : > { %v1440_v50 = vmul.f32 %v1430_v22, %v1377_v55  ;;  %v1473_v4 = vadd.f32 %v1472_v30, %v1465_v43 }
 0x140   : > { %v1449_v12 = vsel %vm1172_vm1, %v1440_v50, 0.0  ;;  %v1466_v15 = vmul.f32 %v1440_v50, %v1377_v55 }
 0x141   : > { %v1450_v61 = vadd.f32 %v1449_v12, %v1447_v10  ;;  %v1581_v12 = vld [vmem:[%s197_s21 + $0x20] sm:$0xf] }
 0x142   : > { %v1474_v14 = vsel %vm1172_vm1, %v1466_v15, 0.0 }
 0x143   : > { %v1451_v63 = vrot.slane %v1450_v61, 4  ;;  %v1475_v5 = vadd.f32 %v1474_v14, %v1473_v4 }
 0x145   : > { %v1452_v48 = vadd.f32 %v1451_v63, %v1450_v61  ;;  %v1476_v18 = vrot.slane %v1475_v5, 4 }
 0x147   : > { %v1453_v19 = vrot.slane %v1452_v48, 2  ;;  %v1477_v20 = vadd.f32 %v1476_v18, %v1475_v5 }
 0x149   : > { %v1454_v42 = vadd.f32 %v1453_v19, %v1452_v48  ;;  %v1478_v17 = vrot.slane %v1477_v20, 2 }
 0x14b   : > { %v1455_v52 = vrot.slane %v1454_v42, 1  ;;  %v1479_v54 = vadd.f32 %v1478_v17, %v1477_v20 }
 0x14d   : > { %v1456_v7 = vadd.f32 %v1455_v52, %v1454_v42  ;;  %v1480_v9 = vrot.slane %v1479_v54, 1 }
 0x14f   : > { %v1457_v1 = vmul.f32 0.015625, %v1456_v7  ;;  %v1481_v3 = vadd.f32 %v1480_v9, %v1479_v54 }
 0x151   : > { %v1482_v45 = vmul.f32 0.015625, %v1481_v3  ;;  %v1483_v16 = vmul.f32 %v1457_v1, %v1457_v1  ;;  %v1486_v56 = vsub.f32 %v2599_v32, %v1457_v1  ;;  %v1487_v23 = vsub.f32 %v2601_v41, %v1457_v1 }
 0x152   : > { %v1488_v24 = vsub.f32 %v2623_v31, %v1457_v1  ;;  %v1489_v36 = vsub.f32 %v2629_v2, %v1457_v1  ;;  %v1490_v58 = vsub.f32 %v2632_v38, %v1457_v1  ;;  %v1491_v26 = vsub.f32 %v2639_v34, %v1457_v1 }
 0x153   : > { %v1484_v51 = vsub.f32 %v1482_v45, %v1483_v16  ;;  %v1492_v32 = vsub.f32 %v2647_v47, %v1457_v1  ;;  %v1493_v41 = vsub.f32 %v2655_v62, %v1457_v1  ;;  %v1494_v28 = vsub.f32 %v1377_v55, %v1457_v1 }
 0x155   : > { %v1485_v6 = vmax.f32 %v1484_v51, 0.0 }
 0x157   : > { %v1495_v8 = vadd.f32 1e-05, %v1485_v6 }
 0x159   : > { %2164 = vrsqrt.f32 %v1495_v8 }
 0x166   : > { %v2165_v25 = vpop.eup %2164 }
 0x167   : > { %v1497_v11 = vmul.f32 %v2165_v25, %v1486_v56  ;;  %v1498_v13 = vmul.f32 %v2165_v25, %v1487_v23  ;;  %v1499_v60 = vmul.f32 %v2165_v25, %v1488_v24  ;;  %v1500_v21 = vmul.f32 %v2165_v25, %v1489_v36 }
 0x168   : > { %v1501_v31 = vmul.f32 %v2165_v25, %v1490_v58  ;;  %v1502_v35 = vmul.f32 %v2165_v25, %v1491_v26  ;;  %v1503_v2 = vmul.f32 %v2165_v25, %v1492_v32  ;;  %v1504_v53 = vmul.f32 %v2165_v25, %v1493_v41 }
 0x169   : > { %v1505_v38 = vmul.f32 %v2165_v25, %v1494_v28  ;;  %vm1506_vm4 = vcmp.gt.f32.partialorder %v1497_v11, 0.0  ;;  %vm1507_vm5 = vcmp.gt.f32.partialorder %v1498_v13, 0.0  ;;  %vm1508_vm6 = vcmp.gt.f32.partialorder %v1499_v60, 0.0 }
 0x16a   : > { %vm1509_vm7 = vcmp.gt.f32.partialorder %v1500_v21, 0.0  ;;  %vm1510_vm8 = vcmp.gt.f32.partialorder %v1501_v31, 0.0  ;;  %vm1511_vm9 = vcmp.gt.f32.partialorder %v1502_v35, 0.0  ;;  %vm1512_vm10 = vcmp.gt.f32.partialorder %v1503_v2, 0.0 }
 0x16b   : > { %vm1513_vm11 = vcmp.gt.f32.partialorder %v1504_v53, 0.0  ;;  %vm1514_vm12 = vcmp.gt.f32.partialorder %v1505_v38, 0.0  ;;  %v1515_v34 = vmul.f32 0.2, %v1497_v11  ;;  %v1516_v47 = vmul.f32 0.2, %v1498_v13 }
 0x16c   : > { %v1517_v62 = vmul.f32 0.2, %v1499_v60  ;;  %v1518_v59 = vmul.f32 0.2, %v1500_v21  ;;  %v1519_v29 = vmul.f32 0.2, %v1501_v31 }
 0x16d   : > { %v1520_v33 = vmul.f32 0.2, %v1502_v35  ;;  %v1521_v37 = vmul.f32 0.2, %v1503_v2  ;;  %v1522_v39 = vmul.f32 0.2, %v1504_v53  ;;  %v1524_v49 = vsel %vm1506_vm4, %v1497_v11, %v1515_v34 }
 0x16e   : > { %v1523_v44 = vmul.f32 0.2, %v1505_v38  ;;  %v1525_v46 = vsel %vm1507_vm5, %v1498_v13, %v1516_v47  ;;  %v1526_v40 = vsel %vm1508_vm6, %v1499_v60, %v1517_v62  ;;  %v1527_v0 = vsel %vm1509_vm7, %v1500_v21, %v1518_v59 }
 0x16f   : > { %v1528_v55 = vsel %vm1510_vm8, %v1501_v31, %v1519_v29  ;;  %v1529_v57 = vsel %vm1511_vm9, %v1502_v35, %v1520_v33  ;;  %v1530_v22 = vsel %vm1512_vm10, %v1503_v2, %v1521_v37  ;;  %v1531_v27 = vsel %vm1513_vm11, %v1504_v53, %v1522_v39 }
 0x170   : > { %v1532_v43 = vsel %vm1514_vm12, %v1505_v38, %v1523_v44  ;;  %v1859_v50 = vpack.c.bf16 %v1525_v46, %v1524_v49  ;;  %v1864_v30 = vpack.c.bf16 %v1527_v0, %v1526_v40  ;;  %v1869_v10 = vpack.c.bf16 %v1529_v57, %v1528_v55 }
 0x171   : > { %v1855_v15 = vpack.c.bf16 %v1532_v43, %v1532_v43  ;;  %v1874_v4 = vpack.c.bf16 %v1531_v27, %v1530_v22 }
 0x172   : > { %1860 = vst [vmem:[%s197_s21] sm:$0xff] %v1859_v50   ;;  %1876 = vst [vmem:[%s197_s21 + $0x8] sm:$0xff] %v1864_v30  }
 0x173   : > { %1877 = vst [vmem:[%s197_s21 + $0x10] sm:$0xff] %v1869_v10   ;;  %1878 = vst [vmem:[%s197_s21 + $0x18] sm:$0xff] %v1874_v4   ;;  %v1582_v61 = vsel %vm1580_vm13, %v1855_v15, %v1581_v12 }
 0x174   : > { %1583 = vst [vmem:[%s197_s21 + $0x20] sm:$0xf] %v1582_v61 }
 0x175 PF: > { %s14_s15 = sadd.s32 1, %s2172_s15  }
 0x176   : > { %p11_p4 = scmp.ge.s32.totalorder %s14_s15, 4  }
 0x178   :  { %13 = sbr.rel (!%p11_p4) target bundleno = 1 (0x1), region = 69 }

// kernel: discriminator_forward.7
= control target key start
LH: loop header
LB: loop body
LE: loop exit
PB: predicated region body
PF: predicated region fallthrough
CT: control target
= control target key end

     0   :  { %s3576_s15 = smov 0   ;;  %s4559_s0 = inlined_call_operand.vmem [shape: bf16[2,25,512], index: 0, kind: input, shape index: {}]   ;;  %s4560_s1 = inlined_call_operand.vmem [shape: bf16[4,512,256], index: 1, kind: input, shape index: {}]   ;;  %s4561_s2 = inlined_call_operand.vmem [shape: f32[1,256], index: 2, kind: input, shape index: {}]   ;;  %s4562_s3 = inlined_call_operand.vmem [shape: f32[19,1], index: 3, kind: input, shape index: {}]   ;;  %s4563_s4 = inlined_call_operand.vmem [shape: bf16[2,19,256], index: 4, kind: output, shape index: {}]  }
   0x1 LB: > { %s2625_s16 = sadd.s32 4294967295, %s3548_s15   ;;  %p2629_p0 = scmp.ge.s32.totalorder %s3548_s15, 1  ;;  %s3548_s15 = sphi %s3576_s15, %s14_s15  }
   0x2   : > { %p162_p1 = scmp.lt.s32.totalorder %s3548_s15, 3 }
   0x4   : > { %p163_p2 = pnand %p2629_p0, %p162_p1 }
   0x5   : > { %p188_p3 = scmp.lt.s32.totalorder (!%p163_p2), %s2625_s16, 1 }
   0x6   : > { %166 = sbr.rel (%p163_p2) target bundleno = 528 (0x210), region = 36 }
   0xb   : > { %v3126_v0 = vld [vmem:[%s4560_s1 + $0x274] ss:$8 sps:$4 sm:$0xff]   ;;  %v3130_v2 = vld [vmem:[%s4560_s1 + $0x270] ss:$8 sps:$4 sm:$0xff]   ;;  %v3132_v4 = vld [vmem:[%s4560_s1 + $0x264] ss:$8 sps:$4 sm:$0xff]  }
   0xc   : > { %v3128_v1 = vld [vmem:[%s4560_s1 + $0x374] ss:$8 sps:$4 sm:$0xff]   ;;  %748 = vmatprep.subr.bf16.mxu0 %v3126_v0  ;;  %v3131_v3 = vld [vmem:[%s4560_s1 + $0x370] ss:$8 sps:$4 sm:$0xff]   ;;  %v3134_v5 = vld [vmem:[%s4560_s1 + $0x364] ss:$8 sps:$4 sm:$0xff]  }
   0xd   : > { %799 = vmatprep.subr.bf16.mxu1 %v3128_v1  ;;  %749 = vmatpush1.bf16.msra.mxu0 %v3130_v2  ;;  %v3136_v6 = vld [vmem:[%s4560_s1 + $0x260] ss:$8 sps:$4 sm:$0xff]   ;;  %v3138_v8 = vld [vmem:[%s4560_s1 + $0x254] ss:$8 sps:$4 sm:$0xff]   ;;  %v3142_v10 = vld [vmem:[%s4560_s1 + $0x250] ss:$8 sps:$4 sm:$0xff]  }
   0xe   : > { %800 = vmatpush1.bf16.msra.mxu1 %v3131_v3  ;;  %750 = vmatprep.subr.bf16.mxu0 %v3132_v4  ;;  %v3137_v7 = vld [vmem:[%s4560_s1 + $0x360] ss:$8 sps:$4 sm:$0xff]   ;;  %v3140_v9 = vld [vmem:[%s4560_s1 + $0x354] ss:$8 sps:$4 sm:$0xff]   ;;  %v3143_v11 = vld [vmem:[%s4560_s1 + $0x350] ss:$8 sps:$4 sm:$0xff]  }
   0xf   : > { %801 = vmatprep.subr.bf16.mxu1 %v3134_v5  ;;  %v3144_v12 = vld [vmem:[%s4560_s1 + $0x244] ss:$8 sps:$4 sm:$0xff]   ;;  %v3148_v14 = vld [vmem:[%s4560_s1 + $0x240] ss:$8 sps:$4 sm:$0xff]   ;;  %v3150_v16 = vld [vmem:[%s4560_s1 + $0x234] ss:$8 sps:$4 sm:$0xff]  }
  0x10   : > { %v3146_v13 = vld [vmem:[%s4560_s1 + $0x344] ss:$8 sps:$4 sm:$0xff]   ;;  %v3149_v15 = vld [vmem:[%s4560_s1 + $0x340] ss:$8 sps:$4 sm:$0xff]   ;;  %v3152_v17 = vld [vmem:[%s4560_s1 + $0x334] ss:$8 sps:$4 sm:$0xff]  }
  0x11   : > { %751 = vmatpush1.bf16.msra.mxu0 %v3136_v6  ;;  %v3154_v18 = vld [vmem:[%s4560_s1 + $0x230] ss:$8 sps:$4 sm:$0xff]   ;;  %v3156_v20 = vld [vmem:[%s4560_s1 + $0x224] ss:$8 sps:$4 sm:$0xff]   ;;  %v3160_v22 = vld [vmem:[%s4560_s1 + $0x220] ss:$8 sps:$4 sm:$0xff]  }
  0x12   : > { %802 = vmatpush1.bf16.msra.mxu1 %v3137_v7  ;;  %752 = vmatprep.subr.bf16.mxu0 %v3138_v8  ;;  %v3155_v19 = vld [vmem:[%s4560_s1 + $0x330] ss:$8 sps:$4 sm:$0xff]   ;;  %v3158_v21 = vld [vmem:[%s4560_s1 + $0x324] ss:$8 sps:$4 sm:$0xff]   ;;  %v3161_v23 = vld [vmem:[%s4560_s1 + $0x320] ss:$8 sps:$4 sm:$0xff]  }
  0x13   : > { %803 = vmatprep.subr.bf16.mxu1 %v3140_v9  ;;  %v3162_v24 = vld [vmem:[%s4560_s1 + $0x214] ss:$8 sps:$4 sm:$0xff]   ;;  %v3166_v26 = vld [vmem:[%s4560_s1 + $0x210] ss:$8 sps:$4 sm:$0xff]   ;;  %v3168_v28 = vld [vmem:[%s4560_s1 + $0x204] ss:$8 sps:$4 sm:$0xff]  }
  0x14   : > { %v3164_v25 = vld [vmem:[%s4560_s1 + $0x314] ss:$8 sps:$4 sm:$0xff]   ;;  %v3167_v27 = vld [vmem:[%s4560_s1 + $0x310] ss:$8 sps:$4 sm:$0xff]   ;;  %v3170_v29 = vld [vmem:[%s4560_s1 + $0x304] ss:$8 sps:$4 sm:$0xff]  }
  0x15   : > { %753 = vmatpush1.bf16.msra.mxu0 %v3142_v10  ;;  %v3172_v30 = vld [vmem:[%s4560_s1 + $0x200] ss:$8 sps:$4 sm:$0xff]   ;;  %v3174_v32 = vld [vmem:[%s4560_s1 + $0x2f4] ss:$8 sps:$4 sm:$0xff]   ;;  %v3178_v34 = vld [vmem:[%s4560_s1 + $0x2f0] ss:$8 sps:$4 sm:$0xff]  }
  0x16   : > { %804 = vmatpush1.bf16.msra.mxu1 %v3143_v11  ;;  %754 = vmatprep.subr.bf16.mxu0 %v3144_v12  ;;  %v3173_v31 = vld [vmem:[%s4560_s1 + $0x300] ss:$8 sps:$4 sm:$0xff]   ;;  %v3176_v33 = vld [vmem:[%s4560_s1 + $0x3f4] ss:$8 sps:$4 sm:$0xff]   ;;  %v3179_v35 = vld [vmem:[%s4560_s1 + $0x3f0] ss:$8 sps:$4 sm:$0xff]  }
  0x17   : > { %805 = vmatprep.subr.bf16.mxu1 %v3146_v13  ;;  %v3180_v36 = vld [vmem:[%s4560_s1 + $0x2e4] ss:$8 sps:$4 sm:$0xff]   ;;  %s4569_s16 = smov (!%p188_p3, %s2625_s16), 1  ;;  %v3184_v38 = vld [vmem:[%s4560_s1 + $0x2e0] ss:$8 sps:$4 sm:$0xff]   ;;  %vm1979_vm2 = vcmask 1044480  }
  0x18   : > { %v3182_v37 = vld [vmem:[%s4560_s1 + $0x3e4] ss:$8 sps:$4 sm:$0xff]   ;;  %v3185_v39 = vld [vmem:[%s4560_s1 + $0x3e0] ss:$8 sps:$4 sm:$0xff]   ;;  %v3186_v40 = vld [vmem:[%s4560_s1 + $0x2d4] ss:$8 sps:$4 sm:$0xff]  }
  0x19   : > { %755 = vmatpush1.bf16.msra.mxu0 %v3148_v14  ;;  %s3110_s23 = sshll.u32 %s4569_s16, 6  ;;  %v3188_v41 = vld [vmem:[%s4560_s1 + $0x3d4] ss:$8 sps:$4 sm:$0xff]   ;;  %v3190_v42 = vld [vmem:[%s4560_s1 + $0x2d0] ss:$8 sps:$4 sm:$0xff]   ;;  %vm2453_vm3 = vcmask 1042432  }
  0x1a   : > { %806 = vmatpush1.bf16.msra.mxu1 %v3149_v15  ;;  %756 = vmatprep.subr.bf16.mxu0 %v3150_v16  ;;  %v3191_v43 = vld [vmem:[%s4560_s1 + $0x3d0] ss:$8 sps:$4 sm:$0xff]   ;;  %s3726_s6 = scalar_lea.vmem %s4559_s0, %s3110_s23  ;;  %v3192_v44 = vld [vmem:[%s4560_s1 + $0x2c4] ss:$8 sps:$4 sm:$0xff]   ;;  %v3196_v46 = vld [vmem:[%s4560_s1 + $0x2c0] ss:$8 sps:$4 sm:$0xff]  }
  0x1b   : > { %807 = vmatprep.subr.bf16.mxu1 %v3152_v17  ;;  %v3194_v45 = vld [vmem:[%s4560_s1 + $0x3c4] ss:$8 sps:$4 sm:$0xff]   ;;  %v3197_v47 = vld [vmem:[%s4560_s1 + $0x3c0] ss:$8 sps:$4 sm:$0xff]   ;;  %v3742_v49 = vld [vmem:[%s3726_s6 + $0x10] sm:$0xff]  ;;  %vm2561_vm4 = vcmask 1041408  }
  0x1c   : > { %v198_v48 = vld [vmem:[%s3726_s6] sm:$0xff]  ;;  %v199_v51 = vld [vmem:[%s3726_s6 + $0x8] sm:$0xff]  ;;  %vm359_vm0 = vsmask.f32 7424  ;;  %v3752_v54 = vld [vmem:[%s3726_s6 + $0x18] sm:$0xff]  ;;  %s3114_s29 = smul.u32 24, %s4569_s16 }
  0x1d   : > { %757 = vmatpush1.bf16.msra.mxu0 %v3154_v18  ;;  %v202_v50 = vld [vmem:[%s3726_s6 + $0x20] sm:$0x33]  ;;  %v3747_v52 = vcombine.high %v198_v48, %v3742_v49  ;;  %v203_v55 = vld [vmem:[%s3726_s6 + $0x28] sm:$0x33]  ;;  %v3198_v56 = vld [vmem:[%s4560_s1 + $0x2b4] ss:$8 sps:$4 sm:$0xff]   ;;  %v3762_v58 = vcombine.high %v199_v51, %v3752_v54  ;;  %v3784_v7 = vcombine.low %v198_v48, %v3742_v49  ;;  %v3787_v8 = vcombine.low %v199_v51, %v3752_v54 }
  0x1e   : > { %808 = vmatpush1.bf16.msra.mxu1 %v3155_v19  ;;  %758 = vmatprep.subr.bf16.mxu0 %v3156_v20  ;;  %v3749_v53 = vcombine.high %v202_v50, %v202_v50  ;;  %v3200_v57 = vld [vmem:[%s4560_s1 + $0x3b4] ss:$8 sps:$4 sm:$0xff]   ;;  %v3764_v59 = vcombine.high %v203_v55, %v203_v55  ;;  %v3202_v60 = vld [vmem:[%s4560_s1 + $0x2b0] ss:$8 sps:$4 sm:$0xff]   ;;  %v3204_v4 = vld [vmem:[%s4560_s1 + $0x2a4] ss:$8 sps:$4 sm:$0xff]   ;;  %v3798_v16 = vcombine.low %v202_v50, %v202_v50  ;;  %s197_s5 = scalar_lea.vmem %s4563_s4, %s3114_s29 }
  0x1f   : > { %809 = vmatprep.subr.bf16.mxu1 %v3158_v21  ;;  %v373_v61 = vshrl.u32 %v3747_v52, 16  ;;  %v375_v62 = vshll.u32 %v3747_v52, 16  ;;  %v3203_v0 = vld [vmem:[%s4560_s1 + $0x3b0] ss:$8 sps:$4 sm:$0xff]   ;;  %v397_v1 = vshrl.u32 %v3762_v58, 16  ;;  %v399_v2 = vshll.u32 %v3762_v58, 16 }
  0x20   : > { %v380_v63 = vshll.u32 %v3749_v53, 16  ;;  %v404_v3 = vshll.u32 %v3764_v59, 16  ;;  %v3206_v9 = vld [vmem:[%s4560_s1 + $0x3a4] ss:$8 sps:$4 sm:$0xff]   ;;  %v3208_v13 = vld [vmem:[%s4560_s1 + $0x2a0] ss:$8 sps:$4 sm:$0xff]   ;;  %v3806_v20 = vcombine.low %v203_v55, %v203_v55 }
  0x21   : > { %759 = vmatpush1.bf16.msra.mxu0 %v3160_v22  ;;  %v377_v5 = vrot.slane %v375_v62, 1  ;;  %v401_v10 = vrot.slane %v399_v2, 1  ;;  %v3209_v14 = vld [vmem:[%s4560_s1 + $0x3a0] ss:$8 sps:$4 sm:$0xff]   ;;  %v3210_v17 = vld [vmem:[%s4560_s1 + $0x294] ss:$8 sps:$4 sm:$0xff]  }
  0x22   : > { %810 = vmatpush1.bf16.msra.mxu1 %v3161_v23  ;;  %760 = vmatprep.subr.bf16.mxu0 %v3162_v24  ;;  %v3781_v6 = vrot.slane %v380_v63, 1  ;;  %v406_v11 = vrot.slane %v404_v3, 1  ;;  %v363_v19 = vshll.u32 %v3784_v7, 16  ;;  %v387_v21 = vshll.u32 %v3787_v8, 16  ;;  %v3212_v22 = vld [vmem:[%s4560_s1 + $0x394] ss:$8 sps:$4 sm:$0xff]  }
  0x23   : > { %811 = vmatprep.subr.bf16.mxu1 %v3164_v25  ;;  %v378_v12 = vor.u32 %v377_v5, %v373_v61  ;;  %v402_v15 = vor.u32 %v401_v10, %v397_v1  ;;  %v3214_v24 = vld [vmem:[%s4560_s1 + $0x290] ss:$8 sps:$4 sm:$0xff]   ;;  %v3238_v48 = vld [vmem:[%s4560_s1 + $0x64] ss:$8 sps:$4 sm:$0xff]   ;;  %v3236_v51 = vld [vmem:[%s4560_s1 + $0x60] ss:$8 sps:$4 sm:$0xff]  }
  0x24   : > { %v3215_v25 = vld [vmem:[%s4560_s1 + $0x390] ss:$8 sps:$4 sm:$0xff]   ;;  %v3241_v50 = vld [vmem:[%s4560_s1 + $0x164] ss:$8 sps:$4 sm:$0xff]   ;;  %v414_v61 = vshrl.u32 %v3806_v20, 16  ;;  %vm2564_vm6 = vcmask 1045508  }
  0x25   : > { %761 = vmatpush1.bf16.msra.mxu0 %v3166_v26  ;;  %v383_v18 = vsel %vm359_vm0, %v378_v12, %v3781_v6  ;;  %v407_v23 = vsel %vm359_vm0, %v402_v15, %v406_v11  ;;  %v3216_v26 = vld [vmem:[%s4560_s1 + $0x284] ss:$8 sps:$4 sm:$0xff]   ;;  %v3244_v62 = vld [vmem:[%s4560_s1 + $0x54] ss:$8 sps:$4 sm:$0xff]   ;;  %v3245_v1 = vld [vmem:[%s4560_s1 + $0x150] ss:$8 sps:$4 sm:$0xff]  }
  0x26   : > { %812 = vmatpush1.bf16.msra.mxu1 %v3167_v27  ;;  %762 = vmatprep.subr.bf16.mxu0 %v3168_v28  ;;  %v361_v27 = vshrl.u32 %v3784_v7, 16  ;;  %v368_v28 = vshll.u32 %v3798_v16, 16  ;;  %v3247_v63 = vld [vmem:[%s4560_s1 + $0x154] ss:$8 sps:$4 sm:$0xff]   ;;  %v3253_v5 = vld [vmem:[%s4560_s1 + $0x144] ss:$8 sps:$4 sm:$0xff]  }
  0x27   : > { %813 = vmatprep.subr.bf16.mxu1 %v3170_v29  ;;  %780 = vmatprep.mubr.bf16.mxu0 %v383_v18  ;;  %v365_v29 = vrot.slane %v363_v19, 1  ;;  %v3256_v10 = vld [vmem:[%s4560_s1 + $0x34] ss:$8 sps:$4 sm:$0xff]   ;;  %v3254_v12 = vld [vmem:[%s4560_s1 + $0x30] ss:$8 sps:$4 sm:$0xff]  }
  0x28   : > { %831 = vmatprep.mubr.bf16.mxu1 %v407_v23  ;;  %v3263_v15 = vld [vmem:[%s4560_s1 + $0x120] ss:$8 sps:$4 sm:$0xff]   ;;  %v3271_v18 = vld [vmem:[%s4560_s1 + $0x114] ss:$8 sps:$4 sm:$0xff]   ;;  %v3266_v19 = vld [vmem:[%s4560_s1 + $0x10] ss:$8 sps:$4 sm:$0xff]  }
  0x29   : > { %763 = vmatpush1.bf16.msra.mxu0 %v3172_v30  ;;  %v385_v30 = vshrl.u32 %v3787_v8, 16  ;;  %v3277_v23 = vld [vmem:[%s4560_s1 + $0x104] ss:$8 sps:$4 sm:$0xff]   ;;  %vm1369_vm1 = vsmask.f32 5376 }
  0x2a   : > { %814 = vmatpush1.bf16.msra.mxu1 %v3173_v31  ;;  %764 = vmatprep.subr.bf16.mxu0 %v3174_v32  ;;  %v389_v31 = vrot.slane %v387_v21, 1  ;;  %v392_v32 = vshll.u32 %v3806_v20, 16  ;;  %v3269_v21 = vld [vmem:[%s4560_s1 + $0x110] ss:$8 sps:$4 sm:$0xff]   ;;  %vm2562_vm5 = vsmask.f32 1280  ;;  %vm4545_vm11 = vmand %vm2564_vm6, %vm1369_vm1 }
  0x2b   : > { %815 = vmatprep.subr.bf16.mxu1 %v3176_v33  ;;  %v3218_v33 = vld [vmem:[%s4560_s1 + $0x384] ss:$8 sps:$4 sm:$0xff]   ;;  %vm4540_vm7 = vmand %vm2561_vm4, %vm2562_vm5 }
  0x2c   : > { %vm2566_vm15 = vmor %vm4545_vm11, %vm4540_vm7 }
  0x2d   : > { %765 = vmatpush2.bf16.msra.mxu0 %v3178_v34  ;;  %v3220_v34 = vld [vmem:[%s4560_s1 + $0x280] ss:$8 sps:$4 sm:$0xff]  }
  0x2e   : > { %816 = vmatpush2.bf16.msra.mxu1 %v3179_v35  ;;  %766 = vmatprep.subr.bf16.mxu0 %v3180_v36  ;;  %v3221_v35 = vld [vmem:[%s4560_s1 + $0x380] ss:$8 sps:$4 sm:$0xff]   ;;  %v366_v36 = vor.u32 %v365_v29, %v361_v27  ;;  %v3283_v27 = vld [vmem:[%s4560_s1 + $0x1f4] ss:$8 sps:$4 sm:$0xff]   ;;  %v3281_v29 = vld [vmem:[%s4560_s1 + $0x1f0] ss:$8 sps:$4 sm:$0xff]  }
  0x2f   : > { %817 = vmatprep.subr.bf16.mxu1 %v3182_v37  ;;  %v370_v37 = vrot.slane %v368_v28, 1  ;;  %v3278_v28 = vld [vmem:[%s4560_s1 + $0xf0] ss:$8 sps:$4 sm:$0xff]  }
  0x31   : > { %767 = vmatpush2.bf16.msra.mxu0 %v3184_v38  ;;  %v390_v38 = vor.u32 %v389_v31, %v385_v30  ;;  %v3286_v30 = vld [vmem:[%s4560_s1 + $0xe4] ss:$8 sps:$4 sm:$0xff]  }
  0x32   : > { %818 = vmatpush2.bf16.msra.mxu1 %v3185_v39  ;;  %768 = vmatprep.subr.bf16.mxu0 %v3186_v40  ;;  %v394_v39 = vrot.slane %v392_v32, 1  ;;  %v3232_v40 = vld [vmem:[%s4560_s1 + $0x74] ss:$8 sps:$4 sm:$0xff]   ;;  %v3289_v31 = vld [vmem:[%s4560_s1 + $0x1e4] ss:$8 sps:$4 sm:$0xff]  }
  0x33   : > { %819 = vmatprep.subr.bf16.mxu1 %v3188_v41  ;;  %v3235_v41 = vld [vmem:[%s4560_s1 + $0x174] ss:$8 sps:$4 sm:$0xff]   ;;  %v3284_v32 = vld [vmem:[%s4560_s1 + $0xe0] ss:$8 sps:$4 sm:$0xff]  }
  0x34   : > { %v416_v3 = vor.u32 %v414_v61, %v394_v39  ;;  %v3325_v61 = vld [vmem:[%s4560_s1 + $0x184] ss:$8 sps:$4 sm:$0xff]  }
  0x35   : > { %769 = vmatpush2.bf16.msra.mxu0 %v3190_v42  ;;  %v411_v42 = vshrl.u32 %v3749_v53, 16 }
  0x36   : > { %820 = vmatpush2.bf16.msra.mxu1 %v3191_v43  ;;  %770 = vmatprep.subr.bf16.mxu0 %v3192_v44  ;;  %v417_v43 = vshrl.u32 %v3764_v59, 16  ;;  %v3230_v44 = vld [vmem:[%s4560_s1 + $0x70] ss:$8 sps:$4 sm:$0xff]  }
  0x37   : > { %821 = vmatprep.subr.bf16.mxu1 %v3194_v45  ;;  %v3233_v45 = vld [vmem:[%s4560_s1 + $0x170] ss:$8 sps:$4 sm:$0xff]   ;;  %v413_v55 = vor.u32 %v411_v42, %v3781_v6  ;;  %v3248_v6 = vld [vmem:[%s4560_s1 + $0x40] ss:$8 sps:$4 sm:$0xff]   ;;  %v3304_v42 = vld [vmem:[%s4560_s1 + $0xb4] ss:$8 sps:$4 sm:$0xff]  }
  0x39   : > { %771 = vmatpush2.bf16.msra.mxu0 %v3196_v46  ;;  %v371_v46 = vsel %vm359_vm0, %v366_v36, %v370_v37  ;;  %v3290_v36 = vld [vmem:[%s4560_s1 + $0xd0] ss:$8 sps:$4 sm:$0xff]  }
  0x3a   : > { %822 = vmatpush2.bf16.msra.mxu1 %v3197_v47  ;;  %772 = vmatprep.subr.bf16.mxu0 %v3198_v56  ;;  %v395_v47 = vsel %vm359_vm0, %v390_v38, %v394_v39  ;;  %v419_v56 = vor.u32 %v417_v43, %v406_v11  ;;  %v3259_v11 = vld [vmem:[%s4560_s1 + $0x134] ss:$8 sps:$4 sm:$0xff]   ;;  %v3298_v38 = vld [vmem:[%s4560_s1 + $0xc4] ss:$8 sps:$4 sm:$0xff]  }
  0x3b   : > { %823 = vmatprep.subr.bf16.mxu1 %v3200_v57  ;;  %v3239_v57 = vld [vmem:[%s4560_s1 + $0x160] ss:$8 sps:$4 sm:$0xff]   ;;  %v3301_v39 = vld [vmem:[%s4560_s1 + $0x1c4] ss:$8 sps:$4 sm:$0xff]   ;;  %v3307_v43 = vld [vmem:[%s4560_s1 + $0x1b4] ss:$8 sps:$4 sm:$0xff]  }
  0x3d   : > { %773 = vmatpush2.bf16.msra.mxu0 %v3202_v60  ;;  %v408_v60 = vshrl.u32 %v3798_v16, 16 }
  0x3e   : > { %824 = vmatpush2.bf16.msra.mxu1 %v3203_v0  ;;  %774 = vmatprep.subr.bf16.mxu0 %v3204_v4  ;;  %v3242_v0 = vld [vmem:[%s4560_s1 + $0x50] ss:$8 sps:$4 sm:$0xff]   ;;  %v3250_v4 = vld [vmem:[%s4560_s1 + $0x44] ss:$8 sps:$4 sm:$0xff]  }
  0x3f   : > { %825 = vmatprep.subr.bf16.mxu1 %v3206_v9  ;;  %v410_v2 = vor.u32 %v408_v60, %v370_v37  ;;  %v3251_v9 = vld [vmem:[%s4560_s1 + $0x140] ss:$8 sps:$4 sm:$0xff]   ;;  %v3293_v37 = vld [vmem:[%s4560_s1 + $0x1d0] ss:$8 sps:$4 sm:$0xff]   ;;  %v3322_v60 = vld [vmem:[%s4560_s1 + $0x84] ss:$8 sps:$4 sm:$0xff]  }
  0x41   : > { %775 = vmatpush2.bf16.msra.mxu0 %v3208_v13  ;;  %v3257_v13 = vld [vmem:[%s4560_s1 + $0x130] ss:$8 sps:$4 sm:$0xff]  }
  0x42   : > { %826 = vmatpush2.bf16.msra.mxu1 %v3209_v14  ;;  %776 = vmatprep.subr.bf16.mxu0 %v3210_v17  ;;  %v3262_v14 = vld [vmem:[%s4560_s1 + $0x24] ss:$8 sps:$4 sm:$0xff]   ;;  %v3268_v17 = vld [vmem:[%s4560_s1 + $0x14] ss:$8 sps:$4 sm:$0xff]  }
  0x43   : > { %827 = vmatprep.subr.bf16.mxu1 %v3212_v22  ;;  %v3274_v22 = vld [vmem:[%s4560_s1 + $0x4] ss:$8 sps:$4 sm:$0xff]  }
  0x45   : > { %777 = vmatpush2.bf16.msra.mxu0 %v3214_v24  ;;  %v3272_v24 = vld [vmem:[%s4560_s1] ss:$8 sps:$4 sm:$0xff]  }
  0x46   : > { %828 = vmatpush2.bf16.msra.mxu1 %v3215_v25  ;;  %778 = vmatprep.subr.bf16.mxu0 %v3216_v26  ;;  %v3275_v25 = vld [vmem:[%s4560_s1 + $0x100] ss:$8 sps:$4 sm:$0xff]   ;;  %v3280_v26 = vld [vmem:[%s4560_s1 + $0xf4] ss:$8 sps:$4 sm:$0xff]  }
  0x47   : > { %829 = vmatprep.subr.bf16.mxu1 %v3218_v33  ;;  %v3287_v33 = vld [vmem:[%s4560_s1 + $0x1e0] ss:$8 sps:$4 sm:$0xff]  }
  0x49   : > { %779 = vmatpush2.bf16.msra.mxu0 %v3220_v34  ;;  %v3292_v34 = vld [vmem:[%s4560_s1 + $0xd4] ss:$8 sps:$4 sm:$0xff]  }
  0x4a   : > { %830 = vmatpush2.bf16.msra.mxu1 %v3221_v35  ;;  %1178 = vmatprep.subr.bf16.mxu0 %v3232_v40  ;;  %v3295_v35 = vld [vmem:[%s4560_s1 + $0x1d4] ss:$8 sps:$4 sm:$0xff]   ;;  %v3296_v40 = vld [vmem:[%s4560_s1 + $0xc0] ss:$8 sps:$4 sm:$0xff]  }
  0x4b   : > { %1229 = vmatprep.subr.bf16.mxu1 %v3235_v41  ;;  %v3299_v41 = vld [vmem:[%s4560_s1 + $0x1c0] ss:$8 sps:$4 sm:$0xff]  }
  0x4c   : > { %781 = vmatmul.mubr.bf16.vlgmr.msra.gmra.mxu0 %v371_v46  ;;  %v3310_v46 = vld [vmem:[%s4560_s1 + $0xa4] ss:$8 sps:$4 sm:$0xff]  }
  0x4d   : > { %832 = vmatmul.mubr.bf16.vlgmr.msra.gmra.mxu1 %v395_v47  ;;  %1179 = vmatpush1.bf16.msra.mxu0 %v3230_v44  ;;  %v3302_v44 = vld [vmem:[%s4560_s1 + $0xb0] ss:$8 sps:$4 sm:$0xff]   ;;  %v3313_v47 = vld [vmem:[%s4560_s1 + $0x1a4] ss:$8 sps:$4 sm:$0xff]  }
  0x4e   : > { %1230 = vmatpush1.bf16.msra.mxu1 %v3233_v45  ;;  %1180 = vmatprep.subr.bf16.mxu0 %v3238_v48  ;;  %v3305_v45 = vld [vmem:[%s4560_s1 + $0x1b0] ss:$8 sps:$4 sm:$0xff]   ;;  %v3308_v48 = vld [vmem:[%s4560_s1 + $0xa0] ss:$8 sps:$4 sm:$0xff]  }
  0x4f   : > { %1231 = vmatprep.subr.bf16.mxu1 %v3241_v50  ;;  %790 = vmatprep.mubr.bf16.mxu0 %v413_v55  ;;  %v3311_v50 = vld [vmem:[%s4560_s1 + $0x1a0] ss:$8 sps:$4 sm:$0xff]   ;;  %v3319_v55 = vld [vmem:[%s4560_s1 + $0x194] ss:$8 sps:$4 sm:$0xff]  }
  0x50   : > { %841 = vmatprep.mubr.bf16.mxu1 %v419_v56  ;;  %v3314_v56 = vld [vmem:[%s4560_s1 + $0x90] ss:$8 sps:$4 sm:$0xff]  }
  0x51   : > { %1181 = vmatpush1.bf16.msra.mxu0 %v3236_v51  ;;  %v3316_v51 = vld [vmem:[%s4560_s1 + $0x94] ss:$8 sps:$4 sm:$0xff]  }
  0x52   : > { %1232 = vmatpush1.bf16.msra.mxu1 %v3239_v57  ;;  %1182 = vmatprep.subr.bf16.mxu0 %v3244_v62  ;;  %v3317_v57 = vld [vmem:[%s4560_s1 + $0x190] ss:$8 sps:$4 sm:$0xff]   ;;  %v3320_v62 = vld [vmem:[%s4560_s1 + $0x80] ss:$8 sps:$4 sm:$0xff]  }
  0x53   : > { %1233 = vmatprep.subr.bf16.mxu1 %v3247_v63  ;;  %v3323_v63 = vld [vmem:[%s4560_s1 + $0x180] ss:$8 sps:$4 sm:$0xff]  }
  0x54   : > { %791 = vmatmul.mubr.bf16.gmra.mxu0 %v410_v2  ;;  %v3326_v2 = vld [vmem:[%s4560_s1 + $0x470] ss:$8 sps:$4 sm:$0xff]  }
  0x55   : > { %842 = vmatmul.mubr.bf16.gmra.mxu1 %v416_v3  ;;  %1183 = vmatpush1.bf16.msra.mxu0 %v3242_v0  ;;  %v3328_v0 = vld [vmem:[%s4560_s1 + $0x474] ss:$8 sps:$4 sm:$0xff]   ;;  %v3329_v3 = vld [vmem:[%s4560_s1 + $0x570] ss:$8 sps:$4 sm:$0xff]  }
  0x56   : > { %1234 = vmatpush1.bf16.msra.mxu1 %v3245_v1  ;;  %1184 = vmatprep.subr.bf16.mxu0 %v3250_v4  ;;  %v3331_v1 = vld [vmem:[%s4560_s1 + $0x574] ss:$8 sps:$4 sm:$0xff]   ;;  %v3334_v4 = vld [vmem:[%s4560_s1 + $0x464] ss:$8 sps:$4 sm:$0xff]  }
  0x57   : > { %1235 = vmatprep.subr.bf16.mxu1 %v3253_v5  ;;  %1210 = vmatprep.mubr.bf16.mxu0 %v3747_v52  ;;  %v3265_v52 = vld [vmem:[%s4560_s1 + $0x124] ss:$8 sps:$4 sm:$0xff]  }
  0x58   : > { %1261 = vmatprep.mubr.bf16.mxu1 %v3762_v58  ;;  %v3260_v58 = vld [vmem:[%s4560_s1 + $0x20] ss:$8 sps:$4 sm:$0xff]   ;;  %v3337_v5 = vld [vmem:[%s4560_s1 + $0x564] ss:$8 sps:$4 sm:$0xff]  }
  0x59   : > { %1185 = vmatpush1.bf16.msra.mxu0 %v3248_v6  ;;  %v3332_v6 = vld [vmem:[%s4560_s1 + $0x460] ss:$8 sps:$4 sm:$0xff]  }
  0x5a   : > { %1236 = vmatpush1.bf16.msra.mxu1 %v3251_v9  ;;  %1186 = vmatprep.subr.bf16.mxu0 %v3256_v10  ;;  %v3335_v9 = vld [vmem:[%s4560_s1 + $0x560] ss:$8 sps:$4 sm:$0xff]   ;;  %v3340_v10 = vld [vmem:[%s4560_s1 + $0x454] ss:$8 sps:$4 sm:$0xff]  }
  0x5b   : > { %1237 = vmatprep.subr.bf16.mxu1 %v3259_v11  ;;  %v4066_v11 = vld [vmem:[%s3726_s6] sm:$0xcc] }
  0x5d   : > { %1187 = vmatpush1.bf16.msra.mxu0 %v3254_v12  ;;  %v4069_v12 = vld [vmem:[%s3726_s6 + $0x20] sm:$0xff] }
  0x5e   : > { %1238 = vmatpush1.bf16.msra.mxu1 %v3257_v13  ;;  %1188 = vmatprep.subr.bf16.mxu0 %v3262_v14  ;;  %v4077_v13 = vld [vmem:[%s3726_s6 + $0x8] sm:$0xcc] }
  0x5f   : > { %1239 = vmatprep.subr.bf16.mxu1 %v3265_v52  ;;  %v4080_v14 = vld [vmem:[%s3726_s6 + $0x28] sm:$0xff]  ;;  %v3338_v52 = vld [vmem:[%s4560_s1 + $0x450] ss:$8 sps:$4 sm:$0xff]  }
  0x61   : > { %1189 = vmatpush1.bf16.msra.mxu0 %v3260_v58  ;;  %v2902_v58 = vcombine.high %v4069_v12, %v4069_v12 }
  0x62   : > { %1240 = vmatpush1.bf16.msra.mxu1 %v3263_v15  ;;  %1190 = vmatprep.subr.bf16.mxu0 %v3268_v17  ;;  %v2900_v15 = vcombine.high %v4077_v13, %v3752_v54  ;;  %v3349_v54 = vld [vmem:[%s4560_s1 + $0x544] ss:$8 sps:$4 sm:$0xff]  }
  0x63   : > { %1241 = vmatprep.subr.bf16.mxu1 %v3271_v18 }
  0x65   : > { %1191 = vmatpush1.bf16.msra.mxu0 %v3266_v19  ;;  %v1396_v19 = vshrl.u32 %v2902_v58, 16 }
  0x66   : > { %1242 = vmatpush1.bf16.msra.mxu1 %v3269_v21  ;;  %1192 = vmatprep.subr.bf16.mxu0 %v3274_v22  ;;  %v1399_v21 = vshll.u32 %v2902_v58, 16  ;;  %v1422_v22 = vshrl.u32 %v2900_v15, 16  ;;  %v3392_v58 = vld [vmem:[%s4560_s1 + $0x4c0] ss:$8 sps:$4 sm:$0xff]  }
  0x67   : > { %1243 = vmatprep.subr.bf16.mxu1 %v3277_v23  ;;  %v1425_v23 = vshll.u32 %v2900_v15, 16  ;;  %v3395_v15 = vld [vmem:[%s4560_s1 + $0x5c0] ss:$8 sps:$4 sm:$0xff]  }
  0x69   : > { %1193 = vmatpush1.bf16.msra.mxu0 %v3272_v24 }
  0x6a   : > { %1244 = vmatpush1.bf16.msra.mxu1 %v3275_v25  ;;  %1194 = vmatprep.subr.bf16.mxu0 %v3280_v26 }
  0x6b   : > { %1245 = vmatprep.subr.bf16.mxu1 %v3283_v27 }
  0x6d   : > { %1195 = vmatpush2.bf16.msra.mxu0 %v3278_v28  ;;  %v1398_v28 = vrot.slane %v1396_v19, 2  ;;  %v2901_v19 = vcombine.low %v4069_v12, %v4069_v12 }
  0x6e   : > { %1246 = vmatpush2.bf16.msra.mxu1 %v3281_v29  ;;  %1196 = vmatprep.subr.bf16.mxu0 %v3286_v30  ;;  %v1401_v29 = vrot.slane %v1399_v21, 3  ;;  %v1424_v30 = vrot.slane %v1422_v22, 2  ;;  %v3541_v21 = vld [vmem:[%s3726_s6 + $0x18] sm:$0xff] }
  0x6f   : > { %1247 = vmatprep.subr.bf16.mxu1 %v3289_v31  ;;  %v1427_v31 = vrot.slane %v1425_v23, 3  ;;  %v2899_v22 = vcombine.low %v4077_v13, %v3541_v21  ;;  %v3401_v23 = vld [vmem:[%s4560_s1 + $0x5b0] ss:$8 sps:$4 sm:$0xff]   ;;  %v3404_v13 = vld [vmem:[%s4560_s1 + $0x4a0] ss:$8 sps:$4 sm:$0xff]  }
  0x71   : > { %1197 = vmatpush2.bf16.msra.mxu0 %v3284_v32 }
  0x72   : > { %1248 = vmatpush2.bf16.msra.mxu1 %v3287_v33  ;;  %1198 = vmatprep.subr.bf16.mxu0 %v3292_v34 }
  0x73   : > { %1249 = vmatprep.subr.bf16.mxu1 %v3295_v35  ;;  %v3344_v35 = vld [vmem:[%s4560_s1 + $0x440] ss:$8 sps:$4 sm:$0xff]  }
  0x75   : > { %1199 = vmatpush2.bf16.msra.mxu0 %v3290_v36  ;;  %v3347_v36 = vld [vmem:[%s4560_s1 + $0x540] ss:$8 sps:$4 sm:$0xff]  }
  0x76   : > { %1250 = vmatpush2.bf16.msra.mxu1 %v3293_v37  ;;  %1200 = vmatprep.subr.bf16.mxu0 %v3298_v38  ;;  %v4110_v37 = vor.u32 %v1401_v29, %v1398_v28  ;;  %v1428_v38 = vor.u32 %v1427_v31, %v1424_v30  ;;  %v1379_v28 = vshrl.u32 %v2901_v19, 16  ;;  %v1382_v29 = vshll.u32 %v2901_v19, 16  ;;  %v3445_v19 = vld [vmem:[%s4560_s1 + $0x750] ss:$8 sps:$4 sm:$0xff]  }
  0x77   : > { %1251 = vmatprep.subr.bf16.mxu1 %v3301_v39  ;;  %v1405_v30 = vshrl.u32 %v2899_v22, 16  ;;  %v1408_v31 = vshll.u32 %v2899_v22, 16 }
  0x79   : > { %1201 = vmatpush2.bf16.msra.mxu0 %v3296_v40 }
  0x7a   : > { %1252 = vmatpush2.bf16.msra.mxu1 %v3299_v41  ;;  %1202 = vmatprep.subr.bf16.mxu0 %v3304_v42  ;;  %v3350_v41 = vld [vmem:[%s4560_s1 + $0x430] ss:$8 sps:$4 sm:$0xff]  }
  0x7b   : > { %1253 = vmatprep.subr.bf16.mxu1 %v3307_v43  ;;  %v3353_v43 = vld [vmem:[%s4560_s1 + $0x530] ss:$8 sps:$4 sm:$0xff]  }
  0x7d   : > { %1203 = vmatpush2.bf16.msra.mxu0 %v3302_v44  ;;  %v3358_v44 = vld [vmem:[%s4560_s1 + $0x424] ss:$8 sps:$4 sm:$0xff]  }
  0x7e   : > { %1254 = vmatpush2.bf16.msra.mxu1 %v3305_v45  ;;  %1204 = vmatprep.subr.bf16.mxu0 %v3310_v46  ;;  %v3361_v45 = vld [vmem:[%s4560_s1 + $0x524] ss:$8 sps:$4 sm:$0xff]   ;;  %v3356_v46 = vld [vmem:[%s4560_s1 + $0x420] ss:$8 sps:$4 sm:$0xff]  }
  0x7f   : > { %1255 = vmatprep.subr.bf16.mxu1 %v3313_v47  ;;  %v3359_v47 = vld [vmem:[%s4560_s1 + $0x520] ss:$8 sps:$4 sm:$0xff]  }
  0x81   : > { %1205 = vmatpush2.bf16.msra.mxu0 %v3308_v48  ;;  %v3364_v48 = vld [vmem:[%s4560_s1 + $0x414] ss:$8 sps:$4 sm:$0xff]  }
  0x82   : > { %1256 = vmatpush2.bf16.msra.mxu1 %v3311_v50  ;;  %1206 = vmatprep.subr.bf16.mxu0 %v3316_v51  ;;  %v3367_v50 = vld [vmem:[%s4560_s1 + $0x514] ss:$8 sps:$4 sm:$0xff]   ;;  %v3362_v51 = vld [vmem:[%s4560_s1 + $0x410] ss:$8 sps:$4 sm:$0xff]  }
  0x83   : > { %1257 = vmatprep.subr.bf16.mxu1 %v3319_v55  ;;  %v3365_v55 = vld [vmem:[%s4560_s1 + $0x510] ss:$8 sps:$4 sm:$0xff]  }
  0x85   : > { %1207 = vmatpush2.bf16.msra.mxu0 %v3314_v56  ;;  %v3370_v56 = vld [vmem:[%s4560_s1 + $0x404] ss:$8 sps:$4 sm:$0xff]  }
  0x86   : > { %1258 = vmatpush2.bf16.msra.mxu1 %v3317_v57  ;;  %1208 = vmatprep.subr.bf16.mxu0 %v3322_v60  ;;  %v3373_v57 = vld [vmem:[%s4560_s1 + $0x504] ss:$8 sps:$4 sm:$0xff]   ;;  %v3368_v60 = vld [vmem:[%s4560_s1 + $0x400] ss:$8 sps:$4 sm:$0xff]  }
  0x87   : > { %1259 = vmatprep.subr.bf16.mxu1 %v3325_v61  ;;  %v3371_v61 = vld [vmem:[%s4560_s1 + $0x500] ss:$8 sps:$4 sm:$0xff]  }
  0x89   : > { %1209 = vmatpush2.bf16.msra.mxu0 %v3320_v62  ;;  %v3376_v62 = vld [vmem:[%s4560_s1 + $0x4f4] ss:$8 sps:$4 sm:$0xff]  }
  0x8a   : > { %1260 = vmatpush2.bf16.msra.mxu1 %v3323_v63  ;;  %1766 = vmatprep.subr.bf16.mxu0 %v3328_v0  ;;  %v3379_v63 = vld [vmem:[%s4560_s1 + $0x5f4] ss:$8 sps:$4 sm:$0xff]   ;;  %v3374_v0 = vld [vmem:[%s4560_s1 + $0x4f0] ss:$8 sps:$4 sm:$0xff]  }
  0x8b   : > { %1817 = vmatprep.subr.bf16.mxu1 %v3331_v1  ;;  %v3377_v1 = vld [vmem:[%s4560_s1 + $0x5f0] ss:$8 sps:$4 sm:$0xff]  }
  0x8c   : > { %1211 = vmatmul.mubr.bf16.vlgmr.msra.gmra.mxu0 %v3784_v7  ;;  %v3343_v7 = vld [vmem:[%s4560_s1 + $0x554] ss:$8 sps:$4 sm:$0xff]  }
  0x8d   : > { %1262 = vmatmul.mubr.bf16.vlgmr.msra.gmra.mxu1 %v3787_v8  ;;  %1767 = vmatpush1.bf16.msra.mxu0 %v3326_v2  ;;  %v2898_v8 = vcombine.high %v4066_v11, %v3742_v49  ;;  %v3341_v49 = vld [vmem:[%s4560_s1 + $0x550] ss:$8 sps:$4 sm:$0xff]   ;;  %v3382_v2 = vld [vmem:[%s4560_s1 + $0x4e4] ss:$8 sps:$4 sm:$0xff]  }
  0x8e   : > { %1818 = vmatpush1.bf16.msra.mxu1 %v3329_v3  ;;  %1768 = vmatprep.subr.bf16.mxu0 %v3334_v4  ;;  %v3385_v3 = vld [vmem:[%s4560_s1 + $0x5e4] ss:$8 sps:$4 sm:$0xff]   ;;  %v3380_v4 = vld [vmem:[%s4560_s1 + $0x4e0] ss:$8 sps:$4 sm:$0xff]  }
  0x8f   : > { %1819 = vmatprep.subr.bf16.mxu1 %v3337_v5  ;;  %1220 = vmatprep.mubr.bf16.mxu0 %v3749_v53  ;;  %v3346_v53 = vld [vmem:[%s4560_s1 + $0x444] ss:$8 sps:$4 sm:$0xff]   ;;  %v1388_v17 = vshrl.u32 %v2898_v8, 16  ;;  %v1391_v18 = vshll.u32 %v2898_v8, 16  ;;  %v3383_v5 = vld [vmem:[%s4560_s1 + $0x5e0] ss:$8 sps:$4 sm:$0xff]  }
  0x90   : > { %1271 = vmatprep.mubr.bf16.mxu1 %v3764_v59  ;;  %v2904_v59 = vcombine.high %v4080_v14, %v4080_v14  ;;  %v3394_v8 = vld [vmem:[%s4560_s1 + $0x4c4] ss:$8 sps:$4 sm:$0xff]  }
  0x91   : > { %1769 = vmatpush1.bf16.msra.mxu0 %v3332_v6  ;;  %v1390_v24 = vrot.slane %v1388_v17, 2  ;;  %v1393_v25 = vrot.slane %v1391_v18, 3  ;;  %v3388_v6 = vld [vmem:[%s4560_s1 + $0x4d4] ss:$8 sps:$4 sm:$0xff]  }
  0x92   : > { %1820 = vmatpush1.bf16.msra.mxu1 %v3335_v9  ;;  %1770 = vmatprep.subr.bf16.mxu0 %v3340_v10  ;;  %v1430_v26 = vshrl.u32 %v2904_v59, 16  ;;  %v1433_v27 = vshll.u32 %v2904_v59, 16  ;;  %v3391_v9 = vld [vmem:[%s4560_s1 + $0x5d4] ss:$8 sps:$4 sm:$0xff]   ;;  %v3386_v10 = vld [vmem:[%s4560_s1 + $0x4d0] ss:$8 sps:$4 sm:$0xff]  }
  0x93   : > { %1821 = vmatprep.subr.bf16.mxu1 %v3343_v7  ;;  %v1394_v32 = vor.u32 %v1393_v25, %v1390_v24  ;;  %v3389_v7 = vld [vmem:[%s4560_s1 + $0x5d0] ss:$8 sps:$4 sm:$0xff]   ;;  %v3409_v24 = vld [vmem:[%s4560_s1 + $0x5a4] ss:$8 sps:$4 sm:$0xff]   ;;  %v3407_v25 = vld [vmem:[%s4560_s1 + $0x5a0] ss:$8 sps:$4 sm:$0xff]  }
  0x94   : > { %1221 = vmatmul.mubr.bf16.gmra.mxu0 %v3798_v16  ;;  %v1432_v33 = vrot.slane %v1430_v26, 2  ;;  %v1435_v34 = vrot.slane %v1433_v27, 3  ;;  %v3352_v16 = vld [vmem:[%s4560_s1 + $0x434] ss:$8 sps:$4 sm:$0xff]   ;;  %v3398_v59 = vld [vmem:[%s4560_s1 + $0x4b0] ss:$8 sps:$4 sm:$0xff]  }
  0x95   : > { %1272 = vmatmul.mubr.bf16.gmra.mxu1 %v3806_v20  ;;  %1771 = vmatpush1.bf16.msra.mxu0 %v3338_v52  ;;  %v3355_v20 = vld [vmem:[%s4560_s1 + $0x534] ss:$8 sps:$4 sm:$0xff]   ;;  %v1403_v40 = vsel %vm1369_vm1, %v1394_v32, %v4110_v37  ;;  %v3397_v52 = vld [vmem:[%s4560_s1 + $0x5c4] ss:$8 sps:$4 sm:$0xff]  }
  0x96   : > { %1822 = vmatpush1.bf16.msra.mxu1 %v3341_v49  ;;  %1772 = vmatprep.subr.bf16.mxu0 %v3346_v53  ;;  %v4118_v39 = vor.u32 %v1435_v34, %v1432_v33  ;;  %v3400_v49 = vld [vmem:[%s4560_s1 + $0x4b4] ss:$8 sps:$4 sm:$0xff]  }
  0x97   : > { %1823 = vmatprep.subr.bf16.mxu1 %v3349_v54  ;;  %1798 = vmatprep.mubr.bf16.mxu0 %v1403_v40  ;;  %v3403_v53 = vld [vmem:[%s4560_s1 + $0x5b4] ss:$8 sps:$4 sm:$0xff]   ;;  %v2903_v54 = vcombine.low %v4080_v14, %v4080_v14  ;;  %v1384_v40 = vrot.slane %v1382_v29, 3  ;;  %v3462_v29 = vld [vmem:[%s4560_s1 + $0x624] ss:$8 sps:$4 sm:$0xff]  }
  0x98   : > { %v1437_v42 = vsel %vm1369_vm1, %v1428_v38, %v4118_v39  ;;  %v3540_v17 = vld [vmem:[%s3726_s6 + $0x10] sm:$0xff] }
  0x99   : > { %1773 = vmatpush1.bf16.msra.mxu0 %v3344_v35  ;;  %1849 = vmatprep.mubr.bf16.mxu1 %v1437_v42  ;;  %v2897_v18 = vcombine.low %v4066_v11, %v3540_v17  ;;  %v3406_v11 = vld [vmem:[%s4560_s1 + $0x4a4] ss:$8 sps:$4 sm:$0xff]   ;;  %v1413_v32 = vshrl.u32 %v2903_v54, 16  ;;  %v1416_v33 = vshll.u32 %v2903_v54, 16  ;;  %v3412_v34 = vld [vmem:[%s4560_s1 + $0x494] ss:$8 sps:$4 sm:$0xff]  }
  0x9a   : > { %1824 = vmatpush1.bf16.msra.mxu1 %v3347_v36  ;;  %1774 = vmatprep.subr.bf16.mxu0 %v3352_v16  ;;  %v3415_v35 = vld [vmem:[%s4560_s1 + $0x594] ss:$8 sps:$4 sm:$0xff]   ;;  %v3410_v36 = vld [vmem:[%s4560_s1 + $0x490] ss:$8 sps:$4 sm:$0xff]   ;;  %v1407_v42 = vrot.slane %v1405_v30, 2 }
  0x9b   : > { %1825 = vmatprep.subr.bf16.mxu1 %v3355_v20  ;;  %v1371_v26 = vshrl.u32 %v2897_v18, 16  ;;  %v1374_v27 = vshll.u32 %v2897_v18, 16  ;;  %v1381_v20 = vrot.slane %v1379_v28, 2  ;;  %v3451_v54 = vld [vmem:[%s4560_s1 + $0x740] ss:$8 sps:$4 sm:$0xff]  }
  0x9c   : > { %v2430_v28 = vld [vmem:[%s4562_s3 + $0x10] sm:$0x7]  ;;  %v3465_v30 = vld [vmem:[%s4560_s1 + $0x724] ss:$8 sps:$4 sm:$0xff]  }
  0x9d   : > { %1775 = vmatpush1.bf16.msra.mxu0 %v3350_v41  ;;  %v1373_v38 = vrot.slane %v1371_v26, 2  ;;  %v1376_v16 = vrot.slane %v1374_v27, 3  ;;  %v3413_v41 = vld [vmem:[%s4560_s1 + $0x590] ss:$8 sps:$4 sm:$0xff]  }
  0x9e   : > { %1826 = vmatpush1.bf16.msra.mxu1 %v3353_v43  ;;  %1776 = vmatprep.subr.bf16.mxu0 %v3358_v44  ;;  %v1410_v43 = vrot.slane %v1408_v31, 3  ;;  %v1415_v44 = vrot.slane %v1413_v32, 2  ;;  %v3454_v26 = vld [vmem:[%s4560_s1 + $0x630] ss:$8 sps:$4 sm:$0xff]   ;;  %v2429_v31 = vld [vmem:[%s4562_s3 + $0x8] sm:$0xff] }
  0x9f   : > { %1827 = vmatprep.subr.bf16.mxu1 %v3361_v45  ;;  %v1418_v45 = vrot.slane %v1416_v33, 3  ;;  %v3457_v27 = vld [vmem:[%s4560_s1 + $0x730] ss:$8 sps:$4 sm:$0xff]   ;;  %v3460_v32 = vld [vmem:[%s4560_s1 + $0x620] ss:$8 sps:$4 sm:$0xff]  }
  0xa0   : > { %v3463_v33 = vld [vmem:[%s4560_s1 + $0x720] ss:$8 sps:$4 sm:$0xff]  }
  0xa1   : > { %1777 = vmatpush1.bf16.msra.mxu0 %v3356_v46  ;;  %v3418_v46 = vld [vmem:[%s4560_s1 + $0x484] ss:$8 sps:$4 sm:$0xff]  }
  0xa2   : > { %1828 = vmatpush1.bf16.msra.mxu1 %v3359_v47  ;;  %1778 = vmatprep.subr.bf16.mxu0 %v3364_v48  ;;  %v3421_v47 = vld [vmem:[%s4560_s1 + $0x584] ss:$8 sps:$4 sm:$0xff]   ;;  %v1377_v48 = vor.u32 %v1376_v16, %v1373_v38  ;;  %v3469_v38 = vld [vmem:[%s4560_s1 + $0x710] ss:$8 sps:$4 sm:$0xff]  }
  0xa3   : > { %1829 = vmatprep.subr.bf16.mxu1 %v3367_v50  ;;  %v3416_v50 = vld [vmem:[%s4560_s1 + $0x480] ss:$8 sps:$4 sm:$0xff]   ;;  %v3474_v16 = vld [vmem:[%s4560_s1 + $0x604] ss:$8 sps:$4 sm:$0xff]  }
  0xa5   : > { %1779 = vmatpush1.bf16.msra.mxu0 %v3362_v51  ;;  %v3419_v51 = vld [vmem:[%s4560_s1 + $0x580] ss:$8 sps:$4 sm:$0xff]  }
  0xa6   : > { %1830 = vmatpush1.bf16.msra.mxu1 %v3365_v55  ;;  %1780 = vmatprep.subr.bf16.mxu0 %v3370_v56  ;;  %v1385_v55 = vor.u32 %v1384_v40, %v1381_v20  ;;  %v1411_v56 = vor.u32 %v1410_v43, %v1407_v42  ;;  %v3477_v20 = vld [vmem:[%s4560_s1 + $0x704] ss:$8 sps:$4 sm:$0xff]   ;;  %v3472_v40 = vld [vmem:[%s4560_s1 + $0x600] ss:$8 sps:$4 sm:$0xff]   ;;  %v3480_v42 = vld [vmem:[%s4560_s1 + $0x6f4] ss:$8 sps:$4 sm:$0xff]  }
  0xa7   : > { %1831 = vmatprep.subr.bf16.mxu1 %v3373_v57  ;;  %v1419_v57 = vor.u32 %v1418_v45, %v1415_v44  ;;  %v3483_v43 = vld [vmem:[%s4560_s1 + $0x7f4] ss:$8 sps:$4 sm:$0xff]   ;;  %v3478_v44 = vld [vmem:[%s4560_s1 + $0x6f0] ss:$8 sps:$4 sm:$0xff]  }
  0xa8   : > { %v3481_v45 = vld [vmem:[%s4560_s1 + $0x7f0] ss:$8 sps:$4 sm:$0xff]  }
  0xa9   : > { %1781 = vmatpush1.bf16.msra.mxu0 %v3368_v60  ;;  %v3432_v60 = vld [vmem:[%s4560_s1 + $0x674] ss:$8 sps:$4 sm:$0xff]  }
  0xaa   : > { %1832 = vmatpush1.bf16.msra.mxu1 %v3371_v61  ;;  %1782 = vmatprep.subr.bf16.mxu0 %v3376_v62  ;;  %v3435_v61 = vld [vmem:[%s4560_s1 + $0x774] ss:$8 sps:$4 sm:$0xff]   ;;  %v3430_v62 = vld [vmem:[%s4560_s1 + $0x670] ss:$8 sps:$4 sm:$0xff]  }
  0xab   : > { %1833 = vmatprep.subr.bf16.mxu1 %v3379_v63  ;;  %v1386_v63 = vsel %vm1369_vm1, %v1377_v48, %v1385_v55  ;;  %v3484_v48 = vld [vmem:[%s4560_s1 + $0x6e0] ss:$8 sps:$4 sm:$0xff]  }
  0xad   : > { %1783 = vmatpush2.bf16.msra.mxu0 %v3374_v0  ;;  %v1420_v0 = vsel %vm1369_vm1, %v1411_v56, %v1419_v57  ;;  %v3490_v56 = vld [vmem:[%s4560_s1 + $0x6d0] ss:$8 sps:$4 sm:$0xff]  }
  0xae   : > { %1834 = vmatpush2.bf16.msra.mxu1 %v3377_v1  ;;  %1784 = vmatprep.subr.bf16.mxu0 %v3382_v2  ;;  %v3433_v1 = vld [vmem:[%s4560_s1 + $0x770] ss:$8 sps:$4 sm:$0xff]  }
  0xaf   : > { %1835 = vmatprep.subr.bf16.mxu1 %v3385_v3  ;;  %v4285_v2 = vld [vmem:[%s3726_s6 + $0x30] sm:$0x11]  ;;  %v4288_v3 = vld [vmem:[%s3726_s6 + $0x38] sm:$0x11] }
  0xb1   : > { %1785 = vmatpush2.bf16.msra.mxu0 %v3380_v4  ;;  %v3438_v4 = vld [vmem:[%s4560_s1 + $0x664] ss:$8 sps:$4 sm:$0xff]  }
  0xb2   : > { %1836 = vmatpush2.bf16.msra.mxu1 %v3383_v5  ;;  %1786 = vmatprep.subr.bf16.mxu0 %v3388_v6  ;;  %v3441_v5 = vld [vmem:[%s4560_s1 + $0x764] ss:$8 sps:$4 sm:$0xff]  }
  0xb3   : > { %1837 = vmatprep.subr.bf16.mxu1 %v3391_v9  ;;  %v3528_v6 = vld [vmem:[%s3726_s6 + $0x4] ss:$16 sps:$4 sm:$0xf8]   ;;  %v3038_v9 = vcombine.high %v4069_v12, %v4285_v2 }
  0xb5   : > { %1787 = vmatpush2.bf16.msra.mxu0 %v3386_v10  ;;  %v3533_v10 = vld [vmem:[%s3726_s6 + $0xc] ss:$16 sps:$4 sm:$0xf8]  }
  0xb6   : > { %1838 = vmatpush2.bf16.msra.mxu1 %v3389_v7  ;;  %1788 = vmatprep.subr.bf16.mxu0 %v3394_v8  ;;  %v3040_v7 = vcombine.high %v4080_v14, %v4288_v3  ;;  %v3436_v8 = vld [vmem:[%s4560_s1 + $0x660] ss:$8 sps:$4 sm:$0xff]   ;;  %v1989_v17 = vrot.slane %v3533_v10, 3 }
  0xb7   : > { %1839 = vmatprep.subr.bf16.mxu1 %v3397_v52  ;;  %v3439_v52 = vld [vmem:[%s4560_s1 + $0x760] ss:$8 sps:$4 sm:$0xff]  }
  0xb8   : > { %v4318_v18 = vrot.slane %v3040_v7, 3  ;;  %v3508_v10 = vld [vmem:[%s4560_s1 + $0x6a0] ss:$8 sps:$4 sm:$0xff]  }
  0xb9   : > { %1789 = vmatpush2.bf16.msra.mxu0 %v3392_v58  ;;  %v3444_v58 = vld [vmem:[%s4560_s1 + $0x654] ss:$8 sps:$4 sm:$0xff]   ;;  %v3511_v7 = vld [vmem:[%s4560_s1 + $0x7a0] ss:$8 sps:$4 sm:$0xff]  }
  0xba   : > { %1840 = vmatpush2.bf16.msra.mxu1 %v3395_v15  ;;  %1790 = vmatprep.subr.bf16.mxu0 %v3400_v49  ;;  %v3447_v15 = vld [vmem:[%s4560_s1 + $0x754] ss:$8 sps:$4 sm:$0xff]   ;;  %v1983_v49 = vrot.slane %v3528_v6, 3  ;;  %v1991_v22 = vsel %vm1979_vm2, %v1989_v17, %v4318_v18  ;;  %v3510_v6 = vld [vmem:[%s4560_s1 + $0x6a4] ss:$8 sps:$4 sm:$0xff]   ;;  %v3037_v17 = vcombine.low %v4069_v12, %v4285_v2 }
  0xbb   : > { %1841 = vmatprep.subr.bf16.mxu1 %v3403_v53  ;;  %v4316_v53 = vrot.slane %v3038_v9, 3  ;;  %v3513_v9 = vld [vmem:[%s4560_s1 + $0x7a4] ss:$8 sps:$4 sm:$0xff]   ;;  %v3523_v12 = vld [vmem:[%s4560_s1 + $0x780] ss:$8 sps:$4 sm:$0xff]  }
  0xbc   : > { %v1981_v2 = vrot.slane %v3037_v17, 3 }
  0xbd   : > { %1791 = vmatpush2.bf16.msra.mxu0 %v3398_v59  ;;  %v3442_v59 = vld [vmem:[%s4560_s1 + $0x650] ss:$8 sps:$4 sm:$0xff]   ;;  %v1985_v21 = vsel %vm1979_vm2, %v1983_v49, %v4316_v53 }
  0xbe   : > { %1842 = vmatpush2.bf16.msra.mxu1 %v3401_v23  ;;  %1792 = vmatprep.subr.bf16.mxu0 %v3406_v11  ;;  %v3448_v23 = vld [vmem:[%s4560_s1 + $0x640] ss:$8 sps:$4 sm:$0xff]   ;;  %v3456_v11 = vld [vmem:[%s4560_s1 + $0x634] ss:$8 sps:$4 sm:$0xff]  }
  0xbf   : > { %1843 = vmatprep.subr.bf16.mxu1 %v3409_v24  ;;  %v3459_v24 = vld [vmem:[%s4560_s1 + $0x734] ss:$8 sps:$4 sm:$0xff]   ;;  %v3526_v49 = vld [vmem:[%s3726_s6] ss:$16 sps:$4 sm:$0xf8]  }
  0xc1   : > { %1793 = vmatpush2.bf16.msra.mxu0 %v3404_v13  ;;  %v3550_v13 = vmov 0  }
  0xc2   : > { %1844 = vmatpush2.bf16.msra.mxu1 %v3407_v25  ;;  %1794 = vmatprep.subr.bf16.mxu0 %v3412_v34  ;;  %v2428_v25 = vld [vmem:[%s4562_s3] sm:$0xff]  ;;  %v3468_v34 = vld [vmem:[%s4560_s1 + $0x614] ss:$8 sps:$4 sm:$0xff]  }
  0xc3   : > { %1845 = vmatprep.subr.bf16.mxu1 %v3415_v35  ;;  %3124 = vset.pattern.permute.xlu0 %v3550_v13  ;;  %v3471_v35 = vld [vmem:[%s4560_s1 + $0x714] ss:$8 sps:$4 sm:$0xff]  }
  0xc4   : > { %3125 = vset.pattern.permute.xlu1 %v3550_v13  ;;  %2433 = vperm.xlu0 %3124, %v2428_v25  }
  0xc5   : > { %1795 = vmatpush2.bf16.msra.mxu0 %v3410_v36  ;;  %2443 = vperm.xlu1 %3125, %v2430_v28   ;;  %v3466_v36 = vld [vmem:[%s4560_s1 + $0x610] ss:$8 sps:$4 sm:$0xff]  }
  0xc6   : > { %1846 = vmatpush2.bf16.msra.mxu1 %v3413_v41  ;;  %1796 = vmatprep.subr.bf16.mxu0 %v3418_v46  ;;  %v3475_v41 = vld [vmem:[%s4560_s1 + $0x700] ss:$8 sps:$4 sm:$0xff]   ;;  %v3486_v46 = vld [vmem:[%s4560_s1 + $0x6e4] ss:$8 sps:$4 sm:$0xff]  }
  0xc7   : > { %1847 = vmatprep.subr.bf16.mxu1 %v3421_v47  ;;  %v3489_v47 = vld [vmem:[%s4560_s1 + $0x7e4] ss:$8 sps:$4 sm:$0xff]  }
  0xc8   : > { %2438 = vperm.xlu0 %3124, %v2429_v31  }
  0xc9   : > { %1797 = vmatpush2.bf16.msra.mxu0 %v3416_v50  ;;  %v3487_v50 = vld [vmem:[%s4560_s1 + $0x7e0] ss:$8 sps:$4 sm:$0xff]  }
  0xca   : > { %1848 = vmatpush2.bf16.msra.mxu1 %v3419_v51  ;;  %2320 = vmatprep.subr.bf16.mxu0 %v3432_v60  ;;  %v3492_v51 = vld [vmem:[%s4560_s1 + $0x6d4] ss:$8 sps:$4 sm:$0xff]   ;;  %v3498_v60 = vld [vmem:[%s4560_s1 + $0x6c4] ss:$8 sps:$4 sm:$0xff]  }
  0xcb   : > { %2371 = vmatprep.subr.bf16.mxu1 %v3435_v61  ;;  %v3501_v61 = vld [vmem:[%s4560_s1 + $0x7c4] ss:$8 sps:$4 sm:$0xff]  }
  0xcc   : > { %1799 = vmatmul.mubr.bf16.vlgmr.msra.gmra.mxu0 %v1386_v63  ;;  %v3499_v63 = vld [vmem:[%s4560_s1 + $0x7c0] ss:$8 sps:$4 sm:$0xff]  }
  0xcd   : > { %1850 = vmatmul.mubr.bf16.vlgmr.msra.gmra.mxu1 %v1420_v0  ;;  %2321 = vmatpush1.bf16.msra.mxu0 %v3430_v62  ;;  %v3496_v62 = vld [vmem:[%s4560_s1 + $0x6c0] ss:$8 sps:$4 sm:$0xff]   ;;  %v3504_v0 = vld [vmem:[%s4560_s1 + $0x6b4] ss:$8 sps:$4 sm:$0xff]  }
  0xce   : > { %2372 = vmatpush1.bf16.msra.mxu1 %v3433_v1  ;;  %2322 = vmatprep.subr.bf16.mxu0 %v3438_v4  ;;  %v3507_v1 = vld [vmem:[%s4560_s1 + $0x7b4] ss:$8 sps:$4 sm:$0xff]   ;;  %v3502_v4 = vld [vmem:[%s4560_s1 + $0x6b0] ss:$8 sps:$4 sm:$0xff]  }
  0xcf   : > { %2373 = vmatprep.subr.bf16.mxu1 %v3441_v5  ;;  %1808 = vmatprep.mubr.bf16.mxu0 %v4110_v37  ;;  %v3450_v37 = vld [vmem:[%s4560_s1 + $0x644] ss:$8 sps:$4 sm:$0xff]   ;;  %v3505_v5 = vld [vmem:[%s4560_s1 + $0x7b0] ss:$8 sps:$4 sm:$0xff]  }
  0xd0   : > { %1859 = vmatprep.mubr.bf16.mxu1 %v4118_v39  ;;  %v3453_v39 = vld [vmem:[%s4560_s1 + $0x744] ss:$8 sps:$4 sm:$0xff]  }
  0xd1   : > { %2323 = vmatpush1.bf16.msra.mxu0 %v3436_v8  ;;  %v3516_v8 = vld [vmem:[%s4560_s1 + $0x694] ss:$8 sps:$4 sm:$0xff]  }
  0xd2   : > { %2374 = vmatpush1.bf16.msra.mxu1 %v3439_v52  ;;  %2324 = vmatprep.subr.bf16.mxu0 %v3444_v58  ;;  %v3519_v52 = vld [vmem:[%s4560_s1 + $0x794] ss:$8 sps:$4 sm:$0xff]   ;;  %v3514_v58 = vld [vmem:[%s4560_s1 + $0x690] ss:$8 sps:$4 sm:$0xff]  }
  0xd3   : > { %2375 = vmatprep.subr.bf16.mxu1 %v3447_v15  ;;  %v3517_v15 = vld [vmem:[%s4560_s1 + $0x790] ss:$8 sps:$4 sm:$0xff]  }
  0xd4   : > { %1809 = vmatmul.mubr.bf16.gmra.mxu0 %v1385_v55  ;;  %v3495_v55 = vld [vmem:[%s4560_s1 + $0x7d4] ss:$8 sps:$4 sm:$0xff]  }
  0xd5   : > { %1860 = vmatmul.mubr.bf16.gmra.mxu1 %v1419_v57  ;;  %2325 = vmatpush1.bf16.msra.mxu0 %v3442_v59  ;;  %v3493_v57 = vld [vmem:[%s4560_s1 + $0x7d0] ss:$8 sps:$4 sm:$0xff]  }
  0xd6   : > { %2376 = vmatpush1.bf16.msra.mxu1 %v3445_v19  ;;  %2326 = vmatprep.subr.bf16.mxu0 %v3450_v37  ;;  %v3531_v59 = vld [vmem:[%s3726_s6 + $0x8] ss:$16 sps:$4 sm:$0xf8]   ;;  %v3039_v19 = vcombine.low %v4080_v14, %v4288_v3  ;;  %v3522_v37 = vld [vmem:[%s4560_s1 + $0x684] ss:$8 sps:$4 sm:$0xff]   ;;  %v1980_v14 = vrot.slane %v3526_v49, 3 }
  0xd7   : > { %2377 = vmatprep.subr.bf16.mxu1 %v3453_v39  ;;  %2352 = vmatprep.mubr.bf16.mxu0 %v1985_v21  ;;  %v3525_v39 = vld [vmem:[%s4560_s1 + $0x784] ss:$8 sps:$4 sm:$0xff]   ;;  %v3520_v21 = vld [vmem:[%s4560_s1 + $0x680] ss:$8 sps:$4 sm:$0xff]   ;;  %v1986_v3 = vrot.slane %v3531_v59, 3 }
  0xd8   : > { %2403 = vmatprep.mubr.bf16.mxu1 %v1991_v22  ;;  %v1987_v22 = vrot.slane %v3039_v19, 3 }
  0xd9   : > { %2327 = vmatpush1.bf16.msra.mxu0 %v3448_v23  ;;  %v1982_v23 = vsel %vm1979_vm2, %v1980_v14, %v1981_v2 }
  0xda   : > { %2378 = vmatpush1.bf16.msra.mxu1 %v3451_v54  ;;  %2328 = vmatprep.subr.bf16.mxu0 %v3456_v11  ;;  %v1988_v54 = vsel %vm1979_vm2, %v1986_v3, %v1987_v22 }
  0xdb   : > { %2379 = vmatprep.subr.bf16.mxu1 %v3459_v24 }
  0xdd   : > { %2329 = vmatpush1.bf16.msra.mxu0 %v3454_v26 }
  0xde   : > { %2380 = vmatpush1.bf16.msra.mxu1 %v3457_v27  ;;  %2330 = vmatprep.subr.bf16.mxu0 %v3462_v29 }
  0xdf   : > { %2381 = vmatprep.subr.bf16.mxu1 %v3465_v30 }
  0xe1   : > { %2331 = vmatpush1.bf16.msra.mxu0 %v3460_v32 }
  0xe2   : > { %2382 = vmatpush1.bf16.msra.mxu1 %v3463_v33  ;;  %2332 = vmatprep.subr.bf16.mxu0 %v3468_v34 }
  0xe3   : > { %2383 = vmatprep.subr.bf16.mxu1 %v3471_v35 }
  0xe5   : > { %2333 = vmatpush1.bf16.msra.mxu0 %v3466_v36 }
  0xe6   : > { %2384 = vmatpush1.bf16.msra.mxu1 %v3469_v38  ;;  %2334 = vmatprep.subr.bf16.mxu0 %v3474_v16 }
  0xe7   : > { %2385 = vmatprep.subr.bf16.mxu1 %v3477_v20 }
  0xe9   : > { %2335 = vmatpush1.bf16.msra.mxu0 %v3472_v40 }
  0xea   : > { %2386 = vmatpush1.bf16.msra.mxu1 %v3475_v41  ;;  %2336 = vmatprep.subr.bf16.mxu0 %v3480_v42 }
  0xeb   : > { %2387 = vmatprep.subr.bf16.mxu1 %v3483_v43 }
  0xed   : > { %2337 = vmatpush2.bf16.msra.mxu0 %v3478_v44 }
  0xee   : > { %2388 = vmatpush2.bf16.msra.mxu1 %v3481_v45  ;;  %2338 = vmatprep.subr.bf16.mxu0 %v3486_v46 }
  0xef   : > { %2389 = vmatprep.subr.bf16.mxu1 %v3489_v47 }
  0xf1   : > { %2339 = vmatpush2.bf16.msra.mxu0 %v3484_v48 }
  0xf2   : > { %2390 = vmatpush2.bf16.msra.mxu1 %v3487_v50  ;;  %2340 = vmatprep.subr.bf16.mxu0 %v3492_v51 }
  0xf3   : > { %2391 = vmatprep.subr.bf16.mxu1 %v3495_v55 }
  0xf5   : > { %2341 = vmatpush2.bf16.msra.mxu0 %v3490_v56 }
  0xf6   : > { %2392 = vmatpush2.bf16.msra.mxu1 %v3493_v57  ;;  %2342 = vmatprep.subr.bf16.mxu0 %v3498_v60 }
  0xf7   : > { %2393 = vmatprep.subr.bf16.mxu1 %v3501_v61 }
  0xf9   : > { %2343 = vmatpush2.bf16.msra.mxu0 %v3496_v62 }
  0xfa   : > { %2394 = vmatpush2.bf16.msra.mxu1 %v3499_v63  ;;  %2344 = vmatprep.subr.bf16.mxu0 %v3504_v0 }
  0xfb   : > { %2395 = vmatprep.subr.bf16.mxu1 %v3507_v1 }
  0xfd   : > { %2345 = vmatpush2.bf16.msra.mxu0 %v3502_v4 }
  0xfe   : > { %2396 = vmatpush2.bf16.msra.mxu1 %v3505_v5  ;;  %2346 = vmatprep.subr.bf16.mxu0 %v3510_v6 }
  0xff   : > { %2397 = vmatprep.subr.bf16.mxu1 %v3513_v9 }
 0x101   : > { %2347 = vmatpush2.bf16.msra.mxu0 %v3508_v10 }
 0x102   : > { %2398 = vmatpush2.bf16.msra.mxu1 %v3511_v7  ;;  %2348 = vmatprep.subr.bf16.mxu0 %v3516_v8 }
 0x103   : > { %2399 = vmatprep.subr.bf16.mxu1 %v3519_v52 }
 0x105   : > { %2349 = vmatpush2.bf16.msra.mxu0 %v3514_v58 }
 0x106   : > { %2400 = vmatpush2.bf16.msra.mxu1 %v3517_v15  ;;  %2350 = vmatprep.subr.bf16.mxu0 %v3522_v37 }
 0x107   : > { %2401 = vmatprep.subr.bf16.mxu1 %v3525_v39 }
 0x109   : > { %2351 = vmatpush2.bf16.msra.mxu0 %v3520_v21 }
 0x10a   : > { %2402 = vmatpush2.bf16.msra.mxu1 %v3523_v12 }
 0x10c   : > { %v782_v11 = vpop.f32.mrf.mxu0  ;;  %2353 = vmatmul.mubr.bf16.vlgmr.msra.gmra.mxu0 %v1982_v23 }
 0x10d   : > { %v833_v24 = vpop.f32.mrf.mxu1  ;;  %2404 = vmatmul.mubr.bf16.vlgmr.msra.gmra.mxu1 %v1988_v54  ;;  %2362 = vmatprep.mubr.bf16.mxu0 %v4316_v53 }
 0x10e   : > { %v834_v13 = vadd.f32 %v833_v24, %v782_v11  ;;  %2413 = vmatprep.mubr.bf16.mxu1 %v4318_v18  ;;  %v784_v25 = vpop.f32.mrf.mxu0 }
 0x10f   : > { %v835_v26 = vpop.f32.mrf.mxu1 }
 0x110   : > { %v836_v27 = vadd.f32 %v835_v26, %v784_v25  ;;  %v786_v28 = vpop.f32.mrf.mxu0 }
 0x111   : > { %v837_v29 = vpop.f32.mrf.mxu1 }
 0x112   : > { %v838_v30 = vadd.f32 %v837_v29, %v786_v28  ;;  %v788_v31 = vpop.f32.mrf.mxu0 }
 0x113   : > { %v839_v32 = vpop.f32.mrf.mxu1 }
 0x114   : > { %v840_v33 = vadd.f32 %v839_v32, %v788_v31  ;;  %2363 = vmatmul.mubr.bf16.gmra.mxu0 %v1981_v2  ;;  %v792_v34 = vpop.f32.mrf.mxu0 }
 0x115   : > { %2414 = vmatmul.mubr.bf16.gmra.mxu1 %v1987_v22  ;;  %v843_v35 = vpop.f32.mrf.mxu1 }
 0x116   : > { %v844_v36 = vadd.f32 %v843_v35, %v792_v34  ;;  %v794_v38 = vpop.f32.mrf.mxu0 }
 0x117   : > { %v845_v16 = vpop.f32.mrf.mxu1 }
 0x118   : > { %v846_v20 = vadd.f32 %v845_v16, %v794_v38  ;;  %v796_v53 = vpop.f32.mrf.mxu0 }
 0x119   : > { %v847_v40 = vpop.f32.mrf.mxu1 }
 0x11a   : > { %v797_v18 = vpop.f32.mrf.mxu0 }
 0x11b   : > { %v848_v41 = vpop.f32.mrf.mxu1 }
 0x13f   : > { %v2434_v34 = vpop.permute.xlu0 %2433 }
 0x14c   : > { %v1212_v42 = vpop.f32.mrf.mxu0 }
 0x14d   : > { %v1263_v43 = vpop.f32.mrf.mxu1  ;;  %v1213_v44 = vadd.f32 %v1212_v42, %v834_v13 }
 0x14e   : > { %v1214_v45 = vpop.f32.mrf.mxu0 }
 0x14f   : > { %v1265_v46 = vpop.f32.mrf.mxu1  ;;  %v1264_v47 = vadd.f32 %v1263_v43, %v1213_v44  ;;  %v1215_v48 = vadd.f32 %v1214_v45, %v836_v27  ;;  %v2439_v44 = vpop.permute.xlu0 %2438 }
 0x150   : > { %v1216_v50 = vpop.f32.mrf.mxu0 }
 0x151   : > { %v1267_v51 = vpop.f32.mrf.mxu1  ;;  %v1266_v55 = vadd.f32 %v1265_v46, %v1215_v48  ;;  %v1217_v56 = vadd.f32 %v1216_v50, %v838_v30 }
 0x152   : > { %v1218_v57 = vpop.f32.mrf.mxu0 }
 0x153   : > { %v1269_v60 = vpop.f32.mrf.mxu1  ;;  %v1268_v61 = vadd.f32 %v1267_v51, %v1217_v56  ;;  %v1219_v62 = vadd.f32 %v1218_v57, %v840_v33 }
 0x154   : > { %v1222_v63 = vpop.f32.mrf.mxu0 }
 0x155   : > { %v1273_v0 = vpop.f32.mrf.mxu1  ;;  %v1270_v1 = vadd.f32 %v1269_v60, %v1219_v62  ;;  %v1223_v4 = vadd.f32 %v1222_v63, %v844_v36  ;;  %v2444_v63 = vpop.permute.xlu1 %2443 }
 0x156   : > { %v1224_v5 = vpop.f32.mrf.mxu0 }
 0x157   : > { %v1275_v6 = vpop.f32.mrf.mxu1  ;;  %v1225_v9 = vadd.f32 %v1224_v5, %v846_v20  ;;  %v1274_v10 = vadd.f32 %v1273_v0, %v1223_v4 }
 0x158   : > { %v1226_v7 = vpop.f32.mrf.mxu0 }
 0x159   : > { %v1277_v8 = vpop.f32.mrf.mxu1  ;;  %v1276_v52 = vadd.f32 %v1275_v6, %v1225_v9 }
 0x15a   : > { %v1227_v58 = vpop.f32.mrf.mxu0 }
 0x15b   : > { %v1278_v15 = vpop.f32.mrf.mxu1 }
 0x18c   : > { %v1800_v49 = vpop.f32.mrf.mxu0 }
 0x18d   : > { %v1851_v17 = vpop.f32.mrf.mxu1 }
 0x18e   : > { %v1852_v59 = vadd.f32 %v1851_v17, %v1800_v49  ;;  %v1802_v19 = vpop.f32.mrf.mxu0 }
 0x18f   : > { %v1853_v37 = vpop.f32.mrf.mxu1 }
 0x190   : > { %v1868_v39 = vadd.f32 %v1852_v59, %v1264_v47  ;;  %v1854_v21 = vadd.f32 %v1853_v37, %v1802_v19  ;;  %v1804_v12 = vpop.f32.mrf.mxu0 }
 0x191   : > { %v1855_v14 = vpop.f32.mrf.mxu1 }
 0x192   : > { %v1869_v2 = vadd.f32 %v1854_v21, %v1266_v55  ;;  %v1856_v3 = vadd.f32 %v1855_v14, %v1804_v12  ;;  %v1806_v22 = vpop.f32.mrf.mxu0 }
 0x193   : > { %v1857_v23 = vpop.f32.mrf.mxu1 }
 0x194   : > { %v1870_v54 = vadd.f32 %v1856_v3, %v1268_v61  ;;  %v1858_v11 = vadd.f32 %v1857_v23, %v1806_v22  ;;  %v1810_v24 = vpop.f32.mrf.mxu0 }
 0x195   : > { %v1861_v13 = vpop.f32.mrf.mxu1 }
 0x196   : > { %v1871_v25 = vadd.f32 %v1858_v11, %v1270_v1  ;;  %v1862_v26 = vadd.f32 %v1861_v13, %v1810_v24  ;;  %v1812_v27 = vpop.f32.mrf.mxu0 }
 0x197   : > { %v1863_v28 = vpop.f32.mrf.mxu1 }
 0x198   : > { %v1872_v29 = vadd.f32 %v1862_v26, %v1274_v10  ;;  %v1814_v30 = vpop.f32.mrf.mxu0  ;;  %v1864_v51 = vadd.f32 %v1863_v28, %v1812_v27 }
 0x199   : > { %v1865_v31 = vpop.f32.mrf.mxu1 }
 0x19a   : > { %v1815_v32 = vpop.f32.mrf.mxu0  ;;  %v1873_v7 = vadd.f32 %v1864_v51, %v1276_v52 }
 0x19b   : > { %v1866_v33 = vpop.f32.mrf.mxu1 }
 0x1cc   : > { %v2354_v35 = vpop.f32.mrf.mxu0 }
 0x1cd   : > { %v2405_v36 = vpop.f32.mrf.mxu1 }
 0x1ce   : > { %v2406_v38 = vadd.f32 %v2405_v36, %v2354_v35  ;;  %v2356_v16 = vpop.f32.mrf.mxu0 }
 0x1cf   : > { %v2407_v20 = vpop.f32.mrf.mxu1 }
 0x1d0   : > { %v4505_v53 = vadd.f32 %v2406_v38, %v1868_v39  ;;  %v2408_v40 = vadd.f32 %v2407_v20, %v2356_v16  ;;  %v2358_v18 = vpop.f32.mrf.mxu0 }
 0x1d1   : > { %v2409_v41 = vpop.f32.mrf.mxu1 }
 0x1d2   : > { %v4507_v42 = vadd.f32 %v2408_v40, %v1869_v2  ;;  %v2410_v43 = vadd.f32 %v2409_v41, %v2358_v18  ;;  %v2446_v45 = vmul.f32 %v2434_v34, %v4505_v53  ;;  %v2360_v46 = vpop.f32.mrf.mxu0 }
 0x1d3   : > { %v2411_v47 = vpop.f32.mrf.mxu1 }
 0x1d4   : > { %v4510_v48 = vadd.f32 %v2410_v43, %v1870_v54  ;;  %v2412_v50 = vadd.f32 %v2411_v47, %v2360_v46  ;;  %v2447_v55 = vmul.f32 %v2434_v34, %v4507_v42  ;;  %v2364_v56 = vpop.f32.mrf.mxu0  ;;  %v2473_v0 = vmul.f32 %v2446_v45, %v4505_v53 }
 0x1d5   : > { %v2415_v57 = vpop.f32.mrf.mxu1 }
 0x1d6   : > { %v4513_v60 = vadd.f32 %v2412_v50, %v1871_v25  ;;  %v2448_v61 = vmul.f32 %v2439_v44, %v4510_v48  ;;  %v2416_v62 = vadd.f32 %v2415_v57, %v2364_v56  ;;  %v2366_v1 = vpop.f32.mrf.mxu0  ;;  %v2474_v8 = vmul.f32 %v2447_v55, %v4507_v42 }
 0x1d7   : > { %v2417_v4 = vpop.f32.mrf.mxu1 }
 0x1d8   : > { %v2449_v5 = vmul.f32 %v2439_v44, %v4513_v60  ;;  %v2452_v6 = vadd.f32 %v2448_v61, %v2446_v45  ;;  %v2475_v9 = vmul.f32 %v2448_v61, %v4510_v48  ;;  %v4519_v10 = vadd.f32 %v2416_v62, %v1872_v29  ;;  %v2368_v15 = vpop.f32.mrf.mxu0 }
 0x1d9   : > { %v2418_v58 = vadd.f32 %v2417_v4, %v2366_v1  ;;  %v2419_v49 = vpop.f32.mrf.mxu1 }
 0x1da   : > { %v2462_v17 = vadd.f32 %v2449_v5, %v2447_v55  ;;  %v2476_v59 = vmul.f32 %v2449_v5, %v4513_v60  ;;  %v2479_v19 = vadd.f32 %v2475_v9, %v2473_v0  ;;  %v2450_v37 = vmul.f32 %v2444_v63, %v4519_v10  ;;  %v2369_v21 = vpop.f32.mrf.mxu0 }
 0x1db   : > { %v4524_v39 = vadd.f32 %v2418_v58, %v1873_v7  ;;  %v2420_v12 = vpop.f32.mrf.mxu1 }
 0x1dc   : > { %v2488_v14 = vadd.f32 %v2476_v59, %v2474_v8  ;;  %v2454_v2 = vsel %vm2453_vm3, %v2450_v37, 0.0  ;;  %v2477_v52 = vmul.f32 %v2450_v37, %v4519_v10 }
 0x1dd   : > { %v2451_v3 = vmul.f32 %v2444_v63, %v4524_v39  ;;  %v2455_v22 = vadd.f32 %v2454_v2, %v2452_v6 }
 0x1de   : > { %v2480_v23 = vsel %vm2453_vm3, %v2477_v52, 0.0 }
 0x1df   : > { %v2456_v54 = vrot.slane %v2455_v22, 4  ;;  %v2463_v11 = vsel %vm2453_vm3, %v2451_v3, 0.0  ;;  %v2478_v24 = vmul.f32 %v2451_v3, %v4524_v39  ;;  %v2481_v13 = vadd.f32 %v2480_v23, %v2479_v19 }
 0x1e0   : > { %v2464_v25 = vadd.f32 %v2463_v11, %v2462_v17 }
 0x1e1   : > { %v2457_v26 = vadd.f32 %v2456_v54, %v2455_v22  ;;  %v2482_v27 = vrot.slane %v2481_v13, 4  ;;  %v2489_v28 = vsel %vm2453_vm3, %v2478_v24, 0.0 }
 0x1e2   : > { %v2465_v29 = vrot.slane %v2464_v25, 4  ;;  %v2490_v30 = vadd.f32 %v2489_v28, %v2488_v14  ;;  %v2567_v28 = vld [vmem:[%s197_s5 + $0x10] sm:$0x33] }
 0x1e3   : > { %v2458_v31 = vrot.slane %v2457_v26, 2  ;;  %v2483_v32 = vadd.f32 %v2482_v27, %v2481_v13 }
 0x1e4   : > { %v2466_v33 = vadd.f32 %v2465_v29, %v2464_v25  ;;  %v2491_v34 = vrot.slane %v2490_v30, 4 }
 0x1e5   : > { %v2459_v35 = vadd.f32 %v2458_v31, %v2457_v26  ;;  %v2484_v36 = vrot.slane %v2483_v32, 2 }
 0x1e6   : > { %v2467_v38 = vrot.slane %v2466_v33, 2  ;;  %v2492_v16 = vadd.f32 %v2491_v34, %v2490_v30 }
 0x1e7   : > { %v2460_v20 = vrot.slane %v2459_v35, 1  ;;  %v2485_v40 = vadd.f32 %v2484_v36, %v2483_v32 }
 0x1e8   : > { %v2468_v18 = vadd.f32 %v2467_v38, %v2466_v33  ;;  %v2493_v41 = vrot.slane %v2492_v16, 2 }
 0x1e9   : > { %v2461_v43 = vadd.f32 %v2460_v20, %v2459_v35  ;;  %v2486_v44 = vrot.slane %v2485_v40, 1 }
 0x1ea   : > { %v2469_v45 = vrot.slane %v2468_v18, 1  ;;  %v2494_v46 = vadd.f32 %v2493_v41, %v2492_v16 }
 0x1eb   : > { %v2471_v47 = vmul.f32 0.0625, %v2461_v43  ;;  %v2487_v50 = vadd.f32 %v2486_v44, %v2485_v40 }
 0x1ec   : > { %v2470_v51 = vadd.f32 %v2469_v45, %v2468_v18  ;;  %v2495_v55 = vrot.slane %v2494_v46, 1 }
 0x1ed   : > { %v2497_v56 = vmul.f32 0.0625, %v2487_v50  ;;  %v2499_v57 = vmul.f32 %v2471_v47, %v2471_v47  ;;  %v2505_v61 = vsub.f32 %v4505_v53, %v2471_v47  ;;  %v2507_v62 = vsub.f32 %v4510_v48, %v2471_v47 }
 0x1ee   : > { %v2472_v63 = vmul.f32 0.0625, %v2470_v51  ;;  %v2496_v0 = vadd.f32 %v2495_v55, %v2494_v46  ;;  %v2509_v1 = vsub.f32 %v4519_v10, %v2471_v47 }
 0x1ef   : > { %v2501_v4 = vsub.f32 %v2497_v56, %v2499_v57 }
 0x1f0   : > { %v2498_v5 = vmul.f32 0.0625, %v2496_v0  ;;  %v2500_v6 = vmul.f32 %v2472_v63, %v2472_v63  ;;  %v2506_v9 = vsub.f32 %v4507_v42, %v2472_v63  ;;  %v2508_v7 = vsub.f32 %v4513_v60, %v2472_v63 }
 0x1f1   : > { %v2503_v8 = vmax.f32 %v2501_v4, 0.0  ;;  %v2510_v58 = vsub.f32 %v4524_v39, %v2472_v63 }
 0x1f2   : > { %v2502_v15 = vsub.f32 %v2498_v5, %v2500_v6 }
 0x1f3   : > { %v2511_v49 = vadd.f32 1e-05, %v2503_v8 }
 0x1f4   : > { %v2504_v53 = vmax.f32 %v2502_v15, 0.0 }
 0x1f5   : > { %3536 = vrsqrt.f32 %v2511_v49 }
 0x1f6   : > { %v2512_v48 = vadd.f32 1e-05, %v2504_v53 }
 0x1f8   : > { %3538 = vrsqrt.f32 %v2512_v48 }
 0x202   : > { %v3537_v17 = vpop.eup %3536 }
 0x203   : > { %v2515_v59 = vmul.f32 %v3537_v17, %v2505_v61  ;;  %v2517_v10 = vmul.f32 %v3537_v17, %v2507_v62  ;;  %v2519_v19 = vmul.f32 %v3537_v17, %v2509_v1 }
 0x205   : > { %v3539_v42 = vpop.eup %3538  ;;  %v2527_v37 = vmul.f32 0.2, %v2515_v59  ;;  %v2529_v39 = vmul.f32 0.2, %v2517_v10  ;;  %vm2521_vm8 = vcmp.gt.f32.partialorder %v2515_v59, 0.0  ;;  %vm2523_vm9 = vcmp.gt.f32.partialorder %v2517_v10, 0.0 }
 0x206   : > { %v2516_v60 = vmul.f32 %v3539_v42, %v2506_v9  ;;  %v2518_v21 = vmul.f32 %v3539_v42, %v2508_v7  ;;  %v2520_v12 = vmul.f32 %v3539_v42, %v2510_v58  ;;  %vm2525_vm10 = vcmp.gt.f32.partialorder %v2519_v19, 0.0 }
 0x207   : > { %v2531_v2 = vmul.f32 0.2, %v2519_v19  ;;  %v2533_v54 = vsel %vm2521_vm8, %v2515_v59, %v2527_v37  ;;  %v2535_v24 = vsel %vm2523_vm9, %v2517_v10, %v2529_v39 }
 0x208   : > { %vm2522_vm12 = vcmp.gt.f32.partialorder %v2516_v60, 0.0  ;;  %vm2524_vm13 = vcmp.gt.f32.partialorder %v2518_v21, 0.0  ;;  %vm2526_vm14 = vcmp.gt.f32.partialorder %v2520_v12, 0.0  ;;  %v2528_v3 = vmul.f32 0.2, %v2516_v60 }
 0x209   : > { %v2530_v22 = vmul.f32 0.2, %v2518_v21  ;;  %v2532_v23 = vmul.f32 0.2, %v2520_v12  ;;  %v2537_v25 = vsel %vm2525_vm10, %v2519_v19, %v2531_v2 }
 0x20a   : > { %v2534_v11 = vsel %vm2522_vm12, %v2516_v60, %v2528_v3 }
 0x20b   : > { %v2536_v13 = vsel %vm2524_vm13, %v2518_v21, %v2530_v22  ;;  %v2538_v26 = vsel %vm2526_vm14, %v2520_v12, %v2532_v23  ;;  %v3111_v27 = vpack.c.bf16 %v2534_v11, %v2533_v54 }
 0x20c   : > { %v3112_v29 = vpack.c.bf16 %v2536_v13, %v2535_v24  ;;  %v3113_v30 = vpack.c.bf16 %v2538_v26, %v2537_v25 }
 0x20d   : > { %2559 = vst [vmem:[%s197_s5] sm:$0xff] %v3111_v27 }
 0x20e   : > { %2560 = vst [vmem:[%s197_s5 + $0x8] sm:$0xff] %v3112_v29  ;;  %v2568_v31 = vsel %vm2566_vm15, %v3113_v30, %v2567_v28 }
 0x20f   : > { %2569 = vst [vmem:[%s197_s5 + $0x10] sm:$0x33] %v2568_v31 }
 0x210 PF: > { %s14_s15 = sadd.s32 1, %s3548_s15  }
 0x211   : > { %p11_p4 = scmp.ge.s32.totalorder %s14_s15, 4  }
 0x213   :  { %13 = sbr.rel (!%p11_p4) target bundleno = 1 (0x1), region = 69 }

// kernel: discriminator_forward.9
= control target key start
LH: loop header
LB: loop body
LE: loop exit
PB: predicated region body
PF: predicated region fallthrough
CT: control target
= control target key end

     0   :  { %s872_s14 = smov 0   ;;  %s993_s0 = inlined_call_operand.vmem [shape: bf16[2,4,4,512], index: 0, kind: input, shape index: {}]   ;;  %s994_s1 = inlined_call_operand.vmem [shape: f32[16,512], index: 1, kind: input, shape index: {}]   ;;  %s995_s2 = inlined_call_operand.<no memory space> [shape: f32[1,1], index: 2, kind: input, shape index: {}]   ;;  %s996_s3 = inlined_call_operand.vmem [shape: f32[2,1,1], index: 3, kind: output, shape index: {}]  }
   0x1   :  { %v8_v0 = vstv %s995_s2 }
   0x2   :  { %9 = vst [vmem:[#allocation2] sm:$0x1] %v8_v0 }
   0x3 LB: > { %s774_s15 = sadd.s32 4294967295, %s845_s14   ;;  %p778_p0 = scmp.ge.s32.totalorder %s845_s14, 1  ;;  %s845_s14 = sphi %s872_s14, %s15_s14  }
   0x4   : > { %p139_p1 = scmp.lt.s32.totalorder %s845_s14, 3 }
   0x6   : > { %p140_p2 = pnand %p778_p0, %p139_p1 }
   0x7   : > { %p161_p3 = scmp.lt.s32.totalorder (!%p140_p2), %s774_s15, 1 }
   0x8   : > { %143 = sbr.rel (%p140_p2) target bundleno = 206 (0xce), region = 32 }
   0xd   : > { %v181_v1 = vlaneseq  ;;  %v847_v2 = vmov 286326784   ;;  %s998_s15 = smov (!%p161_p3, %s774_s15), 1  ;;  %v848_v5 = vmov 858989090   ;;  %vm713_vm0 = vcmask 1040384  }
   0xe   : > { %v179_v3 = vunpack.c.l.s4 %v847_v2  ;;  %v186_v6 = vunpack.c.l.s4 %v848_v5  ;;  %v176_v7 = vld [vmem:[%s994_s1] ss:$8 sm:$0xf]  ;;  %s828_s17 = sshll.u32 %s998_s15, 5  ;;  %s168_s27 = scalar_lea.vmem %s996_s3, %s998_s15  ;;  %vm725_vm1 = vcmask 0  }
   0xf   : > { %v882_v4 = vshrl.u32 %v181_v1, 7  ;;  %v781_v10 = vld [vmem:[%s994_s1 + $0x1] ss:$8 sm:$0xf]  ;;  %s894_s22 = scalar_lea.vmem %s993_s0, %s828_s17 }
  0x10   : > { %v180_v8 = vunpack.c.0.s8 %v179_v3  ;;  %v187_v9 = vunpack.c.0.s8 %v186_v6  ;;  %v784_v12 = vld [vmem:[%s994_s1 + $0x2] ss:$8 sm:$0xf]  ;;  %v229_v15 = vld [vmem:[%s894_s22] sm:$0xaa] }
  0x11   : > { %v169_v13 = vld [vmem:[%s894_s22] sm:$0x55]  ;;  %v787_v20 = vld [vmem:[%s994_s1 + $0x3] ss:$8 sm:$0xf]  ;;  %v230_v23 = vunpack.c.l.bf16 %v229_v15  ;;  %v231_v24 = vunpack.c.h.bf16 %v229_v15 }
  0x12   : > { %v897_v11 = vsub.s32 %v180_v8, %v882_v4  ;;  %v904_v14 = vsub.s32 %v187_v9, %v882_v4  ;;  %v170_v16 = vunpack.c.l.bf16 %v169_v13  ;;  %v171_v17 = vunpack.c.h.bf16 %v169_v13  ;;  %v790_v25 = vld [vmem:[%s894_s22 + $0x8] sm:$0x55]  ;;  %v792_v43 = vld [vmem:[%s994_s1 + $0x5] ss:$8 sm:$0xf] }
  0x13   : > { %v791_v34 = vld [vmem:[%s994_s1 + $0x4] ss:$8 sm:$0xf]  ;;  %v300_v38 = vunpack.c.l.bf16 %v790_v25  ;;  %v301_v42 = vunpack.c.h.bf16 %v790_v25  ;;  %v795_v48 = vld [vmem:[%s894_s22 + $0x8] sm:$0xaa] }
  0x14   : > { %v184_v18 = vrot.slane %v176_v7, %v897_v11  ;;  %v207_v19 = vrot.slane %v781_v10, %v897_v11  ;;  %v191_v21 = vrot.slane %v176_v7, %v904_v14  ;;  %v214_v22 = vrot.slane %v781_v10, %v904_v14  ;;  %v796_v53 = vld [vmem:[%s994_s1 + $0x6] ss:$8 sm:$0xf]  ;;  %v799_v58 = vld [vmem:[%s994_s1 + $0x7] ss:$8 sm:$0xf] }
  0x15   : > { %v245_v28 = vrot.slane %v784_v12, %v897_v11  ;;  %v252_v29 = vrot.slane %v784_v12, %v904_v14  ;;  %v276_v32 = vrot.slane %v787_v20, %v897_v11  ;;  %v283_v33 = vrot.slane %v787_v20, %v904_v14  ;;  %v802_v8 = vld [vmem:[%s894_s22 + $0x10] sm:$0x55]  ;;  %v804_v20 = vld [vmem:[%s994_s1 + $0x21] ss:$8 sm:$0xf] }
  0x16   : > { %v194_v26 = vmul.f32 %v184_v18, %v170_v16  ;;  %v217_v27 = vmul.f32 %v207_v19, %v170_v16  ;;  %v195_v30 = vmul.f32 %v191_v21, %v171_v17  ;;  %v218_v31 = vmul.f32 %v214_v22, %v171_v17  ;;  %v803_v19 = vld [vmem:[%s994_s1 + $0x20] ss:$8 sm:$0xf]  ;;  %v807_v25 = vld [vmem:[%s894_s22 + $0x10] sm:$0xaa] }
  0x17   : > { %v255_v36 = vmul.f32 %v245_v28, %v230_v23  ;;  %v256_v37 = vmul.f32 %v252_v29, %v231_v24  ;;  %v286_v40 = vmul.f32 %v276_v32, %v230_v23  ;;  %v287_v41 = vmul.f32 %v283_v33, %v231_v24 }
  0x18   : > { %v782_v35 = vrot.slane %v217_v27, 9  ;;  %v783_v39 = vrot.slane %v218_v31, 9  ;;  %v315_v47 = vrot.slane %v791_v34, %v897_v11  ;;  %v322_v52 = vrot.slane %v791_v34, %v904_v14  ;;  %v808_v34 = vld [vmem:[%s994_s1 + $0x22] ss:$8 sm:$0xf] }
  0x19   : > { %v785_v45 = vrot.slane %v255_v36, 10  ;;  %v786_v46 = vrot.slane %v256_v37, 10  ;;  %v788_v50 = vrot.slane %v286_v40, 11  ;;  %v789_v51 = vrot.slane %v287_v41, 11 }
  0x1a   : > { %v227_v44 = vadd.f32 %v782_v35, %v194_v26  ;;  %v228_v49 = vadd.f32 %v783_v39, %v195_v30  ;;  %v325_v55 = vmul.f32 %v315_v47, %v300_v38  ;;  %v338_v56 = vrot.slane %v792_v43, %v897_v11  ;;  %v811_v39 = vld [vmem:[%s994_s1 + $0x23] ss:$8 sm:$0xf] }
  0x1b   : > { %v345_v57 = vrot.slane %v792_v43, %v904_v14  ;;  %v326_v60 = vmul.f32 %v322_v52, %v301_v42  ;;  %v361_v61 = vunpack.c.l.bf16 %v795_v48  ;;  %v362_v62 = vunpack.c.h.bf16 %v795_v48  ;;  %v814_v48 = vld [vmem:[%s894_s22 + $0x18] sm:$0x55] }
  0x1c   : > { %v265_v54 = vadd.f32 %v785_v45, %v227_v44  ;;  %v266_v59 = vadd.f32 %v786_v46, %v228_v49  ;;  %v348_v0 = vmul.f32 %v338_v56, %v300_v38  ;;  %v376_v2 = vrot.slane %v796_v53, %v897_v11 }
  0x1d   : > { %v349_v1 = vmul.f32 %v345_v57, %v301_v42  ;;  %v383_v5 = vrot.slane %v796_v53, %v904_v14  ;;  %v407_v6 = vrot.slane %v799_v58, %v897_v11  ;;  %v414_v7 = vrot.slane %v799_v58, %v904_v14  ;;  %v815_v57 = vld [vmem:[%s994_s1 + $0x24] ss:$8 sm:$0xf] }
  0x1e   : > { %v296_v63 = vadd.f32 %v788_v50, %v265_v54  ;;  %v297_v3 = vadd.f32 %v789_v51, %v266_v59  ;;  %v793_v10 = vrot.slane %v348_v0, 9  ;;  %v386_v13 = vmul.f32 %v376_v2, %v361_v61 }
  0x1f   : > { %v794_v12 = vrot.slane %v349_v1, 9  ;;  %v387_v16 = vmul.f32 %v383_v5, %v362_v62  ;;  %v417_v17 = vmul.f32 %v407_v6, %v361_v61  ;;  %v418_v18 = vmul.f32 %v414_v7, %v362_v62  ;;  %v816_v62 = vld [vmem:[%s994_s1 + $0x25] ss:$8 sm:$0xf] }
  0x20   : > { %v327_v9 = vadd.f32 %v325_v55, %v296_v63  ;;  %v328_v15 = vadd.f32 %v326_v60, %v297_v3  ;;  %v797_v22 = vrot.slane %v386_v13, 10  ;;  %v431_v23 = vunpack.c.l.bf16 %v802_v8  ;;  %v819_v3 = vld [vmem:[%s894_s22 + $0x18] sm:$0xaa] }
  0x21   : > { %v432_v24 = vunpack.c.h.bf16 %v802_v8  ;;  %v798_v27 = vrot.slane %v387_v16, 10  ;;  %v800_v28 = vrot.slane %v417_v17, 11  ;;  %v801_v29 = vrot.slane %v418_v18, 11  ;;  %v823_v16 = vld [vmem:[%s994_s1 + $0x27] ss:$8 sm:$0xf] }
  0x22   : > { %v358_v21 = vadd.f32 %v793_v10, %v327_v9  ;;  %v359_v26 = vadd.f32 %v794_v12, %v328_v15  ;;  %v446_v31 = vrot.slane %v803_v19, %v897_v11  ;;  %v453_v32 = vrot.slane %v803_v19, %v904_v14  ;;  %v820_v15 = vld [vmem:[%s994_s1 + $0x26] ss:$8 sm:$0xf] }
  0x23   : > { %v469_v33 = vrot.slane %v804_v20, %v897_v11  ;;  %v476_v36 = vrot.slane %v804_v20, %v904_v14  ;;  %v492_v37 = vunpack.c.l.bf16 %v807_v25  ;;  %v493_v38 = vunpack.c.h.bf16 %v807_v25 }
  0x24   : > { %v396_v30 = vadd.f32 %v797_v22, %v358_v21  ;;  %v397_v35 = vadd.f32 %v798_v27, %v359_v26  ;;  %v456_v41 = vmul.f32 %v446_v31, %v431_v23  ;;  %v457_v42 = vmul.f32 %v453_v32, %v432_v24 }
  0x25   : > { %v479_v43 = vmul.f32 %v469_v33, %v431_v23  ;;  %v480_v45 = vmul.f32 %v476_v36, %v432_v24  ;;  %v507_v46 = vrot.slane %v808_v34, %v897_v11  ;;  %v514_v47 = vrot.slane %v808_v34, %v904_v14 }
  0x26   : > { %v427_v40 = vadd.f32 %v800_v28, %v396_v30  ;;  %v428_v44 = vadd.f32 %v801_v29, %v397_v35  ;;  %v538_v51 = vrot.slane %v811_v39, %v897_v11  ;;  %v545_v52 = vrot.slane %v811_v39, %v904_v14 }
  0x27   : > { %v805_v50 = vrot.slane %v479_v43, 9  ;;  %v806_v54 = vrot.slane %v480_v45, 9  ;;  %v517_v55 = vmul.f32 %v507_v46, %v492_v37  ;;  %v518_v56 = vmul.f32 %v514_v47, %v493_v38 }
  0x28   : > { %v458_v49 = vadd.f32 %v456_v41, %v427_v40  ;;  %v459_v53 = vadd.f32 %v457_v42, %v428_v44  ;;  %v548_v59 = vmul.f32 %v538_v51, %v492_v37  ;;  %v549_v60 = vmul.f32 %v545_v52, %v493_v38 }
  0x29   : > { %v562_v61 = vunpack.c.l.bf16 %v814_v48  ;;  %v809_v0 = vrot.slane %v517_v55, 10  ;;  %v810_v1 = vrot.slane %v518_v56, 10  ;;  %v563_v2 = vunpack.c.h.bf16 %v814_v48 }
  0x2a   : > { %v489_v58 = vadd.f32 %v805_v50, %v458_v49  ;;  %v490_v63 = vadd.f32 %v806_v54, %v459_v53  ;;  %v812_v5 = vrot.slane %v548_v59, 11  ;;  %v813_v6 = vrot.slane %v549_v60, 11 }
  0x2b   : > { %v577_v7 = vrot.slane %v815_v57, %v897_v11  ;;  %v584_v8 = vrot.slane %v815_v57, %v904_v14  ;;  %v600_v12 = vrot.slane %v816_v62, %v897_v11  ;;  %v607_v13 = vrot.slane %v816_v62, %v904_v14 }
  0x2c   : > { %v527_v9 = vadd.f32 %v809_v0, %v489_v58  ;;  %v528_v10 = vadd.f32 %v810_v1, %v490_v63  ;;  %v623_v19 = vunpack.c.l.bf16 %v819_v3  ;;  %v624_v20 = vunpack.c.h.bf16 %v819_v3  ;;  %v723_v58 = vld [vmem:[#allocation2] sm:$0x1] }
  0x2d   : > { %v587_v17 = vmul.f32 %v577_v7, %v562_v61  ;;  %v588_v18 = vmul.f32 %v584_v8, %v563_v2  ;;  %v610_v23 = vmul.f32 %v600_v12, %v562_v61  ;;  %v611_v24 = vmul.f32 %v607_v13, %v563_v2 }
  0x2e   : > { %v558_v21 = vadd.f32 %v812_v5, %v527_v9  ;;  %v559_v22 = vadd.f32 %v813_v6, %v528_v10  ;;  %v638_v25 = vrot.slane %v820_v15, %v897_v11  ;;  %v645_v26 = vrot.slane %v820_v15, %v904_v14 }
  0x2f   : > { %v669_v27 = vrot.slane %v823_v16, %v897_v11  ;;  %v676_v28 = vrot.slane %v823_v16, %v904_v14  ;;  %v817_v31 = vrot.slane %v610_v23, 9  ;;  %v818_v32 = vrot.slane %v611_v24, 9 }
  0x30   : > { %v589_v29 = vadd.f32 %v587_v17, %v558_v21  ;;  %v590_v30 = vadd.f32 %v588_v18, %v559_v22  ;;  %v648_v33 = vmul.f32 %v638_v25, %v623_v19  ;;  %v649_v34 = vmul.f32 %v645_v26, %v624_v20 }
  0x31   : > { %v679_v35 = vmul.f32 %v669_v27, %v623_v19  ;;  %v680_v36 = vmul.f32 %v676_v28, %v624_v20  ;;  %v695_v11 = vsub.s32 0, %v882_v4  ;;  %v699_v14 = vsub.s32 4, %v882_v4 }
  0x32   : > { %v620_v37 = vadd.f32 %v817_v31, %v589_v29  ;;  %v621_v38 = vadd.f32 %v818_v32, %v590_v30  ;;  %v821_v39 = vrot.slane %v648_v33, 10  ;;  %v822_v40 = vrot.slane %v649_v34, 10 }
  0x33   : > { %v824_v41 = vrot.slane %v679_v35, 11  ;;  %v825_v42 = vrot.slane %v680_v36, 11 }
  0x34   : > { %v658_v43 = vadd.f32 %v821_v39, %v620_v37  ;;  %v659_v44 = vadd.f32 %v822_v40, %v621_v38 }
  0x36   : > { %v689_v45 = vadd.f32 %v824_v41, %v658_v43  ;;  %v690_v46 = vadd.f32 %v825_v42, %v659_v44 }
  0x38   : > { %v696_v47 = vrot.slane %v689_v45, %v695_v11  ;;  %v700_v48 = vrot.slane %v689_v45, %v699_v14  ;;  %v704_v49 = vrot.slane %v690_v46, %v695_v11  ;;  %v708_v50 = vrot.slane %v690_v46, %v699_v14 }
  0x3a   : > { %v714_v51 = vsel %vm713_vm0, %v696_v47, 0.0  ;;  %v715_v52 = vsel %vm713_vm0, %v700_v48, 0.0  ;;  %v717_v53 = vsel %vm713_vm0, %v704_v49, 0.0  ;;  %v719_v55 = vsel %vm713_vm0, %v708_v50, 0.0 }
  0x3b   : > { %v716_v54 = vadd.f32 %v715_v52, %v714_v51 }
  0x3d   : > { %v718_v56 = vadd.f32 %v717_v53, %v716_v54 }
  0x3f   : > { %v720_v57 = vadd.f32 %v719_v55, %v718_v56 }
  0x41   : > { %721 = vadd.xlane.f32.xlu0 %v720_v57 }
  0xca   : > { %v722_v4 = vpop.xlane.xlu0 %721 }
  0xcb   : > { %v724_v59 = vadd.f32 %v723_v58, %v722_v4 }
  0xcd   : > { %726 = vst.msk [vmem:[%s168_s27] sm:$0x1] %vm725_vm1, %v724_v59 }
  0xce PF: > { %s15_s14 = sadd.s32 1, %s845_s14  }
  0xcf   : > { %p12_p4 = scmp.ge.s32.totalorder %s15_s14, 4  }
  0xd1   :  { %14 = sbr.rel (!%p12_p4) target bundleno = 3 (0x3), region = 80 }

// kernel: discriminator_forward.8
= control target key start
LH: loop header
LB: loop body
LE: loop exit
PB: predicated region body
PF: predicated region fallthrough
CT: control target
= control target key end

     0   :  { %s11553_s15 = smov 0   ;;  %s14997_s0 = inlined_call_operand.vmem [shape: bf16[2,9,1024], index: 0, kind: input, shape index: {}]   ;;  %s14998_s1 = inlined_call_operand.vmem [shape: bf16[4,1024,512], index: 1, kind: input, shape index: {}]   ;;  %s14999_s2 = inlined_call_operand.vmem [shape: f32[1,512], index: 2, kind: input, shape index: {}]   ;;  %s15000_s3 = inlined_call_operand.vmem [shape: f32[5,1], index: 3, kind: input, shape index: {}]   ;;  %s15001_s4 = inlined_call_operand.vmem [shape: bf16[2,5,512], index: 4, kind: output, shape index: {}]  }
   0x1 LB: > { %s8116_s16 = sadd.s32 4294967295, %s11525_s15   ;;  %p8120_p0 = scmp.ge.s32.totalorder %s11525_s15, 1  ;;  %s11525_s15 = sphi %s11553_s15, %s14_s15  }
   0x2   : > { %p162_p1 = scmp.lt.s32.totalorder %s11525_s15, 3 }
   0x4   : > { %p163_p2 = pnand %p8120_p0, %p162_p1 }
   0x5   : > { %p188_p3 = scmp.lt.s32.totalorder (!%p163_p2), %s8116_s16, 1 }
   0x6   : > { %166 = sbr.rel (%p163_p2) target bundleno = 1285 (0x505), region = 36 }
   0xb   : > { %v9959_v0 = vld [vmem:[%s14998_s1 + $0x8e4] ss:$16 sps:$4 sm:$0xff]   ;;  %v9963_v2 = vld [vmem:[%s14998_s1 + $0x8e0] ss:$16 sps:$4 sm:$0xff]   ;;  %s15007_s16 = smov (!%p188_p3, %s8116_s16), 1  ;;  %vm7923_vm0 = vcmask 1044480  }
   0xc   : > { %v9961_v1 = vld [vmem:[%s14998_s1 + $0xae4] ss:$16 sps:$4 sm:$0xff]   ;;  %2079 = vmatprep.subr.bf16.mxu0 %v9959_v0  ;;  %v9964_v3 = vld [vmem:[%s14998_s1 + $0xae0] ss:$16 sps:$4 sm:$0xff]   ;;  %s9945_s23 = sshll.u32 %s15007_s16, 6  ;;  %vm8048_vm1 = vcmask 1042432  }
   0xd   : > { %2120 = vmatprep.subr.bf16.mxu1 %v9961_v1  ;;  %v9965_v4 = vld [vmem:[%s14998_s1 + $0x8c4] ss:$16 sps:$4 sm:$0xff]   ;;  %2080 = vmatpush1.bf16.msra.mxu0 %v9963_v2  ;;  %v9969_v6 = vld [vmem:[%s14998_s1 + $0x8c0] ss:$16 sps:$4 sm:$0xff]   ;;  %s11703_s6 = scalar_lea.vmem %s14997_s0, %s9945_s23  ;;  %vm8049_vm2 = vsmask.f32 2304 }
   0xe   : > { %2121 = vmatpush1.bf16.msra.mxu1 %v9964_v3  ;;  %v9967_v5 = vld [vmem:[%s14998_s1 + $0xac4] ss:$16 sps:$4 sm:$0xff]   ;;  %2081 = vmatprep.subr.bf16.mxu0 %v9965_v4  ;;  %v9970_v7 = vld [vmem:[%s14998_s1 + $0xac0] ss:$16 sps:$4 sm:$0xff]   ;;  %v199_v49 = vld [vmem:[%s11703_s6 + $0x8] sm:$0x77] }
   0xf   : > { %2122 = vmatprep.subr.bf16.mxu1 %v9967_v5  ;;  %v9971_v8 = vld [vmem:[%s14998_s1 + $0x8a4] ss:$16 sps:$4 sm:$0xff]   ;;  %v9975_v10 = vld [vmem:[%s14998_s1 + $0x8a0] ss:$16 sps:$4 sm:$0xff]   ;;  %v11724_v52 = vcombine.high %v199_v49, %v199_v49  ;;  %v11752_v3 = vcombine.low %v199_v49, %v199_v49  ;;  %s9946_s9 = sshll.u32 %s15007_s16, 4  ;;  %vm8051_vm3 = vcmask 1046532   ;;  %vm14955_vm5 = vmand %vm8048_vm1, %vm8049_vm2 }
  0x10   : > { %v9973_v9 = vld [vmem:[%s14998_s1 + $0xaa4] ss:$16 sps:$4 sm:$0xff]   ;;  %v9976_v11 = vld [vmem:[%s14998_s1 + $0xaa0] ss:$16 sps:$4 sm:$0xff]   ;;  %vm8052_vm4 = vsmask.f32 6400  ;;  %s14962_s12 = scalar_lea.vmem %s15001_s4, %s9946_s9 }
  0x11   : > { %2082 = vmatpush1.bf16.msra.mxu0 %v9969_v6  ;;  %v9977_v12 = vld [vmem:[%s14998_s1 + $0x884] ss:$16 sps:$4 sm:$0xff]   ;;  %v9981_v14 = vld [vmem:[%s14998_s1 + $0x880] ss:$16 sps:$4 sm:$0xff]   ;;  %v757_v56 = vshrl.u32 %v11724_v52, 16  ;;  %v759_v57 = vshll.u32 %v11724_v52, 16  ;;  %vm14964_vm7 = vmand %vm8051_vm3, %vm8052_vm4 }
  0x12   : > { %2123 = vmatpush1.bf16.msra.mxu1 %v9970_v7  ;;  %2083 = vmatprep.subr.bf16.mxu0 %v9971_v8  ;;  %v9979_v13 = vld [vmem:[%s14998_s1 + $0xa84] ss:$16 sps:$4 sm:$0xff]   ;;  %v9982_v15 = vld [vmem:[%s14998_s1 + $0xa80] ss:$16 sps:$4 sm:$0xff]   ;;  %vm8054_vm9 = vmor %vm14964_vm7, %vm14955_vm5 }
  0x13   : > { %2124 = vmatprep.subr.bf16.mxu1 %v9973_v9  ;;  %v9983_v16 = vld [vmem:[%s14998_s1 + $0x864] ss:$16 sps:$4 sm:$0xff]   ;;  %v9987_v18 = vld [vmem:[%s14998_s1 + $0x860] ss:$16 sps:$4 sm:$0xff]   ;;  %v761_v61 = vrot.slane %v759_v57, 1  ;;  %v752_v9 = vshll.u32 %v11752_v3, 16 }
  0x14   : > { %v9985_v17 = vld [vmem:[%s14998_s1 + $0xa64] ss:$16 sps:$4 sm:$0xff]   ;;  %v9988_v19 = vld [vmem:[%s14998_s1 + $0xa60] ss:$16 sps:$4 sm:$0xff]  }
  0x15   : > { %2084 = vmatpush1.bf16.msra.mxu0 %v9975_v10  ;;  %v9989_v20 = vld [vmem:[%s14998_s1 + $0x844] ss:$16 sps:$4 sm:$0xff]   ;;  %v9993_v22 = vld [vmem:[%s14998_s1 + $0x840] ss:$16 sps:$4 sm:$0xff]   ;;  %v11747_v1 = vor.u32 %v761_v61, %v757_v56 }
  0x16   : > { %2125 = vmatpush1.bf16.msra.mxu1 %v9976_v11  ;;  %2085 = vmatprep.subr.bf16.mxu0 %v9977_v12  ;;  %v9991_v21 = vld [vmem:[%s14998_s1 + $0xa44] ss:$16 sps:$4 sm:$0xff]   ;;  %v9994_v23 = vld [vmem:[%s14998_s1 + $0xa40] ss:$16 sps:$4 sm:$0xff]  }
  0x17   : > { %2126 = vmatprep.subr.bf16.mxu1 %v9979_v13  ;;  %v9995_v24 = vld [vmem:[%s14998_s1 + $0x824] ss:$16 sps:$4 sm:$0xff]   ;;  %v9999_v26 = vld [vmem:[%s14998_s1 + $0x820] ss:$16 sps:$4 sm:$0xff]   ;;  %2152 = vmatprep.mubr.bf16.mxu1 %v11747_v1 }
  0x18   : > { %v9997_v25 = vld [vmem:[%s14998_s1 + $0xa24] ss:$16 sps:$4 sm:$0xff]   ;;  %v10000_v27 = vld [vmem:[%s14998_s1 + $0xa20] ss:$16 sps:$4 sm:$0xff]  }
  0x19   : > { %2086 = vmatpush1.bf16.msra.mxu0 %v9981_v14  ;;  %v10001_v28 = vld [vmem:[%s14998_s1 + $0x804] ss:$16 sps:$4 sm:$0xff]   ;;  %v10005_v30 = vld [vmem:[%s14998_s1 + $0x800] ss:$16 sps:$4 sm:$0xff]  }
  0x1a   : > { %2127 = vmatpush1.bf16.msra.mxu1 %v9982_v15  ;;  %2087 = vmatprep.subr.bf16.mxu0 %v9983_v16  ;;  %v10003_v29 = vld [vmem:[%s14998_s1 + $0xa04] ss:$16 sps:$4 sm:$0xff]   ;;  %v10006_v31 = vld [vmem:[%s14998_s1 + $0xa00] ss:$16 sps:$4 sm:$0xff]   ;;  %v750_v16 = vshrl.u32 %v11752_v3, 16 }
  0x1b   : > { %2128 = vmatprep.subr.bf16.mxu1 %v9985_v17  ;;  %v10007_v32 = vld [vmem:[%s14998_s1 + $0x9e4] ss:$16 sps:$4 sm:$0xff]   ;;  %v10011_v34 = vld [vmem:[%s14998_s1 + $0x9e0] ss:$16 sps:$4 sm:$0xff]   ;;  %v754_v17 = vrot.slane %v752_v9, 1 }
  0x1c   : > { %v10009_v33 = vld [vmem:[%s14998_s1 + $0xbe4] ss:$16 sps:$4 sm:$0xff]   ;;  %v10012_v35 = vld [vmem:[%s14998_s1 + $0xbe0] ss:$16 sps:$4 sm:$0xff]  }
  0x1d   : > { %2088 = vmatpush1.bf16.msra.mxu0 %v9987_v18  ;;  %v10013_v36 = vld [vmem:[%s14998_s1 + $0x9c4] ss:$16 sps:$4 sm:$0xff]   ;;  %v10017_v38 = vld [vmem:[%s14998_s1 + $0x9c0] ss:$16 sps:$4 sm:$0xff]  }
  0x1e   : > { %2129 = vmatpush1.bf16.msra.mxu1 %v9988_v19  ;;  %2089 = vmatprep.subr.bf16.mxu0 %v9989_v20  ;;  %v10015_v37 = vld [vmem:[%s14998_s1 + $0xbc4] ss:$16 sps:$4 sm:$0xff]   ;;  %v10018_v39 = vld [vmem:[%s14998_s1 + $0xbc0] ss:$16 sps:$4 sm:$0xff]  }
  0x1f   : > { %2130 = vmatprep.subr.bf16.mxu1 %v9991_v21  ;;  %v10019_v40 = vld [vmem:[%s14998_s1 + $0x9a4] ss:$16 sps:$4 sm:$0xff]   ;;  %v10023_v42 = vld [vmem:[%s14998_s1 + $0x9a0] ss:$16 sps:$4 sm:$0xff]  }
  0x20   : > { %v10021_v41 = vld [vmem:[%s14998_s1 + $0xba4] ss:$16 sps:$4 sm:$0xff]   ;;  %v10024_v43 = vld [vmem:[%s14998_s1 + $0xba0] ss:$16 sps:$4 sm:$0xff]  }
  0x21   : > { %2090 = vmatpush1.bf16.msra.mxu0 %v9993_v22  ;;  %v10025_v44 = vld [vmem:[%s14998_s1 + $0x984] ss:$16 sps:$4 sm:$0xff]   ;;  %v10029_v46 = vld [vmem:[%s14998_s1 + $0x980] ss:$16 sps:$4 sm:$0xff]  }
  0x22   : > { %2131 = vmatpush1.bf16.msra.mxu1 %v9994_v23  ;;  %2091 = vmatprep.subr.bf16.mxu0 %v9995_v24  ;;  %v10027_v45 = vld [vmem:[%s14998_s1 + $0xb84] ss:$16 sps:$4 sm:$0xff]   ;;  %v10030_v50 = vld [vmem:[%s14998_s1 + $0xb80] ss:$16 sps:$4 sm:$0xff]   ;;  %v11797_v23 = vor.u32 %v754_v17, %v750_v16 }
  0x23   : > { %2132 = vmatprep.subr.bf16.mxu1 %v9997_v25  ;;  %v198_v47 = vld [vmem:[%s11703_s6] sm:$0x77] }
  0x24   : > { %v11715_v48 = vcombine.high %v198_v47, %v198_v47  ;;  %v10031_v51 = vld [vmem:[%s14998_s1 + $0x964] ss:$16 sps:$4 sm:$0xff]   ;;  %v10035_v59 = vld [vmem:[%s14998_s1 + $0x960] ss:$16 sps:$4 sm:$0xff]   ;;  %v11749_v2 = vcombine.low %v198_v47, %v198_v47 }
  0x25   : > { %2092 = vmatpush1.bf16.msra.mxu0 %v9999_v26  ;;  %v10033_v53 = vld [vmem:[%s14998_s1 + $0xb64] ss:$16 sps:$4 sm:$0xff]   ;;  %v10036_v60 = vld [vmem:[%s14998_s1 + $0xb60] ss:$16 sps:$4 sm:$0xff]  }
  0x26   : > { %2133 = vmatpush1.bf16.msra.mxu1 %v10000_v27  ;;  %2093 = vmatprep.subr.bf16.mxu0 %v10001_v28  ;;  %v743_v54 = vshrl.u32 %v11715_v48, 16  ;;  %v745_v55 = vshll.u32 %v11715_v48, 16  ;;  %v10037_v62 = vld [vmem:[%s14998_s1 + $0x944] ss:$16 sps:$4 sm:$0xff]   ;;  %v10041_v4 = vld [vmem:[%s14998_s1 + $0x940] ss:$16 sps:$4 sm:$0xff]  }
  0x27   : > { %2134 = vmatprep.subr.bf16.mxu1 %v10003_v29  ;;  %v10039_v63 = vld [vmem:[%s14998_s1 + $0xb44] ss:$16 sps:$4 sm:$0xff]   ;;  %v10042_v5 = vld [vmem:[%s14998_s1 + $0xb40] ss:$16 sps:$4 sm:$0xff]   ;;  %v738_v8 = vshll.u32 %v11749_v2, 16  ;;  %v736_v14 = vshrl.u32 %v11749_v2, 16 }
  0x28   : > { %v747_v58 = vrot.slane %v745_v55, 1  ;;  %v10043_v6 = vld [vmem:[%s14998_s1 + $0x924] ss:$16 sps:$4 sm:$0xff]   ;;  %v10047_v10 = vld [vmem:[%s14998_s1 + $0x920] ss:$16 sps:$4 sm:$0xff]  }
  0x29   : > { %2094 = vmatpush1.bf16.msra.mxu0 %v10005_v30  ;;  %v10045_v7 = vld [vmem:[%s14998_s1 + $0xb24] ss:$16 sps:$4 sm:$0xff]   ;;  %v10048_v11 = vld [vmem:[%s14998_s1 + $0xb20] ss:$16 sps:$4 sm:$0xff]   ;;  %v740_v15 = vrot.slane %v738_v8, 1 }
  0x2a   : > { %2135 = vmatpush1.bf16.msra.mxu1 %v10006_v31  ;;  %2095 = vmatprep.subr.bf16.mxu0 %v10007_v32  ;;  %v11745_v0 = vor.u32 %v747_v58, %v743_v54  ;;  %v10049_v12 = vld [vmem:[%s14998_s1 + $0x904] ss:$16 sps:$4 sm:$0xff]   ;;  %v10053_v18 = vld [vmem:[%s14998_s1 + $0x900] ss:$16 sps:$4 sm:$0xff]  }
  0x2b   : > { %2136 = vmatprep.subr.bf16.mxu1 %v10009_v33  ;;  %v10051_v13 = vld [vmem:[%s14998_s1 + $0xb04] ss:$16 sps:$4 sm:$0xff]   ;;  %v10054_v19 = vld [vmem:[%s14998_s1 + $0xb00] ss:$16 sps:$4 sm:$0xff]   ;;  %v11795_v22 = vor.u32 %v740_v15, %v736_v14 }
  0x2c   : > { %2111 = vmatprep.mubr.bf16.mxu0 %v11745_v0  ;;  %v10061_v20 = vld [vmem:[%s14998_s1 + $0xce4] ss:$16 sps:$4 sm:$0xff]   ;;  %v10059_v24 = vld [vmem:[%s14998_s1 + $0xce0] ss:$16 sps:$4 sm:$0xff]  }
  0x2d   : > { %2096 = vmatpush2.bf16.msra.mxu0 %v10011_v34  ;;  %v10064_v21 = vld [vmem:[%s14998_s1 + $0xee4] ss:$16 sps:$4 sm:$0xff]   ;;  %v10062_v25 = vld [vmem:[%s14998_s1 + $0xee0] ss:$16 sps:$4 sm:$0xff]  }
  0x2e   : > { %2137 = vmatpush2.bf16.msra.mxu1 %v10012_v35  ;;  %2097 = vmatprep.subr.bf16.mxu0 %v10013_v36  ;;  %v10067_v26 = vld [vmem:[%s14998_s1 + $0xcc4] ss:$16 sps:$4 sm:$0xff]   ;;  %v10065_v28 = vld [vmem:[%s14998_s1 + $0xcc0] ss:$16 sps:$4 sm:$0xff]  }
  0x2f   : > { %2138 = vmatprep.subr.bf16.mxu1 %v10015_v37  ;;  %v10070_v27 = vld [vmem:[%s14998_s1 + $0xec4] ss:$16 sps:$4 sm:$0xff]   ;;  %v10068_v29 = vld [vmem:[%s14998_s1 + $0xec0] ss:$16 sps:$4 sm:$0xff]  }
  0x30   : > { %v10073_v30 = vld [vmem:[%s14998_s1 + $0xca4] ss:$16 sps:$4 sm:$0xff]   ;;  %v10071_v32 = vld [vmem:[%s14998_s1 + $0xca0] ss:$16 sps:$4 sm:$0xff]  }
  0x31   : > { %2098 = vmatpush2.bf16.msra.mxu0 %v10017_v38  ;;  %v10076_v31 = vld [vmem:[%s14998_s1 + $0xea4] ss:$16 sps:$4 sm:$0xff]   ;;  %v10074_v33 = vld [vmem:[%s14998_s1 + $0xea0] ss:$16 sps:$4 sm:$0xff]  }
  0x32   : > { %2139 = vmatpush2.bf16.msra.mxu1 %v10018_v39  ;;  %2099 = vmatprep.subr.bf16.mxu0 %v10019_v40  ;;  %v10079_v34 = vld [vmem:[%s14998_s1 + $0xc84] ss:$16 sps:$4 sm:$0xff]   ;;  %v10077_v36 = vld [vmem:[%s14998_s1 + $0xc80] ss:$16 sps:$4 sm:$0xff]  }
  0x33   : > { %2140 = vmatprep.subr.bf16.mxu1 %v10021_v41  ;;  %v10082_v35 = vld [vmem:[%s14998_s1 + $0xe84] ss:$16 sps:$4 sm:$0xff]   ;;  %v10080_v37 = vld [vmem:[%s14998_s1 + $0xe80] ss:$16 sps:$4 sm:$0xff]  }
  0x34   : > { %v10085_v38 = vld [vmem:[%s14998_s1 + $0xc64] ss:$16 sps:$4 sm:$0xff]   ;;  %v10083_v40 = vld [vmem:[%s14998_s1 + $0xc60] ss:$16 sps:$4 sm:$0xff]  }
  0x35   : > { %2100 = vmatpush2.bf16.msra.mxu0 %v10023_v42  ;;  %v10088_v39 = vld [vmem:[%s14998_s1 + $0xe64] ss:$16 sps:$4 sm:$0xff]   ;;  %v10086_v41 = vld [vmem:[%s14998_s1 + $0xe60] ss:$16 sps:$4 sm:$0xff]  }
  0x36   : > { %2141 = vmatpush2.bf16.msra.mxu1 %v10024_v43  ;;  %2101 = vmatprep.subr.bf16.mxu0 %v10025_v44  ;;  %v10091_v42 = vld [vmem:[%s14998_s1 + $0xc44] ss:$16 sps:$4 sm:$0xff]   ;;  %v10089_v44 = vld [vmem:[%s14998_s1 + $0xc40] ss:$16 sps:$4 sm:$0xff]  }
  0x37   : > { %2142 = vmatprep.subr.bf16.mxu1 %v10027_v45  ;;  %v10094_v43 = vld [vmem:[%s14998_s1 + $0xe44] ss:$16 sps:$4 sm:$0xff]   ;;  %v10092_v45 = vld [vmem:[%s14998_s1 + $0xe40] ss:$16 sps:$4 sm:$0xff]  }
  0x38   : > { %v10100_v47 = vld [vmem:[%s14998_s1 + $0xe24] ss:$16 sps:$4 sm:$0xff]   ;;  %v10095_v49 = vld [vmem:[%s14998_s1 + $0xc20] ss:$16 sps:$4 sm:$0xff]  }
  0x39   : > { %2102 = vmatpush2.bf16.msra.mxu0 %v10029_v46  ;;  %v10097_v46 = vld [vmem:[%s14998_s1 + $0xc24] ss:$16 sps:$4 sm:$0xff]   ;;  %v10104_v61 = vld [vmem:[%s14998_s1 + $0xe00] ss:$16 sps:$4 sm:$0xff]  }
  0x3a   : > { %2143 = vmatpush2.bf16.msra.mxu1 %v10030_v50  ;;  %2103 = vmatprep.subr.bf16.mxu0 %v10031_v51  ;;  %v10098_v50 = vld [vmem:[%s14998_s1 + $0xe20] ss:$16 sps:$4 sm:$0xff]   ;;  %v10103_v54 = vld [vmem:[%s14998_s1 + $0xc04] ss:$16 sps:$4 sm:$0xff]  }
  0x3b   : > { %2144 = vmatprep.subr.bf16.mxu1 %v10033_v53  ;;  %v11880_v51 = vld [vmem:[%s11703_s6 + $0x10] sm:$0x77]  ;;  %v11883_v53 = vld [vmem:[%s11703_s6 + $0x18] sm:$0x77] }
  0x3c   : > { %v11890_v55 = vcombine.high %v11880_v51, %v11880_v51  ;;  %v10106_v56 = vld [vmem:[%s14998_s1 + $0xe04] ss:$16 sps:$4 sm:$0xff]   ;;  %v11897_v57 = vcombine.high %v11883_v53, %v11883_v53  ;;  %v10107_v9 = vld [vmem:[%s14998_s1 + $0xde0] ss:$16 sps:$4 sm:$0xff]  }
  0x3d   : > { %2104 = vmatpush2.bf16.msra.mxu0 %v10035_v59  ;;  %v10113_v14 = vld [vmem:[%s14998_s1 + $0xdc0] ss:$16 sps:$4 sm:$0xff]   ;;  %v10121_v16 = vld [vmem:[%s14998_s1 + $0xda4] ss:$16 sps:$4 sm:$0xff]  }
  0x3e   : > { %2145 = vmatpush2.bf16.msra.mxu1 %v10036_v60  ;;  %2105 = vmatprep.subr.bf16.mxu0 %v10037_v62  ;;  %v771_v58 = vshrl.u32 %v11890_v55, 16  ;;  %v773_v59 = vshll.u32 %v11890_v55, 16  ;;  %v10101_v60 = vld [vmem:[%s14998_s1 + $0xc00] ss:$16 sps:$4 sm:$0xff]   ;;  %v785_v62 = vshrl.u32 %v11897_v57, 16 }
  0x3f   : > { %2146 = vmatprep.subr.bf16.mxu1 %v10039_v63  ;;  %v787_v63 = vshll.u32 %v11897_v57, 16  ;;  %v10116_v15 = vld [vmem:[%s14998_s1 + $0xfc0] ss:$16 sps:$4 sm:$0xff]   ;;  %v10124_v17 = vld [vmem:[%s14998_s1 + $0xfa4] ss:$16 sps:$4 sm:$0xff]  }
  0x41   : > { %2106 = vmatpush2.bf16.msra.mxu0 %v10041_v4  ;;  %v10109_v4 = vld [vmem:[%s14998_s1 + $0xde4] ss:$16 sps:$4 sm:$0xff]  }
  0x42   : > { %2147 = vmatpush2.bf16.msra.mxu1 %v10042_v5  ;;  %2107 = vmatprep.subr.bf16.mxu0 %v10043_v6  ;;  %v775_v5 = vrot.slane %v773_v59, 1  ;;  %v10112_v6 = vld [vmem:[%s14998_s1 + $0xfe4] ss:$16 sps:$4 sm:$0xff]   ;;  %v10162_v59 = vld [vmem:[%s14998_s1 + $0xae8] ss:$16 sps:$4 sm:$0xff]  }
  0x43   : > { %2148 = vmatprep.subr.bf16.mxu1 %v10045_v7  ;;  %v789_v7 = vrot.slane %v787_v63, 1  ;;  %v10168_v63 = vld [vmem:[%s14998_s1 + $0xac8] ss:$16 sps:$4 sm:$0xff]  }
  0x44   : > { %v11915_v8 = vor.u32 %v775_v5, %v771_v58  ;;  %v10159_v58 = vld [vmem:[%s14998_s1 + $0x8e8] ss:$16 sps:$4 sm:$0xff]   ;;  %v10176_v5 = vld [vmem:[%s14998_s1 + $0xaac] ss:$16 sps:$4 sm:$0xff]  }
  0x45   : > { %2108 = vmatpush2.bf16.msra.mxu0 %v10047_v10  ;;  %v10110_v10 = vld [vmem:[%s14998_s1 + $0xfe0] ss:$16 sps:$4 sm:$0xff]  }
  0x46   : > { %2149 = vmatpush2.bf16.msra.mxu1 %v10048_v11  ;;  %2109 = vmatprep.subr.bf16.mxu0 %v10049_v12  ;;  %v11923_v11 = vor.u32 %v789_v7, %v785_v62  ;;  %v10115_v12 = vld [vmem:[%s14998_s1 + $0xdc4] ss:$16 sps:$4 sm:$0xff]   ;;  %v10165_v62 = vld [vmem:[%s14998_s1 + $0x8c8] ss:$16 sps:$4 sm:$0xff]  }
  0x47   : > { %2150 = vmatprep.subr.bf16.mxu1 %v10051_v13  ;;  %v10118_v13 = vld [vmem:[%s14998_s1 + $0xfc4] ss:$16 sps:$4 sm:$0xff]   ;;  %v10174_v7 = vld [vmem:[%s14998_s1 + $0xaa8] ss:$16 sps:$4 sm:$0xff]  }
  0x49   : > { %2110 = vmatpush2.bf16.msra.mxu0 %v10053_v18  ;;  %v10119_v18 = vld [vmem:[%s14998_s1 + $0xda0] ss:$16 sps:$4 sm:$0xff]  }
  0x4a   : > { %2151 = vmatpush2.bf16.msra.mxu1 %v10054_v19  ;;  %2161 = vmatprep.subr.bf16.mxu0 %v10061_v20  ;;  %v10122_v19 = vld [vmem:[%s14998_s1 + $0xfa0] ss:$16 sps:$4 sm:$0xff]   ;;  %v10127_v20 = vld [vmem:[%s14998_s1 + $0xd84] ss:$16 sps:$4 sm:$0xff]  }
  0x4b   : > { %2202 = vmatprep.subr.bf16.mxu1 %v10064_v21  ;;  %v10130_v21 = vld [vmem:[%s14998_s1 + $0xf84] ss:$16 sps:$4 sm:$0xff]  }
  0x4c   : > { %2112 = vmatmul.mubr.bf16.vlgmr.msra.gmra.mxu0 %v11795_v22 }
  0x4d   : > { %2153 = vmatmul.mubr.bf16.vlgmr.msra.gmra.mxu1 %v11797_v23  ;;  %2162 = vmatpush1.bf16.msra.mxu0 %v10059_v24  ;;  %v10125_v24 = vld [vmem:[%s14998_s1 + $0xd80] ss:$16 sps:$4 sm:$0xff]  }
  0x4e   : > { %2203 = vmatpush1.bf16.msra.mxu1 %v10062_v25  ;;  %2163 = vmatprep.subr.bf16.mxu0 %v10067_v26  ;;  %v10128_v25 = vld [vmem:[%s14998_s1 + $0xf80] ss:$16 sps:$4 sm:$0xff]   ;;  %v10133_v26 = vld [vmem:[%s14998_s1 + $0xd64] ss:$16 sps:$4 sm:$0xff]  }
  0x4f   : > { %2204 = vmatprep.subr.bf16.mxu1 %v10070_v27  ;;  %2193 = vmatprep.mubr.bf16.mxu0 %v11915_v8  ;;  %v10136_v27 = vld [vmem:[%s14998_s1 + $0xf64] ss:$16 sps:$4 sm:$0xff]  }
  0x50   : > { %2234 = vmatprep.mubr.bf16.mxu1 %v11923_v11 }
  0x51   : > { %2164 = vmatpush1.bf16.msra.mxu0 %v10065_v28  ;;  %v10131_v28 = vld [vmem:[%s14998_s1 + $0xd60] ss:$16 sps:$4 sm:$0xff]  }
  0x52   : > { %2205 = vmatpush1.bf16.msra.mxu1 %v10068_v29  ;;  %2165 = vmatprep.subr.bf16.mxu0 %v10073_v30  ;;  %v10134_v29 = vld [vmem:[%s14998_s1 + $0xf60] ss:$16 sps:$4 sm:$0xff]   ;;  %v10139_v30 = vld [vmem:[%s14998_s1 + $0xd44] ss:$16 sps:$4 sm:$0xff]  }
  0x53   : > { %2206 = vmatprep.subr.bf16.mxu1 %v10076_v31  ;;  %v10142_v31 = vld [vmem:[%s14998_s1 + $0xf44] ss:$16 sps:$4 sm:$0xff]  }
  0x55   : > { %2166 = vmatpush1.bf16.msra.mxu0 %v10071_v32  ;;  %v10137_v32 = vld [vmem:[%s14998_s1 + $0xd40] ss:$16 sps:$4 sm:$0xff]  }
  0x56   : > { %2207 = vmatpush1.bf16.msra.mxu1 %v10074_v33  ;;  %2167 = vmatprep.subr.bf16.mxu0 %v10079_v34  ;;  %v10140_v33 = vld [vmem:[%s14998_s1 + $0xf40] ss:$16 sps:$4 sm:$0xff]   ;;  %v11989_v34 = vcombine.low %v11880_v51, %v11880_v51  ;;  %v10161_v51 = vld [vmem:[%s14998_s1 + $0x8ec] ss:$16 sps:$4 sm:$0xff]  }
  0x57   : > { %2208 = vmatprep.subr.bf16.mxu1 %v10082_v35  ;;  %v11993_v35 = vcombine.low %v11883_v53, %v11883_v53  ;;  %v10164_v53 = vld [vmem:[%s14998_s1 + $0xaec] ss:$16 sps:$4 sm:$0xff]  }
  0x59   : > { %2168 = vmatpush1.bf16.msra.mxu0 %v10077_v36  ;;  %v10145_v36 = vld [vmem:[%s14998_s1 + $0xd24] ss:$16 sps:$4 sm:$0xff]  }
  0x5a   : > { %2209 = vmatpush1.bf16.msra.mxu1 %v10080_v37  ;;  %2169 = vmatprep.subr.bf16.mxu0 %v10085_v38  ;;  %v10148_v37 = vld [vmem:[%s14998_s1 + $0xf24] ss:$16 sps:$4 sm:$0xff]   ;;  %v10143_v38 = vld [vmem:[%s14998_s1 + $0xd20] ss:$16 sps:$4 sm:$0xff]  }
  0x5b   : > { %2210 = vmatprep.subr.bf16.mxu1 %v10088_v39  ;;  %v10146_v39 = vld [vmem:[%s14998_s1 + $0xf20] ss:$16 sps:$4 sm:$0xff]  }
  0x5d   : > { %2170 = vmatpush1.bf16.msra.mxu0 %v10083_v40  ;;  %v766_v40 = vshll.u32 %v11989_v34, 16 }
  0x5e   : > { %2211 = vmatpush1.bf16.msra.mxu1 %v10086_v41  ;;  %2171 = vmatprep.subr.bf16.mxu0 %v10091_v42  ;;  %v780_v41 = vshll.u32 %v11993_v35, 16  ;;  %v10151_v42 = vld [vmem:[%s14998_s1 + $0xd04] ss:$16 sps:$4 sm:$0xff]  }
  0x5f   : > { %2212 = vmatprep.subr.bf16.mxu1 %v10094_v43  ;;  %v10154_v43 = vld [vmem:[%s14998_s1 + $0xf04] ss:$16 sps:$4 sm:$0xff]  }
  0x61   : > { %2172 = vmatpush1.bf16.msra.mxu0 %v10089_v44  ;;  %v10149_v44 = vld [vmem:[%s14998_s1 + $0xd00] ss:$16 sps:$4 sm:$0xff]  }
  0x62   : > { %2213 = vmatpush1.bf16.msra.mxu1 %v10092_v45  ;;  %2173 = vmatprep.subr.bf16.mxu0 %v10097_v46  ;;  %v10152_v45 = vld [vmem:[%s14998_s1 + $0xf00] ss:$16 sps:$4 sm:$0xff]   ;;  %v764_v46 = vshrl.u32 %v11989_v34, 16 }
  0x63   : > { %2214 = vmatprep.subr.bf16.mxu1 %v10100_v47  ;;  %v768_v47 = vrot.slane %v766_v40, 1  ;;  %v10221_v40 = vld [vmem:[%s14998_s1 + $0x9ac] ss:$16 sps:$4 sm:$0xff]  }
  0x65   : > { %2174 = vmatpush1.bf16.msra.mxu0 %v10095_v49  ;;  %v778_v49 = vshrl.u32 %v11993_v35, 16 }
  0x66   : > { %2215 = vmatpush1.bf16.msra.mxu1 %v10098_v50  ;;  %2175 = vmatprep.subr.bf16.mxu0 %v10103_v54  ;;  %v782_v50 = vrot.slane %v780_v41, 1  ;;  %v12029_v54 = vor.u32 %v768_v47, %v764_v46  ;;  %v10224_v41 = vld [vmem:[%s14998_s1 + $0xbac] ss:$16 sps:$4 sm:$0xff]   ;;  %v10225_v46 = vld [vmem:[%s14998_s1 + $0x988] ss:$16 sps:$4 sm:$0xff]  }
  0x67   : > { %2216 = vmatprep.subr.bf16.mxu1 %v10106_v56  ;;  %v10228_v47 = vld [vmem:[%s14998_s1 + $0xb88] ss:$16 sps:$4 sm:$0xff]  }
  0x68   : > { %v12031_v56 = vor.u32 %v782_v50, %v778_v49  ;;  %v10233_v49 = vld [vmem:[%s14998_s1 + $0x96c] ss:$16 sps:$4 sm:$0xff]  }
  0x69   : > { %2176 = vmatpush1.bf16.msra.mxu0 %v10101_v60  ;;  %v10167_v60 = vld [vmem:[%s14998_s1 + $0x8cc] ss:$16 sps:$4 sm:$0xff]  }
  0x6a   : > { %2217 = vmatpush1.bf16.msra.mxu1 %v10104_v61  ;;  %2177 = vmatprep.subr.bf16.mxu0 %v10109_v4  ;;  %v10170_v61 = vld [vmem:[%s14998_s1 + $0xacc] ss:$16 sps:$4 sm:$0xff]  }
  0x6b   : > { %2218 = vmatprep.subr.bf16.mxu1 %v10112_v6  ;;  %v10173_v4 = vld [vmem:[%s14998_s1 + $0x8ac] ss:$16 sps:$4 sm:$0xff]   ;;  %v10171_v6 = vld [vmem:[%s14998_s1 + $0x8a8] ss:$16 sps:$4 sm:$0xff]  }
  0x6c   : > { %v10236_v50 = vld [vmem:[%s14998_s1 + $0xb6c] ss:$16 sps:$4 sm:$0xff]  }
  0x6d   : > { %2178 = vmatpush2.bf16.msra.mxu0 %v10107_v9  ;;  %v10179_v9 = vld [vmem:[%s14998_s1 + $0x88c] ss:$16 sps:$4 sm:$0xff]  }
  0x6e   : > { %2219 = vmatpush2.bf16.msra.mxu1 %v10110_v10  ;;  %2179 = vmatprep.subr.bf16.mxu0 %v10115_v12  ;;  %v10180_v10 = vld [vmem:[%s14998_s1 + $0xa88] ss:$16 sps:$4 sm:$0xff]   ;;  %v10185_v12 = vld [vmem:[%s14998_s1 + $0x86c] ss:$16 sps:$4 sm:$0xff]  }
  0x6f   : > { %2220 = vmatprep.subr.bf16.mxu1 %v10118_v13  ;;  %v10188_v13 = vld [vmem:[%s14998_s1 + $0xa6c] ss:$16 sps:$4 sm:$0xff]  }
  0x71   : > { %2180 = vmatpush2.bf16.msra.mxu0 %v10113_v14  ;;  %v10183_v14 = vld [vmem:[%s14998_s1 + $0x868] ss:$16 sps:$4 sm:$0xff]  }
  0x72   : > { %2221 = vmatpush2.bf16.msra.mxu1 %v10116_v15  ;;  %2181 = vmatprep.subr.bf16.mxu0 %v10121_v16  ;;  %v10186_v15 = vld [vmem:[%s14998_s1 + $0xa68] ss:$16 sps:$4 sm:$0xff]   ;;  %v10191_v16 = vld [vmem:[%s14998_s1 + $0x84c] ss:$16 sps:$4 sm:$0xff]  }
  0x73   : > { %2222 = vmatprep.subr.bf16.mxu1 %v10124_v17  ;;  %v10194_v17 = vld [vmem:[%s14998_s1 + $0xa4c] ss:$16 sps:$4 sm:$0xff]  }
  0x75   : > { %2182 = vmatpush2.bf16.msra.mxu0 %v10119_v18  ;;  %v10189_v18 = vld [vmem:[%s14998_s1 + $0x848] ss:$16 sps:$4 sm:$0xff]  }
  0x76   : > { %2223 = vmatpush2.bf16.msra.mxu1 %v10122_v19  ;;  %2183 = vmatprep.subr.bf16.mxu0 %v10127_v20  ;;  %v10192_v19 = vld [vmem:[%s14998_s1 + $0xa48] ss:$16 sps:$4 sm:$0xff]   ;;  %v10197_v20 = vld [vmem:[%s14998_s1 + $0x82c] ss:$16 sps:$4 sm:$0xff]  }
  0x77   : > { %2224 = vmatprep.subr.bf16.mxu1 %v10130_v21  ;;  %v10200_v21 = vld [vmem:[%s14998_s1 + $0xa2c] ss:$16 sps:$4 sm:$0xff]  }
  0x79   : > { %2184 = vmatpush2.bf16.msra.mxu0 %v10125_v24  ;;  %v10195_v24 = vld [vmem:[%s14998_s1 + $0x828] ss:$16 sps:$4 sm:$0xff]  }
  0x7a   : > { %2225 = vmatpush2.bf16.msra.mxu1 %v10128_v25  ;;  %2185 = vmatprep.subr.bf16.mxu0 %v10133_v26  ;;  %v10198_v25 = vld [vmem:[%s14998_s1 + $0xa28] ss:$16 sps:$4 sm:$0xff]   ;;  %v10203_v26 = vld [vmem:[%s14998_s1 + $0x80c] ss:$16 sps:$4 sm:$0xff]  }
  0x7b   : > { %2226 = vmatprep.subr.bf16.mxu1 %v10136_v27  ;;  %v10206_v27 = vld [vmem:[%s14998_s1 + $0xa0c] ss:$16 sps:$4 sm:$0xff]  }
  0x7d   : > { %2186 = vmatpush2.bf16.msra.mxu0 %v10131_v28  ;;  %v10201_v28 = vld [vmem:[%s14998_s1 + $0x808] ss:$16 sps:$4 sm:$0xff]  }
  0x7e   : > { %2227 = vmatpush2.bf16.msra.mxu1 %v10134_v29  ;;  %2187 = vmatprep.subr.bf16.mxu0 %v10139_v30  ;;  %v10204_v29 = vld [vmem:[%s14998_s1 + $0xa08] ss:$16 sps:$4 sm:$0xff]   ;;  %v10209_v30 = vld [vmem:[%s14998_s1 + $0x9ec] ss:$16 sps:$4 sm:$0xff]  }
  0x7f   : > { %2228 = vmatprep.subr.bf16.mxu1 %v10142_v31  ;;  %v10212_v31 = vld [vmem:[%s14998_s1 + $0xbec] ss:$16 sps:$4 sm:$0xff]  }
  0x81   : > { %2188 = vmatpush2.bf16.msra.mxu0 %v10137_v32  ;;  %v10207_v32 = vld [vmem:[%s14998_s1 + $0x9e8] ss:$16 sps:$4 sm:$0xff]  }
  0x82   : > { %2229 = vmatpush2.bf16.msra.mxu1 %v10140_v33  ;;  %2189 = vmatprep.subr.bf16.mxu0 %v10145_v36  ;;  %v10210_v33 = vld [vmem:[%s14998_s1 + $0xbe8] ss:$16 sps:$4 sm:$0xff]   ;;  %v10215_v36 = vld [vmem:[%s14998_s1 + $0x9cc] ss:$16 sps:$4 sm:$0xff]  }
  0x83   : > { %2230 = vmatprep.subr.bf16.mxu1 %v10148_v37  ;;  %v10218_v37 = vld [vmem:[%s14998_s1 + $0xbcc] ss:$16 sps:$4 sm:$0xff]  }
  0x85   : > { %2190 = vmatpush2.bf16.msra.mxu0 %v10143_v38  ;;  %v10213_v38 = vld [vmem:[%s14998_s1 + $0x9c8] ss:$16 sps:$4 sm:$0xff]  }
  0x86   : > { %2231 = vmatpush2.bf16.msra.mxu1 %v10146_v39  ;;  %2191 = vmatprep.subr.bf16.mxu0 %v10151_v42  ;;  %v10216_v39 = vld [vmem:[%s14998_s1 + $0xbc8] ss:$16 sps:$4 sm:$0xff]  }
  0x87   : > { %2232 = vmatprep.subr.bf16.mxu1 %v10154_v43  ;;  %v10219_v42 = vld [vmem:[%s14998_s1 + $0x9a8] ss:$16 sps:$4 sm:$0xff]  }
  0x88   : > { %v10222_v43 = vld [vmem:[%s14998_s1 + $0xba8] ss:$16 sps:$4 sm:$0xff]  }
  0x89   : > { %2192 = vmatpush2.bf16.msra.mxu0 %v10149_v44  ;;  %v10227_v44 = vld [vmem:[%s14998_s1 + $0x98c] ss:$16 sps:$4 sm:$0xff]  }
  0x8a   : > { %2233 = vmatpush2.bf16.msra.mxu1 %v10152_v45  ;;  %2243 = vmatprep.subr.bf16.mxu0 %v10161_v51  ;;  %v10230_v45 = vld [vmem:[%s14998_s1 + $0xb8c] ss:$16 sps:$4 sm:$0xff]   ;;  %v10231_v51 = vld [vmem:[%s14998_s1 + $0x968] ss:$16 sps:$4 sm:$0xff]  }
  0x8b   : > { %2284 = vmatprep.subr.bf16.mxu1 %v10164_v53  ;;  %v10234_v53 = vld [vmem:[%s14998_s1 + $0xb68] ss:$16 sps:$4 sm:$0xff]  }
  0x8c   : > { %2194 = vmatmul.mubr.bf16.vlgmr.msra.gmra.mxu0 %v12029_v54 }
  0x8d   : > { %2235 = vmatmul.mubr.bf16.vlgmr.msra.gmra.mxu1 %v12031_v56  ;;  %2244 = vmatpush1.bf16.msra.mxu0 %v10159_v58  ;;  %v10239_v58 = vld [vmem:[%s14998_s1 + $0x94c] ss:$16 sps:$4 sm:$0xff]  }
  0x8e   : > { %2285 = vmatpush1.bf16.msra.mxu1 %v10162_v59  ;;  %2245 = vmatprep.subr.bf16.mxu0 %v10167_v60  ;;  %v10242_v59 = vld [vmem:[%s14998_s1 + $0xb4c] ss:$16 sps:$4 sm:$0xff]   ;;  %v10237_v60 = vld [vmem:[%s14998_s1 + $0x948] ss:$16 sps:$4 sm:$0xff]  }
  0x8f   : > { %2286 = vmatprep.subr.bf16.mxu1 %v10170_v61  ;;  %2275 = vmatprep.mubr.bf16.mxu0 %v11745_v0  ;;  %v10182_v0 = vld [vmem:[%s14998_s1 + $0xa8c] ss:$16 sps:$4 sm:$0xff]   ;;  %v10240_v61 = vld [vmem:[%s14998_s1 + $0xb48] ss:$16 sps:$4 sm:$0xff]  }
  0x90   : > { %2316 = vmatprep.mubr.bf16.mxu1 %v11747_v1  ;;  %v10177_v1 = vld [vmem:[%s14998_s1 + $0x888] ss:$16 sps:$4 sm:$0xff]  }
  0x91   : > { %2246 = vmatpush1.bf16.msra.mxu0 %v10165_v62  ;;  %v10245_v62 = vld [vmem:[%s14998_s1 + $0x92c] ss:$16 sps:$4 sm:$0xff]  }
  0x92   : > { %2287 = vmatpush1.bf16.msra.mxu1 %v10168_v63  ;;  %2247 = vmatprep.subr.bf16.mxu0 %v10173_v4  ;;  %v10248_v63 = vld [vmem:[%s14998_s1 + $0xb2c] ss:$16 sps:$4 sm:$0xff]   ;;  %v10243_v4 = vld [vmem:[%s14998_s1 + $0x928] ss:$16 sps:$4 sm:$0xff]  }
  0x93   : > { %2288 = vmatprep.subr.bf16.mxu1 %v10176_v5  ;;  %v10246_v5 = vld [vmem:[%s14998_s1 + $0xb28] ss:$16 sps:$4 sm:$0xff]  }
  0x95   : > { %2248 = vmatpush1.bf16.msra.mxu0 %v10171_v6  ;;  %v10251_v6 = vld [vmem:[%s14998_s1 + $0x90c] ss:$16 sps:$4 sm:$0xff]  }
  0x96   : > { %2289 = vmatpush1.bf16.msra.mxu1 %v10174_v7  ;;  %2249 = vmatprep.subr.bf16.mxu0 %v10179_v9  ;;  %v10254_v7 = vld [vmem:[%s14998_s1 + $0xb0c] ss:$16 sps:$4 sm:$0xff]   ;;  %v10249_v9 = vld [vmem:[%s14998_s1 + $0x908] ss:$16 sps:$4 sm:$0xff]  }
  0x97   : > { %2290 = vmatprep.subr.bf16.mxu1 %v10182_v0  ;;  %v10252_v0 = vld [vmem:[%s14998_s1 + $0xb08] ss:$16 sps:$4 sm:$0xff]  }
  0x99   : > { %2250 = vmatpush1.bf16.msra.mxu0 %v10177_v1  ;;  %v10257_v1 = vld [vmem:[%s14998_s1 + $0xcec] ss:$16 sps:$4 sm:$0xff]  }
  0x9a   : > { %2291 = vmatpush1.bf16.msra.mxu1 %v10180_v10  ;;  %2251 = vmatprep.subr.bf16.mxu0 %v10185_v12  ;;  %v10260_v10 = vld [vmem:[%s14998_s1 + $0xeec] ss:$16 sps:$4 sm:$0xff]   ;;  %v10255_v12 = vld [vmem:[%s14998_s1 + $0xce8] ss:$16 sps:$4 sm:$0xff]  }
  0x9b   : > { %2292 = vmatprep.subr.bf16.mxu1 %v10188_v13  ;;  %v10258_v13 = vld [vmem:[%s14998_s1 + $0xee8] ss:$16 sps:$4 sm:$0xff]  }
  0x9d   : > { %2252 = vmatpush1.bf16.msra.mxu0 %v10183_v14  ;;  %v10263_v14 = vld [vmem:[%s14998_s1 + $0xccc] ss:$16 sps:$4 sm:$0xff]  }
  0x9e   : > { %2293 = vmatpush1.bf16.msra.mxu1 %v10186_v15  ;;  %2253 = vmatprep.subr.bf16.mxu0 %v10191_v16  ;;  %v10266_v15 = vld [vmem:[%s14998_s1 + $0xecc] ss:$16 sps:$4 sm:$0xff]   ;;  %v10261_v16 = vld [vmem:[%s14998_s1 + $0xcc8] ss:$16 sps:$4 sm:$0xff]  }
  0x9f   : > { %2294 = vmatprep.subr.bf16.mxu1 %v10194_v17  ;;  %v10264_v17 = vld [vmem:[%s14998_s1 + $0xec8] ss:$16 sps:$4 sm:$0xff]  }
  0xa1   : > { %2254 = vmatpush1.bf16.msra.mxu0 %v10189_v18  ;;  %v10269_v18 = vld [vmem:[%s14998_s1 + $0xcac] ss:$16 sps:$4 sm:$0xff]  }
  0xa2   : > { %2295 = vmatpush1.bf16.msra.mxu1 %v10192_v19  ;;  %2255 = vmatprep.subr.bf16.mxu0 %v10197_v20  ;;  %v10270_v19 = vld [vmem:[%s14998_s1 + $0xea8] ss:$16 sps:$4 sm:$0xff]   ;;  %v10275_v20 = vld [vmem:[%s14998_s1 + $0xc8c] ss:$16 sps:$4 sm:$0xff]  }
  0xa3   : > { %2296 = vmatprep.subr.bf16.mxu1 %v10200_v21  ;;  %v10276_v21 = vld [vmem:[%s14998_s1 + $0xe88] ss:$16 sps:$4 sm:$0xff]  }
  0xa5   : > { %2256 = vmatpush1.bf16.msra.mxu0 %v10195_v24  ;;  %v10281_v24 = vld [vmem:[%s14998_s1 + $0xc6c] ss:$16 sps:$4 sm:$0xff]  }
  0xa6   : > { %2297 = vmatpush1.bf16.msra.mxu1 %v10198_v25  ;;  %2257 = vmatprep.subr.bf16.mxu0 %v10203_v26  ;;  %v10284_v25 = vld [vmem:[%s14998_s1 + $0xe6c] ss:$16 sps:$4 sm:$0xff]   ;;  %v10279_v26 = vld [vmem:[%s14998_s1 + $0xc68] ss:$16 sps:$4 sm:$0xff]  }
  0xa7   : > { %2298 = vmatprep.subr.bf16.mxu1 %v10206_v27  ;;  %v10282_v27 = vld [vmem:[%s14998_s1 + $0xe68] ss:$16 sps:$4 sm:$0xff]  }
  0xa9   : > { %2258 = vmatpush1.bf16.msra.mxu0 %v10201_v28  ;;  %v10287_v28 = vld [vmem:[%s14998_s1 + $0xc4c] ss:$16 sps:$4 sm:$0xff]  }
  0xaa   : > { %2299 = vmatpush1.bf16.msra.mxu1 %v10204_v29  ;;  %2259 = vmatprep.subr.bf16.mxu0 %v10209_v30  ;;  %v10290_v29 = vld [vmem:[%s14998_s1 + $0xe4c] ss:$16 sps:$4 sm:$0xff]   ;;  %v10285_v30 = vld [vmem:[%s14998_s1 + $0xc48] ss:$16 sps:$4 sm:$0xff]  }
  0xab   : > { %2300 = vmatprep.subr.bf16.mxu1 %v10212_v31  ;;  %v10288_v31 = vld [vmem:[%s14998_s1 + $0xe48] ss:$16 sps:$4 sm:$0xff]  }
  0xad   : > { %2260 = vmatpush2.bf16.msra.mxu0 %v10207_v32  ;;  %v10293_v32 = vld [vmem:[%s14998_s1 + $0xc2c] ss:$16 sps:$4 sm:$0xff]  }
  0xae   : > { %2301 = vmatpush2.bf16.msra.mxu1 %v10210_v33  ;;  %2261 = vmatprep.subr.bf16.mxu0 %v10215_v36  ;;  %v10296_v33 = vld [vmem:[%s14998_s1 + $0xe2c] ss:$16 sps:$4 sm:$0xff]   ;;  %v10291_v36 = vld [vmem:[%s14998_s1 + $0xc28] ss:$16 sps:$4 sm:$0xff]  }
  0xaf   : > { %2302 = vmatprep.subr.bf16.mxu1 %v10218_v37  ;;  %v10294_v37 = vld [vmem:[%s14998_s1 + $0xe28] ss:$16 sps:$4 sm:$0xff]  }
  0xb1   : > { %2262 = vmatpush2.bf16.msra.mxu0 %v10213_v38  ;;  %v10299_v38 = vld [vmem:[%s14998_s1 + $0xc0c] ss:$16 sps:$4 sm:$0xff]  }
  0xb2   : > { %2303 = vmatpush2.bf16.msra.mxu1 %v10216_v39  ;;  %2263 = vmatprep.subr.bf16.mxu0 %v10221_v40  ;;  %v10302_v39 = vld [vmem:[%s14998_s1 + $0xe0c] ss:$16 sps:$4 sm:$0xff]   ;;  %v10297_v40 = vld [vmem:[%s14998_s1 + $0xc08] ss:$16 sps:$4 sm:$0xff]  }
  0xb3   : > { %2304 = vmatprep.subr.bf16.mxu1 %v10224_v41  ;;  %v10300_v41 = vld [vmem:[%s14998_s1 + $0xe08] ss:$16 sps:$4 sm:$0xff]  }
  0xb5   : > { %2264 = vmatpush2.bf16.msra.mxu0 %v10219_v42  ;;  %v10305_v42 = vld [vmem:[%s14998_s1 + $0xdec] ss:$16 sps:$4 sm:$0xff]  }
  0xb6   : > { %2305 = vmatpush2.bf16.msra.mxu1 %v10222_v43  ;;  %2265 = vmatprep.subr.bf16.mxu0 %v10227_v44  ;;  %v10308_v43 = vld [vmem:[%s14998_s1 + $0xfec] ss:$16 sps:$4 sm:$0xff]   ;;  %v10303_v44 = vld [vmem:[%s14998_s1 + $0xde8] ss:$16 sps:$4 sm:$0xff]  }
  0xb7   : > { %2306 = vmatprep.subr.bf16.mxu1 %v10230_v45  ;;  %v10306_v45 = vld [vmem:[%s14998_s1 + $0xfe8] ss:$16 sps:$4 sm:$0xff]  }
  0xb9   : > { %2266 = vmatpush2.bf16.msra.mxu0 %v10225_v46  ;;  %v10311_v46 = vld [vmem:[%s14998_s1 + $0xdcc] ss:$16 sps:$4 sm:$0xff]  }
  0xba   : > { %2307 = vmatpush2.bf16.msra.mxu1 %v10228_v47  ;;  %2267 = vmatprep.subr.bf16.mxu0 %v10233_v49  ;;  %v10314_v47 = vld [vmem:[%s14998_s1 + $0xfcc] ss:$16 sps:$4 sm:$0xff]   ;;  %v10309_v49 = vld [vmem:[%s14998_s1 + $0xdc8] ss:$16 sps:$4 sm:$0xff]  }
  0xbb   : > { %2308 = vmatprep.subr.bf16.mxu1 %v10236_v50  ;;  %v10312_v50 = vld [vmem:[%s14998_s1 + $0xfc8] ss:$16 sps:$4 sm:$0xff]  }
  0xbd   : > { %2268 = vmatpush2.bf16.msra.mxu0 %v10231_v51  ;;  %v10317_v51 = vld [vmem:[%s14998_s1 + $0xdac] ss:$16 sps:$4 sm:$0xff]  }
  0xbe   : > { %2309 = vmatpush2.bf16.msra.mxu1 %v10234_v53  ;;  %2269 = vmatprep.subr.bf16.mxu0 %v10239_v58  ;;  %v10320_v53 = vld [vmem:[%s14998_s1 + $0xfac] ss:$16 sps:$4 sm:$0xff]   ;;  %v10315_v58 = vld [vmem:[%s14998_s1 + $0xda8] ss:$16 sps:$4 sm:$0xff]  }
  0xbf   : > { %2310 = vmatprep.subr.bf16.mxu1 %v10242_v59  ;;  %v10318_v59 = vld [vmem:[%s14998_s1 + $0xfa8] ss:$16 sps:$4 sm:$0xff]  }
  0xc1   : > { %2270 = vmatpush2.bf16.msra.mxu0 %v10237_v60  ;;  %v10323_v60 = vld [vmem:[%s14998_s1 + $0xd8c] ss:$16 sps:$4 sm:$0xff]  }
  0xc2   : > { %2311 = vmatpush2.bf16.msra.mxu1 %v10240_v61  ;;  %2271 = vmatprep.subr.bf16.mxu0 %v10245_v62  ;;  %v10326_v61 = vld [vmem:[%s14998_s1 + $0xf8c] ss:$16 sps:$4 sm:$0xff]   ;;  %v10321_v62 = vld [vmem:[%s14998_s1 + $0xd88] ss:$16 sps:$4 sm:$0xff]  }
  0xc3   : > { %2312 = vmatprep.subr.bf16.mxu1 %v10248_v63  ;;  %v10324_v63 = vld [vmem:[%s14998_s1 + $0xf88] ss:$16 sps:$4 sm:$0xff]  }
  0xc5   : > { %2272 = vmatpush2.bf16.msra.mxu0 %v10243_v4  ;;  %v10329_v4 = vld [vmem:[%s14998_s1 + $0xd6c] ss:$16 sps:$4 sm:$0xff]  }
  0xc6   : > { %2313 = vmatpush2.bf16.msra.mxu1 %v10246_v5  ;;  %2273 = vmatprep.subr.bf16.mxu0 %v10251_v6  ;;  %v10332_v5 = vld [vmem:[%s14998_s1 + $0xf6c] ss:$16 sps:$4 sm:$0xff]   ;;  %v10327_v6 = vld [vmem:[%s14998_s1 + $0xd68] ss:$16 sps:$4 sm:$0xff]  }
  0xc7   : > { %2314 = vmatprep.subr.bf16.mxu1 %v10254_v7  ;;  %v10330_v7 = vld [vmem:[%s14998_s1 + $0xf68] ss:$16 sps:$4 sm:$0xff]  }
  0xc9   : > { %2274 = vmatpush2.bf16.msra.mxu0 %v10249_v9  ;;  %v10335_v9 = vld [vmem:[%s14998_s1 + $0xd4c] ss:$16 sps:$4 sm:$0xff]  }
  0xca   : > { %2315 = vmatpush2.bf16.msra.mxu1 %v10252_v0  ;;  %2325 = vmatprep.subr.bf16.mxu0 %v10257_v1  ;;  %v10338_v0 = vld [vmem:[%s14998_s1 + $0xf4c] ss:$16 sps:$4 sm:$0xff]   ;;  %v10333_v1 = vld [vmem:[%s14998_s1 + $0xd48] ss:$16 sps:$4 sm:$0xff]  }
  0xcb   : > { %2366 = vmatprep.subr.bf16.mxu1 %v10260_v10  ;;  %v10336_v10 = vld [vmem:[%s14998_s1 + $0xf48] ss:$16 sps:$4 sm:$0xff]  }
  0xcc   : > { %2276 = vmatmul.mubr.bf16.vlgmr.msra.gmra.mxu0 %v11795_v22  ;;  %v10272_v22 = vld [vmem:[%s14998_s1 + $0xeac] ss:$16 sps:$4 sm:$0xff]  }
  0xcd   : > { %2317 = vmatmul.mubr.bf16.vlgmr.msra.gmra.mxu1 %v11797_v23  ;;  %2326 = vmatpush1.bf16.msra.mxu0 %v10255_v12  ;;  %v10267_v23 = vld [vmem:[%s14998_s1 + $0xca8] ss:$16 sps:$4 sm:$0xff]   ;;  %v10341_v12 = vld [vmem:[%s14998_s1 + $0xd2c] ss:$16 sps:$4 sm:$0xff]  }
  0xce   : > { %2367 = vmatpush1.bf16.msra.mxu1 %v10258_v13  ;;  %2327 = vmatprep.subr.bf16.mxu0 %v10263_v14  ;;  %v10344_v13 = vld [vmem:[%s14998_s1 + $0xf2c] ss:$16 sps:$4 sm:$0xff]   ;;  %v10339_v14 = vld [vmem:[%s14998_s1 + $0xd28] ss:$16 sps:$4 sm:$0xff]  }
  0xcf   : > { %2368 = vmatprep.subr.bf16.mxu1 %v10266_v15  ;;  %2357 = vmatprep.mubr.bf16.mxu0 %v11915_v8  ;;  %v10278_v8 = vld [vmem:[%s14998_s1 + $0xe8c] ss:$16 sps:$4 sm:$0xff]   ;;  %v10342_v15 = vld [vmem:[%s14998_s1 + $0xf28] ss:$16 sps:$4 sm:$0xff]  }
  0xd0   : > { %2398 = vmatprep.mubr.bf16.mxu1 %v11923_v11  ;;  %v10273_v11 = vld [vmem:[%s14998_s1 + $0xc88] ss:$16 sps:$4 sm:$0xff]  }
  0xd1   : > { %2328 = vmatpush1.bf16.msra.mxu0 %v10261_v16  ;;  %v10347_v16 = vld [vmem:[%s14998_s1 + $0xd0c] ss:$16 sps:$4 sm:$0xff]  }
  0xd2   : > { %2369 = vmatpush1.bf16.msra.mxu1 %v10264_v17  ;;  %2329 = vmatprep.subr.bf16.mxu0 %v10269_v18  ;;  %v10350_v17 = vld [vmem:[%s14998_s1 + $0xf0c] ss:$16 sps:$4 sm:$0xff]   ;;  %v10345_v18 = vld [vmem:[%s14998_s1 + $0xd08] ss:$16 sps:$4 sm:$0xff]  }
  0xd3   : > { %2370 = vmatprep.subr.bf16.mxu1 %v10272_v22  ;;  %v10348_v22 = vld [vmem:[%s14998_s1 + $0xf08] ss:$16 sps:$4 sm:$0xff]  }
  0xd5   : > { %2330 = vmatpush1.bf16.msra.mxu0 %v10267_v23  ;;  %v10353_v23 = vld [vmem:[%s14998_s1 + $0xe4] ss:$16 sps:$4 sm:$0xff]  }
  0xd6   : > { %2371 = vmatpush1.bf16.msra.mxu1 %v10270_v19  ;;  %2331 = vmatprep.subr.bf16.mxu0 %v10275_v20  ;;  %v10356_v19 = vld [vmem:[%s14998_s1 + $0x2e4] ss:$16 sps:$4 sm:$0xff]   ;;  %v10351_v20 = vld [vmem:[%s14998_s1 + $0xe0] ss:$16 sps:$4 sm:$0xff]  }
  0xd7   : > { %2372 = vmatprep.subr.bf16.mxu1 %v10278_v8  ;;  %v10354_v8 = vld [vmem:[%s14998_s1 + $0x2e0] ss:$16 sps:$4 sm:$0xff]  }
  0xd9   : > { %2332 = vmatpush1.bf16.msra.mxu0 %v10273_v11  ;;  %v10359_v11 = vld [vmem:[%s14998_s1 + $0xc4] ss:$16 sps:$4 sm:$0xff]  }
  0xda   : > { %2373 = vmatpush1.bf16.msra.mxu1 %v10276_v21  ;;  %2333 = vmatprep.subr.bf16.mxu0 %v10281_v24  ;;  %v10362_v21 = vld [vmem:[%s14998_s1 + $0x2c4] ss:$16 sps:$4 sm:$0xff]  }
  0xdb   : > { %2374 = vmatprep.subr.bf16.mxu1 %v10284_v25 }
  0xdd   : > { %2334 = vmatpush1.bf16.msra.mxu0 %v10279_v26  ;;  %v10357_v26 = vld [vmem:[%s14998_s1 + $0xc0] ss:$16 sps:$4 sm:$0xff]  }
  0xde   : > { %2375 = vmatpush1.bf16.msra.mxu1 %v10282_v27  ;;  %2335 = vmatprep.subr.bf16.mxu0 %v10287_v28  ;;  %v10360_v27 = vld [vmem:[%s14998_s1 + $0x2c0] ss:$16 sps:$4 sm:$0xff]  }
  0xdf   : > { %2376 = vmatprep.subr.bf16.mxu1 %v10290_v29  ;;  %v10365_v29 = vld [vmem:[%s14998_s1 + $0xa4] ss:$16 sps:$4 sm:$0xff]  }
  0xe1   : > { %2336 = vmatpush1.bf16.msra.mxu0 %v10285_v30 }
  0xe2   : > { %2377 = vmatpush1.bf16.msra.mxu1 %v10288_v31  ;;  %2337 = vmatprep.subr.bf16.mxu0 %v10293_v32 }
  0xe3   : > { %2378 = vmatprep.subr.bf16.mxu1 %v10296_v33 }
  0xe5   : > { %2338 = vmatpush1.bf16.msra.mxu0 %v10291_v36  ;;  %v10363_v36 = vld [vmem:[%s14998_s1 + $0xa0] ss:$16 sps:$4 sm:$0xff]  }
  0xe6   : > { %2379 = vmatpush1.bf16.msra.mxu1 %v10294_v37  ;;  %2339 = vmatprep.subr.bf16.mxu0 %v10299_v38  ;;  %v10366_v37 = vld [vmem:[%s14998_s1 + $0x2a0] ss:$16 sps:$4 sm:$0xff]   ;;  %v10371_v38 = vld [vmem:[%s14998_s1 + $0x84] ss:$16 sps:$4 sm:$0xff]  }
  0xe7   : > { %2380 = vmatprep.subr.bf16.mxu1 %v10302_v39 }
  0xe9   : > { %2340 = vmatpush1.bf16.msra.mxu0 %v10297_v40 }
  0xea   : > { %2381 = vmatpush1.bf16.msra.mxu1 %v10300_v41  ;;  %2341 = vmatprep.subr.bf16.mxu0 %v10305_v42  ;;  %v10374_v41 = vld [vmem:[%s14998_s1 + $0x284] ss:$16 sps:$4 sm:$0xff]   ;;  %v10369_v42 = vld [vmem:[%s14998_s1 + $0x80] ss:$16 sps:$4 sm:$0xff]  }
  0xeb   : > { %2382 = vmatprep.subr.bf16.mxu1 %v10308_v43  ;;  %v10372_v43 = vld [vmem:[%s14998_s1 + $0x280] ss:$16 sps:$4 sm:$0xff]  }
  0xed   : > { %2342 = vmatpush2.bf16.msra.mxu0 %v10303_v44  ;;  %v10377_v44 = vld [vmem:[%s14998_s1 + $0x64] ss:$16 sps:$4 sm:$0xff]  }
  0xee   : > { %2383 = vmatpush2.bf16.msra.mxu1 %v10306_v45  ;;  %2343 = vmatprep.subr.bf16.mxu0 %v10311_v46  ;;  %v10380_v45 = vld [vmem:[%s14998_s1 + $0x264] ss:$16 sps:$4 sm:$0xff]   ;;  %v10375_v46 = vld [vmem:[%s14998_s1 + $0x60] ss:$16 sps:$4 sm:$0xff]  }
  0xef   : > { %2384 = vmatprep.subr.bf16.mxu1 %v10314_v47  ;;  %v10378_v47 = vld [vmem:[%s14998_s1 + $0x260] ss:$16 sps:$4 sm:$0xff]  }
  0xf1   : > { %2344 = vmatpush2.bf16.msra.mxu0 %v10309_v49  ;;  %v10383_v49 = vld [vmem:[%s14998_s1 + $0x44] ss:$16 sps:$4 sm:$0xff]  }
  0xf2   : > { %2385 = vmatpush2.bf16.msra.mxu1 %v10312_v50  ;;  %2345 = vmatprep.subr.bf16.mxu0 %v10317_v51  ;;  %v10386_v50 = vld [vmem:[%s14998_s1 + $0x244] ss:$16 sps:$4 sm:$0xff]   ;;  %v10381_v51 = vld [vmem:[%s14998_s1 + $0x40] ss:$16 sps:$4 sm:$0xff]  }
  0xf3   : > { %2386 = vmatprep.subr.bf16.mxu1 %v10320_v53  ;;  %v10384_v53 = vld [vmem:[%s14998_s1 + $0x240] ss:$16 sps:$4 sm:$0xff]  }
  0xf5   : > { %2346 = vmatpush2.bf16.msra.mxu0 %v10315_v58  ;;  %v10389_v58 = vld [vmem:[%s14998_s1 + $0x24] ss:$16 sps:$4 sm:$0xff]  }
  0xf6   : > { %2387 = vmatpush2.bf16.msra.mxu1 %v10318_v59  ;;  %2347 = vmatprep.subr.bf16.mxu0 %v10323_v60  ;;  %v10392_v59 = vld [vmem:[%s14998_s1 + $0x224] ss:$16 sps:$4 sm:$0xff]   ;;  %v10387_v60 = vld [vmem:[%s14998_s1 + $0x20] ss:$16 sps:$4 sm:$0xff]  }
  0xf7   : > { %2388 = vmatprep.subr.bf16.mxu1 %v10326_v61  ;;  %v10390_v61 = vld [vmem:[%s14998_s1 + $0x220] ss:$16 sps:$4 sm:$0xff]  }
  0xf9   : > { %2348 = vmatpush2.bf16.msra.mxu0 %v10321_v62  ;;  %v10395_v62 = vld [vmem:[%s14998_s1 + $0x4] ss:$16 sps:$4 sm:$0xff]  }
  0xfa   : > { %2389 = vmatpush2.bf16.msra.mxu1 %v10324_v63  ;;  %2349 = vmatprep.subr.bf16.mxu0 %v10329_v4  ;;  %v10398_v63 = vld [vmem:[%s14998_s1 + $0x204] ss:$16 sps:$4 sm:$0xff]   ;;  %v10393_v4 = vld [vmem:[%s14998_s1] ss:$16 sps:$4 sm:$0xff]  }
  0xfb   : > { %2390 = vmatprep.subr.bf16.mxu1 %v10332_v5  ;;  %v10396_v5 = vld [vmem:[%s14998_s1 + $0x200] ss:$16 sps:$4 sm:$0xff]  }
  0xfd   : > { %2350 = vmatpush2.bf16.msra.mxu0 %v10327_v6  ;;  %v10401_v6 = vld [vmem:[%s14998_s1 + $0x1e4] ss:$16 sps:$4 sm:$0xff]  }
  0xfe   : > { %2391 = vmatpush2.bf16.msra.mxu1 %v10330_v7  ;;  %2351 = vmatprep.subr.bf16.mxu0 %v10335_v9  ;;  %v10404_v7 = vld [vmem:[%s14998_s1 + $0x3e4] ss:$16 sps:$4 sm:$0xff]   ;;  %v10399_v9 = vld [vmem:[%s14998_s1 + $0x1e0] ss:$16 sps:$4 sm:$0xff]  }
  0xff   : > { %2392 = vmatprep.subr.bf16.mxu1 %v10338_v0  ;;  %v10402_v0 = vld [vmem:[%s14998_s1 + $0x3e0] ss:$16 sps:$4 sm:$0xff]  }
 0x101   : > { %2352 = vmatpush2.bf16.msra.mxu0 %v10333_v1  ;;  %v10407_v1 = vld [vmem:[%s14998_s1 + $0x1c4] ss:$16 sps:$4 sm:$0xff]  }
 0x102   : > { %2393 = vmatpush2.bf16.msra.mxu1 %v10336_v10  ;;  %2353 = vmatprep.subr.bf16.mxu0 %v10341_v12  ;;  %v10410_v10 = vld [vmem:[%s14998_s1 + $0x3c4] ss:$16 sps:$4 sm:$0xff]   ;;  %v10405_v12 = vld [vmem:[%s14998_s1 + $0x1c0] ss:$16 sps:$4 sm:$0xff]  }
 0x103   : > { %2394 = vmatprep.subr.bf16.mxu1 %v10344_v13  ;;  %v10408_v13 = vld [vmem:[%s14998_s1 + $0x3c0] ss:$16 sps:$4 sm:$0xff]  }
 0x105   : > { %2354 = vmatpush2.bf16.msra.mxu0 %v10339_v14  ;;  %v10413_v14 = vld [vmem:[%s14998_s1 + $0x1a4] ss:$16 sps:$4 sm:$0xff]  }
 0x106   : > { %2395 = vmatpush2.bf16.msra.mxu1 %v10342_v15  ;;  %2355 = vmatprep.subr.bf16.mxu0 %v10347_v16  ;;  %v10416_v15 = vld [vmem:[%s14998_s1 + $0x3a4] ss:$16 sps:$4 sm:$0xff]   ;;  %v10411_v16 = vld [vmem:[%s14998_s1 + $0x1a0] ss:$16 sps:$4 sm:$0xff]  }
 0x107   : > { %2396 = vmatprep.subr.bf16.mxu1 %v10350_v17  ;;  %v10414_v17 = vld [vmem:[%s14998_s1 + $0x3a0] ss:$16 sps:$4 sm:$0xff]  }
 0x109   : > { %2356 = vmatpush2.bf16.msra.mxu0 %v10345_v18  ;;  %v10419_v18 = vld [vmem:[%s14998_s1 + $0x184] ss:$16 sps:$4 sm:$0xff]  }
 0x10a   : > { %2397 = vmatpush2.bf16.msra.mxu1 %v10348_v22  ;;  %3695 = vmatprep.subr.bf16.mxu0 %v10353_v23  ;;  %v10422_v22 = vld [vmem:[%s14998_s1 + $0x384] ss:$16 sps:$4 sm:$0xff]   ;;  %v10417_v23 = vld [vmem:[%s14998_s1 + $0x180] ss:$16 sps:$4 sm:$0xff]  }
 0x10b   : > { %3736 = vmatprep.subr.bf16.mxu1 %v10356_v19  ;;  %v10420_v19 = vld [vmem:[%s14998_s1 + $0x380] ss:$16 sps:$4 sm:$0xff]  }
 0x10c   : > { %v2113_v24 = vpop.f32.mrf.mxu0  ;;  %2358 = vmatmul.mubr.bf16.vlgmr.msra.gmra.mxu0 %v12029_v54 }
 0x10d   : > { %v2154_v25 = vpop.f32.mrf.mxu1  ;;  %2399 = vmatmul.mubr.bf16.vlgmr.msra.gmra.mxu1 %v12031_v56  ;;  %3696 = vmatpush1.bf16.msra.mxu0 %v10351_v20  ;;  %v10368_v56 = vld [vmem:[%s14998_s1 + $0x2a4] ss:$16 sps:$4 sm:$0xff]  }
 0x10e   : > { %v12445_v28 = vadd.f32 %v2154_v25, %v2113_v24  ;;  %3737 = vmatpush1.bf16.msra.mxu1 %v10354_v8  ;;  %v2115_v30 = vpop.f32.mrf.mxu0  ;;  %3697 = vmatprep.subr.bf16.mxu0 %v10359_v11  ;;  %v10425_v20 = vld [vmem:[%s14998_s1 + $0x164] ss:$16 sps:$4 sm:$0xff]   ;;  %v10423_v11 = vld [vmem:[%s14998_s1 + $0x160] ss:$16 sps:$4 sm:$0xff]  }
 0x10f   : > { %v2156_v54 = vpop.f32.mrf.mxu1  ;;  %3738 = vmatprep.subr.bf16.mxu1 %v10362_v21  ;;  %3727 = vmatprep.mubr.bf16.mxu0 %v11715_v48  ;;  %v10428_v8 = vld [vmem:[%s14998_s1 + $0x364] ss:$16 sps:$4 sm:$0xff]   ;;  %v10426_v21 = vld [vmem:[%s14998_s1 + $0x360] ss:$16 sps:$4 sm:$0xff]  }
 0x110   : > { %v12453_v31 = vadd.f32 %v2156_v54, %v2115_v30  ;;  %3768 = vmatprep.mubr.bf16.mxu1 %v11724_v52  ;;  %v2117_v32 = vpop.f32.mrf.mxu0  ;;  %v10431_v24 = vld [vmem:[%s14998_s1 + $0x144] ss:$16 sps:$4 sm:$0xff]   ;;  %v10435_v54 = vld [vmem:[%s14998_s1 + $0x120] ss:$16 sps:$4 sm:$0xff]  }
 0x111   : > { %v2158_v33 = vpop.f32.mrf.mxu1  ;;  %3698 = vmatpush1.bf16.msra.mxu0 %v10357_v26  ;;  %v10434_v25 = vld [vmem:[%s14998_s1 + $0x344] ss:$16 sps:$4 sm:$0xff]   ;;  %v10429_v26 = vld [vmem:[%s14998_s1 + $0x140] ss:$16 sps:$4 sm:$0xff]  }
 0x112   : > { %3739 = vmatpush1.bf16.msra.mxu1 %v10360_v27  ;;  %v2118_v39 = vpop.f32.mrf.mxu0  ;;  %3699 = vmatprep.subr.bf16.mxu0 %v10365_v29  ;;  %v10432_v27 = vld [vmem:[%s14998_s1 + $0x340] ss:$16 sps:$4 sm:$0xff]   ;;  %v10437_v29 = vld [vmem:[%s14998_s1 + $0x124] ss:$16 sps:$4 sm:$0xff]  }
 0x113   : > { %v2159_v40 = vpop.f32.mrf.mxu1  ;;  %3740 = vmatprep.subr.bf16.mxu1 %v10368_v56  ;;  %v10440_v30 = vld [vmem:[%s14998_s1 + $0x324] ss:$16 sps:$4 sm:$0xff]   ;;  %v10438_v56 = vld [vmem:[%s14998_s1 + $0x320] ss:$16 sps:$4 sm:$0xff]  }
 0x114   : > { %v10443_v32 = vld [vmem:[%s14998_s1 + $0x104] ss:$16 sps:$4 sm:$0xff]   ;;  %v10447_v40 = vld [vmem:[%s14998_s1 + $0x4e0] ss:$16 sps:$4 sm:$0xff]  }
 0x115   : > { %3700 = vmatpush1.bf16.msra.mxu0 %v10363_v36  ;;  %v10446_v33 = vld [vmem:[%s14998_s1 + $0x304] ss:$16 sps:$4 sm:$0xff]   ;;  %v10441_v36 = vld [vmem:[%s14998_s1 + $0x100] ss:$16 sps:$4 sm:$0xff]  }
 0x116   : > { %3741 = vmatpush1.bf16.msra.mxu1 %v10366_v37  ;;  %3701 = vmatprep.subr.bf16.mxu0 %v10371_v38  ;;  %v10444_v37 = vld [vmem:[%s14998_s1 + $0x300] ss:$16 sps:$4 sm:$0xff]   ;;  %v10449_v38 = vld [vmem:[%s14998_s1 + $0x4e4] ss:$16 sps:$4 sm:$0xff]  }
 0x117   : > { %3742 = vmatprep.subr.bf16.mxu1 %v10374_v41  ;;  %v10452_v39 = vld [vmem:[%s14998_s1 + $0x6e4] ss:$16 sps:$4 sm:$0xff]   ;;  %v10450_v41 = vld [vmem:[%s14998_s1 + $0x6e0] ss:$16 sps:$4 sm:$0xff]  }
 0x119   : > { %3702 = vmatpush1.bf16.msra.mxu0 %v10369_v42  ;;  %v10455_v42 = vld [vmem:[%s14998_s1 + $0x4c4] ss:$16 sps:$4 sm:$0xff]  }
 0x11a   : > { %3743 = vmatpush1.bf16.msra.mxu1 %v10372_v43  ;;  %3703 = vmatprep.subr.bf16.mxu0 %v10377_v44  ;;  %v10458_v43 = vld [vmem:[%s14998_s1 + $0x6c4] ss:$16 sps:$4 sm:$0xff]   ;;  %v10453_v44 = vld [vmem:[%s14998_s1 + $0x4c0] ss:$16 sps:$4 sm:$0xff]  }
 0x11b   : > { %3744 = vmatprep.subr.bf16.mxu1 %v10380_v45  ;;  %v10456_v45 = vld [vmem:[%s14998_s1 + $0x6c0] ss:$16 sps:$4 sm:$0xff]  }
 0x11d   : > { %3704 = vmatpush1.bf16.msra.mxu0 %v10375_v46 }
 0x11e   : > { %3745 = vmatpush1.bf16.msra.mxu1 %v10378_v47  ;;  %3705 = vmatprep.subr.bf16.mxu0 %v10383_v49 }
 0x11f   : > { %3746 = vmatprep.subr.bf16.mxu1 %v10386_v50 }
 0x121   : > { %3706 = vmatpush1.bf16.msra.mxu0 %v10381_v51 }
 0x122   : > { %3747 = vmatpush1.bf16.msra.mxu1 %v10384_v53  ;;  %3707 = vmatprep.subr.bf16.mxu0 %v10389_v58  ;;  %v10461_v53 = vld [vmem:[%s14998_s1 + $0x4a4] ss:$16 sps:$4 sm:$0xff]  }
 0x123   : > { %3748 = vmatprep.subr.bf16.mxu1 %v10392_v59  ;;  %v10464_v58 = vld [vmem:[%s14998_s1 + $0x6a4] ss:$16 sps:$4 sm:$0xff]  }
 0x125   : > { %3708 = vmatpush1.bf16.msra.mxu0 %v10387_v60 }
 0x126   : > { %3749 = vmatpush1.bf16.msra.mxu1 %v10390_v61  ;;  %3709 = vmatprep.subr.bf16.mxu0 %v10395_v62  ;;  %v10462_v61 = vld [vmem:[%s14998_s1 + $0x6a0] ss:$16 sps:$4 sm:$0xff]  }
 0x127   : > { %3750 = vmatprep.subr.bf16.mxu1 %v10398_v63 }
 0x129   : > { %3710 = vmatpush1.bf16.msra.mxu0 %v10393_v4 }
 0x12a   : > { %3751 = vmatpush1.bf16.msra.mxu1 %v10396_v5  ;;  %3711 = vmatprep.subr.bf16.mxu0 %v10401_v6  ;;  %v10467_v6 = vld [vmem:[%s14998_s1 + $0x484] ss:$16 sps:$4 sm:$0xff]  }
 0x12b   : > { %3752 = vmatprep.subr.bf16.mxu1 %v10404_v7  ;;  %v10470_v7 = vld [vmem:[%s14998_s1 + $0x684] ss:$16 sps:$4 sm:$0xff]  }
 0x12d   : > { %3712 = vmatpush2.bf16.msra.mxu0 %v10399_v9  ;;  %v10465_v9 = vld [vmem:[%s14998_s1 + $0x480] ss:$16 sps:$4 sm:$0xff]  }
 0x12e   : > { %3753 = vmatpush2.bf16.msra.mxu1 %v10402_v0  ;;  %3713 = vmatprep.subr.bf16.mxu0 %v10407_v1  ;;  %v10468_v0 = vld [vmem:[%s14998_s1 + $0x680] ss:$16 sps:$4 sm:$0xff]   ;;  %v10473_v1 = vld [vmem:[%s14998_s1 + $0x464] ss:$16 sps:$4 sm:$0xff]  }
 0x12f   : > { %3754 = vmatprep.subr.bf16.mxu1 %v10410_v10  ;;  %v10476_v10 = vld [vmem:[%s14998_s1 + $0x664] ss:$16 sps:$4 sm:$0xff]  }
 0x131   : > { %3714 = vmatpush2.bf16.msra.mxu0 %v10405_v12  ;;  %v10471_v12 = vld [vmem:[%s14998_s1 + $0x460] ss:$16 sps:$4 sm:$0xff]  }
 0x132   : > { %3755 = vmatpush2.bf16.msra.mxu1 %v10408_v13  ;;  %3715 = vmatprep.subr.bf16.mxu0 %v10413_v14  ;;  %v10474_v13 = vld [vmem:[%s14998_s1 + $0x660] ss:$16 sps:$4 sm:$0xff]   ;;  %v10479_v14 = vld [vmem:[%s14998_s1 + $0x444] ss:$16 sps:$4 sm:$0xff]  }
 0x133   : > { %3756 = vmatprep.subr.bf16.mxu1 %v10416_v15  ;;  %v10482_v15 = vld [vmem:[%s14998_s1 + $0x644] ss:$16 sps:$4 sm:$0xff]  }
 0x135   : > { %3716 = vmatpush2.bf16.msra.mxu0 %v10411_v16  ;;  %v10477_v16 = vld [vmem:[%s14998_s1 + $0x440] ss:$16 sps:$4 sm:$0xff]  }
 0x136   : > { %3757 = vmatpush2.bf16.msra.mxu1 %v10414_v17  ;;  %3717 = vmatprep.subr.bf16.mxu0 %v10419_v18  ;;  %v10480_v17 = vld [vmem:[%s14998_s1 + $0x640] ss:$16 sps:$4 sm:$0xff]   ;;  %v10485_v18 = vld [vmem:[%s14998_s1 + $0x424] ss:$16 sps:$4 sm:$0xff]  }
 0x137   : > { %3758 = vmatprep.subr.bf16.mxu1 %v10422_v22  ;;  %v10488_v22 = vld [vmem:[%s14998_s1 + $0x624] ss:$16 sps:$4 sm:$0xff]  }
 0x139   : > { %3718 = vmatpush2.bf16.msra.mxu0 %v10417_v23  ;;  %v10483_v23 = vld [vmem:[%s14998_s1 + $0x420] ss:$16 sps:$4 sm:$0xff]  }
 0x13a   : > { %3759 = vmatpush2.bf16.msra.mxu1 %v10420_v19  ;;  %3719 = vmatprep.subr.bf16.mxu0 %v10425_v20  ;;  %v10486_v19 = vld [vmem:[%s14998_s1 + $0x620] ss:$16 sps:$4 sm:$0xff]   ;;  %v10491_v20 = vld [vmem:[%s14998_s1 + $0x404] ss:$16 sps:$4 sm:$0xff]  }
 0x13b   : > { %3760 = vmatprep.subr.bf16.mxu1 %v10428_v8  ;;  %v10494_v8 = vld [vmem:[%s14998_s1 + $0x604] ss:$16 sps:$4 sm:$0xff]  }
 0x13d   : > { %3720 = vmatpush2.bf16.msra.mxu0 %v10423_v11  ;;  %v10489_v11 = vld [vmem:[%s14998_s1 + $0x400] ss:$16 sps:$4 sm:$0xff]  }
 0x13e   : > { %3761 = vmatpush2.bf16.msra.mxu1 %v10426_v21  ;;  %3721 = vmatprep.subr.bf16.mxu0 %v10431_v24  ;;  %v10492_v21 = vld [vmem:[%s14998_s1 + $0x600] ss:$16 sps:$4 sm:$0xff]   ;;  %v10497_v24 = vld [vmem:[%s14998_s1 + $0x5e4] ss:$16 sps:$4 sm:$0xff]  }
 0x13f   : > { %3762 = vmatprep.subr.bf16.mxu1 %v10434_v25  ;;  %v10500_v25 = vld [vmem:[%s14998_s1 + $0x7e4] ss:$16 sps:$4 sm:$0xff]  }
 0x141   : > { %3722 = vmatpush2.bf16.msra.mxu0 %v10429_v26  ;;  %v10495_v26 = vld [vmem:[%s14998_s1 + $0x5e0] ss:$16 sps:$4 sm:$0xff]  }
 0x142   : > { %3763 = vmatpush2.bf16.msra.mxu1 %v10432_v27  ;;  %3723 = vmatprep.subr.bf16.mxu0 %v10437_v29  ;;  %v10498_v27 = vld [vmem:[%s14998_s1 + $0x7e0] ss:$16 sps:$4 sm:$0xff]   ;;  %v10503_v29 = vld [vmem:[%s14998_s1 + $0x5c4] ss:$16 sps:$4 sm:$0xff]  }
 0x143   : > { %3764 = vmatprep.subr.bf16.mxu1 %v10440_v30  ;;  %v10506_v30 = vld [vmem:[%s14998_s1 + $0x7c4] ss:$16 sps:$4 sm:$0xff]  }
 0x145   : > { %3724 = vmatpush2.bf16.msra.mxu0 %v10435_v54  ;;  %v10501_v54 = vld [vmem:[%s14998_s1 + $0x5c0] ss:$16 sps:$4 sm:$0xff]  }
 0x146   : > { %3765 = vmatpush2.bf16.msra.mxu1 %v10438_v56  ;;  %3725 = vmatprep.subr.bf16.mxu0 %v10443_v32  ;;  %v10504_v56 = vld [vmem:[%s14998_s1 + $0x7c0] ss:$16 sps:$4 sm:$0xff]   ;;  %v10509_v32 = vld [vmem:[%s14998_s1 + $0x5a4] ss:$16 sps:$4 sm:$0xff]  }
 0x147   : > { %3766 = vmatprep.subr.bf16.mxu1 %v10446_v33  ;;  %v10512_v33 = vld [vmem:[%s14998_s1 + $0x7a4] ss:$16 sps:$4 sm:$0xff]  }
 0x149   : > { %3726 = vmatpush2.bf16.msra.mxu0 %v10441_v36  ;;  %v10507_v36 = vld [vmem:[%s14998_s1 + $0x5a0] ss:$16 sps:$4 sm:$0xff]  }
 0x14a   : > { %3767 = vmatpush2.bf16.msra.mxu1 %v10444_v37  ;;  %3777 = vmatprep.subr.bf16.mxu0 %v10449_v38  ;;  %v10510_v37 = vld [vmem:[%s14998_s1 + $0x7a0] ss:$16 sps:$4 sm:$0xff]   ;;  %v10515_v38 = vld [vmem:[%s14998_s1 + $0x584] ss:$16 sps:$4 sm:$0xff]  }
 0x14b   : > { %3818 = vmatprep.subr.bf16.mxu1 %v10452_v39  ;;  %v10518_v39 = vld [vmem:[%s14998_s1 + $0x784] ss:$16 sps:$4 sm:$0xff]  }
 0x14c   : > { %v2195_v46 = vpop.f32.mrf.mxu0  ;;  %3728 = vmatmul.mubr.bf16.vlgmr.msra.gmra.mxu0 %v11749_v2 }
 0x14d   : > { %v2236_v47 = vpop.f32.mrf.mxu1  ;;  %3769 = vmatmul.mubr.bf16.vlgmr.msra.gmra.mxu1 %v11752_v3  ;;  %v2196_v49 = vadd.f32 %v2195_v46, %v12445_v28  ;;  %3778 = vmatpush1.bf16.msra.mxu0 %v10447_v40  ;;  %v10459_v28 = vld [vmem:[%s14998_s1 + $0x4a0] ss:$16 sps:$4 sm:$0xff]   ;;  %v10527_v46 = vld [vmem:[%s14998_s1 + $0x544] ss:$16 sps:$4 sm:$0xff]  }
 0x14e   : > { %3819 = vmatpush1.bf16.msra.mxu1 %v10450_v41  ;;  %v2197_v50 = vpop.f32.mrf.mxu0  ;;  %3779 = vmatprep.subr.bf16.mxu0 %v10455_v42  ;;  %v10513_v40 = vld [vmem:[%s14998_s1 + $0x580] ss:$16 sps:$4 sm:$0xff]   ;;  %v10521_v42 = vld [vmem:[%s14998_s1 + $0x564] ss:$16 sps:$4 sm:$0xff]  }
 0x14f   : > { %v2238_v51 = vpop.f32.mrf.mxu1  ;;  %3820 = vmatprep.subr.bf16.mxu1 %v10458_v43  ;;  %v12652_v59 = vadd.f32 %v2236_v47, %v2196_v49  ;;  %v2198_v60 = vadd.f32 %v2197_v50, %v12453_v31  ;;  %3809 = vmatprep.mubr.bf16.mxu0 %v11890_v55  ;;  %v10516_v41 = vld [vmem:[%s14998_s1 + $0x780] ss:$16 sps:$4 sm:$0xff]   ;;  %v10524_v43 = vld [vmem:[%s14998_s1 + $0x764] ss:$16 sps:$4 sm:$0xff]  }
 0x150   : > { %3850 = vmatprep.mubr.bf16.mxu1 %v11897_v57  ;;  %v2199_v62 = vpop.f32.mrf.mxu0  ;;  %v10530_v47 = vld [vmem:[%s14998_s1 + $0x744] ss:$16 sps:$4 sm:$0xff]   ;;  %v10525_v49 = vld [vmem:[%s14998_s1 + $0x540] ss:$16 sps:$4 sm:$0xff]  }
 0x151   : > { %v2240_v63 = vpop.f32.mrf.mxu1  ;;  %v12663_v4 = vadd.f32 %v2238_v51, %v2198_v60  ;;  %3780 = vmatpush1.bf16.msra.mxu0 %v10453_v44  ;;  %v10519_v44 = vld [vmem:[%s14998_s1 + $0x560] ss:$16 sps:$4 sm:$0xff]   ;;  %v10533_v51 = vld [vmem:[%s14998_s1 + $0x524] ss:$16 sps:$4 sm:$0xff]  }
 0x152   : > { %3821 = vmatpush1.bf16.msra.mxu1 %v10456_v45  ;;  %v2200_v5 = vpop.f32.mrf.mxu0  ;;  %3781 = vmatprep.subr.bf16.mxu0 %v10461_v53  ;;  %v10522_v45 = vld [vmem:[%s14998_s1 + $0x760] ss:$16 sps:$4 sm:$0xff]   ;;  %v10536_v53 = vld [vmem:[%s14998_s1 + $0x724] ss:$16 sps:$4 sm:$0xff]  }
 0x153   : > { %v2241_v31 = vpop.f32.mrf.mxu1  ;;  %3822 = vmatprep.subr.bf16.mxu1 %v10464_v58  ;;  %v10528_v50 = vld [vmem:[%s14998_s1 + $0x740] ss:$16 sps:$4 sm:$0xff]   ;;  %v10545_v5 = vld [vmem:[%s14998_s1 + $0xec] ss:$16 sps:$4 sm:$0xff]  }
 0x154   : > { %v10531_v58 = vld [vmem:[%s14998_s1 + $0x520] ss:$16 sps:$4 sm:$0xff]   ;;  %v10548_v31 = vld [vmem:[%s14998_s1 + $0x2ec] ss:$16 sps:$4 sm:$0xff]  }
 0x155   : > { %3782 = vmatpush1.bf16.msra.mxu0 %v10459_v28  ;;  %v10534_v60 = vld [vmem:[%s14998_s1 + $0x720] ss:$16 sps:$4 sm:$0xff]   ;;  %v10539_v28 = vld [vmem:[%s14998_s1 + $0x504] ss:$16 sps:$4 sm:$0xff]  }
 0x156   : > { %3823 = vmatpush1.bf16.msra.mxu1 %v10462_v61  ;;  %3783 = vmatprep.subr.bf16.mxu0 %v10467_v6  ;;  %v10542_v61 = vld [vmem:[%s14998_s1 + $0x704] ss:$16 sps:$4 sm:$0xff]   ;;  %v10537_v62 = vld [vmem:[%s14998_s1 + $0x500] ss:$16 sps:$4 sm:$0xff]   ;;  %v10543_v6 = vld [vmem:[%s14998_s1 + $0xe8] ss:$16 sps:$4 sm:$0xff]  }
 0x157   : > { %3824 = vmatprep.subr.bf16.mxu1 %v10470_v7  ;;  %v10540_v63 = vld [vmem:[%s14998_s1 + $0x700] ss:$16 sps:$4 sm:$0xff]   ;;  %v10546_v7 = vld [vmem:[%s14998_s1 + $0x2e8] ss:$16 sps:$4 sm:$0xff]  }
 0x159   : > { %3784 = vmatpush1.bf16.msra.mxu0 %v10465_v9  ;;  %v10551_v9 = vld [vmem:[%s14998_s1 + $0xcc] ss:$16 sps:$4 sm:$0xff]  }
 0x15a   : > { %3825 = vmatpush1.bf16.msra.mxu1 %v10468_v0  ;;  %3785 = vmatprep.subr.bf16.mxu0 %v10473_v1  ;;  %v10554_v0 = vld [vmem:[%s14998_s1 + $0x2cc] ss:$16 sps:$4 sm:$0xff]   ;;  %v10549_v1 = vld [vmem:[%s14998_s1 + $0xc8] ss:$16 sps:$4 sm:$0xff]  }
 0x15b   : > { %3826 = vmatprep.subr.bf16.mxu1 %v10476_v10  ;;  %v10552_v10 = vld [vmem:[%s14998_s1 + $0x2c8] ss:$16 sps:$4 sm:$0xff]  }
 0x15d   : > { %3786 = vmatpush1.bf16.msra.mxu0 %v10471_v12 }
 0x15e   : > { %3827 = vmatpush1.bf16.msra.mxu1 %v10474_v13  ;;  %3787 = vmatprep.subr.bf16.mxu0 %v10479_v14 }
 0x15f   : > { %3828 = vmatprep.subr.bf16.mxu1 %v10482_v15 }
 0x161   : > { %3788 = vmatpush1.bf16.msra.mxu0 %v10477_v16 }
 0x162   : > { %3829 = vmatpush1.bf16.msra.mxu1 %v10480_v17  ;;  %3789 = vmatprep.subr.bf16.mxu0 %v10485_v18  ;;  %v10557_v17 = vld [vmem:[%s14998_s1 + $0xac] ss:$16 sps:$4 sm:$0xff]  }
 0x163   : > { %3830 = vmatprep.subr.bf16.mxu1 %v10488_v22  ;;  %v10560_v18 = vld [vmem:[%s14998_s1 + $0x2ac] ss:$16 sps:$4 sm:$0xff]  }
 0x165   : > { %3790 = vmatpush1.bf16.msra.mxu0 %v10483_v23  ;;  %v10555_v23 = vld [vmem:[%s14998_s1 + $0xa8] ss:$16 sps:$4 sm:$0xff]  }
 0x166   : > { %3831 = vmatpush1.bf16.msra.mxu1 %v10486_v19  ;;  %3791 = vmatprep.subr.bf16.mxu0 %v10491_v20  ;;  %v10558_v19 = vld [vmem:[%s14998_s1 + $0x2a8] ss:$16 sps:$4 sm:$0xff]  }
 0x167   : > { %3832 = vmatprep.subr.bf16.mxu1 %v10494_v8 }
 0x169   : > { %3792 = vmatpush1.bf16.msra.mxu0 %v10489_v11 }
 0x16a   : > { %3833 = vmatpush1.bf16.msra.mxu1 %v10492_v21  ;;  %3793 = vmatprep.subr.bf16.mxu0 %v10497_v24  ;;  %v10563_v24 = vld [vmem:[%s14998_s1 + $0x8c] ss:$16 sps:$4 sm:$0xff]  }
 0x16b   : > { %3834 = vmatprep.subr.bf16.mxu1 %v10500_v25  ;;  %v10566_v25 = vld [vmem:[%s14998_s1 + $0x28c] ss:$16 sps:$4 sm:$0xff]  }
 0x16d   : > { %3794 = vmatpush2.bf16.msra.mxu0 %v10495_v26  ;;  %v10569_v26 = vld [vmem:[%s14998_s1 + $0x6c] ss:$16 sps:$4 sm:$0xff]  }
 0x16e   : > { %3835 = vmatpush2.bf16.msra.mxu1 %v10498_v27  ;;  %3795 = vmatprep.subr.bf16.mxu0 %v10503_v29  ;;  %v10572_v27 = vld [vmem:[%s14998_s1 + $0x26c] ss:$16 sps:$4 sm:$0xff]   ;;  %v10567_v29 = vld [vmem:[%s14998_s1 + $0x68] ss:$16 sps:$4 sm:$0xff]  }
 0x16f   : > { %3836 = vmatprep.subr.bf16.mxu1 %v10506_v30  ;;  %v10570_v30 = vld [vmem:[%s14998_s1 + $0x268] ss:$16 sps:$4 sm:$0xff]  }
 0x171   : > { %3796 = vmatpush2.bf16.msra.mxu0 %v10501_v54  ;;  %v10575_v54 = vld [vmem:[%s14998_s1 + $0x4c] ss:$16 sps:$4 sm:$0xff]  }
 0x172   : > { %3837 = vmatpush2.bf16.msra.mxu1 %v10504_v56  ;;  %3797 = vmatprep.subr.bf16.mxu0 %v10509_v32  ;;  %v10578_v56 = vld [vmem:[%s14998_s1 + $0x24c] ss:$16 sps:$4 sm:$0xff]   ;;  %v10573_v32 = vld [vmem:[%s14998_s1 + $0x48] ss:$16 sps:$4 sm:$0xff]  }
 0x173   : > { %3838 = vmatprep.subr.bf16.mxu1 %v10512_v33  ;;  %v10576_v33 = vld [vmem:[%s14998_s1 + $0x248] ss:$16 sps:$4 sm:$0xff]  }
 0x175   : > { %3798 = vmatpush2.bf16.msra.mxu0 %v10507_v36  ;;  %v10581_v36 = vld [vmem:[%s14998_s1 + $0x2c] ss:$16 sps:$4 sm:$0xff]  }
 0x176   : > { %3839 = vmatpush2.bf16.msra.mxu1 %v10510_v37  ;;  %3799 = vmatprep.subr.bf16.mxu0 %v10515_v38  ;;  %v10584_v37 = vld [vmem:[%s14998_s1 + $0x22c] ss:$16 sps:$4 sm:$0xff]   ;;  %v10579_v38 = vld [vmem:[%s14998_s1 + $0x28] ss:$16 sps:$4 sm:$0xff]  }
 0x177   : > { %3840 = vmatprep.subr.bf16.mxu1 %v10518_v39  ;;  %v10582_v39 = vld [vmem:[%s14998_s1 + $0x228] ss:$16 sps:$4 sm:$0xff]  }
 0x179   : > { %3800 = vmatpush2.bf16.msra.mxu0 %v10513_v40  ;;  %v10587_v40 = vld [vmem:[%s14998_s1 + $0xc] ss:$16 sps:$4 sm:$0xff]  }
 0x17a   : > { %3841 = vmatpush2.bf16.msra.mxu1 %v10516_v41  ;;  %3801 = vmatprep.subr.bf16.mxu0 %v10521_v42  ;;  %v10590_v41 = vld [vmem:[%s14998_s1 + $0x20c] ss:$16 sps:$4 sm:$0xff]   ;;  %v10585_v42 = vld [vmem:[%s14998_s1 + $0x8] ss:$16 sps:$4 sm:$0xff]  }
 0x17b   : > { %3842 = vmatprep.subr.bf16.mxu1 %v10524_v43  ;;  %v10588_v43 = vld [vmem:[%s14998_s1 + $0x208] ss:$16 sps:$4 sm:$0xff]  }
 0x17d   : > { %3802 = vmatpush2.bf16.msra.mxu0 %v10519_v44  ;;  %v10593_v44 = vld [vmem:[%s14998_s1 + $0x1ec] ss:$16 sps:$4 sm:$0xff]  }
 0x17e   : > { %3843 = vmatpush2.bf16.msra.mxu1 %v10522_v45  ;;  %3803 = vmatprep.subr.bf16.mxu0 %v10527_v46  ;;  %v10596_v45 = vld [vmem:[%s14998_s1 + $0x3ec] ss:$16 sps:$4 sm:$0xff]   ;;  %v10591_v46 = vld [vmem:[%s14998_s1 + $0x1e8] ss:$16 sps:$4 sm:$0xff]  }
 0x17f   : > { %3844 = vmatprep.subr.bf16.mxu1 %v10530_v47  ;;  %v10594_v47 = vld [vmem:[%s14998_s1 + $0x3e8] ss:$16 sps:$4 sm:$0xff]  }
 0x181   : > { %3804 = vmatpush2.bf16.msra.mxu0 %v10525_v49  ;;  %v10599_v49 = vld [vmem:[%s14998_s1 + $0x1cc] ss:$16 sps:$4 sm:$0xff]  }
 0x182   : > { %3845 = vmatpush2.bf16.msra.mxu1 %v10528_v50  ;;  %3805 = vmatprep.subr.bf16.mxu0 %v10533_v51  ;;  %v10602_v50 = vld [vmem:[%s14998_s1 + $0x3cc] ss:$16 sps:$4 sm:$0xff]   ;;  %v10597_v51 = vld [vmem:[%s14998_s1 + $0x1c8] ss:$16 sps:$4 sm:$0xff]  }
 0x183   : > { %3846 = vmatprep.subr.bf16.mxu1 %v10536_v53  ;;  %v10600_v53 = vld [vmem:[%s14998_s1 + $0x3c8] ss:$16 sps:$4 sm:$0xff]  }
 0x185   : > { %3806 = vmatpush2.bf16.msra.mxu0 %v10531_v58  ;;  %v10605_v58 = vld [vmem:[%s14998_s1 + $0x1ac] ss:$16 sps:$4 sm:$0xff]  }
 0x186   : > { %3847 = vmatpush2.bf16.msra.mxu1 %v10534_v60  ;;  %3807 = vmatprep.subr.bf16.mxu0 %v10539_v28  ;;  %v10608_v60 = vld [vmem:[%s14998_s1 + $0x3ac] ss:$16 sps:$4 sm:$0xff]   ;;  %v10603_v28 = vld [vmem:[%s14998_s1 + $0x1a8] ss:$16 sps:$4 sm:$0xff]  }
 0x187   : > { %3848 = vmatprep.subr.bf16.mxu1 %v10542_v61  ;;  %v10606_v61 = vld [vmem:[%s14998_s1 + $0x3a8] ss:$16 sps:$4 sm:$0xff]  }
 0x189   : > { %3808 = vmatpush2.bf16.msra.mxu0 %v10537_v62  ;;  %v10611_v62 = vld [vmem:[%s14998_s1 + $0x18c] ss:$16 sps:$4 sm:$0xff]  }
 0x18a   : > { %3849 = vmatpush2.bf16.msra.mxu1 %v10540_v63  ;;  %3859 = vmatprep.subr.bf16.mxu0 %v10545_v5  ;;  %v10614_v63 = vld [vmem:[%s14998_s1 + $0x38c] ss:$16 sps:$4 sm:$0xff]   ;;  %v10609_v5 = vld [vmem:[%s14998_s1 + $0x188] ss:$16 sps:$4 sm:$0xff]  }
 0x18b   : > { %3900 = vmatprep.subr.bf16.mxu1 %v10548_v31  ;;  %v10612_v31 = vld [vmem:[%s14998_s1 + $0x388] ss:$16 sps:$4 sm:$0xff]  }
 0x18c   : > { %v2277_v12 = vpop.f32.mrf.mxu0  ;;  %3810 = vmatmul.mubr.bf16.vlgmr.msra.gmra.mxu0 %v11989_v34 }
 0x18d   : > { %v2318_v13 = vpop.f32.mrf.mxu1  ;;  %3851 = vmatmul.mubr.bf16.vlgmr.msra.gmra.mxu1 %v11993_v35  ;;  %3860 = vmatpush1.bf16.msra.mxu0 %v10543_v6  ;;  %v10617_v6 = vld [vmem:[%s14998_s1 + $0x16c] ss:$16 sps:$4 sm:$0xff]  }
 0x18e   : > { %v12847_v14 = vadd.f32 %v2318_v13, %v2277_v12  ;;  %3901 = vmatpush1.bf16.msra.mxu1 %v10546_v7  ;;  %v2279_v15 = vpop.f32.mrf.mxu0  ;;  %3861 = vmatprep.subr.bf16.mxu0 %v10551_v9  ;;  %v10620_v7 = vld [vmem:[%s14998_s1 + $0x36c] ss:$16 sps:$4 sm:$0xff]   ;;  %v10615_v9 = vld [vmem:[%s14998_s1 + $0x168] ss:$16 sps:$4 sm:$0xff]  }
 0x18f   : > { %v2320_v16 = vpop.f32.mrf.mxu1  ;;  %3902 = vmatprep.subr.bf16.mxu1 %v10554_v0  ;;  %3891 = vmatprep.mubr.bf16.mxu0 %v11715_v48  ;;  %v10561_v48 = vld [vmem:[%s14998_s1 + $0x88] ss:$16 sps:$4 sm:$0xff]  }
 0x190   : > { %v12855_v22 = vadd.f32 %v2320_v16, %v2279_v15  ;;  %3932 = vmatprep.mubr.bf16.mxu1 %v11724_v52  ;;  %v2281_v20 = vpop.f32.mrf.mxu0  ;;  %v10564_v52 = vld [vmem:[%s14998_s1 + $0x288] ss:$16 sps:$4 sm:$0xff]   ;;  %v10629_v15 = vld [vmem:[%s14998_s1 + $0x12c] ss:$16 sps:$4 sm:$0xff]  }
 0x191   : > { %v2322_v8 = vpop.f32.mrf.mxu1  ;;  %3862 = vmatpush1.bf16.msra.mxu0 %v10549_v1  ;;  %v10618_v0 = vld [vmem:[%s14998_s1 + $0x368] ss:$16 sps:$4 sm:$0xff]   ;;  %v10623_v1 = vld [vmem:[%s14998_s1 + $0x14c] ss:$16 sps:$4 sm:$0xff]  }
 0x192   : > { %3903 = vmatpush1.bf16.msra.mxu1 %v10552_v10  ;;  %v2282_v11 = vpop.f32.mrf.mxu0  ;;  %3863 = vmatprep.subr.bf16.mxu0 %v10557_v17  ;;  %v10626_v10 = vld [vmem:[%s14998_s1 + $0x34c] ss:$16 sps:$4 sm:$0xff]   ;;  %v10621_v12 = vld [vmem:[%s14998_s1 + $0x148] ss:$16 sps:$4 sm:$0xff]  }
 0x193   : > { %v2323_v21 = vpop.f32.mrf.mxu1  ;;  %3904 = vmatprep.subr.bf16.mxu1 %v10560_v18  ;;  %v10624_v13 = vld [vmem:[%s14998_s1 + $0x348] ss:$16 sps:$4 sm:$0xff]   ;;  %v10632_v16 = vld [vmem:[%s14998_s1 + $0x32c] ss:$16 sps:$4 sm:$0xff]  }
 0x194   : > { %v10627_v17 = vld [vmem:[%s14998_s1 + $0x128] ss:$16 sps:$4 sm:$0xff]   ;;  %v10641_v11 = vld [vmem:[%s14998_s1 + $0x4ec] ss:$16 sps:$4 sm:$0xff]  }
 0x195   : > { %3864 = vmatpush1.bf16.msra.mxu0 %v10555_v23  ;;  %v10630_v18 = vld [vmem:[%s14998_s1 + $0x328] ss:$16 sps:$4 sm:$0xff]   ;;  %v10635_v23 = vld [vmem:[%s14998_s1 + $0x10c] ss:$16 sps:$4 sm:$0xff]  }
 0x196   : > { %3905 = vmatpush1.bf16.msra.mxu1 %v10558_v19  ;;  %3865 = vmatprep.subr.bf16.mxu0 %v10563_v24  ;;  %v10638_v19 = vld [vmem:[%s14998_s1 + $0x30c] ss:$16 sps:$4 sm:$0xff]   ;;  %v10633_v20 = vld [vmem:[%s14998_s1 + $0x108] ss:$16 sps:$4 sm:$0xff]  }
 0x197   : > { %3906 = vmatprep.subr.bf16.mxu1 %v10566_v25  ;;  %v10636_v8 = vld [vmem:[%s14998_s1 + $0x308] ss:$16 sps:$4 sm:$0xff]   ;;  %v10644_v21 = vld [vmem:[%s14998_s1 + $0x6ec] ss:$16 sps:$4 sm:$0xff]  }
 0x198   : > { %v10639_v24 = vld [vmem:[%s14998_s1 + $0x4e8] ss:$16 sps:$4 sm:$0xff]  }
 0x199   : > { %3866 = vmatpush1.bf16.msra.mxu0 %v10561_v48  ;;  %v10642_v25 = vld [vmem:[%s14998_s1 + $0x6e8] ss:$16 sps:$4 sm:$0xff]   ;;  %v10647_v48 = vld [vmem:[%s14998_s1 + $0x4cc] ss:$16 sps:$4 sm:$0xff]  }
 0x19a   : > { %3907 = vmatpush1.bf16.msra.mxu1 %v10564_v52  ;;  %3867 = vmatprep.subr.bf16.mxu0 %v10569_v26  ;;  %v10650_v52 = vld [vmem:[%s14998_s1 + $0x6cc] ss:$16 sps:$4 sm:$0xff]   ;;  %v10645_v26 = vld [vmem:[%s14998_s1 + $0x4c8] ss:$16 sps:$4 sm:$0xff]  }
 0x19b   : > { %3908 = vmatprep.subr.bf16.mxu1 %v10572_v27  ;;  %v10648_v27 = vld [vmem:[%s14998_s1 + $0x6c8] ss:$16 sps:$4 sm:$0xff]  }
 0x19d   : > { %3868 = vmatpush1.bf16.msra.mxu0 %v10567_v29 }
 0x19e   : > { %3909 = vmatpush1.bf16.msra.mxu1 %v10570_v30  ;;  %3869 = vmatprep.subr.bf16.mxu0 %v10575_v54 }
 0x19f   : > { %3910 = vmatprep.subr.bf16.mxu1 %v10578_v56 }
 0x1a1   : > { %3870 = vmatpush1.bf16.msra.mxu0 %v10573_v32 }
 0x1a2   : > { %3911 = vmatpush1.bf16.msra.mxu1 %v10576_v33  ;;  %3871 = vmatprep.subr.bf16.mxu0 %v10581_v36  ;;  %v10653_v33 = vld [vmem:[%s14998_s1 + $0x4ac] ss:$16 sps:$4 sm:$0xff]  }
 0x1a3   : > { %3912 = vmatprep.subr.bf16.mxu1 %v10584_v37  ;;  %v10656_v36 = vld [vmem:[%s14998_s1 + $0x6ac] ss:$16 sps:$4 sm:$0xff]  }
 0x1a5   : > { %3872 = vmatpush1.bf16.msra.mxu0 %v10579_v38 }
 0x1a6   : > { %3913 = vmatpush1.bf16.msra.mxu1 %v10582_v39  ;;  %3873 = vmatprep.subr.bf16.mxu0 %v10587_v40 }
 0x1a7   : > { %3914 = vmatprep.subr.bf16.mxu1 %v10590_v41 }
 0x1a9   : > { %3874 = vmatpush1.bf16.msra.mxu0 %v10585_v42  ;;  %v10659_v42 = vld [vmem:[%s14998_s1 + $0x48c] ss:$16 sps:$4 sm:$0xff]  }
 0x1aa   : > { %3915 = vmatpush1.bf16.msra.mxu1 %v10588_v43  ;;  %3875 = vmatprep.subr.bf16.mxu0 %v10593_v44  ;;  %v10660_v43 = vld [vmem:[%s14998_s1 + $0x688] ss:$16 sps:$4 sm:$0xff]   ;;  %v10665_v44 = vld [vmem:[%s14998_s1 + $0x46c] ss:$16 sps:$4 sm:$0xff]  }
 0x1ab   : > { %3916 = vmatprep.subr.bf16.mxu1 %v10596_v45  ;;  %v10668_v45 = vld [vmem:[%s14998_s1 + $0x66c] ss:$16 sps:$4 sm:$0xff]  }
 0x1ad   : > { %3876 = vmatpush2.bf16.msra.mxu0 %v10591_v46  ;;  %v10663_v46 = vld [vmem:[%s14998_s1 + $0x468] ss:$16 sps:$4 sm:$0xff]  }
 0x1ae   : > { %3917 = vmatpush2.bf16.msra.mxu1 %v10594_v47  ;;  %3877 = vmatprep.subr.bf16.mxu0 %v10599_v49  ;;  %v10666_v47 = vld [vmem:[%s14998_s1 + $0x668] ss:$16 sps:$4 sm:$0xff]   ;;  %v10671_v49 = vld [vmem:[%s14998_s1 + $0x44c] ss:$16 sps:$4 sm:$0xff]  }
 0x1af   : > { %3918 = vmatprep.subr.bf16.mxu1 %v10602_v50  ;;  %v10674_v50 = vld [vmem:[%s14998_s1 + $0x64c] ss:$16 sps:$4 sm:$0xff]  }
 0x1b1   : > { %3878 = vmatpush2.bf16.msra.mxu0 %v10597_v51  ;;  %v10669_v51 = vld [vmem:[%s14998_s1 + $0x448] ss:$16 sps:$4 sm:$0xff]  }
 0x1b2   : > { %3919 = vmatpush2.bf16.msra.mxu1 %v10600_v53  ;;  %3879 = vmatprep.subr.bf16.mxu0 %v10605_v58  ;;  %v10672_v53 = vld [vmem:[%s14998_s1 + $0x648] ss:$16 sps:$4 sm:$0xff]   ;;  %v10677_v58 = vld [vmem:[%s14998_s1 + $0x42c] ss:$16 sps:$4 sm:$0xff]  }
 0x1b3   : > { %3920 = vmatprep.subr.bf16.mxu1 %v10608_v60  ;;  %v10680_v60 = vld [vmem:[%s14998_s1 + $0x62c] ss:$16 sps:$4 sm:$0xff]  }
 0x1b5   : > { %3880 = vmatpush2.bf16.msra.mxu0 %v10603_v28  ;;  %v10675_v28 = vld [vmem:[%s14998_s1 + $0x428] ss:$16 sps:$4 sm:$0xff]  }
 0x1b6   : > { %3921 = vmatpush2.bf16.msra.mxu1 %v10606_v61  ;;  %3881 = vmatprep.subr.bf16.mxu0 %v10611_v62  ;;  %v10678_v61 = vld [vmem:[%s14998_s1 + $0x628] ss:$16 sps:$4 sm:$0xff]   ;;  %v10683_v62 = vld [vmem:[%s14998_s1 + $0x40c] ss:$16 sps:$4 sm:$0xff]  }
 0x1b7   : > { %3922 = vmatprep.subr.bf16.mxu1 %v10614_v63  ;;  %v10686_v63 = vld [vmem:[%s14998_s1 + $0x60c] ss:$16 sps:$4 sm:$0xff]  }
 0x1b9   : > { %3882 = vmatpush2.bf16.msra.mxu0 %v10609_v5  ;;  %v10681_v5 = vld [vmem:[%s14998_s1 + $0x408] ss:$16 sps:$4 sm:$0xff]  }
 0x1ba   : > { %3923 = vmatpush2.bf16.msra.mxu1 %v10612_v31  ;;  %3883 = vmatprep.subr.bf16.mxu0 %v10617_v6  ;;  %v10684_v31 = vld [vmem:[%s14998_s1 + $0x608] ss:$16 sps:$4 sm:$0xff]   ;;  %v10689_v6 = vld [vmem:[%s14998_s1 + $0x5ec] ss:$16 sps:$4 sm:$0xff]  }
 0x1bb   : > { %3924 = vmatprep.subr.bf16.mxu1 %v10620_v7  ;;  %v10692_v7 = vld [vmem:[%s14998_s1 + $0x7ec] ss:$16 sps:$4 sm:$0xff]  }
 0x1bd   : > { %3884 = vmatpush2.bf16.msra.mxu0 %v10615_v9  ;;  %v10687_v9 = vld [vmem:[%s14998_s1 + $0x5e8] ss:$16 sps:$4 sm:$0xff]  }
 0x1be   : > { %3925 = vmatpush2.bf16.msra.mxu1 %v10618_v0  ;;  %3885 = vmatprep.subr.bf16.mxu0 %v10623_v1  ;;  %v10690_v0 = vld [vmem:[%s14998_s1 + $0x7e8] ss:$16 sps:$4 sm:$0xff]   ;;  %v10695_v1 = vld [vmem:[%s14998_s1 + $0x5cc] ss:$16 sps:$4 sm:$0xff]  }
 0x1bf   : > { %3926 = vmatprep.subr.bf16.mxu1 %v10626_v10  ;;  %v10698_v10 = vld [vmem:[%s14998_s1 + $0x7cc] ss:$16 sps:$4 sm:$0xff]  }
 0x1c1   : > { %3886 = vmatpush2.bf16.msra.mxu0 %v10621_v12  ;;  %v10693_v12 = vld [vmem:[%s14998_s1 + $0x5c8] ss:$16 sps:$4 sm:$0xff]  }
 0x1c2   : > { %3927 = vmatpush2.bf16.msra.mxu1 %v10624_v13  ;;  %3887 = vmatprep.subr.bf16.mxu0 %v10629_v15  ;;  %v10696_v13 = vld [vmem:[%s14998_s1 + $0x7c8] ss:$16 sps:$4 sm:$0xff]   ;;  %v10701_v15 = vld [vmem:[%s14998_s1 + $0x5ac] ss:$16 sps:$4 sm:$0xff]  }
 0x1c3   : > { %3928 = vmatprep.subr.bf16.mxu1 %v10632_v16  ;;  %v10704_v16 = vld [vmem:[%s14998_s1 + $0x7ac] ss:$16 sps:$4 sm:$0xff]  }
 0x1c5   : > { %3888 = vmatpush2.bf16.msra.mxu0 %v10627_v17  ;;  %v10699_v17 = vld [vmem:[%s14998_s1 + $0x5a8] ss:$16 sps:$4 sm:$0xff]  }
 0x1c6   : > { %3929 = vmatpush2.bf16.msra.mxu1 %v10630_v18  ;;  %3889 = vmatprep.subr.bf16.mxu0 %v10635_v23  ;;  %v10702_v18 = vld [vmem:[%s14998_s1 + $0x7a8] ss:$16 sps:$4 sm:$0xff]   ;;  %v10707_v23 = vld [vmem:[%s14998_s1 + $0x58c] ss:$16 sps:$4 sm:$0xff]  }
 0x1c7   : > { %3930 = vmatprep.subr.bf16.mxu1 %v10638_v19  ;;  %v10710_v19 = vld [vmem:[%s14998_s1 + $0x78c] ss:$16 sps:$4 sm:$0xff]  }
 0x1c9   : > { %3890 = vmatpush2.bf16.msra.mxu0 %v10633_v20  ;;  %v10705_v20 = vld [vmem:[%s14998_s1 + $0x588] ss:$16 sps:$4 sm:$0xff]  }
 0x1ca   : > { %3931 = vmatpush2.bf16.msra.mxu1 %v10636_v8  ;;  %3941 = vmatprep.subr.bf16.mxu0 %v10641_v11  ;;  %v10708_v8 = vld [vmem:[%s14998_s1 + $0x788] ss:$16 sps:$4 sm:$0xff]   ;;  %v10713_v11 = vld [vmem:[%s14998_s1 + $0x56c] ss:$16 sps:$4 sm:$0xff]  }
 0x1cb   : > { %3982 = vmatprep.subr.bf16.mxu1 %v10644_v21  ;;  %v10716_v21 = vld [vmem:[%s14998_s1 + $0x76c] ss:$16 sps:$4 sm:$0xff]  }
 0x1cc   : > { %v2359_v29 = vpop.f32.mrf.mxu0  ;;  %3892 = vmatmul.mubr.bf16.vlgmr.msra.gmra.mxu0 %v11749_v2 }
 0x1cd   : > { %v2400_v30 = vpop.f32.mrf.mxu1  ;;  %3933 = vmatmul.mubr.bf16.vlgmr.msra.gmra.mxu1 %v11752_v3  ;;  %v2360_v54 = vadd.f32 %v2359_v29, %v12847_v14  ;;  %3942 = vmatpush1.bf16.msra.mxu0 %v10639_v24  ;;  %v10651_v3 = vld [vmem:[%s14998_s1 + $0x4a8] ss:$16 sps:$4 sm:$0xff]  }
 0x1ce   : > { %3983 = vmatpush1.bf16.msra.mxu1 %v10642_v25  ;;  %v2361_v56 = vpop.f32.mrf.mxu0  ;;  %3943 = vmatprep.subr.bf16.mxu0 %v10647_v48  ;;  %v10654_v14 = vld [vmem:[%s14998_s1 + $0x6a8] ss:$16 sps:$4 sm:$0xff]   ;;  %v10719_v48 = vld [vmem:[%s14998_s1 + $0x54c] ss:$16 sps:$4 sm:$0xff]  }
 0x1cf   : > { %v2402_v32 = vpop.f32.mrf.mxu1  ;;  %3984 = vmatprep.subr.bf16.mxu1 %v10650_v52  ;;  %v13054_v37 = vadd.f32 %v2400_v30, %v2360_v54  ;;  %v2362_v2 = vadd.f32 %v2361_v56, %v12855_v22  ;;  %3973 = vmatprep.mubr.bf16.mxu0 %v11890_v55  ;;  %v10662_v55 = vld [vmem:[%s14998_s1 + $0x68c] ss:$16 sps:$4 sm:$0xff]   ;;  %v10711_v24 = vld [vmem:[%s14998_s1 + $0x568] ss:$16 sps:$4 sm:$0xff]  }
 0x1d0   : > { %4014 = vmatprep.mubr.bf16.mxu1 %v11897_v57  ;;  %v2363_v38 = vpop.f32.mrf.mxu0  ;;  %v10657_v57 = vld [vmem:[%s14998_s1 + $0x488] ss:$16 sps:$4 sm:$0xff]   ;;  %v10722_v52 = vld [vmem:[%s14998_s1 + $0x74c] ss:$16 sps:$4 sm:$0xff]  }
 0x1d1   : > { %v2404_v39 = vpop.f32.mrf.mxu1  ;;  %v13065_v40 = vadd.f32 %v2402_v32, %v2362_v2  ;;  %3944 = vmatpush1.bf16.msra.mxu0 %v10645_v26  ;;  %v10714_v25 = vld [vmem:[%s14998_s1 + $0x768] ss:$16 sps:$4 sm:$0xff]   ;;  %v13194_v26 = vld [vmem:[%s11703_s6] sm:$0xee]  ;;  %v10725_v54 = vld [vmem:[%s14998_s1 + $0x52c] ss:$16 sps:$4 sm:$0xff]  }
 0x1d2   : > { %3985 = vmatpush1.bf16.msra.mxu1 %v10648_v27  ;;  %v2364_v41 = vpop.f32.mrf.mxu0  ;;  %3945 = vmatprep.subr.bf16.mxu0 %v10653_v33  ;;  %v13197_v27 = vld [vmem:[%s11703_s6 + $0x8] sm:$0xee]  ;;  %v9158_v32 = vcombine.high %v13194_v26, %v13194_v26 }
 0x1d3   : > { %v2405_v22 = vpop.f32.mrf.mxu1  ;;  %3986 = vmatprep.subr.bf16.mxu1 %v10656_v36  ;;  %v10717_v29 = vld [vmem:[%s14998_s1 + $0x548] ss:$16 sps:$4 sm:$0xff]   ;;  %v10728_v56 = vld [vmem:[%s14998_s1 + $0x72c] ss:$16 sps:$4 sm:$0xff]   ;;  %v9160_v33 = vcombine.high %v13197_v27, %v13197_v27 }
 0x1d4   : > { %v10720_v30 = vld [vmem:[%s14998_s1 + $0x748] ss:$16 sps:$4 sm:$0xff]   ;;  %v4313_v38 = vshrl.u32 %v9158_v32, 16  ;;  %v4316_v39 = vshll.u32 %v9158_v32, 16  ;;  %v10777_v32 = vld [vmem:[%s14998_s1 + $0x1000] ss:$16 sps:$4 sm:$0xff]  }
 0x1d5   : > { %3946 = vmatpush1.bf16.msra.mxu0 %v10651_v3  ;;  %v10723_v36 = vld [vmem:[%s14998_s1 + $0x528] ss:$16 sps:$4 sm:$0xff]   ;;  %v10731_v3 = vld [vmem:[%s14998_s1 + $0x50c] ss:$16 sps:$4 sm:$0xff]   ;;  %v4329_v41 = vshrl.u32 %v9160_v33, 16  ;;  %v4332_v22 = vshll.u32 %v9160_v33, 16 }
 0x1d6   : > { %3987 = vmatpush1.bf16.msra.mxu1 %v10654_v14  ;;  %3947 = vmatprep.subr.bf16.mxu0 %v10659_v42  ;;  %v10726_v2 = vld [vmem:[%s14998_s1 + $0x728] ss:$16 sps:$4 sm:$0xff]   ;;  %v10734_v14 = vld [vmem:[%s14998_s1 + $0x70c] ss:$16 sps:$4 sm:$0xff]   ;;  %v10780_v33 = vld [vmem:[%s14998_s1 + $0x1200] ss:$16 sps:$4 sm:$0xff]  }
 0x1d7   : > { %3988 = vmatprep.subr.bf16.mxu1 %v10662_v55  ;;  %v10729_v42 = vld [vmem:[%s14998_s1 + $0x508] ss:$16 sps:$4 sm:$0xff]  }
 0x1d8   : > { %v10732_v55 = vld [vmem:[%s14998_s1 + $0x708] ss:$16 sps:$4 sm:$0xff]  }
 0x1d9   : > { %3948 = vmatpush1.bf16.msra.mxu0 %v10657_v57  ;;  %v10737_v57 = vld [vmem:[%s14998_s1 + $0x10e4] ss:$16 sps:$4 sm:$0xff]  }
 0x1da   : > { %3989 = vmatpush1.bf16.msra.mxu1 %v10660_v43  ;;  %3949 = vmatprep.subr.bf16.mxu0 %v10665_v44  ;;  %v10740_v43 = vld [vmem:[%s14998_s1 + $0x12e4] ss:$16 sps:$4 sm:$0xff]   ;;  %v10735_v44 = vld [vmem:[%s14998_s1 + $0x10e0] ss:$16 sps:$4 sm:$0xff]  }
 0x1db   : > { %3990 = vmatprep.subr.bf16.mxu1 %v10668_v45  ;;  %v4315_v45 = vrot.slane %v4313_v38, 1  ;;  %v10791_v38 = vld [vmem:[%s14998_s1 + $0x11c4] ss:$16 sps:$4 sm:$0xff]  }
 0x1dd   : > { %3950 = vmatpush1.bf16.msra.mxu0 %v10663_v46  ;;  %v4318_v46 = vrot.slane %v4316_v39, 2  ;;  %v10794_v39 = vld [vmem:[%s14998_s1 + $0x13c4] ss:$16 sps:$4 sm:$0xff]  }
 0x1de   : > { %3991 = vmatpush1.bf16.msra.mxu1 %v10666_v47  ;;  %3951 = vmatprep.subr.bf16.mxu0 %v10671_v49  ;;  %v4331_v47 = vrot.slane %v4329_v41, 1  ;;  %v4334_v49 = vrot.slane %v4332_v22, 2  ;;  %v10789_v41 = vld [vmem:[%s14998_s1 + $0x11c0] ss:$16 sps:$4 sm:$0xff]  }
 0x1df   : > { %3992 = vmatprep.subr.bf16.mxu1 %v10674_v50  ;;  %v10738_v50 = vld [vmem:[%s14998_s1 + $0x12e0] ss:$16 sps:$4 sm:$0xff]  }
 0x1e0   : > { %v10792_v22 = vld [vmem:[%s14998_s1 + $0x13c0] ss:$16 sps:$4 sm:$0xff]  }
 0x1e1   : > { %3952 = vmatpush1.bf16.msra.mxu0 %v10669_v51  ;;  %v10743_v51 = vld [vmem:[%s14998_s1 + $0x10c4] ss:$16 sps:$4 sm:$0xff]  }
 0x1e2   : > { %3993 = vmatpush1.bf16.msra.mxu1 %v10672_v53  ;;  %3953 = vmatprep.subr.bf16.mxu0 %v10677_v58  ;;  %v10746_v53 = vld [vmem:[%s14998_s1 + $0x12c4] ss:$16 sps:$4 sm:$0xff]   ;;  %v10741_v58 = vld [vmem:[%s14998_s1 + $0x10c0] ss:$16 sps:$4 sm:$0xff]  }
 0x1e3   : > { %3994 = vmatprep.subr.bf16.mxu1 %v10680_v60  ;;  %v10744_v60 = vld [vmem:[%s14998_s1 + $0x12c0] ss:$16 sps:$4 sm:$0xff]  }
 0x1e5   : > { %3954 = vmatpush1.bf16.msra.mxu0 %v10675_v28  ;;  %v13257_v28 = vor.u32 %v4318_v46, %v4315_v45  ;;  %v10806_v45 = vld [vmem:[%s14998_s1 + $0x1384] ss:$16 sps:$4 sm:$0xff]   ;;  %v10801_v46 = vld [vmem:[%s14998_s1 + $0x1180] ss:$16 sps:$4 sm:$0xff]  }
 0x1e6   : > { %3995 = vmatpush1.bf16.msra.mxu1 %v10678_v61  ;;  %3955 = vmatprep.subr.bf16.mxu0 %v10683_v62  ;;  %v13259_v61 = vor.u32 %v4334_v49, %v4331_v47  ;;  %v10804_v47 = vld [vmem:[%s14998_s1 + $0x1380] ss:$16 sps:$4 sm:$0xff]   ;;  %v10809_v49 = vld [vmem:[%s14998_s1 + $0x1164] ss:$16 sps:$4 sm:$0xff]  }
 0x1e7   : > { %3996 = vmatprep.subr.bf16.mxu1 %v10686_v63 }
 0x1e9   : > { %3956 = vmatpush1.bf16.msra.mxu0 %v10681_v5 }
 0x1ea   : > { %3997 = vmatpush1.bf16.msra.mxu1 %v10684_v31  ;;  %3957 = vmatprep.subr.bf16.mxu0 %v10689_v6 }
 0x1eb   : > { %3998 = vmatprep.subr.bf16.mxu1 %v10692_v7  ;;  %v10749_v7 = vld [vmem:[%s14998_s1 + $0x10a4] ss:$16 sps:$4 sm:$0xff]  }
 0x1ed   : > { %3958 = vmatpush2.bf16.msra.mxu0 %v10687_v9  ;;  %v10752_v9 = vld [vmem:[%s14998_s1 + $0x12a4] ss:$16 sps:$4 sm:$0xff]  }
 0x1ee   : > { %3999 = vmatpush2.bf16.msra.mxu1 %v10690_v0  ;;  %3959 = vmatprep.subr.bf16.mxu0 %v10695_v1 }
 0x1ef   : > { %4000 = vmatprep.subr.bf16.mxu1 %v10698_v10 }
 0x1f1   : > { %3960 = vmatpush2.bf16.msra.mxu0 %v10693_v12 }
 0x1f2   : > { %4001 = vmatpush2.bf16.msra.mxu1 %v10696_v13  ;;  %3961 = vmatprep.subr.bf16.mxu0 %v10701_v15  ;;  %v10755_v15 = vld [vmem:[%s14998_s1 + $0x1084] ss:$16 sps:$4 sm:$0xff]  }
 0x1f3   : > { %4002 = vmatprep.subr.bf16.mxu1 %v10704_v16  ;;  %v10758_v16 = vld [vmem:[%s14998_s1 + $0x1284] ss:$16 sps:$4 sm:$0xff]  }
 0x1f5   : > { %3962 = vmatpush2.bf16.msra.mxu0 %v10699_v17  ;;  %v10753_v17 = vld [vmem:[%s14998_s1 + $0x1080] ss:$16 sps:$4 sm:$0xff]  }
 0x1f6   : > { %4003 = vmatpush2.bf16.msra.mxu1 %v10702_v18  ;;  %3963 = vmatprep.subr.bf16.mxu0 %v10707_v23  ;;  %v10756_v18 = vld [vmem:[%s14998_s1 + $0x1280] ss:$16 sps:$4 sm:$0xff]   ;;  %v10761_v23 = vld [vmem:[%s14998_s1 + $0x1064] ss:$16 sps:$4 sm:$0xff]  }
 0x1f7   : > { %4004 = vmatprep.subr.bf16.mxu1 %v10710_v19  ;;  %v10764_v19 = vld [vmem:[%s14998_s1 + $0x1264] ss:$16 sps:$4 sm:$0xff]  }
 0x1f9   : > { %3964 = vmatpush2.bf16.msra.mxu0 %v10705_v20  ;;  %v10759_v20 = vld [vmem:[%s14998_s1 + $0x1060] ss:$16 sps:$4 sm:$0xff]  }
 0x1fa   : > { %4005 = vmatpush2.bf16.msra.mxu1 %v10708_v8  ;;  %3965 = vmatprep.subr.bf16.mxu0 %v10713_v11  ;;  %v10762_v8 = vld [vmem:[%s14998_s1 + $0x1260] ss:$16 sps:$4 sm:$0xff]   ;;  %v10767_v11 = vld [vmem:[%s14998_s1 + $0x1044] ss:$16 sps:$4 sm:$0xff]  }
 0x1fb   : > { %4006 = vmatprep.subr.bf16.mxu1 %v10716_v21  ;;  %v10770_v21 = vld [vmem:[%s14998_s1 + $0x1244] ss:$16 sps:$4 sm:$0xff]  }
 0x1fd   : > { %3966 = vmatpush2.bf16.msra.mxu0 %v10711_v24  ;;  %v10765_v24 = vld [vmem:[%s14998_s1 + $0x1040] ss:$16 sps:$4 sm:$0xff]  }
 0x1fe   : > { %4007 = vmatpush2.bf16.msra.mxu1 %v10714_v25  ;;  %3967 = vmatprep.subr.bf16.mxu0 %v10719_v48  ;;  %v10768_v25 = vld [vmem:[%s14998_s1 + $0x1240] ss:$16 sps:$4 sm:$0xff]   ;;  %v10773_v48 = vld [vmem:[%s14998_s1 + $0x1024] ss:$16 sps:$4 sm:$0xff]  }
 0x1ff   : > { %4008 = vmatprep.subr.bf16.mxu1 %v10722_v52  ;;  %v10776_v52 = vld [vmem:[%s14998_s1 + $0x1224] ss:$16 sps:$4 sm:$0xff]  }
 0x201   : > { %3968 = vmatpush2.bf16.msra.mxu0 %v10717_v29  ;;  %v10771_v29 = vld [vmem:[%s14998_s1 + $0x1020] ss:$16 sps:$4 sm:$0xff]  }
 0x202   : > { %4009 = vmatpush2.bf16.msra.mxu1 %v10720_v30  ;;  %3969 = vmatprep.subr.bf16.mxu0 %v10725_v54  ;;  %v10774_v30 = vld [vmem:[%s14998_s1 + $0x1220] ss:$16 sps:$4 sm:$0xff]   ;;  %v10779_v54 = vld [vmem:[%s14998_s1 + $0x1004] ss:$16 sps:$4 sm:$0xff]  }
 0x203   : > { %4010 = vmatprep.subr.bf16.mxu1 %v10728_v56  ;;  %v10782_v56 = vld [vmem:[%s14998_s1 + $0x1204] ss:$16 sps:$4 sm:$0xff]  }
 0x205   : > { %3970 = vmatpush2.bf16.msra.mxu0 %v10723_v36  ;;  %v10785_v36 = vld [vmem:[%s14998_s1 + $0x11e4] ss:$16 sps:$4 sm:$0xff]  }
 0x206   : > { %4011 = vmatpush2.bf16.msra.mxu1 %v10726_v2  ;;  %3971 = vmatprep.subr.bf16.mxu0 %v10731_v3  ;;  %v10788_v2 = vld [vmem:[%s14998_s1 + $0x13e4] ss:$16 sps:$4 sm:$0xff]   ;;  %v10783_v3 = vld [vmem:[%s14998_s1 + $0x11e0] ss:$16 sps:$4 sm:$0xff]  }
 0x207   : > { %4012 = vmatprep.subr.bf16.mxu1 %v10734_v14  ;;  %v10786_v14 = vld [vmem:[%s14998_s1 + $0x13e0] ss:$16 sps:$4 sm:$0xff]  }
 0x209   : > { %3972 = vmatpush2.bf16.msra.mxu0 %v10729_v42  ;;  %v10797_v42 = vld [vmem:[%s14998_s1 + $0x11a4] ss:$16 sps:$4 sm:$0xff]  }
 0x20a   : > { %4013 = vmatpush2.bf16.msra.mxu1 %v10732_v55  ;;  %5656 = vmatprep.subr.bf16.mxu0 %v10737_v57  ;;  %v10800_v55 = vld [vmem:[%s14998_s1 + $0x13a4] ss:$16 sps:$4 sm:$0xff]   ;;  %v10795_v57 = vld [vmem:[%s14998_s1 + $0x11a0] ss:$16 sps:$4 sm:$0xff]  }
 0x20b   : > { %5697 = vmatprep.subr.bf16.mxu1 %v10740_v43  ;;  %v10798_v43 = vld [vmem:[%s14998_s1 + $0x13a0] ss:$16 sps:$4 sm:$0xff]  }
 0x20c   : > { %v3729_v62 = vpop.f32.mrf.mxu0  ;;  %3974 = vmatmul.mubr.bf16.vlgmr.msra.gmra.mxu0 %v11989_v34 }
 0x20d   : > { %v3770_v63 = vpop.f32.mrf.mxu1  ;;  %4015 = vmatmul.mubr.bf16.vlgmr.msra.gmra.mxu1 %v11993_v35  ;;  %v3730_v5 = vadd.f32 %v3729_v62, %v12652_v59  ;;  %5657 = vmatpush1.bf16.msra.mxu0 %v10735_v44  ;;  %v10747_v35 = vld [vmem:[%s14998_s1 + $0x10a0] ss:$16 sps:$4 sm:$0xff]   ;;  %v10803_v44 = vld [vmem:[%s14998_s1 + $0x1184] ss:$16 sps:$4 sm:$0xff]   ;;  %v9157_v62 = vcombine.low %v13194_v26, %v13194_v26 }
 0x20e   : > { %5698 = vmatpush1.bf16.msra.mxu1 %v10738_v50  ;;  %v3731_v31 = vpop.f32.mrf.mxu0  ;;  %5658 = vmatprep.subr.bf16.mxu0 %v10743_v51  ;;  %v10750_v59 = vld [vmem:[%s14998_s1 + $0x12a0] ss:$16 sps:$4 sm:$0xff]   ;;  %v10812_v50 = vld [vmem:[%s14998_s1 + $0x1364] ss:$16 sps:$4 sm:$0xff]  }
 0x20f   : > { %v3772_v6 = vpop.f32.mrf.mxu1  ;;  %5699 = vmatprep.subr.bf16.mxu1 %v10746_v53  ;;  %v13270_v0 = vadd.f32 %v3770_v63, %v3730_v5  ;;  %v3732_v34 = vadd.f32 %v3731_v31, %v12663_v4  ;;  %5688 = vmatprep.mubr.bf16.mxu0 %v13257_v28  ;;  %v10807_v51 = vld [vmem:[%s14998_s1 + $0x1160] ss:$16 sps:$4 sm:$0xff]   ;;  %v13415_v5 = vld [vmem:[%s11703_s6 + $0x18] sm:$0xee]  ;;  %v9159_v31 = vcombine.low %v13197_v27, %v13197_v27  ;;  %v10821_v26 = vld [vmem:[%s14998_s1 + $0x1124] ss:$16 sps:$4 sm:$0xff]  }
 0x210   : > { %5729 = vmatprep.mubr.bf16.mxu1 %v13259_v61  ;;  %v3733_v1 = vpop.f32.mrf.mxu0  ;;  %v10810_v53 = vld [vmem:[%s14998_s1 + $0x1360] ss:$16 sps:$4 sm:$0xff]   ;;  %v10824_v27 = vld [vmem:[%s14998_s1 + $0x1324] ss:$16 sps:$4 sm:$0xff]  }
 0x211   : > { %v3774_v10 = vpop.f32.mrf.mxu1  ;;  %v13281_v12 = vadd.f32 %v3772_v6, %v3732_v34  ;;  %5659 = vmatpush1.bf16.msra.mxu0 %v10741_v58  ;;  %v10815_v58 = vld [vmem:[%s14998_s1 + $0x1144] ss:$16 sps:$4 sm:$0xff]   ;;  %v10813_v6 = vld [vmem:[%s14998_s1 + $0x1140] ss:$16 sps:$4 sm:$0xff]   ;;  %v4308_v1 = vshll.u32 %v9157_v62, 16 }
 0x212   : > { %5700 = vmatpush1.bf16.msra.mxu1 %v10744_v60  ;;  %v3734_v13 = vpop.f32.mrf.mxu0  ;;  %5660 = vmatprep.subr.bf16.mxu0 %v10749_v7  ;;  %v10818_v60 = vld [vmem:[%s14998_s1 + $0x1344] ss:$16 sps:$4 sm:$0xff]   ;;  %v10816_v7 = vld [vmem:[%s14998_s1 + $0x1340] ss:$16 sps:$4 sm:$0xff]   ;;  %v4321_v10 = vshrl.u32 %v9159_v31, 16 }
 0x213   : > { %v3775_v4 = vpop.f32.mrf.mxu1  ;;  %5701 = vmatprep.subr.bf16.mxu1 %v10752_v9  ;;  %v13412_v63 = vld [vmem:[%s11703_s6 + $0x10] sm:$0xee]  ;;  %v4305_v9 = vshrl.u32 %v9157_v62, 16  ;;  %v4324_v13 = vshll.u32 %v9159_v31, 16 }
 0x214   : > { %v9162_v34 = vcombine.high %v13412_v63, %v13412_v63  ;;  %v10822_v4 = vld [vmem:[%s14998_s1 + $0x1320] ss:$16 sps:$4 sm:$0xff]   ;;  %v10855_v62 = vld [vmem:[%s14998_s1 + $0x1484] ss:$16 sps:$4 sm:$0xff]  }
 0x215   : > { %5661 = vmatpush1.bf16.msra.mxu0 %v10747_v35  ;;  %v10819_v35 = vld [vmem:[%s14998_s1 + $0x1120] ss:$16 sps:$4 sm:$0xff]   ;;  %v10858_v31 = vld [vmem:[%s14998_s1 + $0x1684] ss:$16 sps:$4 sm:$0xff]  }
 0x216   : > { %5702 = vmatpush1.bf16.msra.mxu1 %v10750_v59  ;;  %5662 = vmatprep.subr.bf16.mxu0 %v10755_v15  ;;  %v9164_v59 = vcombine.high %v13415_v5, %v13415_v5  ;;  %v10827_v15 = vld [vmem:[%s14998_s1 + $0x1104] ss:$16 sps:$4 sm:$0xff]  }
 0x217   : > { %5703 = vmatprep.subr.bf16.mxu1 %v10758_v16  ;;  %v10830_v16 = vld [vmem:[%s14998_s1 + $0x1304] ss:$16 sps:$4 sm:$0xff]  }
 0x219   : > { %5663 = vmatpush1.bf16.msra.mxu0 %v10753_v17  ;;  %v4307_v17 = vrot.slane %v4305_v9, 1  ;;  %v10859_v9 = vld [vmem:[%s14998_s1 + $0x1460] ss:$16 sps:$4 sm:$0xff]  }
 0x21a   : > { %5704 = vmatpush1.bf16.msra.mxu1 %v10756_v18  ;;  %5664 = vmatprep.subr.bf16.mxu0 %v10761_v23  ;;  %v4345_v18 = vshrl.u32 %v9162_v34, 16  ;;  %v4348_v23 = vshll.u32 %v9162_v34, 16  ;;  %v10862_v34 = vld [vmem:[%s14998_s1 + $0x1660] ss:$16 sps:$4 sm:$0xff]  }
 0x21b   : > { %5705 = vmatprep.subr.bf16.mxu1 %v10764_v19  ;;  %v4361_v19 = vshrl.u32 %v9164_v59, 16 }
 0x21d   : > { %5665 = vmatpush1.bf16.msra.mxu0 %v10759_v20  ;;  %v4364_v20 = vshll.u32 %v9164_v59, 16  ;;  %v10870_v59 = vld [vmem:[%s14998_s1 + $0x1644] ss:$16 sps:$4 sm:$0xff]  }
 0x21e   : > { %5706 = vmatpush1.bf16.msra.mxu1 %v10762_v8  ;;  %5666 = vmatprep.subr.bf16.mxu0 %v10767_v11  ;;  %v4310_v8 = vrot.slane %v4308_v1, 2  ;;  %v4323_v11 = vrot.slane %v4321_v10, 1  ;;  %v10865_v1 = vld [vmem:[%s14998_s1 + $0x1440] ss:$16 sps:$4 sm:$0xff]  }
 0x21f   : > { %5707 = vmatprep.subr.bf16.mxu1 %v10770_v21  ;;  %v4326_v21 = vrot.slane %v4324_v13, 2  ;;  %v10868_v10 = vld [vmem:[%s14998_s1 + $0x1640] ss:$16 sps:$4 sm:$0xff]   ;;  %v10873_v13 = vld [vmem:[%s14998_s1 + $0x1424] ss:$16 sps:$4 sm:$0xff]  }
 0x221   : > { %5667 = vmatpush1.bf16.msra.mxu0 %v10765_v24  ;;  %v10825_v24 = vld [vmem:[%s14998_s1 + $0x1100] ss:$16 sps:$4 sm:$0xff]  }
 0x222   : > { %5708 = vmatpush1.bf16.msra.mxu1 %v10768_v25  ;;  %5668 = vmatprep.subr.bf16.mxu0 %v10773_v48  ;;  %v10828_v25 = vld [vmem:[%s14998_s1 + $0x1300] ss:$16 sps:$4 sm:$0xff]   ;;  %v10837_v48 = vld [vmem:[%s14998_s1 + $0x14e4] ss:$16 sps:$4 sm:$0xff]  }
 0x223   : > { %5709 = vmatprep.subr.bf16.mxu1 %v10776_v52  ;;  %v10840_v52 = vld [vmem:[%s14998_s1 + $0x16e4] ss:$16 sps:$4 sm:$0xff]  }
 0x225   : > { %5669 = vmatpush1.bf16.msra.mxu0 %v10771_v29  ;;  %v4347_v29 = vrot.slane %v4345_v18, 1  ;;  %v10882_v18 = vld [vmem:[%s14998_s1 + $0x1604] ss:$16 sps:$4 sm:$0xff]  }
 0x226   : > { %5710 = vmatpush1.bf16.msra.mxu1 %v10774_v30  ;;  %5670 = vmatprep.subr.bf16.mxu0 %v10779_v54  ;;  %v10835_v30 = vld [vmem:[%s14998_s1 + $0x14e0] ss:$16 sps:$4 sm:$0xff]  }
 0x227   : > { %5711 = vmatprep.subr.bf16.mxu1 %v10782_v56  ;;  %v10838_v54 = vld [vmem:[%s14998_s1 + $0x16e0] ss:$16 sps:$4 sm:$0xff]   ;;  %v4350_v56 = vrot.slane %v4348_v23, 2 }
 0x228   : > { %v10877_v23 = vld [vmem:[%s14998_s1 + $0x1400] ss:$16 sps:$4 sm:$0xff]  }
 0x229   : > { %5671 = vmatpush1.bf16.msra.mxu0 %v10777_v32  ;;  %v4363_v32 = vrot.slane %v4361_v19, 1  ;;  %v10880_v19 = vld [vmem:[%s14998_s1 + $0x1600] ss:$16 sps:$4 sm:$0xff]  }
 0x22a   : > { %5712 = vmatpush1.bf16.msra.mxu1 %v10780_v33  ;;  %5672 = vmatprep.subr.bf16.mxu0 %v10785_v36  ;;  %v4366_v33 = vrot.slane %v4364_v20, 2  ;;  %v13465_v36 = vor.u32 %v4310_v8, %v4307_v17  ;;  %v10879_v17 = vld [vmem:[%s14998_s1 + $0x1404] ss:$16 sps:$4 sm:$0xff]  }
 0x22b   : > { %5713 = vmatprep.subr.bf16.mxu1 %v10788_v2  ;;  %v13467_v2 = vor.u32 %v4326_v21, %v4323_v11  ;;  %v10885_v20 = vld [vmem:[%s14998_s1 + $0x15e4] ss:$16 sps:$4 sm:$0xff]   ;;  %v10883_v11 = vld [vmem:[%s14998_s1 + $0x15e0] ss:$16 sps:$4 sm:$0xff]  }
 0x22c   : > { %v10888_v8 = vld [vmem:[%s14998_s1 + $0x17e4] ss:$16 sps:$4 sm:$0xff]   ;;  %v10886_v21 = vld [vmem:[%s14998_s1 + $0x17e0] ss:$16 sps:$4 sm:$0xff]  }
 0x22d   : > { %5673 = vmatpush2.bf16.msra.mxu0 %v10783_v3  ;;  %v10843_v3 = vld [vmem:[%s14998_s1 + $0x14c4] ss:$16 sps:$4 sm:$0xff]  }
 0x22e   : > { %5714 = vmatpush2.bf16.msra.mxu1 %v10786_v14  ;;  %5674 = vmatprep.subr.bf16.mxu0 %v10791_v38  ;;  %v10846_v14 = vld [vmem:[%s14998_s1 + $0x16c4] ss:$16 sps:$4 sm:$0xff]   ;;  %v10841_v38 = vld [vmem:[%s14998_s1 + $0x14c0] ss:$16 sps:$4 sm:$0xff]  }
 0x22f   : > { %5715 = vmatprep.subr.bf16.mxu1 %v10794_v39  ;;  %v10844_v39 = vld [vmem:[%s14998_s1 + $0x16c0] ss:$16 sps:$4 sm:$0xff]  }
 0x231   : > { %5675 = vmatpush2.bf16.msra.mxu0 %v10789_v41  ;;  %v13481_v41 = vor.u32 %v4350_v56, %v4347_v29  ;;  %v10897_v29 = vld [vmem:[%s14998_s1 + $0x15a4] ss:$16 sps:$4 sm:$0xff]   ;;  %v10898_v56 = vld [vmem:[%s14998_s1 + $0x17a0] ss:$16 sps:$4 sm:$0xff]  }
 0x232   : > { %5716 = vmatpush2.bf16.msra.mxu1 %v10792_v22  ;;  %5676 = vmatprep.subr.bf16.mxu0 %v10797_v42  ;;  %v13483_v22 = vor.u32 %v4366_v33, %v4363_v32  ;;  %v10903_v32 = vld [vmem:[%s14998_s1 + $0x1584] ss:$16 sps:$4 sm:$0xff]  }
 0x233   : > { %5717 = vmatprep.subr.bf16.mxu1 %v10800_v55  ;;  %v10906_v33 = vld [vmem:[%s14998_s1 + $0x1784] ss:$16 sps:$4 sm:$0xff]  }
 0x235   : > { %5677 = vmatpush2.bf16.msra.mxu0 %v10795_v57 }
 0x236   : > { %5718 = vmatpush2.bf16.msra.mxu1 %v10798_v43  ;;  %5678 = vmatprep.subr.bf16.mxu0 %v10803_v44 }
 0x237   : > { %5719 = vmatprep.subr.bf16.mxu1 %v10806_v45  ;;  %v10849_v45 = vld [vmem:[%s14998_s1 + $0x14a4] ss:$16 sps:$4 sm:$0xff]  }
 0x239   : > { %5679 = vmatpush2.bf16.msra.mxu0 %v10801_v46  ;;  %v10852_v46 = vld [vmem:[%s14998_s1 + $0x16a4] ss:$16 sps:$4 sm:$0xff]  }
 0x23a   : > { %5720 = vmatpush2.bf16.msra.mxu1 %v10804_v47  ;;  %5680 = vmatprep.subr.bf16.mxu0 %v10809_v49 }
 0x23b   : > { %5721 = vmatprep.subr.bf16.mxu1 %v10812_v50  ;;  %v10850_v50 = vld [vmem:[%s14998_s1 + $0x16a0] ss:$16 sps:$4 sm:$0xff]  }
 0x23d   : > { %5681 = vmatpush2.bf16.msra.mxu0 %v10807_v51 }
 0x23e   : > { %5722 = vmatpush2.bf16.msra.mxu1 %v10810_v53  ;;  %5682 = vmatprep.subr.bf16.mxu0 %v10815_v58 }
 0x23f   : > { %5723 = vmatprep.subr.bf16.mxu1 %v10818_v60 }
 0x241   : > { %5683 = vmatpush2.bf16.msra.mxu0 %v10813_v6  ;;  %v10853_v6 = vld [vmem:[%s14998_s1 + $0x1480] ss:$16 sps:$4 sm:$0xff]  }
 0x242   : > { %5724 = vmatpush2.bf16.msra.mxu1 %v10816_v7  ;;  %5684 = vmatprep.subr.bf16.mxu0 %v10821_v26  ;;  %v10856_v7 = vld [vmem:[%s14998_s1 + $0x1680] ss:$16 sps:$4 sm:$0xff]   ;;  %v10861_v26 = vld [vmem:[%s14998_s1 + $0x1464] ss:$16 sps:$4 sm:$0xff]  }
 0x243   : > { %5725 = vmatprep.subr.bf16.mxu1 %v10824_v27  ;;  %v10864_v27 = vld [vmem:[%s14998_s1 + $0x1664] ss:$16 sps:$4 sm:$0xff]  }
 0x245   : > { %5685 = vmatpush2.bf16.msra.mxu0 %v10819_v35  ;;  %v10867_v35 = vld [vmem:[%s14998_s1 + $0x1444] ss:$16 sps:$4 sm:$0xff]  }
 0x246   : > { %5726 = vmatpush2.bf16.msra.mxu1 %v10822_v4  ;;  %5686 = vmatprep.subr.bf16.mxu0 %v10827_v15  ;;  %v10876_v4 = vld [vmem:[%s14998_s1 + $0x1624] ss:$16 sps:$4 sm:$0xff]   ;;  %v10871_v15 = vld [vmem:[%s14998_s1 + $0x1420] ss:$16 sps:$4 sm:$0xff]  }
 0x247   : > { %5727 = vmatprep.subr.bf16.mxu1 %v10830_v16  ;;  %v10874_v16 = vld [vmem:[%s14998_s1 + $0x1620] ss:$16 sps:$4 sm:$0xff]  }
 0x249   : > { %5687 = vmatpush2.bf16.msra.mxu0 %v10825_v24  ;;  %v10891_v24 = vld [vmem:[%s14998_s1 + $0x15c4] ss:$16 sps:$4 sm:$0xff]  }
 0x24a   : > { %5728 = vmatpush2.bf16.msra.mxu1 %v10828_v25  ;;  %5738 = vmatprep.subr.bf16.mxu0 %v10837_v48  ;;  %v10894_v25 = vld [vmem:[%s14998_s1 + $0x17c4] ss:$16 sps:$4 sm:$0xff]   ;;  %v10889_v48 = vld [vmem:[%s14998_s1 + $0x15c0] ss:$16 sps:$4 sm:$0xff]  }
 0x24b   : > { %5779 = vmatprep.subr.bf16.mxu1 %v10840_v52  ;;  %v10892_v52 = vld [vmem:[%s14998_s1 + $0x17c0] ss:$16 sps:$4 sm:$0xff]  }
 0x24c   : > { %v3811_v42 = vpop.f32.mrf.mxu0  ;;  %5689 = vmatmul.mubr.bf16.vlgmr.msra.gmra.mxu0 %v13465_v36 }
 0x24d   : > { %v3852_v55 = vpop.f32.mrf.mxu1  ;;  %5730 = vmatmul.mubr.bf16.vlgmr.msra.gmra.mxu1 %v13467_v2  ;;  %v3812_v57 = vadd.f32 %v3811_v42, %v13270_v0  ;;  %5739 = vmatpush1.bf16.msra.mxu0 %v10835_v30  ;;  %v10847_v0 = vld [vmem:[%s14998_s1 + $0x14a0] ss:$16 sps:$4 sm:$0xff]   ;;  %v10900_v30 = vld [vmem:[%s14998_s1 + $0x17a4] ss:$16 sps:$4 sm:$0xff]  }
 0x24e   : > { %5780 = vmatpush1.bf16.msra.mxu1 %v10838_v54  ;;  %v3813_v43 = vpop.f32.mrf.mxu0  ;;  %5740 = vmatprep.subr.bf16.mxu0 %v10843_v3  ;;  %v10895_v54 = vld [vmem:[%s14998_s1 + $0x15a0] ss:$16 sps:$4 sm:$0xff]  }
 0x24f   : > { %v3854_v44 = vpop.f32.mrf.mxu1  ;;  %5781 = vmatprep.subr.bf16.mxu1 %v10846_v14  ;;  %v13494_v47 = vadd.f32 %v3852_v55, %v3812_v57  ;;  %v3814_v49 = vadd.f32 %v3813_v43, %v13281_v12  ;;  %5770 = vmatprep.mubr.bf16.mxu0 %v13481_v41  ;;  %v10901_v3 = vld [vmem:[%s14998_s1 + $0x1580] ss:$16 sps:$4 sm:$0xff]   ;;  %v10915_v57 = vld [vmem:[%s14998_s1 + $0x1544] ss:$16 sps:$4 sm:$0xff]  }
 0x250   : > { %5811 = vmatprep.mubr.bf16.mxu1 %v13483_v22  ;;  %v3815_v51 = vpop.f32.mrf.mxu0  ;;  %v10904_v14 = vld [vmem:[%s14998_s1 + $0x1780] ss:$16 sps:$4 sm:$0xff]   ;;  %v10918_v43 = vld [vmem:[%s14998_s1 + $0x1744] ss:$16 sps:$4 sm:$0xff]  }
 0x251   : > { %v3856_v53 = vpop.f32.mrf.mxu1  ;;  %v13505_v58 = vadd.f32 %v3854_v44, %v3814_v49  ;;  %5741 = vmatpush1.bf16.msra.mxu0 %v10841_v38  ;;  %v10909_v38 = vld [vmem:[%s14998_s1 + $0x1564] ss:$16 sps:$4 sm:$0xff]   ;;  %v10907_v42 = vld [vmem:[%s14998_s1 + $0x1560] ss:$16 sps:$4 sm:$0xff]   ;;  %v9161_v44 = vcombine.low %v13412_v63, %v13412_v63 }
 0x252   : > { %5782 = vmatpush1.bf16.msra.mxu1 %v10844_v39  ;;  %v3816_v60 = vpop.f32.mrf.mxu0  ;;  %5742 = vmatprep.subr.bf16.mxu0 %v10849_v45  ;;  %v10912_v39 = vld [vmem:[%s14998_s1 + $0x1764] ss:$16 sps:$4 sm:$0xff]   ;;  %v10910_v55 = vld [vmem:[%s14998_s1 + $0x1760] ss:$16 sps:$4 sm:$0xff]   ;;  %v9163_v45 = vcombine.low %v13415_v5, %v13415_v5 }
 0x253   : > { %v3857_v12 = vpop.f32.mrf.mxu1  ;;  %5783 = vmatprep.subr.bf16.mxu1 %v10852_v46  ;;  %v10913_v46 = vld [vmem:[%s14998_s1 + $0x1540] ss:$16 sps:$4 sm:$0xff]   ;;  %v10924_v63 = vld [vmem:[%s14998_s1 + $0x1724] ss:$16 sps:$4 sm:$0xff]   ;;  %v4337_v5 = vshrl.u32 %v9161_v44, 16 }
 0x254   : > { %v10916_v49 = vld [vmem:[%s14998_s1 + $0x1740] ss:$16 sps:$4 sm:$0xff]   ;;  %v4353_v51 = vshrl.u32 %v9163_v45, 16  ;;  %v4356_v53 = vshll.u32 %v9163_v45, 16  ;;  %v10976_v45 = vld [vmem:[%s14998_s1 + $0x122c] ss:$16 sps:$4 sm:$0xff]  }
 0x255   : > { %5743 = vmatpush1.bf16.msra.mxu0 %v10847_v0  ;;  %v10921_v0 = vld [vmem:[%s14998_s1 + $0x1524] ss:$16 sps:$4 sm:$0xff]   ;;  %v10919_v60 = vld [vmem:[%s14998_s1 + $0x1520] ss:$16 sps:$4 sm:$0xff]  }
 0x256   : > { %5784 = vmatpush1.bf16.msra.mxu1 %v10850_v50  ;;  %5744 = vmatprep.subr.bf16.mxu0 %v10855_v62  ;;  %v4340_v50 = vshll.u32 %v9161_v44, 16  ;;  %v10922_v12 = vld [vmem:[%s14998_s1 + $0x1720] ss:$16 sps:$4 sm:$0xff]   ;;  %v10927_v62 = vld [vmem:[%s14998_s1 + $0x1504] ss:$16 sps:$4 sm:$0xff]  }
 0x257   : > { %5785 = vmatprep.subr.bf16.mxu1 %v10858_v31  ;;  %v10930_v31 = vld [vmem:[%s14998_s1 + $0x1704] ss:$16 sps:$4 sm:$0xff]   ;;  %v10973_v44 = vld [vmem:[%s14998_s1 + $0x102c] ss:$16 sps:$4 sm:$0xff]  }
 0x259   : > { %5745 = vmatpush1.bf16.msra.mxu0 %v10853_v6  ;;  %v4339_v6 = vrot.slane %v4337_v5, 1  ;;  %v10977_v5 = vld [vmem:[%s14998_s1 + $0x1008] ss:$16 sps:$4 sm:$0xff]  }
 0x25a   : > { %5786 = vmatpush1.bf16.msra.mxu1 %v10856_v7  ;;  %5746 = vmatprep.subr.bf16.mxu0 %v10861_v26  ;;  %v4342_v7 = vrot.slane %v4340_v50, 2  ;;  %v4355_v26 = vrot.slane %v4353_v51, 1  ;;  %v10980_v50 = vld [vmem:[%s14998_s1 + $0x1208] ss:$16 sps:$4 sm:$0xff]   ;;  %v10985_v51 = vld [vmem:[%s14998_s1 + $0x11ec] ss:$16 sps:$4 sm:$0xff]  }
 0x25b   : > { %5787 = vmatprep.subr.bf16.mxu1 %v10864_v27  ;;  %v4358_v27 = vrot.slane %v4356_v53, 2  ;;  %v10988_v53 = vld [vmem:[%s14998_s1 + $0x13ec] ss:$16 sps:$4 sm:$0xff]  }
 0x25d   : > { %5747 = vmatpush1.bf16.msra.mxu0 %v10859_v9  ;;  %v10925_v9 = vld [vmem:[%s14998_s1 + $0x1500] ss:$16 sps:$4 sm:$0xff]  }
 0x25e   : > { %5788 = vmatpush1.bf16.msra.mxu1 %v10862_v34  ;;  %5748 = vmatprep.subr.bf16.mxu0 %v10867_v35  ;;  %v10928_v34 = vld [vmem:[%s14998_s1 + $0x1700] ss:$16 sps:$4 sm:$0xff]   ;;  %v10937_v35 = vld [vmem:[%s14998_s1 + $0x10ec] ss:$16 sps:$4 sm:$0xff]  }
 0x25f   : > { %5789 = vmatprep.subr.bf16.mxu1 %v10870_v59  ;;  %v10940_v59 = vld [vmem:[%s14998_s1 + $0x12ec] ss:$16 sps:$4 sm:$0xff]  }
 0x261   : > { %5749 = vmatpush1.bf16.msra.mxu0 %v10865_v1  ;;  %v13673_v1 = vor.u32 %v4342_v7, %v4339_v6  ;;  %v10989_v6 = vld [vmem:[%s14998_s1 + $0x11c8] ss:$16 sps:$4 sm:$0xff]  }
 0x262   : > { %5790 = vmatpush1.bf16.msra.mxu1 %v10868_v10  ;;  %5750 = vmatprep.subr.bf16.mxu0 %v10873_v13  ;;  %v13675_v10 = vor.u32 %v4358_v27, %v4355_v26  ;;  %v10935_v13 = vld [vmem:[%s14998_s1 + $0x10e8] ss:$16 sps:$4 sm:$0xff]   ;;  %v10997_v26 = vld [vmem:[%s14998_s1 + $0x11ac] ss:$16 sps:$4 sm:$0xff]  }
 0x263   : > { %5791 = vmatprep.subr.bf16.mxu1 %v10876_v4  ;;  %v10938_v4 = vld [vmem:[%s14998_s1 + $0x12e8] ss:$16 sps:$4 sm:$0xff]   ;;  %v11000_v27 = vld [vmem:[%s14998_s1 + $0x13ac] ss:$16 sps:$4 sm:$0xff]  }
 0x264   : > { %v10992_v7 = vld [vmem:[%s14998_s1 + $0x13c8] ss:$16 sps:$4 sm:$0xff]  }
 0x265   : > { %5751 = vmatpush1.bf16.msra.mxu0 %v10871_v15  ;;  %v10943_v15 = vld [vmem:[%s14998_s1 + $0x10cc] ss:$16 sps:$4 sm:$0xff]  }
 0x266   : > { %5792 = vmatpush1.bf16.msra.mxu1 %v10874_v16  ;;  %5752 = vmatprep.subr.bf16.mxu0 %v10879_v17  ;;  %v10946_v16 = vld [vmem:[%s14998_s1 + $0x12cc] ss:$16 sps:$4 sm:$0xff]  }
 0x267   : > { %5793 = vmatprep.subr.bf16.mxu1 %v10882_v18 }
 0x269   : > { %5753 = vmatpush1.bf16.msra.mxu0 %v10877_v23 }
 0x26a   : > { %5794 = vmatpush1.bf16.msra.mxu1 %v10880_v19  ;;  %5754 = vmatprep.subr.bf16.mxu0 %v10885_v20  ;;  %v10941_v19 = vld [vmem:[%s14998_s1 + $0x10c8] ss:$16 sps:$4 sm:$0xff]  }
 0x26b   : > { %5795 = vmatprep.subr.bf16.mxu1 %v10888_v8  ;;  %v10944_v20 = vld [vmem:[%s14998_s1 + $0x12c8] ss:$16 sps:$4 sm:$0xff]  }
 0x26d   : > { %5755 = vmatpush2.bf16.msra.mxu0 %v10883_v11 }
 0x26e   : > { %5796 = vmatpush2.bf16.msra.mxu1 %v10886_v21  ;;  %5756 = vmatprep.subr.bf16.mxu0 %v10891_v24  ;;  %v10949_v21 = vld [vmem:[%s14998_s1 + $0x10ac] ss:$16 sps:$4 sm:$0xff]  }
 0x26f   : > { %5797 = vmatprep.subr.bf16.mxu1 %v10894_v25 }
 0x271   : > { %5757 = vmatpush2.bf16.msra.mxu0 %v10889_v48 }
 0x272   : > { %5798 = vmatpush2.bf16.msra.mxu1 %v10892_v52  ;;  %5758 = vmatprep.subr.bf16.mxu0 %v10897_v29 }
 0x273   : > { %5799 = vmatprep.subr.bf16.mxu1 %v10900_v30  ;;  %v10947_v30 = vld [vmem:[%s14998_s1 + $0x10a8] ss:$16 sps:$4 sm:$0xff]  }
 0x275   : > { %5759 = vmatpush2.bf16.msra.mxu0 %v10895_v54  ;;  %v10950_v54 = vld [vmem:[%s14998_s1 + $0x12a8] ss:$16 sps:$4 sm:$0xff]  }
 0x276   : > { %5800 = vmatpush2.bf16.msra.mxu1 %v10898_v56  ;;  %5760 = vmatprep.subr.bf16.mxu0 %v10903_v32  ;;  %v10953_v32 = vld [vmem:[%s14998_s1 + $0x1088] ss:$16 sps:$4 sm:$0xff]  }
 0x277   : > { %5801 = vmatprep.subr.bf16.mxu1 %v10906_v33  ;;  %v10956_v33 = vld [vmem:[%s14998_s1 + $0x1288] ss:$16 sps:$4 sm:$0xff]  }
 0x279   : > { %5761 = vmatpush2.bf16.msra.mxu0 %v10901_v3  ;;  %v10961_v3 = vld [vmem:[%s14998_s1 + $0x106c] ss:$16 sps:$4 sm:$0xff]  }
 0x27a   : > { %5802 = vmatpush2.bf16.msra.mxu1 %v10904_v14  ;;  %5762 = vmatprep.subr.bf16.mxu0 %v10909_v38  ;;  %v10964_v14 = vld [vmem:[%s14998_s1 + $0x126c] ss:$16 sps:$4 sm:$0xff]   ;;  %v10959_v38 = vld [vmem:[%s14998_s1 + $0x1068] ss:$16 sps:$4 sm:$0xff]  }
 0x27b   : > { %5803 = vmatprep.subr.bf16.mxu1 %v10912_v39  ;;  %v10962_v39 = vld [vmem:[%s14998_s1 + $0x1268] ss:$16 sps:$4 sm:$0xff]  }
 0x27d   : > { %5763 = vmatpush2.bf16.msra.mxu0 %v10907_v42  ;;  %v10967_v42 = vld [vmem:[%s14998_s1 + $0x104c] ss:$16 sps:$4 sm:$0xff]  }
 0x27e   : > { %5804 = vmatpush2.bf16.msra.mxu1 %v10910_v55  ;;  %5764 = vmatprep.subr.bf16.mxu0 %v10915_v57  ;;  %v10970_v55 = vld [vmem:[%s14998_s1 + $0x124c] ss:$16 sps:$4 sm:$0xff]   ;;  %v10965_v57 = vld [vmem:[%s14998_s1 + $0x1048] ss:$16 sps:$4 sm:$0xff]  }
 0x27f   : > { %5805 = vmatprep.subr.bf16.mxu1 %v10918_v43  ;;  %v10968_v43 = vld [vmem:[%s14998_s1 + $0x1248] ss:$16 sps:$4 sm:$0xff]  }
 0x281   : > { %5765 = vmatpush2.bf16.msra.mxu0 %v10913_v46  ;;  %v10971_v46 = vld [vmem:[%s14998_s1 + $0x1028] ss:$16 sps:$4 sm:$0xff]  }
 0x282   : > { %5806 = vmatpush2.bf16.msra.mxu1 %v10916_v49  ;;  %5766 = vmatprep.subr.bf16.mxu0 %v10921_v0  ;;  %v10974_v49 = vld [vmem:[%s14998_s1 + $0x1228] ss:$16 sps:$4 sm:$0xff]   ;;  %v10979_v0 = vld [vmem:[%s14998_s1 + $0x100c] ss:$16 sps:$4 sm:$0xff]  }
 0x283   : > { %5807 = vmatprep.subr.bf16.mxu1 %v10924_v63  ;;  %v10982_v63 = vld [vmem:[%s14998_s1 + $0x120c] ss:$16 sps:$4 sm:$0xff]  }
 0x285   : > { %5767 = vmatpush2.bf16.msra.mxu0 %v10919_v60  ;;  %v10983_v60 = vld [vmem:[%s14998_s1 + $0x11e8] ss:$16 sps:$4 sm:$0xff]  }
 0x286   : > { %5808 = vmatpush2.bf16.msra.mxu1 %v10922_v12  ;;  %5768 = vmatprep.subr.bf16.mxu0 %v10927_v62  ;;  %v10986_v12 = vld [vmem:[%s14998_s1 + $0x13e8] ss:$16 sps:$4 sm:$0xff]   ;;  %v10991_v62 = vld [vmem:[%s14998_s1 + $0x11cc] ss:$16 sps:$4 sm:$0xff]  }
 0x287   : > { %5809 = vmatprep.subr.bf16.mxu1 %v10930_v31  ;;  %v10994_v31 = vld [vmem:[%s14998_s1 + $0x13cc] ss:$16 sps:$4 sm:$0xff]  }
 0x289   : > { %5769 = vmatpush2.bf16.msra.mxu0 %v10925_v9  ;;  %v10995_v9 = vld [vmem:[%s14998_s1 + $0x11a8] ss:$16 sps:$4 sm:$0xff]  }
 0x28a   : > { %5810 = vmatpush2.bf16.msra.mxu1 %v10928_v34  ;;  %5820 = vmatprep.subr.bf16.mxu0 %v10937_v35  ;;  %v10998_v34 = vld [vmem:[%s14998_s1 + $0x13a8] ss:$16 sps:$4 sm:$0xff]   ;;  %v11003_v35 = vld [vmem:[%s14998_s1 + $0x118c] ss:$16 sps:$4 sm:$0xff]  }
 0x28b   : > { %5861 = vmatprep.subr.bf16.mxu1 %v10940_v59  ;;  %v11006_v59 = vld [vmem:[%s14998_s1 + $0x138c] ss:$16 sps:$4 sm:$0xff]  }
 0x28c   : > { %v3893_v17 = vpop.f32.mrf.mxu0  ;;  %5771 = vmatmul.mubr.bf16.vlgmr.msra.gmra.mxu0 %v13673_v1 }
 0x28d   : > { %v3934_v18 = vpop.f32.mrf.mxu1  ;;  %5812 = vmatmul.mubr.bf16.vlgmr.msra.gmra.mxu1 %v13675_v10  ;;  %v3894_v23 = vadd.f32 %v3893_v17, %v13054_v37  ;;  %5821 = vmatpush1.bf16.msra.mxu0 %v10935_v13  ;;  %v10952_v37 = vld [vmem:[%s14998_s1 + $0x12ac] ss:$16 sps:$4 sm:$0xff]   ;;  %v11001_v13 = vld [vmem:[%s14998_s1 + $0x1188] ss:$16 sps:$4 sm:$0xff]  }
 0x28e   : > { %5862 = vmatpush1.bf16.msra.mxu1 %v10938_v4  ;;  %v3895_v8 = vpop.f32.mrf.mxu0  ;;  %5822 = vmatprep.subr.bf16.mxu0 %v10943_v15  ;;  %v11004_v4 = vld [vmem:[%s14998_s1 + $0x1388] ss:$16 sps:$4 sm:$0xff]   ;;  %v11009_v15 = vld [vmem:[%s14998_s1 + $0x116c] ss:$16 sps:$4 sm:$0xff]  }
 0x28f   : > { %v3936_v11 = vpop.f32.mrf.mxu1  ;;  %5863 = vmatprep.subr.bf16.mxu1 %v10946_v16  ;;  %v13704_v24 = vadd.f32 %v3934_v18, %v3894_v23  ;;  %v3896_v25 = vadd.f32 %v3895_v8, %v13065_v40  ;;  %5852 = vmatprep.mubr.bf16.mxu0 %v13257_v28  ;;  %v10955_v28 = vld [vmem:[%s14998_s1 + $0x108c] ss:$16 sps:$4 sm:$0xff]   ;;  %v11007_v17 = vld [vmem:[%s14998_s1 + $0x1168] ss:$16 sps:$4 sm:$0xff]  }
 0x290   : > { %5893 = vmatprep.mubr.bf16.mxu1 %v13259_v61  ;;  %v3897_v48 = vpop.f32.mrf.mxu0  ;;  %v10958_v61 = vld [vmem:[%s14998_s1 + $0x128c] ss:$16 sps:$4 sm:$0xff]   ;;  %v11010_v18 = vld [vmem:[%s14998_s1 + $0x1368] ss:$16 sps:$4 sm:$0xff]  }
 0x291   : > { %v3938_v52 = vpop.f32.mrf.mxu1  ;;  %v13709_v29 = vadd.f32 %v3936_v11, %v3896_v25  ;;  %5823 = vmatpush1.bf16.msra.mxu0 %v10941_v19  ;;  %v11012_v16 = vld [vmem:[%s14998_s1 + $0x136c] ss:$16 sps:$4 sm:$0xff]   ;;  %v11016_v8 = vld [vmem:[%s14998_s1 + $0x1348] ss:$16 sps:$4 sm:$0xff]  }
 0x292   : > { %5864 = vmatpush1.bf16.msra.mxu1 %v10944_v20  ;;  %v3898_v56 = vpop.f32.mrf.mxu0  ;;  %5824 = vmatprep.subr.bf16.mxu0 %v10949_v21  ;;  %v11015_v23 = vld [vmem:[%s14998_s1 + $0x114c] ss:$16 sps:$4 sm:$0xff]   ;;  %v11013_v20 = vld [vmem:[%s14998_s1 + $0x1148] ss:$16 sps:$4 sm:$0xff]  }
 0x293   : > { %v3939_v40 = vpop.f32.mrf.mxu1  ;;  %5865 = vmatprep.subr.bf16.mxu1 %v10952_v37  ;;  %v11018_v19 = vld [vmem:[%s14998_s1 + $0x134c] ss:$16 sps:$4 sm:$0xff]   ;;  %v11019_v37 = vld [vmem:[%s14998_s1 + $0x1128] ss:$16 sps:$4 sm:$0xff]  }
 0x294   : > { %v11021_v11 = vld [vmem:[%s14998_s1 + $0x112c] ss:$16 sps:$4 sm:$0xff]   ;;  %v11022_v25 = vld [vmem:[%s14998_s1 + $0x1328] ss:$16 sps:$4 sm:$0xff]  }
 0x295   : > { %5825 = vmatpush1.bf16.msra.mxu0 %v10947_v30  ;;  %v11024_v21 = vld [vmem:[%s14998_s1 + $0x132c] ss:$16 sps:$4 sm:$0xff]   ;;  %v11025_v30 = vld [vmem:[%s14998_s1 + $0x1108] ss:$16 sps:$4 sm:$0xff]  }
 0x296   : > { %5866 = vmatpush1.bf16.msra.mxu1 %v10950_v54  ;;  %5826 = vmatprep.subr.bf16.mxu0 %v10955_v28  ;;  %v11027_v48 = vld [vmem:[%s14998_s1 + $0x110c] ss:$16 sps:$4 sm:$0xff]   ;;  %v11028_v54 = vld [vmem:[%s14998_s1 + $0x1308] ss:$16 sps:$4 sm:$0xff]  }
 0x297   : > { %5867 = vmatprep.subr.bf16.mxu1 %v10958_v61  ;;  %v11030_v52 = vld [vmem:[%s14998_s1 + $0x130c] ss:$16 sps:$4 sm:$0xff]   ;;  %v11031_v28 = vld [vmem:[%s14998_s1 + $0x14e8] ss:$16 sps:$4 sm:$0xff]  }
 0x298   : > { %v11033_v56 = vld [vmem:[%s14998_s1 + $0x14ec] ss:$16 sps:$4 sm:$0xff]   ;;  %v11034_v61 = vld [vmem:[%s14998_s1 + $0x16e8] ss:$16 sps:$4 sm:$0xff]  }
 0x299   : > { %5827 = vmatpush1.bf16.msra.mxu0 %v10953_v32  ;;  %v11036_v40 = vld [vmem:[%s14998_s1 + $0x16ec] ss:$16 sps:$4 sm:$0xff]  }
 0x29a   : > { %5868 = vmatpush1.bf16.msra.mxu1 %v10956_v33  ;;  %5828 = vmatprep.subr.bf16.mxu0 %v10961_v3  ;;  %v11039_v32 = vld [vmem:[%s14998_s1 + $0x14cc] ss:$16 sps:$4 sm:$0xff]  }
 0x29b   : > { %5869 = vmatprep.subr.bf16.mxu1 %v10964_v14  ;;  %v11042_v33 = vld [vmem:[%s14998_s1 + $0x16cc] ss:$16 sps:$4 sm:$0xff]  }
 0x29d   : > { %5829 = vmatpush1.bf16.msra.mxu0 %v10959_v38 }
 0x29e   : > { %5870 = vmatpush1.bf16.msra.mxu1 %v10962_v39  ;;  %5830 = vmatprep.subr.bf16.mxu0 %v10967_v42  ;;  %v11037_v39 = vld [vmem:[%s14998_s1 + $0x14c8] ss:$16 sps:$4 sm:$0xff]  }
 0x29f   : > { %5871 = vmatprep.subr.bf16.mxu1 %v10970_v55  ;;  %v11040_v42 = vld [vmem:[%s14998_s1 + $0x16c8] ss:$16 sps:$4 sm:$0xff]  }
 0x2a1   : > { %5831 = vmatpush1.bf16.msra.mxu0 %v10965_v57 }
 0x2a2   : > { %5872 = vmatpush1.bf16.msra.mxu1 %v10968_v43  ;;  %5832 = vmatprep.subr.bf16.mxu0 %v10973_v44 }
 0x2a3   : > { %5873 = vmatprep.subr.bf16.mxu1 %v10976_v45 }
 0x2a5   : > { %5833 = vmatpush1.bf16.msra.mxu0 %v10971_v46 }
 0x2a6   : > { %5874 = vmatpush1.bf16.msra.mxu1 %v10974_v49  ;;  %5834 = vmatprep.subr.bf16.mxu0 %v10979_v0  ;;  %v11043_v49 = vld [vmem:[%s14998_s1 + $0x14a8] ss:$16 sps:$4 sm:$0xff]  }
 0x2a7   : > { %5875 = vmatprep.subr.bf16.mxu1 %v10982_v63  ;;  %v11046_v0 = vld [vmem:[%s14998_s1 + $0x16a8] ss:$16 sps:$4 sm:$0xff]  }
 0x2a9   : > { %5835 = vmatpush1.bf16.msra.mxu0 %v10977_v5  ;;  %v11049_v5 = vld [vmem:[%s14998_s1 + $0x1488] ss:$16 sps:$4 sm:$0xff]  }
 0x2aa   : > { %5876 = vmatpush1.bf16.msra.mxu1 %v10980_v50  ;;  %5836 = vmatprep.subr.bf16.mxu0 %v10985_v51  ;;  %v11052_v50 = vld [vmem:[%s14998_s1 + $0x1688] ss:$16 sps:$4 sm:$0xff]   ;;  %v11057_v51 = vld [vmem:[%s14998_s1 + $0x146c] ss:$16 sps:$4 sm:$0xff]  }
 0x2ab   : > { %5877 = vmatprep.subr.bf16.mxu1 %v10988_v53  ;;  %v11060_v53 = vld [vmem:[%s14998_s1 + $0x166c] ss:$16 sps:$4 sm:$0xff]  }
 0x2ad   : > { %5837 = vmatpush2.bf16.msra.mxu0 %v10983_v60  ;;  %v11055_v60 = vld [vmem:[%s14998_s1 + $0x1468] ss:$16 sps:$4 sm:$0xff]  }
 0x2ae   : > { %5878 = vmatpush2.bf16.msra.mxu1 %v10986_v12  ;;  %5838 = vmatprep.subr.bf16.mxu0 %v10991_v62  ;;  %v11058_v12 = vld [vmem:[%s14998_s1 + $0x1668] ss:$16 sps:$4 sm:$0xff]   ;;  %v11063_v62 = vld [vmem:[%s14998_s1 + $0x144c] ss:$16 sps:$4 sm:$0xff]  }
 0x2af   : > { %5879 = vmatprep.subr.bf16.mxu1 %v10994_v31  ;;  %v11066_v31 = vld [vmem:[%s14998_s1 + $0x164c] ss:$16 sps:$4 sm:$0xff]  }
 0x2b1   : > { %5839 = vmatpush2.bf16.msra.mxu0 %v10989_v6  ;;  %v11061_v6 = vld [vmem:[%s14998_s1 + $0x1448] ss:$16 sps:$4 sm:$0xff]  }
 0x2b2   : > { %5880 = vmatpush2.bf16.msra.mxu1 %v10992_v7  ;;  %5840 = vmatprep.subr.bf16.mxu0 %v10997_v26  ;;  %v11064_v7 = vld [vmem:[%s14998_s1 + $0x1648] ss:$16 sps:$4 sm:$0xff]   ;;  %v11069_v26 = vld [vmem:[%s14998_s1 + $0x142c] ss:$16 sps:$4 sm:$0xff]  }
 0x2b3   : > { %5881 = vmatprep.subr.bf16.mxu1 %v11000_v27  ;;  %v11072_v27 = vld [vmem:[%s14998_s1 + $0x162c] ss:$16 sps:$4 sm:$0xff]  }
 0x2b5   : > { %5841 = vmatpush2.bf16.msra.mxu0 %v10995_v9  ;;  %v11067_v9 = vld [vmem:[%s14998_s1 + $0x1428] ss:$16 sps:$4 sm:$0xff]  }
 0x2b6   : > { %5882 = vmatpush2.bf16.msra.mxu1 %v10998_v34  ;;  %5842 = vmatprep.subr.bf16.mxu0 %v11003_v35  ;;  %v11070_v34 = vld [vmem:[%s14998_s1 + $0x1628] ss:$16 sps:$4 sm:$0xff]   ;;  %v11075_v35 = vld [vmem:[%s14998_s1 + $0x140c] ss:$16 sps:$4 sm:$0xff]  }
 0x2b7   : > { %5883 = vmatprep.subr.bf16.mxu1 %v11006_v59  ;;  %v11078_v59 = vld [vmem:[%s14998_s1 + $0x160c] ss:$16 sps:$4 sm:$0xff]  }
 0x2b9   : > { %5843 = vmatpush2.bf16.msra.mxu0 %v11001_v13  ;;  %v11073_v13 = vld [vmem:[%s14998_s1 + $0x1408] ss:$16 sps:$4 sm:$0xff]  }
 0x2ba   : > { %5884 = vmatpush2.bf16.msra.mxu1 %v11004_v4  ;;  %5844 = vmatprep.subr.bf16.mxu0 %v11009_v15  ;;  %v11076_v4 = vld [vmem:[%s14998_s1 + $0x1608] ss:$16 sps:$4 sm:$0xff]   ;;  %v11081_v15 = vld [vmem:[%s14998_s1 + $0x15ec] ss:$16 sps:$4 sm:$0xff]  }
 0x2bb   : > { %5885 = vmatprep.subr.bf16.mxu1 %v11012_v16  ;;  %v11084_v16 = vld [vmem:[%s14998_s1 + $0x17ec] ss:$16 sps:$4 sm:$0xff]  }
 0x2bd   : > { %5845 = vmatpush2.bf16.msra.mxu0 %v11007_v17  ;;  %v11079_v17 = vld [vmem:[%s14998_s1 + $0x15e8] ss:$16 sps:$4 sm:$0xff]  }
 0x2be   : > { %5886 = vmatpush2.bf16.msra.mxu1 %v11010_v18  ;;  %5846 = vmatprep.subr.bf16.mxu0 %v11015_v23  ;;  %v11082_v18 = vld [vmem:[%s14998_s1 + $0x17e8] ss:$16 sps:$4 sm:$0xff]   ;;  %v11087_v23 = vld [vmem:[%s14998_s1 + $0x15cc] ss:$16 sps:$4 sm:$0xff]  }
 0x2bf   : > { %5887 = vmatprep.subr.bf16.mxu1 %v11018_v19  ;;  %v11090_v19 = vld [vmem:[%s14998_s1 + $0x17cc] ss:$16 sps:$4 sm:$0xff]  }
 0x2c1   : > { %5847 = vmatpush2.bf16.msra.mxu0 %v11013_v20  ;;  %v11085_v20 = vld [vmem:[%s14998_s1 + $0x15c8] ss:$16 sps:$4 sm:$0xff]  }
 0x2c2   : > { %5888 = vmatpush2.bf16.msra.mxu1 %v11016_v8  ;;  %5848 = vmatprep.subr.bf16.mxu0 %v11021_v11  ;;  %v11088_v8 = vld [vmem:[%s14998_s1 + $0x17c8] ss:$16 sps:$4 sm:$0xff]   ;;  %v11093_v11 = vld [vmem:[%s14998_s1 + $0x15ac] ss:$16 sps:$4 sm:$0xff]  }
 0x2c3   : > { %5889 = vmatprep.subr.bf16.mxu1 %v11024_v21  ;;  %v11096_v21 = vld [vmem:[%s14998_s1 + $0x17ac] ss:$16 sps:$4 sm:$0xff]  }
 0x2c5   : > { %5849 = vmatpush2.bf16.msra.mxu0 %v11019_v37  ;;  %v11091_v37 = vld [vmem:[%s14998_s1 + $0x15a8] ss:$16 sps:$4 sm:$0xff]  }
 0x2c6   : > { %5890 = vmatpush2.bf16.msra.mxu1 %v11022_v25  ;;  %5850 = vmatprep.subr.bf16.mxu0 %v11027_v48  ;;  %v11094_v25 = vld [vmem:[%s14998_s1 + $0x17a8] ss:$16 sps:$4 sm:$0xff]   ;;  %v11099_v48 = vld [vmem:[%s14998_s1 + $0x158c] ss:$16 sps:$4 sm:$0xff]  }
 0x2c7   : > { %5891 = vmatprep.subr.bf16.mxu1 %v11030_v52  ;;  %v11102_v52 = vld [vmem:[%s14998_s1 + $0x178c] ss:$16 sps:$4 sm:$0xff]  }
 0x2c9   : > { %5851 = vmatpush2.bf16.msra.mxu0 %v11025_v30  ;;  %v11097_v30 = vld [vmem:[%s14998_s1 + $0x1588] ss:$16 sps:$4 sm:$0xff]  }
 0x2ca   : > { %5892 = vmatpush2.bf16.msra.mxu1 %v11028_v54  ;;  %5902 = vmatprep.subr.bf16.mxu0 %v11033_v56  ;;  %v11100_v54 = vld [vmem:[%s14998_s1 + $0x1788] ss:$16 sps:$4 sm:$0xff]   ;;  %v11105_v56 = vld [vmem:[%s14998_s1 + $0x156c] ss:$16 sps:$4 sm:$0xff]  }
 0x2cb   : > { %5943 = vmatprep.subr.bf16.mxu1 %v11036_v40  ;;  %v11108_v40 = vld [vmem:[%s14998_s1 + $0x176c] ss:$16 sps:$4 sm:$0xff]  }
 0x2cc   : > { %v3975_v3 = vpop.f32.mrf.mxu0  ;;  %5853 = vmatmul.mubr.bf16.vlgmr.msra.gmra.mxu0 %v13465_v36  ;;  %v11045_v36 = vld [vmem:[%s14998_s1 + $0x14ac] ss:$16 sps:$4 sm:$0xff]  }
 0x2cd   : > { %v4016_v14 = vpop.f32.mrf.mxu1  ;;  %5894 = vmatmul.mubr.bf16.vlgmr.msra.gmra.mxu1 %v13467_v2  ;;  %v3976_v38 = vadd.f32 %v3975_v3, %v13704_v24  ;;  %5903 = vmatpush1.bf16.msra.mxu0 %v11031_v28  ;;  %v11048_v2 = vld [vmem:[%s14998_s1 + $0x16ac] ss:$16 sps:$4 sm:$0xff]   ;;  %v11103_v28 = vld [vmem:[%s14998_s1 + $0x1568] ss:$16 sps:$4 sm:$0xff]  }
 0x2ce   : > { %5944 = vmatpush1.bf16.msra.mxu1 %v11034_v61  ;;  %v3977_v55 = vpop.f32.mrf.mxu0  ;;  %5904 = vmatprep.subr.bf16.mxu0 %v11039_v32  ;;  %v11106_v61 = vld [vmem:[%s14998_s1 + $0x1768] ss:$16 sps:$4 sm:$0xff]   ;;  %v11111_v32 = vld [vmem:[%s14998_s1 + $0x154c] ss:$16 sps:$4 sm:$0xff]  }
 0x2cf   : > { %v4018_v57 = vpop.f32.mrf.mxu1  ;;  %5945 = vmatprep.subr.bf16.mxu1 %v11042_v33  ;;  %v13906_v24 = vadd.f32 %v4016_v14, %v3976_v38  ;;  %v3978_v43 = vadd.f32 %v3977_v55, %v13709_v29  ;;  %5934 = vmatprep.mubr.bf16.mxu0 %v13481_v41  ;;  %v11051_v41 = vld [vmem:[%s14998_s1 + $0x148c] ss:$16 sps:$4 sm:$0xff]   ;;  %v11109_v3 = vld [vmem:[%s14998_s1 + $0x1548] ss:$16 sps:$4 sm:$0xff]  }
 0x2d0   : > { %5975 = vmatprep.mubr.bf16.mxu1 %v13483_v22  ;;  %v3979_v44 = vpop.f32.mrf.mxu0  ;;  %v11054_v22 = vld [vmem:[%s14998_s1 + $0x168c] ss:$16 sps:$4 sm:$0xff]   ;;  %v11112_v14 = vld [vmem:[%s14998_s1 + $0x1748] ss:$16 sps:$4 sm:$0xff]  }
 0x2d1   : > { %v4020_v45 = vpop.f32.mrf.mxu1  ;;  %v13911_v46 = vadd.f32 %v4018_v57, %v3978_v43  ;;  %5905 = vmatpush1.bf16.msra.mxu0 %v11037_v39  ;;  %v11114_v33 = vld [vmem:[%s14998_s1 + $0x174c] ss:$16 sps:$4 sm:$0xff]   ;;  %v11118_v55 = vld [vmem:[%s14998_s1 + $0x1728] ss:$16 sps:$4 sm:$0xff]   ;;  %v14073_v43 = vld [vmem:[%s11703_s6 + $0x20] sm:$0x11] }
 0x2d2   : > { %5946 = vmatpush1.bf16.msra.mxu1 %v11040_v42  ;;  %v3980_v63 = vpop.f32.mrf.mxu0  ;;  %5906 = vmatprep.subr.bf16.mxu0 %v11045_v36  ;;  %v11117_v38 = vld [vmem:[%s14998_s1 + $0x152c] ss:$16 sps:$4 sm:$0xff]   ;;  %v11115_v42 = vld [vmem:[%s14998_s1 + $0x1528] ss:$16 sps:$4 sm:$0xff]  }
 0x2d3   : > { %v4021_v29 = vpop.f32.mrf.mxu1  ;;  %5947 = vmatprep.subr.bf16.mxu1 %v11048_v2  ;;  %v11120_v39 = vld [vmem:[%s14998_s1 + $0x172c] ss:$16 sps:$4 sm:$0xff]   ;;  %v14070_v2 = vld [vmem:[%s11703_s6] sm:$0xcc] }
 0x2d4   : > { %v11123_v57 = vld [vmem:[%s14998_s1 + $0x150c] ss:$16 sps:$4 sm:$0xff]   ;;  %v11129_v63 = vld [vmem:[%s14998_s1 + $0x18e4] ss:$16 sps:$4 sm:$0xff]  }
 0x2d5   : > { %5907 = vmatpush1.bf16.msra.mxu0 %v11043_v49  ;;  %v11126_v36 = vld [vmem:[%s14998_s1 + $0x170c] ss:$16 sps:$4 sm:$0xff]   ;;  %v11121_v49 = vld [vmem:[%s14998_s1 + $0x1508] ss:$16 sps:$4 sm:$0xff]   ;;  %v11132_v29 = vld [vmem:[%s14998_s1 + $0x1ae4] ss:$16 sps:$4 sm:$0xff]  }
 0x2d6   : > { %5948 = vmatpush1.bf16.msra.mxu1 %v11046_v0  ;;  %5908 = vmatprep.subr.bf16.mxu0 %v11051_v41  ;;  %v14076_v44 = vld [vmem:[%s11703_s6 + $0x8] sm:$0xcc]  ;;  %v14079_v45 = vld [vmem:[%s11703_s6 + $0x28] sm:$0x11]  ;;  %v9678_v41 = vcombine.high %v14070_v2, %v14073_v43 }
 0x2d7   : > { %5949 = vmatprep.subr.bf16.mxu1 %v11054_v22  ;;  %v11124_v0 = vld [vmem:[%s14998_s1 + $0x1708] ss:$16 sps:$4 sm:$0xff]   ;;  %v9680_v22 = vcombine.high %v14076_v44, %v14079_v45 }
 0x2d9   : > { %5909 = vmatpush1.bf16.msra.mxu0 %v11049_v5  ;;  %v11127_v5 = vld [vmem:[%s14998_s1 + $0x18e0] ss:$16 sps:$4 sm:$0xff]  }
 0x2da   : > { %5950 = vmatpush1.bf16.msra.mxu1 %v11052_v50  ;;  %5910 = vmatprep.subr.bf16.mxu0 %v11057_v51  ;;  %v11130_v50 = vld [vmem:[%s14998_s1 + $0x1ae0] ss:$16 sps:$4 sm:$0xff]   ;;  %v11135_v51 = vld [vmem:[%s14998_s1 + $0x18c4] ss:$16 sps:$4 sm:$0xff]  }
 0x2db   : > { %5951 = vmatprep.subr.bf16.mxu1 %v11060_v53  ;;  %v11138_v53 = vld [vmem:[%s14998_s1 + $0x1ac4] ss:$16 sps:$4 sm:$0xff]  }
 0x2dd   : > { %5911 = vmatpush1.bf16.msra.mxu0 %v11055_v60  ;;  %v14109_v60 = vrot.slane %v9678_v41, 2  ;;  %v11195_v41 = vld [vmem:[%s14998_s1 + $0x1984] ss:$16 sps:$4 sm:$0xff]  }
 0x2de   : > { %5952 = vmatpush1.bf16.msra.mxu1 %v11058_v12  ;;  %5912 = vmatprep.subr.bf16.mxu0 %v11063_v62  ;;  %v14111_v12 = vrot.slane %v9680_v22, 2  ;;  %v11198_v22 = vld [vmem:[%s14998_s1 + $0x1b84] ss:$16 sps:$4 sm:$0xff]  }
 0x2df   : > { %5953 = vmatprep.subr.bf16.mxu1 %v11066_v31 }
 0x2e1   : > { %5913 = vmatpush1.bf16.msra.mxu0 %v11061_v6 }
 0x2e2   : > { %5954 = vmatpush1.bf16.msra.mxu1 %v11064_v7  ;;  %5914 = vmatprep.subr.bf16.mxu0 %v11069_v26  ;;  %v11133_v7 = vld [vmem:[%s14998_s1 + $0x18c0] ss:$16 sps:$4 sm:$0xff]  }
 0x2e3   : > { %5955 = vmatprep.subr.bf16.mxu1 %v11072_v27  ;;  %v11136_v26 = vld [vmem:[%s14998_s1 + $0x1ac0] ss:$16 sps:$4 sm:$0xff]  }
 0x2e5   : > { %5915 = vmatpush1.bf16.msra.mxu0 %v11067_v9 }
 0x2e6   : > { %5956 = vmatpush1.bf16.msra.mxu1 %v11070_v34  ;;  %5916 = vmatprep.subr.bf16.mxu0 %v11075_v35 }
 0x2e7   : > { %5957 = vmatprep.subr.bf16.mxu1 %v11078_v59 }
 0x2e9   : > { %5917 = vmatpush1.bf16.msra.mxu0 %v11073_v13  ;;  %v11139_v13 = vld [vmem:[%s14998_s1 + $0x18a0] ss:$16 sps:$4 sm:$0xff]  }
 0x2ea   : > { %5958 = vmatpush1.bf16.msra.mxu1 %v11076_v4  ;;  %5918 = vmatprep.subr.bf16.mxu0 %v11081_v15  ;;  %v11142_v4 = vld [vmem:[%s14998_s1 + $0x1aa0] ss:$16 sps:$4 sm:$0xff]  }
 0x2eb   : > { %5959 = vmatprep.subr.bf16.mxu1 %v11084_v16 }
 0x2ed   : > { %5919 = vmatpush2.bf16.msra.mxu0 %v11079_v17  ;;  %v11147_v17 = vld [vmem:[%s14998_s1 + $0x1884] ss:$16 sps:$4 sm:$0xff]  }
 0x2ee   : > { %5960 = vmatpush2.bf16.msra.mxu1 %v11082_v18  ;;  %5920 = vmatprep.subr.bf16.mxu0 %v11087_v23  ;;  %v11150_v18 = vld [vmem:[%s14998_s1 + $0x1a84] ss:$16 sps:$4 sm:$0xff]   ;;  %v11145_v23 = vld [vmem:[%s14998_s1 + $0x1880] ss:$16 sps:$4 sm:$0xff]  }
 0x2ef   : > { %5961 = vmatprep.subr.bf16.mxu1 %v11090_v19  ;;  %v11148_v19 = vld [vmem:[%s14998_s1 + $0x1a80] ss:$16 sps:$4 sm:$0xff]  }
 0x2f1   : > { %5921 = vmatpush2.bf16.msra.mxu0 %v11085_v20  ;;  %v11153_v20 = vld [vmem:[%s14998_s1 + $0x1864] ss:$16 sps:$4 sm:$0xff]  }
 0x2f2   : > { %5962 = vmatpush2.bf16.msra.mxu1 %v11088_v8  ;;  %5922 = vmatprep.subr.bf16.mxu0 %v11093_v11  ;;  %v11156_v8 = vld [vmem:[%s14998_s1 + $0x1a64] ss:$16 sps:$4 sm:$0xff]   ;;  %v11151_v11 = vld [vmem:[%s14998_s1 + $0x1860] ss:$16 sps:$4 sm:$0xff]  }
 0x2f3   : > { %5963 = vmatprep.subr.bf16.mxu1 %v11096_v21  ;;  %v11154_v21 = vld [vmem:[%s14998_s1 + $0x1a60] ss:$16 sps:$4 sm:$0xff]  }
 0x2f5   : > { %5923 = vmatpush2.bf16.msra.mxu0 %v11091_v37  ;;  %v11159_v37 = vld [vmem:[%s14998_s1 + $0x1844] ss:$16 sps:$4 sm:$0xff]  }
 0x2f6   : > { %5964 = vmatpush2.bf16.msra.mxu1 %v11094_v25  ;;  %5924 = vmatprep.subr.bf16.mxu0 %v11099_v48  ;;  %v11162_v25 = vld [vmem:[%s14998_s1 + $0x1a44] ss:$16 sps:$4 sm:$0xff]   ;;  %v11157_v48 = vld [vmem:[%s14998_s1 + $0x1840] ss:$16 sps:$4 sm:$0xff]  }
 0x2f7   : > { %5965 = vmatprep.subr.bf16.mxu1 %v11102_v52  ;;  %v11160_v52 = vld [vmem:[%s14998_s1 + $0x1a40] ss:$16 sps:$4 sm:$0xff]  }
 0x2f9   : > { %5925 = vmatpush2.bf16.msra.mxu0 %v11097_v30  ;;  %v11165_v30 = vld [vmem:[%s14998_s1 + $0x1824] ss:$16 sps:$4 sm:$0xff]  }
 0x2fa   : > { %5966 = vmatpush2.bf16.msra.mxu1 %v11100_v54  ;;  %5926 = vmatprep.subr.bf16.mxu0 %v11105_v56  ;;  %v11168_v54 = vld [vmem:[%s14998_s1 + $0x1a24] ss:$16 sps:$4 sm:$0xff]   ;;  %v11163_v56 = vld [vmem:[%s14998_s1 + $0x1820] ss:$16 sps:$4 sm:$0xff]  }
 0x2fb   : > { %5967 = vmatprep.subr.bf16.mxu1 %v11108_v40  ;;  %v11166_v40 = vld [vmem:[%s14998_s1 + $0x1a20] ss:$16 sps:$4 sm:$0xff]  }
 0x2fd   : > { %5927 = vmatpush2.bf16.msra.mxu0 %v11103_v28  ;;  %v11171_v28 = vld [vmem:[%s14998_s1 + $0x1804] ss:$16 sps:$4 sm:$0xff]  }
 0x2fe   : > { %5968 = vmatpush2.bf16.msra.mxu1 %v11106_v61  ;;  %5928 = vmatprep.subr.bf16.mxu0 %v11111_v32  ;;  %v11174_v61 = vld [vmem:[%s14998_s1 + $0x1a04] ss:$16 sps:$4 sm:$0xff]   ;;  %v11169_v32 = vld [vmem:[%s14998_s1 + $0x1800] ss:$16 sps:$4 sm:$0xff]  }
 0x2ff   : > { %5969 = vmatprep.subr.bf16.mxu1 %v11114_v33  ;;  %v11172_v33 = vld [vmem:[%s14998_s1 + $0x1a00] ss:$16 sps:$4 sm:$0xff]  }
 0x301   : > { %5929 = vmatpush2.bf16.msra.mxu0 %v11109_v3  ;;  %v11177_v3 = vld [vmem:[%s14998_s1 + $0x19e4] ss:$16 sps:$4 sm:$0xff]  }
 0x302   : > { %5970 = vmatpush2.bf16.msra.mxu1 %v11112_v14  ;;  %5930 = vmatprep.subr.bf16.mxu0 %v11117_v38  ;;  %v11180_v14 = vld [vmem:[%s14998_s1 + $0x1be4] ss:$16 sps:$4 sm:$0xff]   ;;  %v11175_v38 = vld [vmem:[%s14998_s1 + $0x19e0] ss:$16 sps:$4 sm:$0xff]  }
 0x303   : > { %5971 = vmatprep.subr.bf16.mxu1 %v11120_v39  ;;  %v11178_v39 = vld [vmem:[%s14998_s1 + $0x1be0] ss:$16 sps:$4 sm:$0xff]  }
 0x305   : > { %5931 = vmatpush2.bf16.msra.mxu0 %v11115_v42  ;;  %v11183_v42 = vld [vmem:[%s14998_s1 + $0x19c4] ss:$16 sps:$4 sm:$0xff]  }
 0x306   : > { %5972 = vmatpush2.bf16.msra.mxu1 %v11118_v55  ;;  %5932 = vmatprep.subr.bf16.mxu0 %v11123_v57  ;;  %v11186_v55 = vld [vmem:[%s14998_s1 + $0x1bc4] ss:$16 sps:$4 sm:$0xff]   ;;  %v11181_v57 = vld [vmem:[%s14998_s1 + $0x19c0] ss:$16 sps:$4 sm:$0xff]  }
 0x307   : > { %5973 = vmatprep.subr.bf16.mxu1 %v11126_v36  ;;  %v11184_v36 = vld [vmem:[%s14998_s1 + $0x1bc0] ss:$16 sps:$4 sm:$0xff]  }
 0x309   : > { %5933 = vmatpush2.bf16.msra.mxu0 %v11121_v49  ;;  %v11189_v49 = vld [vmem:[%s14998_s1 + $0x19a4] ss:$16 sps:$4 sm:$0xff]  }
 0x30a   : > { %5974 = vmatpush2.bf16.msra.mxu1 %v11124_v0  ;;  %7581 = vmatprep.subr.bf16.mxu0 %v11129_v63  ;;  %v11192_v0 = vld [vmem:[%s14998_s1 + $0x1ba4] ss:$16 sps:$4 sm:$0xff]   ;;  %v11187_v63 = vld [vmem:[%s14998_s1 + $0x19a0] ss:$16 sps:$4 sm:$0xff]  }
 0x30b   : > { %7622 = vmatprep.subr.bf16.mxu1 %v11132_v29  ;;  %v11190_v29 = vld [vmem:[%s14998_s1 + $0x1ba0] ss:$16 sps:$4 sm:$0xff]  }
 0x30c   : > { %v5690_v62 = vpop.f32.mrf.mxu0  ;;  %5935 = vmatmul.mubr.bf16.vlgmr.msra.gmra.mxu0 %v13673_v1  ;;  %v11141_v1 = vld [vmem:[%s14998_s1 + $0x18a4] ss:$16 sps:$4 sm:$0xff]  }
 0x30d   : > { %v5731_v31 = vpop.f32.mrf.mxu1  ;;  %5976 = vmatmul.mubr.bf16.vlgmr.msra.gmra.mxu1 %v13675_v10  ;;  %7582 = vmatpush1.bf16.msra.mxu0 %v11127_v5  ;;  %v11144_v10 = vld [vmem:[%s14998_s1 + $0x1aa4] ss:$16 sps:$4 sm:$0xff]   ;;  %v11193_v5 = vld [vmem:[%s14998_s1 + $0x1980] ss:$16 sps:$4 sm:$0xff]  }
 0x30e   : > { %v14115_v6 = vadd.f32 %v5731_v31, %v5690_v62  ;;  %7623 = vmatpush1.bf16.msra.mxu1 %v11130_v50  ;;  %v5692_v27 = vpop.f32.mrf.mxu0  ;;  %7583 = vmatprep.subr.bf16.mxu0 %v11135_v51  ;;  %v11196_v50 = vld [vmem:[%s14998_s1 + $0x1b80] ss:$16 sps:$4 sm:$0xff]   ;;  %v11201_v51 = vld [vmem:[%s14998_s1 + $0x1964] ss:$16 sps:$4 sm:$0xff]  }
 0x30f   : > { %v5733_v9 = vpop.f32.mrf.mxu1  ;;  %7624 = vmatprep.subr.bf16.mxu1 %v11138_v53  ;;  %7613 = vmatprep.mubr.bf16.mxu0 %v14109_v60  ;;  %v11204_v53 = vld [vmem:[%s14998_s1 + $0x1b64] ss:$16 sps:$4 sm:$0xff]   ;;  %v11199_v62 = vld [vmem:[%s14998_s1 + $0x1960] ss:$16 sps:$4 sm:$0xff]  }
 0x310   : > { %v14129_v34 = vadd.f32 %v5733_v9, %v5692_v27  ;;  %7654 = vmatprep.mubr.bf16.mxu1 %v14111_v12  ;;  %v5694_v35 = vpop.f32.mrf.mxu0  ;;  %v11202_v31 = vld [vmem:[%s14998_s1 + $0x1b60] ss:$16 sps:$4 sm:$0xff]  }
 0x311   : > { %v5735_v59 = vpop.f32.mrf.mxu1  ;;  %7584 = vmatpush1.bf16.msra.mxu0 %v11133_v7  ;;  %v11207_v7 = vld [vmem:[%s14998_s1 + $0x1944] ss:$16 sps:$4 sm:$0xff]   ;;  %v11205_v27 = vld [vmem:[%s14998_s1 + $0x1940] ss:$16 sps:$4 sm:$0xff]  }
 0x312   : > { %7625 = vmatpush1.bf16.msra.mxu1 %v11136_v26  ;;  %v5695_v15 = vpop.f32.mrf.mxu0  ;;  %7585 = vmatprep.subr.bf16.mxu0 %v11141_v1  ;;  %v11210_v26 = vld [vmem:[%s14998_s1 + $0x1b44] ss:$16 sps:$4 sm:$0xff]   ;;  %v11208_v9 = vld [vmem:[%s14998_s1 + $0x1b40] ss:$16 sps:$4 sm:$0xff]  }
 0x313   : > { %v5736_v16 = vpop.f32.mrf.mxu1  ;;  %7626 = vmatprep.subr.bf16.mxu1 %v11144_v10  ;;  %v11213_v1 = vld [vmem:[%s14998_s1 + $0x1924] ss:$16 sps:$4 sm:$0xff]   ;;  %v11211_v35 = vld [vmem:[%s14998_s1 + $0x1920] ss:$16 sps:$4 sm:$0xff]  }
 0x314   : > { %v11216_v10 = vld [vmem:[%s14998_s1 + $0x1b24] ss:$16 sps:$4 sm:$0xff]   ;;  %v11214_v59 = vld [vmem:[%s14998_s1 + $0x1b20] ss:$16 sps:$4 sm:$0xff]   ;;  %v9677_v16 = vcombine.low %v14070_v2, %v14073_v43 }
 0x315   : > { %7586 = vmatpush1.bf16.msra.mxu0 %v11139_v13  ;;  %v11219_v13 = vld [vmem:[%s14998_s1 + $0x1904] ss:$16 sps:$4 sm:$0xff]  }
 0x316   : > { %7627 = vmatpush1.bf16.msra.mxu1 %v11142_v4  ;;  %7587 = vmatprep.subr.bf16.mxu0 %v11147_v17  ;;  %v11222_v4 = vld [vmem:[%s14998_s1 + $0x1b04] ss:$16 sps:$4 sm:$0xff]   ;;  %v9679_v17 = vcombine.low %v14076_v44, %v14079_v45 }
 0x317   : > { %7628 = vmatprep.subr.bf16.mxu1 %v11150_v18  ;;  %v14290_v15 = vld [vmem:[%s11703_s6 + $0x10] sm:$0xcc]  ;;  %v14297_v18 = vld [vmem:[%s11703_s6 + $0x30] sm:$0x11] }
 0x318   : > { %v11225_v2 = vld [vmem:[%s14998_s1 + $0x1ce4] ss:$16 sps:$4 sm:$0xff]   ;;  %v9682_v44 = vcombine.high %v14290_v15, %v14297_v18 }
 0x319   : > { %7588 = vmatpush1.bf16.msra.mxu0 %v11145_v23  ;;  %v14300_v23 = vld [vmem:[%s11703_s6 + $0x18] sm:$0xcc]  ;;  %v11228_v43 = vld [vmem:[%s14998_s1 + $0x1ee4] ss:$16 sps:$4 sm:$0xff]  }
 0x31a   : > { %7629 = vmatpush1.bf16.msra.mxu1 %v11148_v19  ;;  %7589 = vmatprep.subr.bf16.mxu0 %v11153_v20  ;;  %v14303_v19 = vld [vmem:[%s11703_s6 + $0x38] sm:$0x11]  ;;  %v11217_v20 = vld [vmem:[%s14998_s1 + $0x1900] ss:$16 sps:$4 sm:$0xff]  }
 0x31b   : > { %7630 = vmatprep.subr.bf16.mxu1 %v11156_v8  ;;  %v11220_v8 = vld [vmem:[%s14998_s1 + $0x1b00] ss:$16 sps:$4 sm:$0xff]   ;;  %v9684_v45 = vcombine.high %v14300_v23, %v14303_v19 }
 0x31d   : > { %7590 = vmatpush1.bf16.msra.mxu0 %v11151_v11  ;;  %v14321_v11 = vrot.slane %v9677_v16, 2  ;;  %v11265_v16 = vld [vmem:[%s14998_s1 + $0x1c00] ss:$16 sps:$4 sm:$0xff]  }
 0x31e   : > { %7631 = vmatpush1.bf16.msra.mxu1 %v11154_v21  ;;  %7591 = vmatprep.subr.bf16.mxu0 %v11159_v37  ;;  %v14323_v21 = vrot.slane %v9679_v17, 2  ;;  %v11223_v37 = vld [vmem:[%s14998_s1 + $0x1ce0] ss:$16 sps:$4 sm:$0xff]  }
 0x31f   : > { %7632 = vmatprep.subr.bf16.mxu1 %v11162_v25  ;;  %v11226_v25 = vld [vmem:[%s14998_s1 + $0x1ee0] ss:$16 sps:$4 sm:$0xff]  }
 0x320   : > { %v11268_v17 = vld [vmem:[%s14998_s1 + $0x1e00] ss:$16 sps:$4 sm:$0xff]  }
 0x321   : > { %7592 = vmatpush1.bf16.msra.mxu0 %v11157_v48  ;;  %v11231_v48 = vld [vmem:[%s14998_s1 + $0x1cc4] ss:$16 sps:$4 sm:$0xff]  }
 0x322   : > { %7633 = vmatpush1.bf16.msra.mxu1 %v11160_v52  ;;  %7593 = vmatprep.subr.bf16.mxu0 %v11165_v30  ;;  %v11234_v52 = vld [vmem:[%s14998_s1 + $0x1ec4] ss:$16 sps:$4 sm:$0xff]   ;;  %v14337_v30 = vrot.slane %v9682_v44, 2 }
 0x323   : > { %7634 = vmatprep.subr.bf16.mxu1 %v11168_v54  ;;  %v14339_v54 = vrot.slane %v9684_v45, 2  ;;  %v11279_v44 = vld [vmem:[%s14998_s1 + $0x1dc4] ss:$16 sps:$4 sm:$0xff]  }
 0x324   : > { %v11282_v45 = vld [vmem:[%s14998_s1 + $0x1fc4] ss:$16 sps:$4 sm:$0xff]  }
 0x325   : > { %7594 = vmatpush1.bf16.msra.mxu0 %v11163_v56 }
 0x326   : > { %7635 = vmatpush1.bf16.msra.mxu1 %v11166_v40  ;;  %7595 = vmatprep.subr.bf16.mxu0 %v11171_v28 }
 0x327   : > { %7636 = vmatprep.subr.bf16.mxu1 %v11174_v61  ;;  %v11229_v61 = vld [vmem:[%s14998_s1 + $0x1cc0] ss:$16 sps:$4 sm:$0xff]  }
 0x329   : > { %7596 = vmatpush1.bf16.msra.mxu0 %v11169_v32  ;;  %v11232_v32 = vld [vmem:[%s14998_s1 + $0x1ec0] ss:$16 sps:$4 sm:$0xff]  }
 0x32a   : > { %7637 = vmatpush1.bf16.msra.mxu1 %v11172_v33  ;;  %7597 = vmatprep.subr.bf16.mxu0 %v11177_v3 }
 0x32b   : > { %7638 = vmatprep.subr.bf16.mxu1 %v11180_v14  ;;  %v11237_v14 = vld [vmem:[%s14998_s1 + $0x1ca4] ss:$16 sps:$4 sm:$0xff]  }
 0x32d   : > { %7598 = vmatpush2.bf16.msra.mxu0 %v11175_v38 }
 0x32e   : > { %7639 = vmatpush2.bf16.msra.mxu1 %v11178_v39  ;;  %7599 = vmatprep.subr.bf16.mxu0 %v11183_v42 }
 0x32f   : > { %7640 = vmatprep.subr.bf16.mxu1 %v11186_v55 }
 0x331   : > { %7600 = vmatpush2.bf16.msra.mxu0 %v11181_v57 }
 0x332   : > { %7641 = vmatpush2.bf16.msra.mxu1 %v11184_v36  ;;  %7601 = vmatprep.subr.bf16.mxu0 %v11189_v49  ;;  %v11235_v49 = vld [vmem:[%s14998_s1 + $0x1ca0] ss:$16 sps:$4 sm:$0xff]  }
 0x333   : > { %7642 = vmatprep.subr.bf16.mxu1 %v11192_v0 }
 0x335   : > { %7602 = vmatpush2.bf16.msra.mxu0 %v11187_v63 }
 0x336   : > { %7643 = vmatpush2.bf16.msra.mxu1 %v11190_v29  ;;  %7603 = vmatprep.subr.bf16.mxu0 %v11195_v41  ;;  %v11246_v29 = vld [vmem:[%s14998_s1 + $0x1e84] ss:$16 sps:$4 sm:$0xff]  }
 0x337   : > { %7644 = vmatprep.subr.bf16.mxu1 %v11198_v22  ;;  %v11241_v22 = vld [vmem:[%s14998_s1 + $0x1c80] ss:$16 sps:$4 sm:$0xff]  }
 0x339   : > { %7604 = vmatpush2.bf16.msra.mxu0 %v11193_v5  ;;  %v11244_v5 = vld [vmem:[%s14998_s1 + $0x1e80] ss:$16 sps:$4 sm:$0xff]  }
 0x33a   : > { %7645 = vmatpush2.bf16.msra.mxu1 %v11196_v50  ;;  %7605 = vmatprep.subr.bf16.mxu0 %v11201_v51  ;;  %v7913_v50 = vld [vmem:[%s15000_s3] sm:$0x1f] }
 0x33b   : > { %7646 = vmatprep.subr.bf16.mxu1 %v11204_v53  ;;  %v11252_v51 = vld [vmem:[%s14998_s1 + $0x1e64] ss:$16 sps:$4 sm:$0xff]   ;;  %v11527_v53 = vmov 0  }
 0x33c   : > { %9958 = vset.pattern.permute.xlu0 %v11527_v53  ;;  %v11322_v53 = vld [vmem:[%s14998_s1 + $0x1ae8] ss:$16 sps:$4 sm:$0xff]  }
 0x33d   : > { %7606 = vmatpush2.bf16.msra.mxu0 %v11199_v62  ;;  %7916 = vperm.xlu0 %9958, %v7913_v50   ;;  %v11247_v62 = vld [vmem:[%s14998_s1 + $0x1c60] ss:$16 sps:$4 sm:$0xff]  }
 0x33e   : > { %7647 = vmatpush2.bf16.msra.mxu1 %v11202_v31  ;;  %7607 = vmatprep.subr.bf16.mxu0 %v11207_v7  ;;  %v11250_v31 = vld [vmem:[%s14998_s1 + $0x1e60] ss:$16 sps:$4 sm:$0xff]   ;;  %v11255_v7 = vld [vmem:[%s14998_s1 + $0x1c44] ss:$16 sps:$4 sm:$0xff]  }
 0x33f   : > { %7648 = vmatprep.subr.bf16.mxu1 %v11210_v26  ;;  %v11258_v26 = vld [vmem:[%s14998_s1 + $0x1e44] ss:$16 sps:$4 sm:$0xff]   ;;  %v11313_v50 = vld [vmem:[%s14998_s1 + $0x1d00] ss:$16 sps:$4 sm:$0xff]  }
 0x341   : > { %7608 = vmatpush2.bf16.msra.mxu0 %v11205_v27  ;;  %v11253_v27 = vld [vmem:[%s14998_s1 + $0x1c40] ss:$16 sps:$4 sm:$0xff]  }
 0x342   : > { %7649 = vmatpush2.bf16.msra.mxu1 %v11208_v9  ;;  %7609 = vmatprep.subr.bf16.mxu0 %v11213_v1  ;;  %v11256_v9 = vld [vmem:[%s14998_s1 + $0x1e40] ss:$16 sps:$4 sm:$0xff]   ;;  %v11261_v1 = vld [vmem:[%s14998_s1 + $0x1c24] ss:$16 sps:$4 sm:$0xff]  }
 0x343   : > { %7650 = vmatprep.subr.bf16.mxu1 %v11216_v10  ;;  %v11264_v10 = vld [vmem:[%s14998_s1 + $0x1e24] ss:$16 sps:$4 sm:$0xff]  }
 0x345   : > { %7610 = vmatpush2.bf16.msra.mxu0 %v11211_v35  ;;  %v11259_v35 = vld [vmem:[%s14998_s1 + $0x1c20] ss:$16 sps:$4 sm:$0xff]  }
 0x346   : > { %7651 = vmatpush2.bf16.msra.mxu1 %v11214_v59  ;;  %7611 = vmatprep.subr.bf16.mxu0 %v11219_v13  ;;  %v11262_v59 = vld [vmem:[%s14998_s1 + $0x1e20] ss:$16 sps:$4 sm:$0xff]   ;;  %v11267_v13 = vld [vmem:[%s14998_s1 + $0x1c04] ss:$16 sps:$4 sm:$0xff]  }
 0x347   : > { %7652 = vmatprep.subr.bf16.mxu1 %v11222_v4  ;;  %v11270_v4 = vld [vmem:[%s14998_s1 + $0x1e04] ss:$16 sps:$4 sm:$0xff]  }
 0x349   : > { %7612 = vmatpush2.bf16.msra.mxu0 %v11217_v20  ;;  %v11273_v20 = vld [vmem:[%s14998_s1 + $0x1de4] ss:$16 sps:$4 sm:$0xff]  }
 0x34a   : > { %7653 = vmatpush2.bf16.msra.mxu1 %v11220_v8  ;;  %7663 = vmatprep.subr.bf16.mxu0 %v11225_v2  ;;  %v11276_v8 = vld [vmem:[%s14998_s1 + $0x1fe4] ss:$16 sps:$4 sm:$0xff]   ;;  %v11271_v2 = vld [vmem:[%s14998_s1 + $0x1de0] ss:$16 sps:$4 sm:$0xff]  }
 0x34b   : > { %7704 = vmatprep.subr.bf16.mxu1 %v11228_v43  ;;  %v11274_v43 = vld [vmem:[%s14998_s1 + $0x1fe0] ss:$16 sps:$4 sm:$0xff]  }
 0x34c   : > { %v5772_v56 = vpop.f32.mrf.mxu0  ;;  %7614 = vmatmul.mubr.bf16.vlgmr.msra.gmra.mxu0 %v14321_v11 }
 0x34d   : > { %v5813_v40 = vpop.f32.mrf.mxu1  ;;  %7655 = vmatmul.mubr.bf16.vlgmr.msra.gmra.mxu1 %v14323_v21  ;;  %v5773_v28 = vadd.f32 %v5772_v56, %v14115_v6  ;;  %7664 = vmatpush1.bf16.msra.mxu0 %v11223_v37  ;;  %v11240_v6 = vld [vmem:[%s14998_s1 + $0x1ea4] ss:$16 sps:$4 sm:$0xff]   ;;  %v11277_v37 = vld [vmem:[%s14998_s1 + $0x1dc0] ss:$16 sps:$4 sm:$0xff]  }
 0x34e   : > { %7705 = vmatpush1.bf16.msra.mxu1 %v11226_v25  ;;  %v5774_v33 = vpop.f32.mrf.mxu0  ;;  %7665 = vmatprep.subr.bf16.mxu0 %v11231_v48  ;;  %v11280_v25 = vld [vmem:[%s14998_s1 + $0x1fc0] ss:$16 sps:$4 sm:$0xff]   ;;  %v11285_v48 = vld [vmem:[%s14998_s1 + $0x1da4] ss:$16 sps:$4 sm:$0xff]  }
 0x34f   : > { %v5815_v3 = vpop.f32.mrf.mxu1  ;;  %7706 = vmatprep.subr.bf16.mxu1 %v11234_v52  ;;  %v5814_v38 = vadd.f32 %v5813_v40, %v5773_v28  ;;  %v5775_v39 = vadd.f32 %v5774_v33, %v14129_v34  ;;  %7695 = vmatprep.mubr.bf16.mxu0 %v14337_v30  ;;  %v11238_v34 = vld [vmem:[%s14998_s1 + $0x1ea0] ss:$16 sps:$4 sm:$0xff]   ;;  %v11288_v52 = vld [vmem:[%s14998_s1 + $0x1fa4] ss:$16 sps:$4 sm:$0xff]  }
 0x350   : > { %7736 = vmatprep.mubr.bf16.mxu1 %v14339_v54  ;;  %v5776_v42 = vpop.f32.mrf.mxu0  ;;  %v11283_v56 = vld [vmem:[%s14998_s1 + $0x1da0] ss:$16 sps:$4 sm:$0xff]   ;;  %v11291_v28 = vld [vmem:[%s14998_s1 + $0x1d84] ss:$16 sps:$4 sm:$0xff]  }
 0x351   : > { %v5817_v55 = vpop.f32.mrf.mxu1  ;;  %v14360_v57 = vadd.f32 %v5814_v38, %v13494_v47  ;;  %v5816_v36 = vadd.f32 %v5815_v3, %v5775_v39  ;;  %7666 = vmatpush1.bf16.msra.mxu0 %v11229_v61  ;;  %v11243_v47 = vld [vmem:[%s14998_s1 + $0x1c84] ss:$16 sps:$4 sm:$0xff]   ;;  %v11286_v40 = vld [vmem:[%s14998_s1 + $0x1fa0] ss:$16 sps:$4 sm:$0xff]  }
 0x352   : > { %7707 = vmatpush1.bf16.msra.mxu1 %v11232_v32  ;;  %v5777_v0 = vpop.f32.mrf.mxu0  ;;  %7667 = vmatprep.subr.bf16.mxu0 %v11237_v14  ;;  %v11294_v61 = vld [vmem:[%s14998_s1 + $0x1f84] ss:$16 sps:$4 sm:$0xff]   ;;  %v11289_v32 = vld [vmem:[%s14998_s1 + $0x1d80] ss:$16 sps:$4 sm:$0xff]  }
 0x353   : > { %v5818_v63 = vpop.f32.mrf.mxu1  ;;  %7708 = vmatprep.subr.bf16.mxu1 %v11240_v6  ;;  %v14375_v41 = vadd.f32 %v5816_v36, %v13505_v58  ;;  %v11249_v58 = vld [vmem:[%s14998_s1 + $0x1c64] ss:$16 sps:$4 sm:$0xff]   ;;  %v11292_v33 = vld [vmem:[%s14998_s1 + $0x1f80] ss:$16 sps:$4 sm:$0xff]  }
 0x354   : > { %v11297_v3 = vld [vmem:[%s14998_s1 + $0x1d64] ss:$16 sps:$4 sm:$0xff]   ;;  %v11295_v6 = vld [vmem:[%s14998_s1 + $0x1d60] ss:$16 sps:$4 sm:$0xff]  }
 0x355   : > { %7668 = vmatpush1.bf16.msra.mxu0 %v11235_v49  ;;  %v11300_v14 = vld [vmem:[%s14998_s1 + $0x1f64] ss:$16 sps:$4 sm:$0xff]   ;;  %v11298_v38 = vld [vmem:[%s14998_s1 + $0x1f60] ss:$16 sps:$4 sm:$0xff]  }
 0x356   : > { %7709 = vmatpush1.bf16.msra.mxu1 %v11238_v34  ;;  %7669 = vmatprep.subr.bf16.mxu0 %v11243_v47  ;;  %v11303_v39 = vld [vmem:[%s14998_s1 + $0x1d44] ss:$16 sps:$4 sm:$0xff]   ;;  %v11301_v55 = vld [vmem:[%s14998_s1 + $0x1d40] ss:$16 sps:$4 sm:$0xff]  }
 0x357   : > { %7710 = vmatprep.subr.bf16.mxu1 %v11246_v29  ;;  %v11306_v42 = vld [vmem:[%s14998_s1 + $0x1f44] ss:$16 sps:$4 sm:$0xff]   ;;  %v11304_v36 = vld [vmem:[%s14998_s1 + $0x1f40] ss:$16 sps:$4 sm:$0xff]  }
 0x358   : > { %v11309_v49 = vld [vmem:[%s14998_s1 + $0x1d24] ss:$16 sps:$4 sm:$0xff]   ;;  %v11307_v0 = vld [vmem:[%s14998_s1 + $0x1d20] ss:$16 sps:$4 sm:$0xff]  }
 0x359   : > { %7670 = vmatpush1.bf16.msra.mxu0 %v11241_v22  ;;  %v11312_v34 = vld [vmem:[%s14998_s1 + $0x1f24] ss:$16 sps:$4 sm:$0xff]   ;;  %v11310_v63 = vld [vmem:[%s14998_s1 + $0x1f20] ss:$16 sps:$4 sm:$0xff]   ;;  %v9681_v22 = vcombine.low %v14290_v15, %v14297_v18  ;;  %v11324_v15 = vld [vmem:[%s14998_s1 + $0x1aec] ss:$16 sps:$4 sm:$0xff]  }
 0x35a   : > { %7711 = vmatpush1.bf16.msra.mxu1 %v11244_v5  ;;  %7671 = vmatprep.subr.bf16.mxu0 %v11249_v58  ;;  %v11315_v47 = vld [vmem:[%s14998_s1 + $0x1d04] ss:$16 sps:$4 sm:$0xff]   ;;  %v9683_v5 = vcombine.low %v14300_v23, %v14303_v19  ;;  %v11316_v58 = vld [vmem:[%s14998_s1 + $0x1f00] ss:$16 sps:$4 sm:$0xff]   ;;  %v11319_v19 = vld [vmem:[%s14998_s1 + $0x18e8] ss:$16 sps:$4 sm:$0xff]  }
 0x35b   : > { %7712 = vmatprep.subr.bf16.mxu1 %v11252_v51  ;;  %v11318_v29 = vld [vmem:[%s14998_s1 + $0x1f04] ss:$16 sps:$4 sm:$0xff]   ;;  %v11321_v51 = vld [vmem:[%s14998_s1 + $0x18ec] ss:$16 sps:$4 sm:$0xff]   ;;  %v14540_v18 = vrot.slane %v9681_v22, 2 }
 0x35c   : > { %v14542_v23 = vrot.slane %v9683_v5, 2  ;;  %v11381_v22 = vld [vmem:[%s14998_s1 + $0x19ac] ss:$16 sps:$4 sm:$0xff]  }
 0x35d   : > { %7672 = vmatpush1.bf16.msra.mxu0 %v11247_v62  ;;  %v11327_v62 = vld [vmem:[%s14998_s1 + $0x18cc] ss:$16 sps:$4 sm:$0xff]  }
 0x35e   : > { %7713 = vmatpush1.bf16.msra.mxu1 %v11250_v31  ;;  %7673 = vmatprep.subr.bf16.mxu0 %v11255_v7  ;;  %v11330_v31 = vld [vmem:[%s14998_s1 + $0x1acc] ss:$16 sps:$4 sm:$0xff]  }
 0x35f   : > { %7714 = vmatprep.subr.bf16.mxu1 %v11258_v26  ;;  %v11384_v5 = vld [vmem:[%s14998_s1 + $0x1bac] ss:$16 sps:$4 sm:$0xff]  }
 0x361   : > { %7674 = vmatpush1.bf16.msra.mxu0 %v11253_v27 }
 0x362   : > { %7715 = vmatpush1.bf16.msra.mxu1 %v11256_v9  ;;  %7675 = vmatprep.subr.bf16.mxu0 %v11261_v1  ;;  %v11325_v9 = vld [vmem:[%s14998_s1 + $0x18c8] ss:$16 sps:$4 sm:$0xff]  }
 0x363   : > { %7716 = vmatprep.subr.bf16.mxu1 %v11264_v10  ;;  %v11328_v1 = vld [vmem:[%s14998_s1 + $0x1ac8] ss:$16 sps:$4 sm:$0xff]  }
 0x365   : > { %7676 = vmatpush1.bf16.msra.mxu0 %v11259_v35 }
 0x366   : > { %7717 = vmatpush1.bf16.msra.mxu1 %v11262_v59  ;;  %7677 = vmatprep.subr.bf16.mxu0 %v11267_v13  ;;  %v11333_v59 = vld [vmem:[%s14998_s1 + $0x18ac] ss:$16 sps:$4 sm:$0xff]  }
 0x367   : > { %7718 = vmatprep.subr.bf16.mxu1 %v11270_v4  ;;  %v11336_v13 = vld [vmem:[%s14998_s1 + $0x1aac] ss:$16 sps:$4 sm:$0xff]  }
 0x369   : > { %7678 = vmatpush1.bf16.msra.mxu0 %v11265_v16 }
 0x36a   : > { %7719 = vmatpush1.bf16.msra.mxu1 %v11268_v17  ;;  %7679 = vmatprep.subr.bf16.mxu0 %v11273_v20  ;;  %v11331_v20 = vld [vmem:[%s14998_s1 + $0x18a8] ss:$16 sps:$4 sm:$0xff]  }
 0x36b   : > { %7720 = vmatprep.subr.bf16.mxu1 %v11276_v8  ;;  %v11334_v8 = vld [vmem:[%s14998_s1 + $0x1aa8] ss:$16 sps:$4 sm:$0xff]  }
 0x36d   : > { %7680 = vmatpush2.bf16.msra.mxu0 %v11271_v2 }
 0x36e   : > { %7721 = vmatpush2.bf16.msra.mxu1 %v11274_v43  ;;  %7681 = vmatprep.subr.bf16.mxu0 %v11279_v44  ;;  %v11337_v44 = vld [vmem:[%s14998_s1 + $0x1888] ss:$16 sps:$4 sm:$0xff]  }
 0x36f   : > { %7722 = vmatprep.subr.bf16.mxu1 %v11282_v45  ;;  %v11340_v45 = vld [vmem:[%s14998_s1 + $0x1a88] ss:$16 sps:$4 sm:$0xff]  }
 0x371   : > { %7682 = vmatpush2.bf16.msra.mxu0 %v11277_v37  ;;  %v11345_v37 = vld [vmem:[%s14998_s1 + $0x186c] ss:$16 sps:$4 sm:$0xff]  }
 0x372   : > { %7723 = vmatpush2.bf16.msra.mxu1 %v11280_v25  ;;  %7683 = vmatprep.subr.bf16.mxu0 %v11285_v48  ;;  %v11348_v25 = vld [vmem:[%s14998_s1 + $0x1a6c] ss:$16 sps:$4 sm:$0xff]   ;;  %v11343_v48 = vld [vmem:[%s14998_s1 + $0x1868] ss:$16 sps:$4 sm:$0xff]  }
 0x373   : > { %7724 = vmatprep.subr.bf16.mxu1 %v11288_v52  ;;  %v11346_v52 = vld [vmem:[%s14998_s1 + $0x1a68] ss:$16 sps:$4 sm:$0xff]  }
 0x375   : > { %7684 = vmatpush2.bf16.msra.mxu0 %v11283_v56  ;;  %v11351_v56 = vld [vmem:[%s14998_s1 + $0x184c] ss:$16 sps:$4 sm:$0xff]  }
 0x376   : > { %7725 = vmatpush2.bf16.msra.mxu1 %v11286_v40  ;;  %7685 = vmatprep.subr.bf16.mxu0 %v11291_v28  ;;  %v11354_v40 = vld [vmem:[%s14998_s1 + $0x1a4c] ss:$16 sps:$4 sm:$0xff]   ;;  %v11349_v28 = vld [vmem:[%s14998_s1 + $0x1848] ss:$16 sps:$4 sm:$0xff]  }
 0x377   : > { %7726 = vmatprep.subr.bf16.mxu1 %v11294_v61  ;;  %v11352_v61 = vld [vmem:[%s14998_s1 + $0x1a48] ss:$16 sps:$4 sm:$0xff]  }
 0x379   : > { %7686 = vmatpush2.bf16.msra.mxu0 %v11289_v32  ;;  %v11357_v32 = vld [vmem:[%s14998_s1 + $0x182c] ss:$16 sps:$4 sm:$0xff]  }
 0x37a   : > { %7727 = vmatpush2.bf16.msra.mxu1 %v11292_v33  ;;  %7687 = vmatprep.subr.bf16.mxu0 %v11297_v3  ;;  %v11360_v33 = vld [vmem:[%s14998_s1 + $0x1a2c] ss:$16 sps:$4 sm:$0xff]   ;;  %v11355_v3 = vld [vmem:[%s14998_s1 + $0x1828] ss:$16 sps:$4 sm:$0xff]  }
 0x37b   : > { %7728 = vmatprep.subr.bf16.mxu1 %v11300_v14  ;;  %v11358_v14 = vld [vmem:[%s14998_s1 + $0x1a28] ss:$16 sps:$4 sm:$0xff]  }
 0x37d   : > { %7688 = vmatpush2.bf16.msra.mxu0 %v11295_v6  ;;  %v11363_v6 = vld [vmem:[%s14998_s1 + $0x180c] ss:$16 sps:$4 sm:$0xff]  }
 0x37e   : > { %7729 = vmatpush2.bf16.msra.mxu1 %v11298_v38  ;;  %7689 = vmatprep.subr.bf16.mxu0 %v11303_v39  ;;  %v11366_v38 = vld [vmem:[%s14998_s1 + $0x1a0c] ss:$16 sps:$4 sm:$0xff]   ;;  %v11361_v39 = vld [vmem:[%s14998_s1 + $0x1808] ss:$16 sps:$4 sm:$0xff]  }
 0x37f   : > { %7730 = vmatprep.subr.bf16.mxu1 %v11306_v42  ;;  %v11364_v42 = vld [vmem:[%s14998_s1 + $0x1a08] ss:$16 sps:$4 sm:$0xff]  }
 0x381   : > { %7690 = vmatpush2.bf16.msra.mxu0 %v11301_v55  ;;  %v11369_v55 = vld [vmem:[%s14998_s1 + $0x19ec] ss:$16 sps:$4 sm:$0xff]  }
 0x382   : > { %7731 = vmatpush2.bf16.msra.mxu1 %v11304_v36  ;;  %7691 = vmatprep.subr.bf16.mxu0 %v11309_v49  ;;  %v11372_v36 = vld [vmem:[%s14998_s1 + $0x1bec] ss:$16 sps:$4 sm:$0xff]   ;;  %v11367_v49 = vld [vmem:[%s14998_s1 + $0x19e8] ss:$16 sps:$4 sm:$0xff]  }
 0x383   : > { %7732 = vmatprep.subr.bf16.mxu1 %v11312_v34  ;;  %v11370_v34 = vld [vmem:[%s14998_s1 + $0x1be8] ss:$16 sps:$4 sm:$0xff]  }
 0x385   : > { %7692 = vmatpush2.bf16.msra.mxu0 %v11307_v0  ;;  %v11375_v0 = vld [vmem:[%s14998_s1 + $0x19cc] ss:$16 sps:$4 sm:$0xff]  }
 0x386   : > { %7733 = vmatpush2.bf16.msra.mxu1 %v11310_v63  ;;  %7693 = vmatprep.subr.bf16.mxu0 %v11315_v47  ;;  %v11378_v63 = vld [vmem:[%s14998_s1 + $0x1bcc] ss:$16 sps:$4 sm:$0xff]   ;;  %v11373_v47 = vld [vmem:[%s14998_s1 + $0x19c8] ss:$16 sps:$4 sm:$0xff]  }
 0x387   : > { %7734 = vmatprep.subr.bf16.mxu1 %v11318_v29  ;;  %v11376_v29 = vld [vmem:[%s14998_s1 + $0x1bc8] ss:$16 sps:$4 sm:$0xff]  }
 0x389   : > { %7694 = vmatpush2.bf16.msra.mxu0 %v11313_v50  ;;  %v11379_v50 = vld [vmem:[%s14998_s1 + $0x19a8] ss:$16 sps:$4 sm:$0xff]  }
 0x38a   : > { %7735 = vmatpush2.bf16.msra.mxu1 %v11316_v58  ;;  %7745 = vmatprep.subr.bf16.mxu0 %v11321_v51  ;;  %v11382_v58 = vld [vmem:[%s14998_s1 + $0x1ba8] ss:$16 sps:$4 sm:$0xff]   ;;  %v11387_v51 = vld [vmem:[%s14998_s1 + $0x198c] ss:$16 sps:$4 sm:$0xff]  }
 0x38b   : > { %7786 = vmatprep.subr.bf16.mxu1 %v11324_v15  ;;  %v11390_v15 = vld [vmem:[%s14998_s1 + $0x1b8c] ss:$16 sps:$4 sm:$0xff]  }
 0x38c   : > { %v5854_v7 = vpop.f32.mrf.mxu0  ;;  %7696 = vmatmul.mubr.bf16.vlgmr.msra.gmra.mxu0 %v14540_v18 }
 0x38d   : > { %v5895_v26 = vpop.f32.mrf.mxu1  ;;  %7737 = vmatmul.mubr.bf16.vlgmr.msra.gmra.mxu1 %v14542_v23  ;;  %7746 = vmatpush1.bf16.msra.mxu0 %v11319_v19  ;;  %v11385_v19 = vld [vmem:[%s14998_s1 + $0x1988] ss:$16 sps:$4 sm:$0xff]  }
 0x38e   : > { %v14558_v27 = vadd.f32 %v5895_v26, %v5854_v7  ;;  %7787 = vmatpush1.bf16.msra.mxu1 %v11322_v53  ;;  %v5856_v10 = vpop.f32.mrf.mxu0  ;;  %7747 = vmatprep.subr.bf16.mxu0 %v11327_v62  ;;  %v11388_v53 = vld [vmem:[%s14998_s1 + $0x1b88] ss:$16 sps:$4 sm:$0xff]   ;;  %v11393_v62 = vld [vmem:[%s14998_s1 + $0x196c] ss:$16 sps:$4 sm:$0xff]  }
 0x38f   : > { %v5897_v35 = vpop.f32.mrf.mxu1  ;;  %7788 = vmatprep.subr.bf16.mxu1 %v11330_v31  ;;  %7777 = vmatprep.mubr.bf16.mxu0 %v14109_v60  ;;  %v11339_v60 = vld [vmem:[%s14998_s1 + $0x188c] ss:$16 sps:$4 sm:$0xff]   ;;  %v11391_v7 = vld [vmem:[%s14998_s1 + $0x1968] ss:$16 sps:$4 sm:$0xff]  }
 0x390   : > { %v14572_v4 = vadd.f32 %v5897_v35, %v5856_v10  ;;  %7818 = vmatprep.mubr.bf16.mxu1 %v14111_v12  ;;  %v5858_v16 = vpop.f32.mrf.mxu0  ;;  %v11342_v12 = vld [vmem:[%s14998_s1 + $0x1a8c] ss:$16 sps:$4 sm:$0xff]   ;;  %v11394_v26 = vld [vmem:[%s14998_s1 + $0x1b68] ss:$16 sps:$4 sm:$0xff]  }
 0x391   : > { %v5899_v17 = vpop.f32.mrf.mxu1  ;;  %7748 = vmatpush1.bf16.msra.mxu0 %v11325_v9  ;;  %v11396_v31 = vld [vmem:[%s14998_s1 + $0x1b6c] ss:$16 sps:$4 sm:$0xff]   ;;  %v11397_v10 = vld [vmem:[%s14998_s1 + $0x1948] ss:$16 sps:$4 sm:$0xff]  }
 0x392   : > { %7789 = vmatpush1.bf16.msra.mxu1 %v11328_v1  ;;  %v5859_v2 = vpop.f32.mrf.mxu0  ;;  %7749 = vmatprep.subr.bf16.mxu0 %v11333_v59  ;;  %v11399_v9 = vld [vmem:[%s14998_s1 + $0x194c] ss:$16 sps:$4 sm:$0xff]   ;;  %v11400_v35 = vld [vmem:[%s14998_s1 + $0x1b48] ss:$16 sps:$4 sm:$0xff]  }
 0x393   : > { %v5900_v43 = vpop.f32.mrf.mxu1  ;;  %7790 = vmatprep.subr.bf16.mxu1 %v11336_v13  ;;  %v11402_v1 = vld [vmem:[%s14998_s1 + $0x1b4c] ss:$16 sps:$4 sm:$0xff]   ;;  %v11403_v16 = vld [vmem:[%s14998_s1 + $0x1928] ss:$16 sps:$4 sm:$0xff]  }
 0x394   : > { %v11405_v59 = vld [vmem:[%s14998_s1 + $0x192c] ss:$16 sps:$4 sm:$0xff]   ;;  %v11406_v17 = vld [vmem:[%s14998_s1 + $0x1b28] ss:$16 sps:$4 sm:$0xff]  }
 0x395   : > { %7750 = vmatpush1.bf16.msra.mxu0 %v11331_v20  ;;  %v11408_v13 = vld [vmem:[%s14998_s1 + $0x1b2c] ss:$16 sps:$4 sm:$0xff]   ;;  %v11409_v2 = vld [vmem:[%s14998_s1 + $0x1908] ss:$16 sps:$4 sm:$0xff]  }
 0x396   : > { %7791 = vmatpush1.bf16.msra.mxu1 %v11334_v8  ;;  %7751 = vmatprep.subr.bf16.mxu0 %v11339_v60  ;;  %v11411_v20 = vld [vmem:[%s14998_s1 + $0x190c] ss:$16 sps:$4 sm:$0xff]   ;;  %v11412_v43 = vld [vmem:[%s14998_s1 + $0x1b08] ss:$16 sps:$4 sm:$0xff]  }
 0x397   : > { %7792 = vmatprep.subr.bf16.mxu1 %v11342_v12  ;;  %v11414_v8 = vld [vmem:[%s14998_s1 + $0x1b0c] ss:$16 sps:$4 sm:$0xff]  }
 0x398   : > { %v11417_v60 = vld [vmem:[%s14998_s1 + $0x1cec] ss:$16 sps:$4 sm:$0xff]  }
 0x399   : > { %7752 = vmatpush1.bf16.msra.mxu0 %v11337_v44  ;;  %v11420_v12 = vld [vmem:[%s14998_s1 + $0x1eec] ss:$16 sps:$4 sm:$0xff]   ;;  %v11415_v44 = vld [vmem:[%s14998_s1 + $0x1ce8] ss:$16 sps:$4 sm:$0xff]  }
 0x39a   : > { %7793 = vmatpush1.bf16.msra.mxu1 %v11340_v45  ;;  %7753 = vmatprep.subr.bf16.mxu0 %v11345_v37  ;;  %v11418_v45 = vld [vmem:[%s14998_s1 + $0x1ee8] ss:$16 sps:$4 sm:$0xff]   ;;  %v11423_v37 = vld [vmem:[%s14998_s1 + $0x1ccc] ss:$16 sps:$4 sm:$0xff]  }
 0x39b   : > { %7794 = vmatprep.subr.bf16.mxu1 %v11348_v25  ;;  %v11426_v25 = vld [vmem:[%s14998_s1 + $0x1ecc] ss:$16 sps:$4 sm:$0xff]  }
 0x39d   : > { %7754 = vmatpush1.bf16.msra.mxu0 %v11343_v48 }
 0x39e   : > { %7795 = vmatpush1.bf16.msra.mxu1 %v11346_v52  ;;  %7755 = vmatprep.subr.bf16.mxu0 %v11351_v56 }
 0x39f   : > { %7796 = vmatprep.subr.bf16.mxu1 %v11354_v40  ;;  %v11421_v40 = vld [vmem:[%s14998_s1 + $0x1cc8] ss:$16 sps:$4 sm:$0xff]  }
 0x3a1   : > { %7756 = vmatpush1.bf16.msra.mxu0 %v11349_v28  ;;  %v11424_v28 = vld [vmem:[%s14998_s1 + $0x1ec8] ss:$16 sps:$4 sm:$0xff]  }
 0x3a2   : > { %7797 = vmatpush1.bf16.msra.mxu1 %v11352_v61  ;;  %7757 = vmatprep.subr.bf16.mxu0 %v11357_v32 }
 0x3a3   : > { %7798 = vmatprep.subr.bf16.mxu1 %v11360_v33 }
 0x3a5   : > { %7758 = vmatpush1.bf16.msra.mxu0 %v11355_v3 }
 0x3a6   : > { %7799 = vmatpush1.bf16.msra.mxu1 %v11358_v14  ;;  %7759 = vmatprep.subr.bf16.mxu0 %v11363_v6 }
 0x3a7   : > { %7800 = vmatprep.subr.bf16.mxu1 %v11366_v38 }
 0x3a9   : > { %7760 = vmatpush1.bf16.msra.mxu0 %v11361_v39  ;;  %v11427_v39 = vld [vmem:[%s14998_s1 + $0x1ca8] ss:$16 sps:$4 sm:$0xff]  }
 0x3aa   : > { %7801 = vmatpush1.bf16.msra.mxu1 %v11364_v42  ;;  %7761 = vmatprep.subr.bf16.mxu0 %v11369_v55 }
 0x3ab   : > { %7802 = vmatprep.subr.bf16.mxu1 %v11372_v36  ;;  %v11433_v36 = vld [vmem:[%s14998_s1 + $0x1c88] ss:$16 sps:$4 sm:$0xff]  }
 0x3ad   : > { %7762 = vmatpush2.bf16.msra.mxu0 %v11367_v49  ;;  %v11436_v49 = vld [vmem:[%s14998_s1 + $0x1e88] ss:$16 sps:$4 sm:$0xff]  }
 0x3ae   : > { %7803 = vmatpush2.bf16.msra.mxu1 %v11370_v34  ;;  %7763 = vmatprep.subr.bf16.mxu0 %v11375_v0  ;;  %v11441_v34 = vld [vmem:[%s14998_s1 + $0x1c6c] ss:$16 sps:$4 sm:$0xff]   ;;  %v11439_v0 = vld [vmem:[%s14998_s1 + $0x1c68] ss:$16 sps:$4 sm:$0xff]  }
 0x3af   : > { %7804 = vmatprep.subr.bf16.mxu1 %v11378_v63  ;;  %v11442_v63 = vld [vmem:[%s14998_s1 + $0x1e68] ss:$16 sps:$4 sm:$0xff]  }
 0x3b1   : > { %7764 = vmatpush2.bf16.msra.mxu0 %v11373_v47  ;;  %v11447_v47 = vld [vmem:[%s14998_s1 + $0x1c4c] ss:$16 sps:$4 sm:$0xff]  }
 0x3b2   : > { %7805 = vmatpush2.bf16.msra.mxu1 %v11376_v29  ;;  %7765 = vmatprep.subr.bf16.mxu0 %v11381_v22  ;;  %v11450_v29 = vld [vmem:[%s14998_s1 + $0x1e4c] ss:$16 sps:$4 sm:$0xff]   ;;  %v11445_v22 = vld [vmem:[%s14998_s1 + $0x1c48] ss:$16 sps:$4 sm:$0xff]  }
 0x3b3   : > { %7806 = vmatprep.subr.bf16.mxu1 %v11384_v5  ;;  %v11448_v5 = vld [vmem:[%s14998_s1 + $0x1e48] ss:$16 sps:$4 sm:$0xff]  }
 0x3b5   : > { %7766 = vmatpush2.bf16.msra.mxu0 %v11379_v50  ;;  %v11453_v50 = vld [vmem:[%s14998_s1 + $0x1c2c] ss:$16 sps:$4 sm:$0xff]  }
 0x3b6   : > { %7807 = vmatpush2.bf16.msra.mxu1 %v11382_v58  ;;  %7767 = vmatprep.subr.bf16.mxu0 %v11387_v51  ;;  %v11456_v58 = vld [vmem:[%s14998_s1 + $0x1e2c] ss:$16 sps:$4 sm:$0xff]   ;;  %v11451_v51 = vld [vmem:[%s14998_s1 + $0x1c28] ss:$16 sps:$4 sm:$0xff]  }
 0x3b7   : > { %7808 = vmatprep.subr.bf16.mxu1 %v11390_v15  ;;  %v11454_v15 = vld [vmem:[%s14998_s1 + $0x1e28] ss:$16 sps:$4 sm:$0xff]  }
 0x3b9   : > { %7768 = vmatpush2.bf16.msra.mxu0 %v11385_v19  ;;  %v11459_v19 = vld [vmem:[%s14998_s1 + $0x1c0c] ss:$16 sps:$4 sm:$0xff]  }
 0x3ba   : > { %7809 = vmatpush2.bf16.msra.mxu1 %v11388_v53  ;;  %7769 = vmatprep.subr.bf16.mxu0 %v11393_v62  ;;  %v11462_v53 = vld [vmem:[%s14998_s1 + $0x1e0c] ss:$16 sps:$4 sm:$0xff]   ;;  %v11457_v62 = vld [vmem:[%s14998_s1 + $0x1c08] ss:$16 sps:$4 sm:$0xff]  }
 0x3bb   : > { %7810 = vmatprep.subr.bf16.mxu1 %v11396_v31  ;;  %v11460_v31 = vld [vmem:[%s14998_s1 + $0x1e08] ss:$16 sps:$4 sm:$0xff]  }
 0x3bd   : > { %7770 = vmatpush2.bf16.msra.mxu0 %v11391_v7  ;;  %v11465_v7 = vld [vmem:[%s14998_s1 + $0x1dec] ss:$16 sps:$4 sm:$0xff]  }
 0x3be   : > { %7811 = vmatpush2.bf16.msra.mxu1 %v11394_v26  ;;  %7771 = vmatprep.subr.bf16.mxu0 %v11399_v9  ;;  %v11468_v26 = vld [vmem:[%s14998_s1 + $0x1fec] ss:$16 sps:$4 sm:$0xff]   ;;  %v11463_v9 = vld [vmem:[%s14998_s1 + $0x1de8] ss:$16 sps:$4 sm:$0xff]  }
 0x3bf   : > { %7812 = vmatprep.subr.bf16.mxu1 %v11402_v1  ;;  %v11466_v1 = vld [vmem:[%s14998_s1 + $0x1fe8] ss:$16 sps:$4 sm:$0xff]  }
 0x3c1   : > { %7772 = vmatpush2.bf16.msra.mxu0 %v11397_v10  ;;  %v11471_v10 = vld [vmem:[%s14998_s1 + $0x1dcc] ss:$16 sps:$4 sm:$0xff]  }
 0x3c2   : > { %7813 = vmatpush2.bf16.msra.mxu1 %v11400_v35  ;;  %7773 = vmatprep.subr.bf16.mxu0 %v11405_v59  ;;  %v11474_v35 = vld [vmem:[%s14998_s1 + $0x1fcc] ss:$16 sps:$4 sm:$0xff]   ;;  %v11469_v59 = vld [vmem:[%s14998_s1 + $0x1dc8] ss:$16 sps:$4 sm:$0xff]  }
 0x3c3   : > { %7814 = vmatprep.subr.bf16.mxu1 %v11408_v13  ;;  %v11472_v13 = vld [vmem:[%s14998_s1 + $0x1fc8] ss:$16 sps:$4 sm:$0xff]  }
 0x3c5   : > { %7774 = vmatpush2.bf16.msra.mxu0 %v11403_v16  ;;  %v11477_v16 = vld [vmem:[%s14998_s1 + $0x1dac] ss:$16 sps:$4 sm:$0xff]  }
 0x3c6   : > { %7815 = vmatpush2.bf16.msra.mxu1 %v11406_v17  ;;  %7775 = vmatprep.subr.bf16.mxu0 %v11411_v20  ;;  %v11480_v17 = vld [vmem:[%s14998_s1 + $0x1fac] ss:$16 sps:$4 sm:$0xff]   ;;  %v11475_v20 = vld [vmem:[%s14998_s1 + $0x1da8] ss:$16 sps:$4 sm:$0xff]  }
 0x3c7   : > { %7816 = vmatprep.subr.bf16.mxu1 %v11414_v8  ;;  %v11478_v8 = vld [vmem:[%s14998_s1 + $0x1fa8] ss:$16 sps:$4 sm:$0xff]  }
 0x3c9   : > { %7776 = vmatpush2.bf16.msra.mxu0 %v11409_v2  ;;  %v11483_v2 = vld [vmem:[%s14998_s1 + $0x1d8c] ss:$16 sps:$4 sm:$0xff]  }
 0x3ca   : > { %7817 = vmatpush2.bf16.msra.mxu1 %v11412_v43  ;;  %7827 = vmatprep.subr.bf16.mxu0 %v11417_v60  ;;  %v11486_v43 = vld [vmem:[%s14998_s1 + $0x1f8c] ss:$16 sps:$4 sm:$0xff]   ;;  %v11481_v60 = vld [vmem:[%s14998_s1 + $0x1d88] ss:$16 sps:$4 sm:$0xff]  }
 0x3cb   : > { %7868 = vmatprep.subr.bf16.mxu1 %v11420_v12  ;;  %v11484_v12 = vld [vmem:[%s14998_s1 + $0x1f88] ss:$16 sps:$4 sm:$0xff]  }
 0x3cc   : > { %v5936_v48 = vpop.f32.mrf.mxu0  ;;  %7778 = vmatmul.mubr.bf16.vlgmr.msra.gmra.mxu0 %v14321_v11  ;;  %v11429_v11 = vld [vmem:[%s14998_s1 + $0x1cac] ss:$16 sps:$4 sm:$0xff]  }
 0x3cd   : > { %v5977_v52 = vpop.f32.mrf.mxu1  ;;  %7819 = vmatmul.mubr.bf16.vlgmr.msra.gmra.mxu1 %v14323_v21  ;;  %v5937_v56 = vadd.f32 %v5936_v48, %v14558_v27  ;;  %7828 = vmatpush1.bf16.msra.mxu0 %v11415_v44  ;;  %v11432_v21 = vld [vmem:[%s14998_s1 + $0x1eac] ss:$16 sps:$4 sm:$0xff]  }
 0x3ce   : > { %7869 = vmatpush1.bf16.msra.mxu1 %v11418_v45  ;;  %v5938_v61 = vpop.f32.mrf.mxu0  ;;  %7829 = vmatprep.subr.bf16.mxu0 %v11423_v37  ;;  %v11489_v44 = vld [vmem:[%s14998_s1 + $0x1d6c] ss:$16 sps:$4 sm:$0xff]   ;;  %v11487_v37 = vld [vmem:[%s14998_s1 + $0x1d68] ss:$16 sps:$4 sm:$0xff]  }
 0x3cf   : > { %v5979_v32 = vpop.f32.mrf.mxu1  ;;  %7870 = vmatprep.subr.bf16.mxu1 %v11426_v25  ;;  %v5978_v27 = vadd.f32 %v5977_v52, %v5937_v56  ;;  %v5939_v33 = vadd.f32 %v5938_v61, %v14572_v4  ;;  %7859 = vmatprep.mubr.bf16.mxu0 %v14337_v30  ;;  %v11430_v4 = vld [vmem:[%s14998_s1 + $0x1ea8] ss:$16 sps:$4 sm:$0xff]   ;;  %v11492_v45 = vld [vmem:[%s14998_s1 + $0x1f6c] ss:$16 sps:$4 sm:$0xff]  }
 0x3d0   : > { %7900 = vmatprep.mubr.bf16.mxu1 %v14339_v54  ;;  %v5940_v3 = vpop.f32.mrf.mxu0  ;;  %v11438_v54 = vld [vmem:[%s14998_s1 + $0x1e8c] ss:$16 sps:$4 sm:$0xff]   ;;  %v11490_v25 = vld [vmem:[%s14998_s1 + $0x1f68] ss:$16 sps:$4 sm:$0xff]  }
 0x3d1   : > { %v5981_v14 = vpop.f32.mrf.mxu1  ;;  %v14775_v6 = vadd.f32 %v5978_v27, %v13906_v24  ;;  %v5980_v38 = vadd.f32 %v5979_v32, %v5939_v33  ;;  %7830 = vmatpush1.bf16.msra.mxu0 %v11421_v40  ;;  %v11435_v24 = vld [vmem:[%s14998_s1 + $0x1c8c] ss:$16 sps:$4 sm:$0xff]   ;;  %v11493_v56 = vld [vmem:[%s14998_s1 + $0x1d48] ss:$16 sps:$4 sm:$0xff]  }
 0x3d2   : > { %7871 = vmatpush1.bf16.msra.mxu1 %v11424_v28  ;;  %v5941_v42 = vpop.f32.mrf.mxu0  ;;  %7831 = vmatprep.subr.bf16.mxu0 %v11429_v11  ;;  %v11495_v48 = vld [vmem:[%s14998_s1 + $0x1d4c] ss:$16 sps:$4 sm:$0xff]   ;;  %v11496_v40 = vld [vmem:[%s14998_s1 + $0x1f48] ss:$16 sps:$4 sm:$0xff]  }
 0x3d3   : > { %v5982_v30 = vpop.f32.mrf.mxu1  ;;  %7872 = vmatprep.subr.bf16.mxu1 %v11432_v21  ;;  %v14790_v55 = vadd.f32 %v5980_v38, %v13911_v46  ;;  %v11444_v46 = vld [vmem:[%s14998_s1 + $0x1e6c] ss:$16 sps:$4 sm:$0xff]   ;;  %v11499_v32 = vld [vmem:[%s14998_s1 + $0x1d28] ss:$16 sps:$4 sm:$0xff]  }
 0x3d4   : > { %v11498_v52 = vld [vmem:[%s14998_s1 + $0x1f4c] ss:$16 sps:$4 sm:$0xff]   ;;  %v11502_v11 = vld [vmem:[%s14998_s1 + $0x1f28] ss:$16 sps:$4 sm:$0xff]  }
 0x3d5   : > { %7832 = vmatpush1.bf16.msra.mxu0 %v11427_v39  ;;  %v11501_v28 = vld [vmem:[%s14998_s1 + $0x1d2c] ss:$16 sps:$4 sm:$0xff]   ;;  %v11505_v33 = vld [vmem:[%s14998_s1 + $0x1d08] ss:$16 sps:$4 sm:$0xff]  }
 0x3d6   : > { %7873 = vmatpush1.bf16.msra.mxu1 %v11430_v4  ;;  %7833 = vmatprep.subr.bf16.mxu0 %v11435_v24  ;;  %v11504_v61 = vld [vmem:[%s14998_s1 + $0x1f2c] ss:$16 sps:$4 sm:$0xff]   ;;  %v11508_v3 = vld [vmem:[%s14998_s1 + $0x1f08] ss:$16 sps:$4 sm:$0xff]  }
 0x3d7   : > { %7874 = vmatprep.subr.bf16.mxu1 %v11438_v54  ;;  %v11507_v21 = vld [vmem:[%s14998_s1 + $0x1d0c] ss:$16 sps:$4 sm:$0xff]  }
 0x3d8   : > { %v11510_v27 = vld [vmem:[%s14998_s1 + $0x1f0c] ss:$16 sps:$4 sm:$0xff]  }
 0x3d9   : > { %7834 = vmatpush1.bf16.msra.mxu0 %v11433_v36 }
 0x3da   : > { %7875 = vmatpush1.bf16.msra.mxu1 %v11436_v49  ;;  %7835 = vmatprep.subr.bf16.mxu0 %v11441_v34 }
 0x3db   : > { %7876 = vmatprep.subr.bf16.mxu1 %v11444_v46 }
 0x3dd   : > { %7836 = vmatpush1.bf16.msra.mxu0 %v11439_v0 }
 0x3de   : > { %7877 = vmatpush1.bf16.msra.mxu1 %v11442_v63  ;;  %7837 = vmatprep.subr.bf16.mxu0 %v11447_v47 }
 0x3df   : > { %7878 = vmatprep.subr.bf16.mxu1 %v11450_v29 }
 0x3e1   : > { %7838 = vmatpush1.bf16.msra.mxu0 %v11445_v22 }
 0x3e2   : > { %7879 = vmatpush1.bf16.msra.mxu1 %v11448_v5  ;;  %7839 = vmatprep.subr.bf16.mxu0 %v11453_v50  ;;  %v14944_v5 = vpop.permute.xlu0 %7916 }
 0x3e3   : > { %7880 = vmatprep.subr.bf16.mxu1 %v11456_v58 }
 0x3e5   : > { %7840 = vmatpush1.bf16.msra.mxu0 %v11451_v51 }
 0x3e6   : > { %7881 = vmatpush1.bf16.msra.mxu1 %v11454_v15  ;;  %7841 = vmatprep.subr.bf16.mxu0 %v11459_v19 }
 0x3e7   : > { %7882 = vmatprep.subr.bf16.mxu1 %v11462_v53 }
 0x3e9   : > { %7842 = vmatpush1.bf16.msra.mxu0 %v11457_v62 }
 0x3ea   : > { %7883 = vmatpush1.bf16.msra.mxu1 %v11460_v31  ;;  %7843 = vmatprep.subr.bf16.mxu0 %v11465_v7 }
 0x3eb   : > { %7884 = vmatprep.subr.bf16.mxu1 %v11468_v26 }
 0x3ed   : > { %7844 = vmatpush2.bf16.msra.mxu0 %v11463_v9 }
 0x3ee   : > { %7885 = vmatpush2.bf16.msra.mxu1 %v11466_v1  ;;  %7845 = vmatprep.subr.bf16.mxu0 %v11471_v10 }
 0x3ef   : > { %7886 = vmatprep.subr.bf16.mxu1 %v11474_v35 }
 0x3f1   : > { %7846 = vmatpush2.bf16.msra.mxu0 %v11469_v59 }
 0x3f2   : > { %7887 = vmatpush2.bf16.msra.mxu1 %v11472_v13  ;;  %7847 = vmatprep.subr.bf16.mxu0 %v11477_v16 }
 0x3f3   : > { %7888 = vmatprep.subr.bf16.mxu1 %v11480_v17 }
 0x3f5   : > { %7848 = vmatpush2.bf16.msra.mxu0 %v11475_v20 }
 0x3f6   : > { %7889 = vmatpush2.bf16.msra.mxu1 %v11478_v8  ;;  %7849 = vmatprep.subr.bf16.mxu0 %v11483_v2 }
 0x3f7   : > { %7890 = vmatprep.subr.bf16.mxu1 %v11486_v43 }
 0x3f9   : > { %7850 = vmatpush2.bf16.msra.mxu0 %v11481_v60 }
 0x3fa   : > { %7891 = vmatpush2.bf16.msra.mxu1 %v11484_v12  ;;  %7851 = vmatprep.subr.bf16.mxu0 %v11489_v44 }
 0x3fb   : > { %7892 = vmatprep.subr.bf16.mxu1 %v11492_v45 }
 0x3fd   : > { %7852 = vmatpush2.bf16.msra.mxu0 %v11487_v37 }
 0x3fe   : > { %7893 = vmatpush2.bf16.msra.mxu1 %v11490_v25  ;;  %7853 = vmatprep.subr.bf16.mxu0 %v11495_v48 }
 0x3ff   : > { %7894 = vmatprep.subr.bf16.mxu1 %v11498_v52 }
 0x401   : > { %7854 = vmatpush2.bf16.msra.mxu0 %v11493_v56 }
 0x402   : > { %7895 = vmatpush2.bf16.msra.mxu1 %v11496_v40  ;;  %7855 = vmatprep.subr.bf16.mxu0 %v11501_v28 }
 0x403   : > { %7896 = vmatprep.subr.bf16.mxu1 %v11504_v61 }
 0x405   : > { %7856 = vmatpush2.bf16.msra.mxu0 %v11499_v32 }
 0x406   : > { %7897 = vmatpush2.bf16.msra.mxu1 %v11502_v11  ;;  %7857 = vmatprep.subr.bf16.mxu0 %v11507_v21 }
 0x407   : > { %7898 = vmatprep.subr.bf16.mxu1 %v11510_v27 }
 0x409   : > { %7858 = vmatpush2.bf16.msra.mxu0 %v11505_v33 }
 0x40a   : > { %7899 = vmatpush2.bf16.msra.mxu1 %v11508_v3 }
 0x40c   : > { %v7615_v14 = vpop.f32.mrf.mxu0  ;;  %7860 = vmatmul.mubr.bf16.vlgmr.msra.gmra.mxu0 %v14540_v18 }
 0x40d   : > { %v7656_v38 = vpop.f32.mrf.mxu1  ;;  %7901 = vmatmul.mubr.bf16.vlgmr.msra.gmra.mxu1 %v14542_v23 }
 0x40e   : > { %v7657_v39 = vadd.f32 %v7656_v38, %v7615_v14  ;;  %v7617_v4 = vpop.f32.mrf.mxu0 }
 0x40f   : > { %v7658_v42 = vpop.f32.mrf.mxu1 }
 0x410   : > { %v7619_v30 = vpop.f32.mrf.mxu0  ;;  %v7659_v46 = vadd.f32 %v7658_v42, %v7617_v4 }
 0x411   : > { %v7660_v24 = vpop.f32.mrf.mxu1 }
 0x412   : > { %v7620_v54 = vpop.f32.mrf.mxu0 }
 0x413   : > { %v7661_v36 = vpop.f32.mrf.mxu1 }
 0x44c   : > { %v7697_v49 = vpop.f32.mrf.mxu0 }
 0x44d   : > { %v7738_v34 = vpop.f32.mrf.mxu1  ;;  %v7698_v0 = vadd.f32 %v7697_v49, %v7657_v39 }
 0x44e   : > { %v7699_v63 = vpop.f32.mrf.mxu0 }
 0x44f   : > { %v7740_v47 = vpop.f32.mrf.mxu1  ;;  %v7739_v29 = vadd.f32 %v7738_v34, %v7698_v0  ;;  %v7700_v22 = vadd.f32 %v7699_v63, %v7659_v46 }
 0x450   : > { %v7701_v18 = vpop.f32.mrf.mxu0 }
 0x451   : > { %v7742_v50 = vpop.f32.mrf.mxu1  ;;  %v7909_v23 = vadd.f32 %v7739_v29, %v14360_v57  ;;  %v7741_v58 = vadd.f32 %v7740_v47, %v7700_v22 }
 0x452   : > { %v7702_v51 = vpop.f32.mrf.mxu0 }
 0x453   : > { %v7743_v15 = vpop.f32.mrf.mxu1  ;;  %v7910_v19 = vadd.f32 %v7741_v58, %v14375_v41  ;;  %v7919_v53 = vmul.f32 %v14944_v5, %v7909_v23 }
 0x455   : > { %v7920_v62 = vmul.f32 %v14944_v5, %v7910_v19  ;;  %v7924_v31 = vsel %vm7923_vm0, %v7919_v53, 0.0  ;;  %v7956_v7 = vmul.f32 %v7919_v53, %v7909_v23 }
 0x456   : > { %v7925_v26 = vrot.slane %v7924_v31, 4 }
 0x457   : > { %v7931_v9 = vsel %vm7923_vm0, %v7920_v62, 0.0  ;;  %v7957_v1 = vmul.f32 %v7920_v62, %v7910_v19  ;;  %v7960_v10 = vsel %vm7923_vm0, %v7956_v7, 0.0 }
 0x458   : > { %v7926_v57 = vadd.f32 %v7925_v26, %v7924_v31  ;;  %v7932_v35 = vrot.slane %v7931_v9, 4  ;;  %v7961_v59 = vrot.slane %v7960_v10, 4 }
 0x459   : > { %v7967_v13 = vsel %vm7923_vm0, %v7957_v1, 0.0 }
 0x45a   : > { %v7927_v16 = vrot.slane %v7926_v57, 2  ;;  %v7933_v41 = vadd.f32 %v7932_v35, %v7931_v9  ;;  %v7962_v17 = vadd.f32 %v7961_v59, %v7960_v10  ;;  %v7968_v20 = vrot.slane %v7967_v13, 4 }
 0x45c   : > { %v7928_v8 = vadd.f32 %v7927_v16, %v7926_v57  ;;  %v7934_v2 = vrot.slane %v7933_v41, 2  ;;  %v7963_v43 = vrot.slane %v7962_v17, 2  ;;  %v7969_v60 = vadd.f32 %v7968_v20, %v7967_v13 }
 0x45e   : > { %v7929_v12 = vrot.slane %v7928_v8, 1  ;;  %v7935_v44 = vadd.f32 %v7934_v2, %v7933_v41  ;;  %v7964_v45 = vadd.f32 %v7963_v43, %v7962_v17  ;;  %v7970_v37 = vrot.slane %v7969_v60, 2 }
 0x460   : > { %v7930_v25 = vadd.f32 %v7929_v12, %v7928_v8  ;;  %v7936_v48 = vrot.slane %v7935_v44, 1  ;;  %v7965_v52 = vrot.slane %v7964_v45, 1  ;;  %v7971_v56 = vadd.f32 %v7970_v37, %v7969_v60 }
 0x462   : > { %v7937_v40 = vadd.f32 %v7936_v48, %v7935_v44  ;;  %v7952_v28 = vmul.f32 0.25, %v7930_v25  ;;  %v7966_v61 = vadd.f32 %v7965_v52, %v7964_v45  ;;  %v7972_v32 = vrot.slane %v7971_v56, 1 }
 0x464   : > { %v7953_v11 = vmul.f32 0.25, %v7937_v40  ;;  %v7973_v21 = vadd.f32 %v7972_v32, %v7971_v56  ;;  %v7988_v27 = vmul.f32 0.25, %v7966_v61  ;;  %v7992_v33 = vmul.f32 %v7952_v28, %v7952_v28 }
 0x465   : > { %v8004_v54 = vsub.f32 %v7909_v23, %v7952_v28  ;;  %v8055_v23 = vld [vmem:[%s14962_s12] sm:$0x77] }
 0x466   : > { %v7989_v3 = vmul.f32 0.25, %v7973_v21  ;;  %v7993_v14 = vmul.f32 %v7953_v11, %v7953_v11  ;;  %v7996_v38 = vsub.f32 %v7988_v27, %v7992_v33  ;;  %v8005_v49 = vsub.f32 %v7910_v19, %v7953_v11 }
 0x468   : > { %v7997_v39 = vsub.f32 %v7989_v3, %v7993_v14  ;;  %v8000_v4 = vmax.f32 %v7996_v38, 0.0 }
 0x46a   : > { %v8001_v42 = vmax.f32 %v7997_v39, 0.0  ;;  %v8008_v30 = vadd.f32 1e-05, %v8000_v4 }
 0x46c   : > { %v8009_v24 = vadd.f32 1e-05, %v8001_v42  ;;  %11511 = vrsqrt.f32 %v8008_v30 }
 0x46e   : > { %11513 = vrsqrt.f32 %v8009_v24 }
 0x479   : > { %v11512_v36 = vpop.eup %11511 }
 0x47a   : > { %v8016_v34 = vmul.f32 %v11512_v36, %v8004_v54 }
 0x47b   : > { %v11514_v46 = vpop.eup %11513 }
 0x47c   : > { %v8017_v0 = vmul.f32 %v11514_v46, %v8005_v49  ;;  %v8024_v63 = vmul.f32 0.2, %v8016_v34  ;;  %vm8020_vm6 = vcmp.gt.f32.partialorder %v8016_v34, 0.0 }
 0x47e   : > { %vm8021_vm8 = vcmp.gt.f32.partialorder %v8017_v0, 0.0  ;;  %v8025_v22 = vmul.f32 0.2, %v8017_v0  ;;  %v8028_v18 = vsel %vm8020_vm6, %v8016_v34, %v8024_v63 }
 0x480   : > { %v8029_v50 = vsel %vm8021_vm8, %v8017_v0, %v8025_v22 }
 0x481   : > { %v9947_v58 = vpack.c.bf16 %v8029_v50, %v8028_v18 }
 0x483   : > { %v8056_v51 = vsel %vm8054_vm9, %v9947_v58, %v8055_v23 }
 0x484   : > { %8057 = vst [vmem:[%s14962_s12] sm:$0x77] %v8056_v51 }
 0x48c   : > { %v7779_v15 = vpop.f32.mrf.mxu0 }
 0x48d   : > { %v7820_v19 = vpop.f32.mrf.mxu1 }
 0x48e   : > { %v7821_v53 = vadd.f32 %v7820_v19, %v7779_v15  ;;  %v7781_v62 = vpop.f32.mrf.mxu0 }
 0x48f   : > { %v7822_v31 = vpop.f32.mrf.mxu1 }
 0x490   : > { %v7783_v7 = vpop.f32.mrf.mxu0  ;;  %v7823_v35 = vadd.f32 %v7822_v31, %v7781_v62 }
 0x491   : > { %v7824_v26 = vpop.f32.mrf.mxu1 }
 0x492   : > { %v7784_v9 = vpop.f32.mrf.mxu0 }
 0x493   : > { %v7825_v1 = vpop.f32.mrf.mxu1 }
 0x4cc   : > { %v7861_v10 = vpop.f32.mrf.mxu0 }
 0x4cd   : > { %v7902_v57 = vpop.f32.mrf.mxu1  ;;  %v7862_v59 = vadd.f32 %v7861_v10, %v7821_v53 }
 0x4ce   : > { %v7863_v13 = vpop.f32.mrf.mxu0 }
 0x4cf   : > { %v7904_v16 = vpop.f32.mrf.mxu1  ;;  %v7903_v41 = vadd.f32 %v7902_v57, %v7862_v59  ;;  %v7864_v17 = vadd.f32 %v7863_v13, %v7823_v35 }
 0x4d0   : > { %v7865_v20 = vpop.f32.mrf.mxu0 }
 0x4d1   : > { %v7906_v8 = vpop.f32.mrf.mxu1  ;;  %v7911_v2 = vadd.f32 %v7903_v41, %v14775_v6  ;;  %v7905_v43 = vadd.f32 %v7904_v16, %v7864_v17  ;;  %v8058_v17 = vld [vmem:[%s14962_s12 + $0x8] sm:$0x77] }
 0x4d2   : > { %v7866_v60 = vpop.f32.mrf.mxu0 }
 0x4d3   : > { %v7907_v12 = vpop.f32.mrf.mxu1  ;;  %v7921_v44 = vmul.f32 %v14944_v5, %v7911_v2  ;;  %v7912_v45 = vadd.f32 %v7905_v43, %v14790_v55 }
 0x4d5   : > { %v7938_v37 = vsel %vm7923_vm0, %v7921_v44, 0.0  ;;  %v7958_v25 = vmul.f32 %v7921_v44, %v7911_v2  ;;  %v7922_v48 = vmul.f32 %v14944_v5, %v7912_v45 }
 0x4d6   : > { %v7939_v52 = vrot.slane %v7938_v37, 4 }
 0x4d7   : > { %v7974_v56 = vsel %vm7923_vm0, %v7958_v25, 0.0  ;;  %v7945_v40 = vsel %vm7923_vm0, %v7922_v48, 0.0  ;;  %v7959_v28 = vmul.f32 %v7922_v48, %v7912_v45 }
 0x4d8   : > { %v7940_v61 = vadd.f32 %v7939_v52, %v7938_v37  ;;  %v7975_v6 = vrot.slane %v7974_v56, 4  ;;  %v7946_v32 = vrot.slane %v7945_v40, 4 }
 0x4d9   : > { %v7981_v11 = vsel %vm7923_vm0, %v7959_v28, 0.0 }
 0x4da   : > { %v7941_v21 = vrot.slane %v7940_v61, 2  ;;  %v7976_v27 = vadd.f32 %v7975_v6, %v7974_v56  ;;  %v7947_v33 = vadd.f32 %v7946_v32, %v7945_v40  ;;  %v7982_v55 = vrot.slane %v7981_v11, 4 }
 0x4dc   : > { %v7942_v3 = vadd.f32 %v7941_v21, %v7940_v61  ;;  %v7977_v14 = vrot.slane %v7976_v27, 2  ;;  %v7948_v38 = vrot.slane %v7947_v33, 2  ;;  %v7983_v39 = vadd.f32 %v7982_v55, %v7981_v11 }
 0x4de   : > { %v7943_v5 = vrot.slane %v7942_v3, 1  ;;  %v7978_v4 = vadd.f32 %v7977_v14, %v7976_v27  ;;  %v7949_v42 = vadd.f32 %v7948_v38, %v7947_v33  ;;  %v7984_v30 = vrot.slane %v7983_v39, 2 }
 0x4e0   : > { %v7944_v24 = vadd.f32 %v7943_v5, %v7942_v3  ;;  %v7979_v54 = vrot.slane %v7978_v4, 1  ;;  %v7950_v36 = vrot.slane %v7949_v42, 1  ;;  %v7985_v49 = vadd.f32 %v7984_v30, %v7983_v39 }
 0x4e2   : > { %v7954_v34 = vmul.f32 0.25, %v7944_v24  ;;  %v7980_v46 = vadd.f32 %v7979_v54, %v7978_v4  ;;  %v7951_v0 = vadd.f32 %v7950_v36, %v7949_v42  ;;  %v7986_v63 = vrot.slane %v7985_v49, 1 }
 0x4e4   : > { %v7990_v22 = vmul.f32 0.25, %v7980_v46  ;;  %v7994_v18 = vmul.f32 %v7954_v34, %v7954_v34  ;;  %v7955_v50 = vmul.f32 0.25, %v7951_v0  ;;  %v7987_v23 = vadd.f32 %v7986_v63, %v7985_v49 }
 0x4e5   : > { %v8006_v26 = vsub.f32 %v7911_v2, %v7954_v34 }
 0x4e6   : > { %v7998_v58 = vsub.f32 %v7990_v22, %v7994_v18  ;;  %v7995_v51 = vmul.f32 %v7955_v50, %v7955_v50  ;;  %v7991_v15 = vmul.f32 0.25, %v7987_v23  ;;  %v8007_v10 = vsub.f32 %v7912_v45, %v7955_v50 }
 0x4e8   : > { %v8002_v19 = vmax.f32 %v7998_v58, 0.0  ;;  %v7999_v53 = vsub.f32 %v7991_v15, %v7995_v51 }
 0x4ea   : > { %v8010_v62 = vadd.f32 1e-05, %v8002_v19  ;;  %v8003_v31 = vmax.f32 %v7999_v53, 0.0 }
 0x4ec   : > { %11515 = vrsqrt.f32 %v8010_v62  ;;  %v8011_v7 = vadd.f32 1e-05, %v8003_v31 }
 0x4ee   : > { %11517 = vrsqrt.f32 %v8011_v7 }
 0x4f9   : > { %v11516_v9 = vpop.eup %11515 }
 0x4fa   : > { %v8018_v1 = vmul.f32 %v11516_v9, %v8006_v26 }
 0x4fb   : > { %v11518_v57 = vpop.eup %11517 }
 0x4fc   : > { %v8026_v35 = vmul.f32 0.2, %v8018_v1  ;;  %v8019_v59 = vmul.f32 %v11518_v57, %v8007_v10  ;;  %vm8022_vm10 = vcmp.gt.f32.partialorder %v8018_v1, 0.0 }
 0x4fe   : > { %vm8023_vm11 = vcmp.gt.f32.partialorder %v8019_v59, 0.0  ;;  %v8027_v13 = vmul.f32 0.2, %v8019_v59  ;;  %v8030_v16 = vsel %vm8022_vm10, %v8018_v1, %v8026_v35 }
 0x500   : > { %v8031_v41 = vsel %vm8023_vm11, %v8019_v59, %v8027_v13 }
 0x501   : > { %v9948_v20 = vpack.c.bf16 %v8031_v41, %v8030_v16 }
 0x503   : > { %v8059_v8 = vsel %vm8054_vm9, %v9948_v20, %v8058_v17 }
 0x504   : > { %8060 = vst [vmem:[%s14962_s12 + $0x8] sm:$0x77] %v8059_v8 }
 0x505 PF: > { %s14_s15 = sadd.s32 1, %s11525_s15  }
 0x506   : > { %p11_p4 = scmp.ge.s32.totalorder %s14_s15, 4  }
 0x508   :  { %13 = sbr.rel (!%p11_p4) target bundleno = 1 (0x1), region = 69 }

</bundles_post_ra>
